<compile_context>
chip_gen: v7x
topology: tpu7x:2x2x1
jax: 0.10.0
libtpu: 0.0.40
codegen_flags: <defaults>
</compile_context>

<pallas_src>
import functools
import math

import jax
import jax.numpy as jnp
from jax import lax
from jax.experimental import pallas as pl
from jax.experimental.pallas import tpu as pltpu


# ----------------------------------------------------------------------------
# Fused kernel: `nb` batch elements per grid step, everything stays in VMEM.
# ----------------------------------------------------------------------------
def _bot_bottleneck_kernel(head_num, add, nb, fast,
                           p_ref, w1_ref, s1_ref, b1_ref,
                           wqkv_ref, r_ref, w2_ref, s2_ref, b2_ref,
                           o_ref, acc_ref):
    # p_ref   : (nb, 9*c1, L)  channel-major im2col patches (L lane-dense)
    # w1_ref  : (c_, 9*c1)     3x3 conv weights, (dy, dx, cin) tap-major
    # s1/b1   : (c_, 1)        folded BN of cv1
    # wqkv_ref: (3*c_, c_)     1x1 qkv weights (q rows pre-scaled by hd**-0.5)
    # r_ref   : (c_, L)        rw + rh relative position, rows = head*hd + d
    # w2_ref  : (c_, c2)       1x1 cv2 weights (rows = c_ so head slice = sublane)
    # s2/b2   : (c2, 1)        folded BN of cv2
    # o_ref   : (nb, c2, L)    NCHW-flat output (lane-dense store, no transpose)
    # acc_ref : (c2, L) f32    VMEM accumulator for the per-head cv2 partials
    K1 = p_ref.shape[1]
    L = p_ref.shape[2]
    c1 = K1 // 9
    c_ = w1_ref.shape[0]
    c2 = o_ref.shape[1]
    hd = c_ // head_num
    cdt = p_ref.dtype                      # bf16 (fast) or f32 (exact) MXU dtype

    def recip(x):
        return pl.reciprocal(x, approx=fast)    # EUP slot in the fast path

    w1 = w1_ref[...]
    s1 = s1_ref[...]
    b1 = b1_ref[...]
    wqkv = wqkv_ref[...]
    r = r_ref[...].astype(jnp.float32)
    w2 = w2_ref[...]
    s2 = s2_ref[...]
    b2 = b2_ref[...]

    for n in range(nb):
        patches = p_ref[n]                                    # (9*c1, L)

        # ---- cv1: 3x3 conv as ONE matmul + folded BN + SiLU -> (c_, L) ------
        a = jnp.dot(w1, patches, preferred_element_type=jnp.float32)
        a = a * s1 + b1
        a = a * recip(1.0 + jnp.exp(-a))                      # SiLU

        # ---- qkv 1x1 conv (scale already folded into q rows) -> (3c_, L) ----
        qkv = jnp.dot(wqkv, a.astype(cdt), preferred_element_type=jnp.float32)
        q = qkv[0:c_]                                         # sublane slices
        kr = qkv[c_:2 * c_] + r                               # k + rel-pos
        v = qkv[2 * c_:3 * c_]

        # ---- per-head attention, cv2 folded into v, VMEM accumulation -------
        for h in range(head_num):
            lo, hi = h * hd, (h + 1) * hd
            # logits_t[j, i] = sum_d kr[d, j] * q_scaled[d, i]   (keys x queries)
            logits = lax.dot_general(
                kr[lo:hi].astype(cdt), q[lo:hi].astype(cdt),
                (((0,), (0,)), ((), ())),
                preferred_element_type=jnp.float32)           # (Lk, Lq)
            m = jnp.max(logits, axis=0, keepdims=True)
            p = jnp.exp(logits - m)
            attn = (p * recip(jnp.sum(p, axis=0, keepdims=True))).astype(cdt)
            # vw[o, j] = sum_d w2[o, d] * v[d, j]   (cv2 folded before attn)
            vw = lax.dot_general(
                w2[lo:hi], v[lo:hi].astype(cdt),
                (((0,), (0,)), ((), ())),
                preferred_element_type=jnp.float32)           # (c2, Lk)
            part = jnp.dot(vw.astype(cdt), attn,
                           preferred_element_type=jnp.float32)  # (c2, Lq)
            if h == 0:
                acc_ref[...] = part
            else:
                acc_ref[...] += part

        # ---- cv2 epilogue: folded BN + SiLU (+ residual), lane-dense store ---
        y = acc_ref[...] * s2 + b2
        y = y * recip(1.0 + jnp.exp(-y))                      # SiLU
        if add:
            # residual = original x = centre im2col tap (dy=1, dx=1); c1 == c2
            y = y + p_ref[n, 4 * c1:5 * c1, :].astype(jnp.float32)
        o_ref[n] = y.astype(o_ref.dtype)                      # (c2, L), L=256 lanes


def _pick_batch_block(n):
    """Largest divisor of n (<= 8) keeping >= 2 parallel grid steps (v7x has
    2 TensorCores); single-TC chips simply get fewer, fatter steps."""
    nb = 1
    for cand in range(1, min(n, 8) + 1):
        if n % cand == 0 and (n // cand >= 2 or n == 1):
            nb = cand
    return nb


@functools.partial(jax.jit,
                   static_argnames=("head_num", "add", "exact", "batch_block"))
def bot_bottleneck_pallas(x_nchw, w1k, s1, b1, wqkvk, r_cl, w2k, s2, b2,
                          *, head_num, add, exact=False, batch_block=None):
    N, c1, H, W = x_nchw.shape
    L = H * W
    c_ = w1k.shape[0]
    c2 = w2k.shape[1]
    if L % 128 != 0:
        # TODO(synk): pad L up to a multiple of 128 to support other f_size.
        raise ValueError("H*W must be a multiple of 128 (lane-dense layout)")

    cdt = jnp.float32 if exact else jnp.bfloat16

    # Channel-major im2col (N, 9*c1, L) built on the XLA side so the kernel has
    # no in-kernel relayouts / masked stores; extra HBM traffic is hidden by
    # the BlockSpec pipeline.
    xpad = jnp.pad(x_nchw.astype(jnp.float32), ((0, 0), (0, 0), (1, 1), (1, 1)))
    taps = [xpad[:, :, dy:dy + H, dx:dx + W]
            for dy in range(3) for dx in range(3)]
    patches = jnp.concatenate(taps, axis=1).reshape(N, 9 * c1, L).astype(cdt)

    nb = _pick_batch_block(N) if batch_block is None else batch_block
    assert N % nb == 0, "batch_block must divide the batch size"

    kernel = functools.partial(_bot_bottleneck_kernel, head_num, add, nb,
                               not exact)
    out = pl.pallas_call(
        kernel,
        out_shape=jax.ShapeDtypeStruct((N, c2, L), jnp.float32),
        grid=(N // nb,),
        in_specs=[
            pl.BlockSpec((nb, 9 * c1, L), lambda n: (n, 0, 0)),
            pl.BlockSpec((c_, 9 * c1), lambda n: (0, 0)),
            pl.BlockSpec((c_, 1), lambda n: (0, 0)),
            pl.BlockSpec((c_, 1), lambda n: (0, 0)),
            pl.BlockSpec((3 * c_, c_), lambda n: (0, 0)),
            pl.BlockSpec((c_, L), lambda n: (0, 0)),
            pl.BlockSpec((c_, c2), lambda n: (0, 0)),
            pl.BlockSpec((c2, 1), lambda n: (0, 0)),
            pl.BlockSpec((c2, 1), lambda n: (0, 0)),
        ],
        out_specs=pl.BlockSpec((nb, c2, L), lambda n: (n, 0, 0)),
        scratch_shapes=[pltpu.VMEM((c2, L), jnp.float32)],
        compiler_params=pltpu.CompilerParams(
            dimension_semantics=("parallel",)),
    )(patches, w1k.astype(cdt), s1, b1, wqkvk.astype(cdt), r_cl.astype(cdt),
      w2k.astype(cdt), s2, b2)
    return out.reshape(N, c2, H, W)                           # free reshape (NCHW)


# ----------------------------------------------------------------------------
# Parameter construction (deterministic, synthetic) + module wrapper
# ----------------------------------------------------------------------------
class BoTBottleneckPallas:
    """Pallas implementation of BoTBottleneck (Conv+BN+SiLU, BoTAttention, 1x1+BN+SiLU)."""

    def __init__(self, key, c1, c2, f_size=16, shortcut=True, e=0.5,
                 head_num=4, eps=1e-5):
        c_ = int(c2 * e)
        assert c_ % head_num == 0, "c_ must divide by head_num"
        hd = c_ // head_num
        self.c1, self.c2, self.c_, self.f = c1, c2, c_, f_size
        self.head_num = head_num
        self.add = bool(shortcut and c1 == c2)

        ks = jax.random.split(key, 14)

        def bn(kk, c):
            g = jax.random.uniform(kk[0], (c,), jnp.float32, 0.5, 1.5)
            b = jax.random.normal(kk[1], (c,), jnp.float32) * 0.1
            mu = jax.random.normal(kk[2], (c,), jnp.float32) * 0.1
            var = jax.random.uniform(kk[3], (c,), jnp.float32, 0.5, 1.5)
            s = g / jnp.sqrt(var + eps)
            return s, b - mu * s

        # PyTorch-layout parameters (also used by the pure-JAX reference).
        w1 = jax.random.normal(ks[0], (c_, c1, 3, 3), jnp.float32) / math.sqrt(c1 * 9)
        s1, b1 = bn(ks[1:5], c_)
        wqkv = jax.random.normal(ks[5], (3 * c_, c_, 1, 1), jnp.float32) / math.sqrt(c_)
        rw = jax.random.normal(ks[6], (1, head_num, hd, 1, f_size), jnp.float32)
        rh = jax.random.normal(ks[7], (1, head_num, hd, f_size, 1), jnp.float32)
        w2 = jax.random.normal(ks[8], (c2, c_, 1, 1), jnp.float32) / math.sqrt(c_)
        s2, b2 = bn(ks[9:13], c2)
        self.torch_params = dict(w1=w1, s1=s1, b1=b1, wqkv=wqkv, rw=rw, rh=rh,
                                 w2=w2, s2=s2, b2=b2,
                                 head_num=head_num, add=self.add)

        # Kernel-layout parameters (channel-major, L lane-dense).
        L = f_size * f_size
        scale = hd ** -0.5
        # 3x3 weights -> (c_, 9*c1) in (dy, dx, cin) tap-major order.
        self.w1k = jnp.transpose(w1, (0, 2, 3, 1)).reshape(c_, 9 * c1)
        self.s1k = s1.reshape(c_, 1)
        self.b1k = b1.reshape(c_, 1)
        # qkv 1x1 weights (3c_, c_); attention scale folded into the q rows only.
        self.wqkvk = wqkv[:, :, 0, 0].at[:c_, :].multiply(scale)
        # Relative position (rw + rh): (c_, L), rows ordered head*hd + d.
        self.r_cl = (rw + rh)[0].reshape(head_num * hd, L)
        # cv2 1x1 weights stored (c_, c2) so per-head slices are sublane slices.
        self.w2k = jnp.transpose(w2[:, :, 0, 0], (1, 0))
        self.s2k = s2.reshape(c2, 1)
        self.b2k = b2.reshape(c2, 1)

    def __call__(self, x_nchw, exact=False, batch_block=None):
        N, c1, H, W = x_nchw.shape
        assert c1 == self.c1 and H == self.f and W == self.f, \
            "BoTAttention requires spatial size == f_size (as in the PyTorch module)"
        return bot_bottleneck_pallas(
            x_nchw.astype(jnp.float32),
            self.w1k, self.s1k, self.b1k, self.wqkvk, self.r_cl,
            self.w2k, self.s2k, self.b2k,
            head_num=self.head_num, add=self.add,
            exact=exact, batch_block=batch_block)


# ----------------------------------------------------------------------------
# Pure-JAX reference (straight transcription of the PyTorch forward)
# ----------------------------------------------------------------------------
def _silu(x):
    return x * jax.nn.sigmoid(x)


def ref_bot_bottleneck(x, p):
    # cv1: 3x3 conv + folded BN + SiLU
    z = lax.conv_general_dilated(x, p["w1"], (1, 1), "SAME",
                                 dimension_numbers=("NCHW", "OIHW", "NCHW"))
    z = z * p["s1"][None, :, None, None] + p["b1"][None, :, None, None]
    z = _silu(z)

    # BoTAttention
    B, c, H, W = z.shape
    heads = p["head_num"]
    hd = c // heads
    L = H * W
    qkv = jnp.einsum("nchw,oc->nohw", z, p["wqkv"][:, :, 0, 0])
    qkv = qkv.reshape(B, 3, heads, hd, L)
    q, k, v = qkv[:, 0], qkv[:, 1], qkv[:, 2]              # (B, heads, hd, L)
    scale = hd ** -0.5
    attn_content = jnp.einsum("bhdi,bhdj->bhij", q, k) * scale
    r = (p["rw"] + p["rh"]).reshape(1, heads, hd, L)
    attn_position = jnp.einsum("bhdi,hdj->bhij", q, r[0]) * scale
    attn = jax.nn.softmax(attn_content + attn_position, axis=-1)
    out = jnp.einsum("bhij,bhdj->bhdi", attn, v).reshape(B, c, H, W)

    # cv2: 1x1 conv + BN + SiLU (+ residual)
    y = jnp.einsum("nchw,oc->nohw", out, p["w2"][:, :, 0, 0])
    y = y * p["s2"][None, :, None, None] + p["b2"][None, :, None, None]
    y = _silu(y)
    if p["add"]:
        y = x + y
    return y


if __name__ == "__main__":
    root = jax.random.PRNGKey(0)
    kp1, kx1, kp2, kx2, kx3 = jax.random.split(root, 5)

    # Config 1: residual path (shortcut=True, c1 == c2).
    B, c1, c2, f = 2, 64, 64, 16
    blk1 = BoTBottleneckPallas(kp1, c1, c2, f_size=f, shortcut=True, head_num=4)
    x1 = jax.random.normal(kx1, (B, c1, f, f), jnp.float32)
    ref1 = jax.block_until_ready(ref_bot_bottleneck(x1, blk1.torch_params))

    # exact mode (f32 MXU operands, exact reciprocals): tight tolerance.
    out1e = jax.block_until_ready(blk1(x1, exact=True))
    assert out1e.shape == (B, c2, f, f)
    assert jnp.allclose(out1e, ref1, atol=1e-3, rtol=1e-3), (
        "config1 exact mismatch, max abs err = "
        + str(float(jnp.max(jnp.abs(out1e - ref1)))))

    # fast mode (bf16 MXU operands + approx EUP reciprocals): bf16-level tol.
    out1f = jax.block_until_ready(blk1(x1))
    assert jnp.allclose(out1f, ref1, atol=5e-2, rtol=5e-2), (
        "config1 fast mismatch, max abs err = "
        + str(float(jnp.max(jnp.abs(out1f - ref1)))))

    # Config 2: no residual (c1 != c2), fast mode.
    c1b, c2b = 32, 64
    blk2 = BoTBottleneckPallas(kp2, c1b, c2b, f_size=f, shortcut=True, head_num=4)
    x2 = jax.random.normal(kx2, (B, c1b, f, f), jnp.float32)
    ref2 = jax.block_until_ready(ref_bot_bottleneck(x2, blk2.torch_params))
    out2 = jax.block_until_ready(blk2(x2))
    assert out2.shape == (B, c2b, f, f)
    assert jnp.allclose(out2, ref2, atol=5e-2, rtol=5e-2), (
        "config2 fast mismatch, max abs err = "
        + str(float(jnp.max(jnp.abs(out2 - ref2)))))

    # Batch-blocked path (2 elements per grid step, as used on v5e/v6e).
    x3 = jax.random.normal(kx3, (4, c1, f, f), jnp.float32)
    ref3 = jax.block_until_ready(ref_bot_bottleneck(x3, blk1.torch_params))
    out3 = jax.block_until_ready(blk1(x3, batch_block=2))
    assert out3.shape == (4, c2, f, f)
    assert jnp.allclose(out3, ref3, atol=5e-2, rtol=5e-2), (
        "batch-blocked mismatch, max abs err = "
        + str(float(jnp.max(jnp.abs(out3 - ref3)))))

    print("KERNEL_OK")
</pallas_src>

<mosaic_0001>
module attributes {stable_mosaic.version = 11 : i64} {
  func.func @_bot_bottleneck_kernel(%arg0: i32, %arg1: memref<1x576x256xf32, #tpu.memory_space<vmem>>, %arg2: memref<32x576xf32, #tpu.memory_space<vmem>>, %arg3: memref<32x1xf32, #tpu.memory_space<vmem>>, %arg4: memref<32x1xf32, #tpu.memory_space<vmem>>, %arg5: memref<96x32xf32, #tpu.memory_space<vmem>>, %arg6: memref<32x256xf32, #tpu.memory_space<vmem>>, %arg7: memref<32x64xf32, #tpu.memory_space<vmem>>, %arg8: memref<64x1xf32, #tpu.memory_space<vmem>>, %arg9: memref<64x1xf32, #tpu.memory_space<vmem>>, %arg10: memref<1x64x256xf32, #tpu.memory_space<vmem>>, %arg11: memref<64x256xf32, #tpu.memory_space<vmem>>) attributes {dimension_semantics = [#tpu.dimension_semantics<parallel>], iteration_bounds = array<i64: 2>, scalar_prefetch = 0 : i64, scratch_operands = 1 : i64, tpu.core_type = #tpu.core_type<tc>, window_params = [{transform_indices = @transform_0, window_bounds = array<i64: 1, 576, 256>}, {pipeline_mode = #tpu.pipeline_mode<synchronous>, transform_indices = @transform_1, window_bounds = array<i64: 32, 576>}, {pipeline_mode = #tpu.pipeline_mode<synchronous>, transform_indices = @transform_2, window_bounds = array<i64: 32, 1>}, {pipeline_mode = #tpu.pipeline_mode<synchronous>, transform_indices = @transform_3, window_bounds = array<i64: 32, 1>}, {pipeline_mode = #tpu.pipeline_mode<synchronous>, transform_indices = @transform_4, window_bounds = array<i64: 96, 32>}, {pipeline_mode = #tpu.pipeline_mode<synchronous>, transform_indices = @transform_5, window_bounds = array<i64: 32, 256>}, {pipeline_mode = #tpu.pipeline_mode<synchronous>, transform_indices = @transform_6, window_bounds = array<i64: 32, 64>}, {pipeline_mode = #tpu.pipeline_mode<synchronous>, transform_indices = @transform_7, window_bounds = array<i64: 64, 1>}, {pipeline_mode = #tpu.pipeline_mode<synchronous>, transform_indices = @transform_8, window_bounds = array<i64: 64, 1>}, {transform_indices = @transform_9, window_bounds = array<i64: 1, 64, 256>}]} {
    %c0 = arith.constant 0 : index
    %c0_0 = arith.constant 0 : index
    %0 = vector.load %arg2[%c0, %c0_0] : memref<32x576xf32, #tpu.memory_space<vmem>>, vector<32x576xf32>
    %c0_1 = arith.constant 0 : index
    %c0_2 = arith.constant 0 : index
    %1 = vector.load %arg3[%c0_1, %c0_2] : memref<32x1xf32, #tpu.memory_space<vmem>>, vector<32x1xf32>
    %c0_3 = arith.constant 0 : index
    %c0_4 = arith.constant 0 : index
    %2 = vector.load %arg4[%c0_3, %c0_4] : memref<32x1xf32, #tpu.memory_space<vmem>>, vector<32x1xf32>
    %c0_5 = arith.constant 0 : index
    %c0_6 = arith.constant 0 : index
    %3 = vector.load %arg5[%c0_5, %c0_6] : memref<96x32xf32, #tpu.memory_space<vmem>>, vector<96x32xf32>
    %c0_7 = arith.constant 0 : index
    %c0_8 = arith.constant 0 : index
    %4 = vector.load %arg6[%c0_7, %c0_8] : memref<32x256xf32, #tpu.memory_space<vmem>>, vector<32x256xf32>
    %c0_9 = arith.constant 0 : index
    %c0_10 = arith.constant 0 : index
    %5 = vector.load %arg7[%c0_9, %c0_10] : memref<32x64xf32, #tpu.memory_space<vmem>>, vector<32x64xf32>
    %c0_11 = arith.constant 0 : index
    %c0_12 = arith.constant 0 : index
    %6 = vector.load %arg8[%c0_11, %c0_12] : memref<64x1xf32, #tpu.memory_space<vmem>>, vector<64x1xf32>
    %c0_13 = arith.constant 0 : index
    %c0_14 = arith.constant 0 : index
    %7 = vector.load %arg9[%c0_13, %c0_14] : memref<64x1xf32, #tpu.memory_space<vmem>>, vector<64x1xf32>
    %c0_15 = arith.constant 0 : index
    %c0_16 = arith.constant 0 : index
    %c0_17 = arith.constant 0 : index
    %8 = vector.load %arg1[%c0_15, %c0_16, %c0_17] : memref<1x576x256xf32, #tpu.memory_space<vmem>>, vector<1x576x256xf32>
    %9 = vector.shape_cast %8 : vector<1x576x256xf32> to vector<576x256xf32>
    %cst = arith.constant dense<0.000000e+00> : vector<32x256xf32>
    %10 = tpu.matmul %0, %9, %cst {dimension_numbers = #tpu.dot_dimension_numbers<[1], [0], [0], [1], [0, 0, 1, 1], [], []>} : vector<32x576xf32>, vector<576x256xf32>, vector<32x256xf32> -> vector<32x256xf32>
    %11 = vector.broadcast %1 : vector<32x1xf32> to vector<32x256xf32>
    %12 = arith.mulf %10, %11 : vector<32x256xf32>
    %13 = vector.broadcast %2 : vector<32x1xf32> to vector<32x256xf32>
    %14 = arith.addf %12, %13 : vector<32x256xf32>
    %cst_18 = arith.constant 0.000000e+00 : f32
    %15 = vector.broadcast %cst_18 : f32 to vector<32x256xf32>
    %16 = arith.subf %15, %14 : vector<32x256xf32>
    %17 = math.exp %16 : vector<32x256xf32>
    %cst_19 = arith.constant 1.000000e+00 : f32
    %18 = vector.broadcast %cst_19 : f32 to vector<32x256xf32>
    %19 = arith.addf %18, %17 : vector<32x256xf32>
    %20 = tpu.reciprocal %19 : vector<32x256xf32> -> vector<32x256xf32>
    %21 = arith.mulf %14, %20 : vector<32x256xf32>
    %cst_20 = arith.constant dense<0.000000e+00> : vector<96x256xf32>
    %22 = tpu.matmul %3, %21, %cst_20 {dimension_numbers = #tpu.dot_dimension_numbers<[1], [0], [0], [1], [0, 0, 1, 1], [], []>} : vector<96x32xf32>, vector<32x256xf32>, vector<96x256xf32> -> vector<96x256xf32>
    %23 = vector.extract_strided_slice %22 {offsets = [0, 0], sizes = [32, 256], strides = [1, 1]} : vector<96x256xf32> to vector<32x256xf32>
    %24 = vector.extract_strided_slice %22 {offsets = [32, 0], sizes = [32, 256], strides = [1, 1]} : vector<96x256xf32> to vector<32x256xf32>
    %25 = arith.addf %24, %4 : vector<32x256xf32>
    %26 = vector.extract_strided_slice %22 {offsets = [64, 0], sizes = [32, 256], strides = [1, 1]} : vector<96x256xf32> to vector<32x256xf32>
    %27 = vector.extract_strided_slice %25 {offsets = [0, 0], sizes = [8, 256], strides = [1, 1]} : vector<32x256xf32> to vector<8x256xf32>
    %28 = vector.extract_strided_slice %23 {offsets = [0, 0], sizes = [8, 256], strides = [1, 1]} : vector<32x256xf32> to vector<8x256xf32>
    %cst_21 = arith.constant dense<0.000000e+00> : vector<256x256xf32>
    %29 = tpu.matmul %27, %28, %cst_21 {dimension_numbers = #tpu.dot_dimension_numbers<[0], [0], [1], [1], [0, 1, 1, 1], [], []>} : vector<8x256xf32>, vector<8x256xf32>, vector<256x256xf32> -> vector<256x256xf32>
    %cst_22 = arith.constant dense<0xFF800000> : vector<256xf32>
    %30 = vector.multi_reduction <maximumf>, %29, %cst_22 [0] : vector<256x256xf32> to vector<256xf32>
    %31 = vector.shape_cast %30 : vector<256xf32> to vector<1x256xf32>
    %32 = vector.broadcast %31 : vector<1x256xf32> to vector<256x256xf32>
    %33 = arith.subf %29, %32 : vector<256x256xf32>
    %34 = math.exp %33 : vector<256x256xf32>
    %cst_23 = arith.constant dense<0.000000e+00> : vector<256xf32>
    %35 = vector.multi_reduction <add>, %34, %cst_23 [0] : vector<256x256xf32> to vector<256xf32>
    %36 = vector.shape_cast %35 : vector<256xf32> to vector<1x256xf32>
    %37 = tpu.reciprocal %36 : vector<1x256xf32> -> vector<1x256xf32>
    %38 = vector.broadcast %37 : vector<1x256xf32> to vector<256x256xf32>
    %39 = arith.mulf %34, %38 : vector<256x256xf32>
    %40 = vector.extract_strided_slice %5 {offsets = [0, 0], sizes = [8, 64], strides = [1, 1]} : vector<32x64xf32> to vector<8x64xf32>
    %41 = vector.extract_strided_slice %26 {offsets = [0, 0], sizes = [8, 256], strides = [1, 1]} : vector<32x256xf32> to vector<8x256xf32>
    %cst_24 = arith.constant dense<0.000000e+00> : vector<64x256xf32>
    %42 = tpu.matmul %40, %41, %cst_24 {dimension_numbers = #tpu.dot_dimension_numbers<[0], [0], [1], [1], [0, 1, 1, 1], [], []>} : vector<8x64xf32>, vector<8x256xf32>, vector<64x256xf32> -> vector<64x256xf32>
    %cst_25 = arith.constant dense<0.000000e+00> : vector<64x256xf32>
    %43 = tpu.matmul %42, %39, %cst_25 {dimension_numbers = #tpu.dot_dimension_numbers<[1], [0], [0], [1], [0, 0, 1, 1], [], []>} : vector<64x256xf32>, vector<256x256xf32>, vector<64x256xf32> -> vector<64x256xf32>
    %c0_26 = arith.constant 0 : index
    %c0_27 = arith.constant 0 : index
    %44 = vector.load %arg11[%c0_26, %c0_27] : memref<64x256xf32, #tpu.memory_space<vmem>>, vector<64x256xf32>
    tpu.vector_store %arg11[%c0_26, %c0_27], %43 {strides = array<i32>} : memref<64x256xf32, #tpu.memory_space<vmem>>, vector<64x256xf32>,
    %45 = vector.extract_strided_slice %25 {offsets = [8, 0], sizes = [8, 256], strides = [1, 1]} : vector<32x256xf32> to vector<8x256xf32>
    %46 = vector.extract_strided_slice %23 {offsets = [8, 0], sizes = [8, 256], strides = [1, 1]} : vector<32x256xf32> to vector<8x256xf32>
    %cst_28 = arith.constant dense<0.000000e+00> : vector<256x256xf32>
    %47 = tpu.matmul %45, %46, %cst_28 {dimension_numbers = #tpu.dot_dimension_numbers<[0], [0], [1], [1], [0, 1, 1, 1], [], []>} : vector<8x256xf32>, vector<8x256xf32>, vector<256x256xf32> -> vector<256x256xf32>
    %cst_29 = arith.constant dense<0xFF800000> : vector<256xf32>
    %48 = vector.multi_reduction <maximumf>, %47, %cst_29 [0] : vector<256x256xf32> to vector<256xf32>
    %49 = vector.shape_cast %48 : vector<256xf32> to vector<1x256xf32>
    %50 = vector.broadcast %49 : vector<1x256xf32> to vector<256x256xf32>
    %51 = arith.subf %47, %50 : vector<256x256xf32>
    %52 = math.exp %51 : vector<256x256xf32>
    %cst_30 = arith.constant dense<0.000000e+00> : vector<256xf32>
    %53 = vector.multi_reduction <add>, %52, %cst_30 [0] : vector<256x256xf32> to vector<256xf32>
    %54 = vector.shape_cast %53 : vector<256xf32> to vector<1x256xf32>
    %55 = tpu.reciprocal %54 : vector<1x256xf32> -> vector<1x256xf32>
    %56 = vector.broadcast %55 : vector<1x256xf32> to vector<256x256xf32>
    %57 = arith.mulf %52, %56 : vector<256x256xf32>
    %58 = vector.extract_strided_slice %5 {offsets = [8, 0], sizes = [8, 64], strides = [1, 1]} : vector<32x64xf32> to vector<8x64xf32>
    %59 = vector.extract_strided_slice %26 {offsets = [8, 0], sizes = [8, 256], strides = [1, 1]} : vector<32x256xf32> to vector<8x256xf32>
    %cst_31 = arith.constant dense<0.000000e+00> : vector<64x256xf32>
    %60 = tpu.matmul %58, %59, %cst_31 {dimension_numbers = #tpu.dot_dimension_numbers<[0], [0], [1], [1], [0, 1, 1, 1], [], []>} : vector<8x64xf32>, vector<8x256xf32>, vector<64x256xf32> -> vector<64x256xf32>
    %cst_32 = arith.constant dense<0.000000e+00> : vector<64x256xf32>
    %61 = tpu.matmul %60, %57, %cst_32 {dimension_numbers = #tpu.dot_dimension_numbers<[1], [0], [0], [1], [0, 0, 1, 1], [], []>} : vector<64x256xf32>, vector<256x256xf32>, vector<64x256xf32> -> vector<64x256xf32>
    %c0_33 = arith.constant 0 : index
    %c0_34 = arith.constant 0 : index
    %62 = vector.load %arg11[%c0_33, %c0_34] : memref<64x256xf32, #tpu.memory_space<vmem>>, vector<64x256xf32>
    %63 = arith.addf %62, %61 : vector<64x256xf32>
    %c0_35 = arith.constant 0 : index
    %c0_36 = arith.constant 0 : index
    %64 = vector.load %arg11[%c0_35, %c0_36] : memref<64x256xf32, #tpu.memory_space<vmem>>, vector<64x256xf32>
    tpu.vector_store %arg11[%c0_35, %c0_36], %63 {strides = array<i32>} : memref<64x256xf32, #tpu.memory_space<vmem>>, vector<64x256xf32>,
    %65 = vector.extract_strided_slice %25 {offsets = [16, 0], sizes = [8, 256], strides = [1, 1]} : vector<32x256xf32> to vector<8x256xf32>
    %66 = vector.extract_strided_slice %23 {offsets = [16, 0], sizes = [8, 256], strides = [1, 1]} : vector<32x256xf32> to vector<8x256xf32>
    %cst_37 = arith.constant dense<0.000000e+00> : vector<256x256xf32>
    %67 = tpu.matmul %65, %66, %cst_37 {dimension_numbers = #tpu.dot_dimension_numbers<[0], [0], [1], [1], [0, 1, 1, 1], [], []>} : vector<8x256xf32>, vector<8x256xf32>, vector<256x256xf32> -> vector<256x256xf32>
    %cst_38 = arith.constant dense<0xFF800000> : vector<256xf32>
    %68 = vector.multi_reduction <maximumf>, %67, %cst_38 [0] : vector<256x256xf32> to vector<256xf32>
    %69 = vector.shape_cast %68 : vector<256xf32> to vector<1x256xf32>
    %70 = vector.broadcast %69 : vector<1x256xf32> to vector<256x256xf32>
    %71 = arith.subf %67, %70 : vector<256x256xf32>
    %72 = math.exp %71 : vector<256x256xf32>
    %cst_39 = arith.constant dense<0.000000e+00> : vector<256xf32>
    %73 = vector.multi_reduction <add>, %72, %cst_39 [0] : vector<256x256xf32> to vector<256xf32>
    %74 = vector.shape_cast %73 : vector<256xf32> to vector<1x256xf32>
    %75 = tpu.reciprocal %74 : vector<1x256xf32> -> vector<1x256xf32>
    %76 = vector.broadcast %75 : vector<1x256xf32> to vector<256x256xf32>
    %77 = arith.mulf %72, %76 : vector<256x256xf32>
    %78 = vector.extract_strided_slice %5 {offsets = [16, 0], sizes = [8, 64], strides = [1, 1]} : vector<32x64xf32> to vector<8x64xf32>
    %79 = vector.extract_strided_slice %26 {offsets = [16, 0], sizes = [8, 256], strides = [1, 1]} : vector<32x256xf32> to vector<8x256xf32>
    %cst_40 = arith.constant dense<0.000000e+00> : vector<64x256xf32>
    %80 = tpu.matmul %78, %79, %cst_40 {dimension_numbers = #tpu.dot_dimension_numbers<[0], [0], [1], [1], [0, 1, 1, 1], [], []>} : vector<8x64xf32>, vector<8x256xf32>, vector<64x256xf32> -> vector<64x256xf32>
    %cst_41 = arith.constant dense<0.000000e+00> : vector<64x256xf32>
    %81 = tpu.matmul %80, %77, %cst_41 {dimension_numbers = #tpu.dot_dimension_numbers<[1], [0], [0], [1], [0, 0, 1, 1], [], []>} : vector<64x256xf32>, vector<256x256xf32>, vector<64x256xf32> -> vector<64x256xf32>
    %c0_42 = arith.constant 0 : index
    %c0_43 = arith.constant 0 : index
    %82 = vector.load %arg11[%c0_42, %c0_43] : memref<64x256xf32, #tpu.memory_space<vmem>>, vector<64x256xf32>
    %83 = arith.addf %82, %81 : vector<64x256xf32>
    %c0_44 = arith.constant 0 : index
    %c0_45 = arith.constant 0 : index
    %84 = vector.load %arg11[%c0_44, %c0_45] : memref<64x256xf32, #tpu.memory_space<vmem>>, vector<64x256xf32>
    tpu.vector_store %arg11[%c0_44, %c0_45], %83 {strides = array<i32>} : memref<64x256xf32, #tpu.memory_space<vmem>>, vector<64x256xf32>,
    %85 = vector.extract_strided_slice %25 {offsets = [24, 0], sizes = [8, 256], strides = [1, 1]} : vector<32x256xf32> to vector<8x256xf32>
    %86 = vector.extract_strided_slice %23 {offsets = [24, 0], sizes = [8, 256], strides = [1, 1]} : vector<32x256xf32> to vector<8x256xf32>
    %cst_46 = arith.constant dense<0.000000e+00> : vector<256x256xf32>
    %87 = tpu.matmul %85, %86, %cst_46 {dimension_numbers = #tpu.dot_dimension_numbers<[0], [0], [1], [1], [0, 1, 1, 1], [], []>} : vector<8x256xf32>, vector<8x256xf32>, vector<256x256xf32> -> vector<256x256xf32>
    %cst_47 = arith.constant dense<0xFF800000> : vector<256xf32>
    %88 = vector.multi_reduction <maximumf>, %87, %cst_47 [0] : vector<256x256xf32> to vector<256xf32>
    %89 = vector.shape_cast %88 : vector<256xf32> to vector<1x256xf32>
    %90 = vector.broadcast %89 : vector<1x256xf32> to vector<256x256xf32>
    %91 = arith.subf %87, %90 : vector<256x256xf32>
    %92 = math.exp %91 : vector<256x256xf32>
    %cst_48 = arith.constant dense<0.000000e+00> : vector<256xf32>
    %93 = vector.multi_reduction <add>, %92, %cst_48 [0] : vector<256x256xf32> to vector<256xf32>
    %94 = vector.shape_cast %93 : vector<256xf32> to vector<1x256xf32>
    %95 = tpu.reciprocal %94 : vector<1x256xf32> -> vector<1x256xf32>
    %96 = vector.broadcast %95 : vector<1x256xf32> to vector<256x256xf32>
    %97 = arith.mulf %92, %96 : vector<256x256xf32>
    %98 = vector.extract_strided_slice %5 {offsets = [24, 0], sizes = [8, 64], strides = [1, 1]} : vector<32x64xf32> to vector<8x64xf32>
    %99 = vector.extract_strided_slice %26 {offsets = [24, 0], sizes = [8, 256], strides = [1, 1]} : vector<32x256xf32> to vector<8x256xf32>
    %cst_49 = arith.constant dense<0.000000e+00> : vector<64x256xf32>
    %100 = tpu.matmul %98, %99, %cst_49 {dimension_numbers = #tpu.dot_dimension_numbers<[0], [0], [1], [1], [0, 1, 1, 1], [], []>} : vector<8x64xf32>, vector<8x256xf32>, vector<64x256xf32> -> vector<64x256xf32>
    %cst_50 = arith.constant dense<0.000000e+00> : vector<64x256xf32>
    %101 = tpu.matmul %100, %97, %cst_50 {dimension_numbers = #tpu.dot_dimension_numbers<[1], [0], [0], [1], [0, 0, 1, 1], [], []>} : vector<64x256xf32>, vector<256x256xf32>, vector<64x256xf32> -> vector<64x256xf32>
    %c0_51 = arith.constant 0 : index
    %c0_52 = arith.constant 0 : index
    %102 = vector.load %arg11[%c0_51, %c0_52] : memref<64x256xf32, #tpu.memory_space<vmem>>, vector<64x256xf32>
    %103 = arith.addf %102, %101 : vector<64x256xf32>
    %c0_53 = arith.constant 0 : index
    %c0_54 = arith.constant 0 : index
    %104 = vector.load %arg11[%c0_53, %c0_54] : memref<64x256xf32, #tpu.memory_space<vmem>>, vector<64x256xf32>
    tpu.vector_store %arg11[%c0_53, %c0_54], %103 {strides = array<i32>} : memref<64x256xf32, #tpu.memory_space<vmem>>, vector<64x256xf32>,
    %c0_55 = arith.constant 0 : index
    %c0_56 = arith.constant 0 : index
    %105 = vector.load %arg11[%c0_55, %c0_56] : memref<64x256xf32, #tpu.memory_space<vmem>>, vector<64x256xf32>
    %106 = vector.broadcast %6 : vector<64x1xf32> to vector<64x256xf32>
    %107 = arith.mulf %105, %106 : vector<64x256xf32>
    %108 = vector.broadcast %7 : vector<64x1xf32> to vector<64x256xf32>
    %109 = arith.addf %107, %108 : vector<64x256xf32>
    %cst_57 = arith.constant 0.000000e+00 : f32
    %110 = vector.broadcast %cst_57 : f32 to vector<64x256xf32>
    %111 = arith.subf %110, %109 : vector<64x256xf32>
    %112 = math.exp %111 : vector<64x256xf32>
    %cst_58 = arith.constant 1.000000e+00 : f32
    %113 = vector.broadcast %cst_58 : f32 to vector<64x256xf32>
    %114 = arith.addf %113, %112 : vector<64x256xf32>
    %115 = tpu.reciprocal %114 : vector<64x256xf32> -> vector<64x256xf32>
    %116 = arith.mulf %109, %115 : vector<64x256xf32>
    %c0_59 = arith.constant 0 : index
    %c256 = arith.constant 256 : index
    %c0_60 = arith.constant 0 : index
    %117 = vector.load %arg1[%c0_59, %c256, %c0_60] : memref<1x576x256xf32, #tpu.memory_space<vmem>>, vector<1x64x256xf32>
    %118 = vector.shape_cast %117 : vector<1x64x256xf32> to vector<64x256xf32>
    %119 = arith.addf %116, %118 : vector<64x256xf32>
    %c0_61 = arith.constant 0 : index
    %c0_62 = arith.constant 0 : index
    %c0_63 = arith.constant 0 : index
    %120 = vector.load %arg10[%c0_61, %c0_62, %c0_63] : memref<1x64x256xf32, #tpu.memory_space<vmem>>, vector<1x64x256xf32>
    %121 = vector.shape_cast %120 : vector<1x64x256xf32> to vector<64x256xf32>
    %122 = vector.shape_cast %119 : vector<64x256xf32> to vector<1x64x256xf32>
    tpu.vector_store %arg10[%c0_61, %c0_62, %c0_63], %122 {strides = array<i32>} : memref<1x64x256xf32, #tpu.memory_space<vmem>>, vector<1x64x256xf32>,
    return
  }
  func.func @transform_0(%arg0: i32) -> (i32, i32, i32) {
    %c0_i32 = arith.constant 0 : i32
    %c0_i32_0 = arith.constant 0 : i32
    %c0_i32_1 = arith.constant 0 : i32
    return %arg0, %c0_i32, %c0_i32_0 : i32, i32, i32
  }
  func.func @transform_1(%arg0: i32) -> (i32, i32) {
    %c0_i32 = arith.constant 0 : i32
    %c0_i32_0 = arith.constant 0 : i32
    %c0_i32_1 = arith.constant 0 : i32
    return %c0_i32, %c0_i32_0 : i32, i32
  }
  func.func @transform_2(%arg0: i32) -> (i32, i32) {
    %c0_i32 = arith.constant 0 : i32
    %c0_i32_0 = arith.constant 0 : i32
    %c0_i32_1 = arith.constant 0 : i32
    return %c0_i32, %c0_i32_0 : i32, i32
  }
  func.func @transform_3(%arg0: i32) -> (i32, i32) {
    %c0_i32 = arith.constant 0 : i32
    %c0_i32_0 = arith.constant 0 : i32
    %c0_i32_1 = arith.constant 0 : i32
    return %c0_i32, %c0_i32_0 : i32, i32
  }
  func.func @transform_4(%arg0: i32) -> (i32, i32) {
    %c0_i32 = arith.constant 0 : i32
    %c0_i32_0 = arith.constant 0 : i32
    %c0_i32_1 = arith.constant 0 : i32
    return %c0_i32, %c0_i32_0 : i32, i32
  }
  func.func @transform_5(%arg0: i32) -> (i32, i32) {
    %c0_i32 = arith.constant 0 : i32
    %c0_i32_0 = arith.constant 0 : i32
    %c0_i32_1 = arith.constant 0 : i32
    return %c0_i32, %c0_i32_0 : i32, i32
  }
  func.func @transform_6(%arg0: i32) -> (i32, i32) {
    %c0_i32 = arith.constant 0 : i32
    %c0_i32_0 = arith.constant 0 : i32
    %c0_i32_1 = arith.constant 0 : i32
    return %c0_i32, %c0_i32_0 : i32, i32
  }
  func.func @transform_7(%arg0: i32) -> (i32, i32) {
    %c0_i32 = arith.constant 0 : i32
    %c0_i32_0 = arith.constant 0 : i32
    %c0_i32_1 = arith.constant 0 : i32
    return %c0_i32, %c0_i32_0 : i32, i32
  }
  func.func @transform_8(%arg0: i32) -> (i32, i32) {
    %c0_i32 = arith.constant 0 : i32
    %c0_i32_0 = arith.constant 0 : i32
    %c0_i32_1 = arith.constant 0 : i32
    return %c0_i32, %c0_i32_0 : i32, i32
  }
  func.func @transform_9(%arg0: i32) -> (i32, i32, i32) {
    %c0_i32 = arith.constant 0 : i32
    %c0_i32_0 = arith.constant 0 : i32
    %c0_i32_1 = arith.constant 0 : i32
    return %arg0, %c0_i32, %c0_i32_0 : i32, i32, i32
  }
}

</mosaic_0001>

<bundles_post_ra>
// kernel: bot_bottleneck_pallas.1
= control target key start
LH: loop header
LB: loop body
LE: loop exit
PB: predicated region body
PF: predicated region fallthrough
CT: control target
= control target key end

     0   :  { %s7377_s30 = smov 0   ;;  %s12442_s0 = inlined_call_operand.vmem [shape: f32[2,576,256], index: 0, kind: input, shape index: {}]   ;;  %s12443_s1 = inlined_call_operand.vmem [shape: f32[32,576], index: 1, kind: input, shape index: {}]   ;;  %s12444_s2 = inlined_call_operand.vmem [shape: f32[32,1], index: 2, kind: input, shape index: {}]   ;;  %s12445_s3 = inlined_call_operand.vmem [shape: f32[32,1], index: 3, kind: input, shape index: {}]   ;;  %s12446_s4 = inlined_call_operand.vmem [shape: f32[96,32], index: 4, kind: input, shape index: {}]   ;;  %s12447_s5 = inlined_call_operand.vmem [shape: f32[32,256], index: 5, kind: input, shape index: {}]   ;;  %s12448_s6 = inlined_call_operand.vmem [shape: f32[32,64], index: 6, kind: input, shape index: {}]   ;;  %s12449_s7 = inlined_call_operand.vmem [shape: f32[64,1], index: 7, kind: input, shape index: {}]   ;;  %s12450_s8 = inlined_call_operand.vmem [shape: f32[64,1], index: 8, kind: input, shape index: {}]   ;;  %s12451_s9 = inlined_call_operand.vmem [shape: f32[2,64,256], index: 9, kind: output, shape index: {}]  }
   0x1 LB: > { %s6019_s10 = sadd.s32 4294967295, %s7323_s30   ;;  %p6023_p0 = scmp.ge.s32.totalorder %s7323_s30, 1  ;;  %s7323_s30 = sphi %s7377_s30, %s19_s30  }
   0x2   : > { %p287_p1 = scmp.lt.s32.totalorder %s7323_s30, 3 }
   0x4   : > { %p288_p2 = pnand %p6023_p0, %p287_p1 }
   0x6   : > { %291 = sbr.rel (%p288_p2) target bundleno = 2709 (0xa95), region = 56 }
   0xd   : > { %p323_p3 = scmp.lt.s32.totalorder %s6019_s10, 1  ;;  %v334_v0 = vld [vmem:[%s12443_s1 + $0x8] sm:$0xff]  ;;  %v12452_v36 = vmov 0.0   ;;  %v7326_v58 = vmov 0   ;;  %vm545_vm0 = vcmask 523264   ;;  %vm929_vm1 = vcmask 261120  }
   0xe   : > { %622 = vmatprep.mubr.f32.mxu0 %v334_v0  ;;  %1030 = vmatprep.mubr.f32.mxu1 %v12452_v36  ;;  %vm1175_vm2 = vcmask 64512  }
   0xf   : > { %s13643_s10 = smov (!%p323_p3, %s6019_s10), 1  ;;  %6692 = vset.pattern.permute.xlu1 %v7326_v58  ;;  %6691 = vset.pattern.permute.xlu0 %v7326_v58 }
  0x10   : > { %s6680_s13 = smul.u32 1152, %s13643_s10  ;;  %s6205_s25 = sshll.u32 %s13643_s10, 7 }
  0x11   : > { %s12389_s27 = scalar_lea.vmem %s12451_s9, %s6205_s25 }
  0x12   : > { %s7394_s16 = scalar_lea.vmem %s12442_s0, %s6680_s13 }
  0x13   : > { %v402_v1 = vld [vmem:[%s7394_s16 + $0x8] sm:$0xff]  ;;  %v404_v2 = vld [vmem:[%s7394_s16 + $0x18] sm:$0xff]  ;;  %v401_v3 = vld [vmem:[%s7394_s16] sm:$0xff] }
  0x14   : > { %v6206_v4 = vpack.c.bf16 %v404_v2, %v402_v1  ;;  %v403_v5 = vld [vmem:[%s7394_s16 + $0x10] sm:$0xff]  ;;  %v406_v6 = vld [vmem:[%s7394_s16 + $0x28] sm:$0xff]  ;;  %v408_v7 = vld [vmem:[%s7394_s16 + $0x38] sm:$0xff] }
  0x15   : > { %v6208_v8 = vpack.c.bf16 %v403_v5, %v401_v3  ;;  %v6210_v9 = vpack.c.bf16 %v408_v7, %v406_v6  ;;  %v405_v10 = vld [vmem:[%s7394_s16 + $0x20] sm:$0xff]  ;;  %v407_v11 = vld [vmem:[%s7394_s16 + $0x30] sm:$0xff]  ;;  %v410_v12 = vld [vmem:[%s7394_s16 + $0x48] sm:$0xff] }
  0x16   : > { %6207 = vmatprep.subr.bf16.mxu0 %v6206_v4  ;;  %v412_v13 = vld [vmem:[%s7394_s16 + $0x58] sm:$0xff]  ;;  %v6212_v14 = vpack.c.bf16 %v407_v11, %v405_v10  ;;  %v409_v16 = vld [vmem:[%s7394_s16 + $0x40] sm:$0xff]  ;;  %v411_v17 = vld [vmem:[%s7394_s16 + $0x50] sm:$0xff] }
  0x17   : > { %6209 = vmatpush1.bf16.msra.mxu0 %v6208_v8  ;;  %v6214_v15 = vpack.c.bf16 %v412_v13, %v410_v12  ;;  %v414_v18 = vld [vmem:[%s7394_s16 + $0x68] sm:$0xff]  ;;  %v416_v19 = vld [vmem:[%s7394_s16 + $0x78] sm:$0xff]  ;;  %v6216_v20 = vpack.c.bf16 %v411_v17, %v409_v16  ;;  %v413_v22 = vld [vmem:[%s7394_s16 + $0x60] sm:$0xff] }
  0x18   : > { %6211 = vmatprep.subr.bf16.mxu0 %v6210_v9  ;;  %v6218_v21 = vpack.c.bf16 %v416_v19, %v414_v18  ;;  %v415_v23 = vld [vmem:[%s7394_s16 + $0x70] sm:$0xff]  ;;  %v418_v24 = vld [vmem:[%s7394_s16 + $0x88] sm:$0xff]  ;;  %v420_v25 = vld [vmem:[%s7394_s16 + $0x98] sm:$0xff] }
  0x19   : > { %v6220_v26 = vpack.c.bf16 %v415_v23, %v413_v22  ;;  %v6222_v27 = vpack.c.bf16 %v420_v25, %v418_v24  ;;  %v417_v28 = vld [vmem:[%s7394_s16 + $0x80] sm:$0xff]  ;;  %v419_v29 = vld [vmem:[%s7394_s16 + $0x90] sm:$0xff]  ;;  %v422_v30 = vld [vmem:[%s7394_s16 + $0xa8] sm:$0xff] }
  0x1a   : > { %v424_v31 = vld [vmem:[%s7394_s16 + $0xb8] sm:$0xff]  ;;  %v6224_v32 = vpack.c.bf16 %v419_v29, %v417_v28  ;;  %v421_v34 = vld [vmem:[%s7394_s16 + $0xa0] sm:$0xff]  ;;  %v423_v35 = vld [vmem:[%s7394_s16 + $0xb0] sm:$0xff] }
  0x1b   : > { %6213 = vmatpush1.bf16.msra.mxu0 %v6212_v14  ;;  %v6226_v33 = vpack.c.bf16 %v424_v31, %v422_v30  ;;  %v426_v37 = vld [vmem:[%s7394_s16 + $0xc8] sm:$0xff]  ;;  %v428_v38 = vld [vmem:[%s7394_s16 + $0xd8] sm:$0xff]  ;;  %v6228_v39 = vpack.c.bf16 %v423_v35, %v421_v34  ;;  %v425_v41 = vld [vmem:[%s7394_s16 + $0xc0] sm:$0xff] }
  0x1c   : > { %6215 = vmatprep.subr.bf16.mxu0 %v6214_v15  ;;  %v6230_v40 = vpack.c.bf16 %v428_v38, %v426_v37  ;;  %v427_v42 = vld [vmem:[%s7394_s16 + $0xd0] sm:$0xff]  ;;  %v430_v43 = vld [vmem:[%s7394_s16 + $0xe8] sm:$0xff]  ;;  %v432_v44 = vld [vmem:[%s7394_s16 + $0xf8] sm:$0xff] }
  0x1d   : > { %v6232_v45 = vpack.c.bf16 %v427_v42, %v425_v41  ;;  %v6234_v46 = vpack.c.bf16 %v432_v44, %v430_v43  ;;  %v429_v47 = vld [vmem:[%s7394_s16 + $0xe0] sm:$0xff]  ;;  %v431_v48 = vld [vmem:[%s7394_s16 + $0xf0] sm:$0xff]  ;;  %v434_v49 = vld [vmem:[%s7394_s16 + $0x108] sm:$0xff] }
  0x1e   : > { %v436_v50 = vld [vmem:[%s7394_s16 + $0x118] sm:$0xff]  ;;  %v6236_v51 = vpack.c.bf16 %v431_v48, %v429_v47  ;;  %v433_v53 = vld [vmem:[%s7394_s16 + $0x100] sm:$0xff]  ;;  %v435_v54 = vld [vmem:[%s7394_s16 + $0x110] sm:$0xff] }
  0x1f   : > { %6217 = vmatpush1.bf16.msra.mxu0 %v6216_v20  ;;  %v6238_v52 = vpack.c.bf16 %v436_v50, %v434_v49  ;;  %v438_v55 = vld [vmem:[%s7394_s16 + $0x128] sm:$0xff]  ;;  %v440_v56 = vld [vmem:[%s7394_s16 + $0x138] sm:$0xff]  ;;  %v6240_v57 = vpack.c.bf16 %v435_v54, %v433_v53  ;;  %v437_v60 = vld [vmem:[%s7394_s16 + $0x120] sm:$0xff] }
  0x20   : > { %6219 = vmatprep.subr.bf16.mxu0 %v6218_v21  ;;  %v6242_v59 = vpack.c.bf16 %v440_v56, %v438_v55  ;;  %v439_v61 = vld [vmem:[%s7394_s16 + $0x130] sm:$0xff]  ;;  %v442_v62 = vld [vmem:[%s7394_s16 + $0x148] sm:$0xff]  ;;  %v444_v63 = vld [vmem:[%s7394_s16 + $0x158] sm:$0xff] }
  0x21   : > { %v6244_v0 = vpack.c.bf16 %v439_v61, %v437_v60  ;;  %v6246_v1 = vpack.c.bf16 %v444_v63, %v442_v62  ;;  %v441_v2 = vld [vmem:[%s7394_s16 + $0x140] sm:$0xff]  ;;  %v443_v3 = vld [vmem:[%s7394_s16 + $0x150] sm:$0xff]  ;;  %v446_v4 = vld [vmem:[%s7394_s16 + $0x168] sm:$0xff] }
  0x22   : > { %v448_v5 = vld [vmem:[%s7394_s16 + $0x178] sm:$0xff]  ;;  %v6248_v6 = vpack.c.bf16 %v443_v3, %v441_v2  ;;  %v445_v8 = vld [vmem:[%s7394_s16 + $0x160] sm:$0xff]  ;;  %v447_v9 = vld [vmem:[%s7394_s16 + $0x170] sm:$0xff] }
  0x23   : > { %6221 = vmatpush1.bf16.msra.mxu0 %v6220_v26  ;;  %v6250_v7 = vpack.c.bf16 %v448_v5, %v446_v4  ;;  %v450_v10 = vld [vmem:[%s7394_s16 + $0x188] sm:$0xff]  ;;  %v452_v11 = vld [vmem:[%s7394_s16 + $0x198] sm:$0xff]  ;;  %v6252_v12 = vpack.c.bf16 %v447_v9, %v445_v8  ;;  %v449_v14 = vld [vmem:[%s7394_s16 + $0x180] sm:$0xff] }
  0x24   : > { %6223 = vmatprep.subr.bf16.mxu0 %v6222_v27  ;;  %v6254_v13 = vpack.c.bf16 %v452_v11, %v450_v10  ;;  %v451_v15 = vld [vmem:[%s7394_s16 + $0x190] sm:$0xff]  ;;  %v454_v16 = vld [vmem:[%s7394_s16 + $0x1a8] sm:$0xff]  ;;  %v456_v17 = vld [vmem:[%s7394_s16 + $0x1b8] sm:$0xff] }
  0x25   : > { %v6256_v18 = vpack.c.bf16 %v451_v15, %v449_v14  ;;  %v6258_v19 = vpack.c.bf16 %v456_v17, %v454_v16  ;;  %v453_v20 = vld [vmem:[%s7394_s16 + $0x1a0] sm:$0xff]  ;;  %v455_v21 = vld [vmem:[%s7394_s16 + $0x1b0] sm:$0xff]  ;;  %v458_v22 = vld [vmem:[%s7394_s16 + $0x1c8] sm:$0xff] }
  0x26   : > { %v460_v23 = vld [vmem:[%s7394_s16 + $0x1d8] sm:$0xff]  ;;  %v6260_v24 = vpack.c.bf16 %v455_v21, %v453_v20  ;;  %v357_v25 = vld [vmem:[%s12445_s3] sm:$0xff]  ;;  %v459_v29 = vld [vmem:[%s7394_s16 + $0x1d0] sm:$0xff] }
  0x27   : > { %6225 = vmatpush1.bf16.msra.mxu0 %v6224_v32  ;;  %v353_v26 = vld [vmem:[%s12444_s2] sm:$0xff]  ;;  %v6262_v27 = vpack.c.bf16 %v460_v23, %v458_v22  ;;  %855 = vperm.xlu1 %6692, %v357_v25   ;;  %v462_v30 = vld [vmem:[%s7394_s16 + $0x1e8] sm:$0xff]  ;;  %v464_v31 = vld [vmem:[%s7394_s16 + $0x1f8] sm:$0xff] }
  0x28   : > { %6227 = vmatprep.subr.bf16.mxu0 %v6226_v33  ;;  %v457_v28 = vld [vmem:[%s7394_s16 + $0x1c0] sm:$0xff]  ;;  %827 = vperm.xlu0 %6691, %v353_v26   ;;  %v358_v32 = vld [vmem:[%s12445_s3 + $0x8] sm:$0xff]  ;;  %v6266_v35 = vpack.c.bf16 %v464_v31, %v462_v30  ;;  %v463_v38 = vld [vmem:[%s7394_s16 + $0x1f0] sm:$0xff] }
  0x29   : > { %v354_v33 = vld [vmem:[%s12444_s2 + $0x8] sm:$0xff]  ;;  %v6264_v34 = vpack.c.bf16 %v459_v29, %v457_v28  ;;  %v461_v37 = vld [vmem:[%s7394_s16 + $0x1e0] sm:$0xff]  ;;  %v356_v41 = vld [vmem:[%s12444_s2 + $0x18] sm:$0xff] }
  0x2a   : > { %v355_v42 = vld [vmem:[%s12444_s2 + $0x10] sm:$0xff]  ;;  %v6268_v43 = vpack.c.bf16 %v463_v38, %v461_v37  ;;  %v470_v47 = vld [vmem:[%s7394_s16 + $0x228] sm:$0xff]  ;;  %v472_v48 = vld [vmem:[%s7394_s16 + $0x238] sm:$0xff] }
  0x2b   : > { %6229 = vmatpush1.bf16.msra.mxu0 %v6228_v39  ;;  %860 = vperm.xlu1 %6692, %v358_v32   ;;  %v466_v39 = vld [vmem:[%s7394_s16 + $0x208] sm:$0xff]  ;;  %v360_v49 = vld [vmem:[%s12445_s3 + $0x18] sm:$0xff]  ;;  %v359_v50 = vld [vmem:[%s12445_s3 + $0x10] sm:$0xff]  ;;  %v6274_v53 = vpack.c.bf16 %v472_v48, %v470_v47 }
  0x2c   : > { %6231 = vmatprep.subr.bf16.mxu0 %v6230_v40  ;;  %v468_v40 = vld [vmem:[%s7394_s16 + $0x218] sm:$0xff]  ;;  %832 = vperm.xlu0 %6691, %v354_v33   ;;  %v469_v54 = vld [vmem:[%s7394_s16 + $0x220] sm:$0xff]  ;;  %v471_v55 = vld [vmem:[%s7394_s16 + $0x230] sm:$0xff] }
  0x2d   : > { %v6270_v44 = vpack.c.bf16 %v468_v40, %v466_v39  ;;  %v339_v56 = vld [vmem:[%s12443_s1 + $0x30] sm:$0xff]  ;;  %v476_v58 = vld [vmem:[%s7394_s16 + $0x258] sm:$0xff]  ;;  %v338_v60 = vld [vmem:[%s12443_s1 + $0x28] sm:$0xff] }
  0x2e   : > { %v473_v62 = vld [vmem:[%s7394_s16 + $0x240] sm:$0xff]  ;;  %v475_v63 = vld [vmem:[%s7394_s16 + $0x250] sm:$0xff]  ;;  %v480_v2 = vld [vmem:[%s7394_s16 + $0x278] sm:$0xff] }
  0x2f   : > { %6233 = vmatpush1.bf16.msra.mxu0 %v6232_v45  ;;  %v465_v45 = vld [vmem:[%s7394_s16 + $0x200] sm:$0xff]  ;;  %842 = vperm.xlu1 %6692, %v356_v41   ;;  %v6280_v3 = vpack.c.bf16 %v475_v63, %v473_v62  ;;  %v343_v4 = vld [vmem:[%s12443_s1 + $0x50] sm:$0xff]  ;;  %v482_v9 = vld [vmem:[%s7394_s16 + $0x288] sm:$0xff] }
  0x30   : > { %6235 = vmatprep.subr.bf16.mxu0 %v6234_v46  ;;  %v467_v46 = vld [vmem:[%s7394_s16 + $0x210] sm:$0xff]  ;;  %837 = vperm.xlu0 %6691, %v355_v42   ;;  %v349_v8 = vld [vmem:[%s12443_s1 + $0x80] sm:$0xff]  ;;  %v484_v10 = vld [vmem:[%s7394_s16 + $0x298] sm:$0xff] }
  0x31   : > { %v481_v14 = vld [vmem:[%s7394_s16 + $0x280] sm:$0xff]  ;;  %v483_v15 = vld [vmem:[%s7394_s16 + $0x290] sm:$0xff]  ;;  %v336_v16 = vld [vmem:[%s12443_s1 + $0x18] sm:$0xff] }
  0x32   : > { %v486_v17 = vld [vmem:[%s7394_s16 + $0x2a8] sm:$0xff]  ;;  %v485_v21 = vld [vmem:[%s7394_s16 + $0x2a0] sm:$0xff]  ;;  %v487_v22 = vld [vmem:[%s7394_s16 + $0x2b0] sm:$0xff] }
  0x33   : > { %6237 = vmatpush1.bf16.msra.mxu0 %v6236_v51  ;;  %v333_v51 = vld [vmem:[%s12443_s1] sm:$0xff]  ;;  %870 = vperm.xlu1 %6692, %v360_v49   ;;  %v490_v23 = vld [vmem:[%s7394_s16 + $0x2c8] sm:$0xff]  ;;  %v6292_v25 = vpack.c.bf16 %v487_v22, %v485_v21  ;;  %v491_v28 = vld [vmem:[%s7394_s16 + $0x2d0] sm:$0xff] }
  0x34   : > { %6239 = vmatprep.subr.bf16.mxu0 %v6238_v52  ;;  %v6272_v52 = vpack.c.bf16 %v467_v46, %v465_v45  ;;  %865 = vperm.xlu0 %6691, %v359_v50   ;;  %v494_v29 = vld [vmem:[%s7394_s16 + $0x2e8] sm:$0xff]  ;;  %v496_v30 = vld [vmem:[%s7394_s16 + $0x2f8] sm:$0xff]  ;;  %v493_v33 = vld [vmem:[%s7394_s16 + $0x2e0] sm:$0xff] }
  0x35   : > { %v6298_v32 = vpack.c.bf16 %v496_v30, %v494_v29  ;;  %v500_v37 = vld [vmem:[%s7394_s16 + $0x318] sm:$0xff]  ;;  %v497_v40 = vld [vmem:[%s7394_s16 + $0x300] sm:$0xff]  ;;  %v499_v41 = vld [vmem:[%s7394_s16 + $0x310] sm:$0xff] }
  0x36   : > { %v502_v42 = vld [vmem:[%s7394_s16 + $0x328] sm:$0xff]  ;;  %v501_v46 = vld [vmem:[%s7394_s16 + $0x320] sm:$0xff]  ;;  %v503_v47 = vld [vmem:[%s7394_s16 + $0x330] sm:$0xff] }
  0x37   : > { %6241 = vmatpush1.bf16.msra.mxu0 %v6240_v57  ;;  %v474_v57 = vld [vmem:[%s7394_s16 + $0x248] sm:$0xff]  ;;  %v508_v49 = vld [vmem:[%s7394_s16 + $0x358] sm:$0xff]  ;;  %v6308_v50 = vpack.c.bf16 %v503_v47, %v501_v46  ;;  %v341_v30 = vld [vmem:[%s12443_s1 + $0x40] sm:$0xff] }
  0x38   : > { %6243 = vmatprep.subr.bf16.mxu0 %v6242_v59  ;;  %v6276_v59 = vpack.c.bf16 %v471_v55, %v469_v54  ;;  %v6278_v61 = vpack.c.bf16 %v476_v58, %v474_v57  ;;  %v506_v48 = vld [vmem:[%s7394_s16 + $0x348] sm:$0xff]  ;;  %v512_v55 = vld [vmem:[%s7394_s16 + $0x378] sm:$0xff]  ;;  %v509_v58 = vld [vmem:[%s7394_s16 + $0x360] sm:$0xff] }
  0x39   : > { %v510_v54 = vld [vmem:[%s7394_s16 + $0x368] sm:$0xff]  ;;  %v532_v21 = vld [vmem:[%s7394_s16 + $0x418] sm:$0xff]  ;;  %v351_v47 = vld [vmem:[%s12443_s1 + $0x90] sm:$0xff] }
  0x3a   : > { %v6314_v57 = vpack.c.bf16 %v512_v55, %v510_v54  ;;  %v342_v54 = vld [vmem:[%s12443_s1 + $0x48] sm:$0xff]  ;;  %v347_v55 = vld [vmem:[%s12443_s1 + $0x70] sm:$0xff] }
  0x3b   : > { %6245 = vmatpush1.bf16.msra.mxu0 %v6244_v0  ;;  %v344_v0 = vld [vmem:[%s12443_s1 + $0x58] sm:$0xff] }
  0x3c   : > { %6247 = vmatprep.subr.bf16.mxu0 %v6246_v1  ;;  %v478_v1 = vld [vmem:[%s7394_s16 + $0x268] sm:$0xff] }
  0x3d   : > { %v6282_v5 = vpack.c.bf16 %v480_v2, %v478_v1  ;;  %v515_v1 = vld [vmem:[%s7394_s16 + $0x390] sm:$0xff]  ;;  %v518_v2 = vld [vmem:[%s7394_s16 + $0x3a8] sm:$0xff] }
  0x3f   : > { %6249 = vmatpush1.bf16.msra.mxu0 %v6248_v6  ;;  %v477_v6 = vld [vmem:[%s7394_s16 + $0x260] sm:$0xff] }
  0x40   : > { %6251 = vmatprep.subr.bf16.mxu0 %v6250_v7  ;;  %v479_v7 = vld [vmem:[%s7394_s16 + $0x270] sm:$0xff] }
  0x41   : > { %v6284_v11 = vpack.c.bf16 %v479_v7, %v477_v6  ;;  %v517_v6 = vld [vmem:[%s7394_s16 + $0x3a0] sm:$0xff]  ;;  %v519_v7 = vld [vmem:[%s7394_s16 + $0x3b0] sm:$0xff] }
  0x43   : > { %6253 = vmatpush1.bf16.msra.mxu0 %v6252_v12  ;;  %v348_v12 = vld [vmem:[%s12443_s1 + $0x78] sm:$0xff] }
  0x44   : > { %6255 = vmatprep.subr.bf16.mxu0 %v6254_v13  ;;  %v6286_v13 = vpack.c.bf16 %v484_v10, %v482_v9  ;;  %v524_v9 = vld [vmem:[%s7394_s16 + $0x3d8] sm:$0xff]  ;;  %v6324_v10 = vpack.c.bf16 %v519_v7, %v517_v6 }
  0x47   : > { %6257 = vmatpush1.bf16.msra.mxu0 %v6256_v18  ;;  %v488_v18 = vld [vmem:[%s7394_s16 + $0x2b8] sm:$0xff] }
  0x48   : > { %6259 = vmatprep.subr.bf16.mxu0 %v6258_v19  ;;  %v6288_v19 = vpack.c.bf16 %v483_v15, %v481_v14  ;;  %v6290_v20 = vpack.c.bf16 %v488_v18, %v486_v17  ;;  %v526_v14 = vld [vmem:[%s7394_s16 + $0x3e8] sm:$0xff]  ;;  %v528_v15 = vld [vmem:[%s7394_s16 + $0x3f8] sm:$0xff]  ;;  %v525_v18 = vld [vmem:[%s7394_s16 + $0x3e0] sm:$0xff] }
  0x49   : > { %v6330_v17 = vpack.c.bf16 %v528_v15, %v526_v14 }
  0x4b   : > { %6261 = vmatpush1.bf16.msra.mxu0 %v6260_v24  ;;  %v492_v24 = vld [vmem:[%s7394_s16 + $0x2d8] sm:$0xff] }
  0x4c   : > { %6263 = vmatprep.subr.bf16.mxu0 %v6262_v27  ;;  %v6294_v26 = vpack.c.bf16 %v492_v24, %v490_v23  ;;  %v489_v27 = vld [vmem:[%s7394_s16 + $0x2c0] sm:$0xff] }
  0x4d   : > { %v6296_v31 = vpack.c.bf16 %v491_v28, %v489_v27  ;;  %v529_v24 = vld [vmem:[%s7394_s16 + $0x400] sm:$0xff]  ;;  %v536_v27 = vld [vmem:[%s7394_s16 + $0x438] sm:$0xff]  ;;  %v335_v28 = vld [vmem:[%s12443_s1 + $0x10] sm:$0xff] }
  0x4f   : > { %6265 = vmatpush1.bf16.msra.mxu0 %v6264_v34  ;;  %v495_v34 = vld [vmem:[%s7394_s16 + $0x2f0] sm:$0xff] }
  0x50   : > { %6267 = vmatprep.subr.bf16.mxu0 %v6266_v35  ;;  %v498_v35 = vld [vmem:[%s7394_s16 + $0x308] sm:$0xff]  ;;  %v6300_v38 = vpack.c.bf16 %v495_v34, %v493_v33  ;;  %v535_v33 = vld [vmem:[%s7394_s16 + $0x430] sm:$0xff] }
  0x51   : > { %v6302_v39 = vpack.c.bf16 %v500_v37, %v498_v35  ;;  %v538_v34 = vld [vmem:[%s7394_s16 + $0x448] sm:$0xff]  ;;  %v540_v35 = vld [vmem:[%s7394_s16 + $0x458] sm:$0xff] }
  0x52   : > { %v340_v37 = vld [vmem:[%s12443_s1 + $0x38] sm:$0xff] }
  0x53   : > { %6269 = vmatpush1.bf16.msra.mxu0 %v6268_v43  ;;  %v504_v43 = vld [vmem:[%s7394_s16 + $0x338] sm:$0xff] }
  0x54   : > { %6271 = vmatprep.subr.bf16.mxu0 %v6270_v44  ;;  %v6304_v44 = vpack.c.bf16 %v499_v41, %v497_v40  ;;  %v6306_v45 = vpack.c.bf16 %v504_v43, %v502_v42  ;;  %v6342_v40 = vpack.c.bf16 %v540_v35, %v538_v34  ;;  %v537_v41 = vld [vmem:[%s7394_s16 + $0x440] sm:$0xff]  ;;  %v539_v42 = vld [vmem:[%s7394_s16 + $0x450] sm:$0xff]  ;;  %v542_v43 = vld [vmem:[%s7394_s16 + $0x468] sm:$0xff] }
  0x55   : > { %v6344_v46 = vpack.c.bf16 %v539_v42, %v537_v41 }
  0x56   : > { %623 = vmatmul.mubr.f32.vlgmr.msra.gmra.mrb[0].mxu0 %v333_v51  ;;  %v6310_v51 = vpack.c.bf16 %v508_v49, %v506_v48  ;;  %v541_v49 = vld [vmem:[%s7394_s16 + $0x460] sm:$0xff] }
  0x57   : > { %6273 = vmatpush1.bf16.msra.mxu0 %v6272_v52  ;;  %628 = vmatprep.mubr.f32.mxu0 %v339_v56  ;;  %v505_v52 = vld [vmem:[%s7394_s16 + $0x340] sm:$0xff] }
  0x58   : > { %6275 = vmatprep.subr.bf16.mxu0 %v6274_v53  ;;  %v507_v53 = vld [vmem:[%s7394_s16 + $0x350] sm:$0xff] }
  0x59   : > { %v6312_v56 = vpack.c.bf16 %v507_v53, %v505_v52  ;;  %v337_v53 = vld [vmem:[%s12443_s1 + $0x20] sm:$0xff] }
  0x5a   : > { %629 = vmatmul.mubr.f32.gmra.mrb[2].mxu0 %v338_v60  ;;  %v514_v60 = vld [vmem:[%s7394_s16 + $0x388] sm:$0xff] }
  0x5b   : > { %6277 = vmatpush1.bf16.msra.mxu0 %v6276_v59  ;;  %634 = vmatprep.mubr.f32.mxu0 %v344_v0  ;;  %v511_v59 = vld [vmem:[%s7394_s16 + $0x370] sm:$0xff]  ;;  %v513_v0 = vld [vmem:[%s7394_s16 + $0x380] sm:$0xff] }
  0x5c   : > { %6279 = vmatprep.subr.bf16.mxu0 %v6278_v61  ;;  %v516_v61 = vld [vmem:[%s7394_s16 + $0x398] sm:$0xff]  ;;  %v6316_v62 = vpack.c.bf16 %v511_v59, %v509_v58 }
  0x5d   : > { %v6318_v63 = vpack.c.bf16 %v516_v61, %v514_v60 }
  0x5e   : > { %635 = vmatmul.mubr.f32.gmra.mrb[4].mxu0 %v343_v4  ;;  %v6320_v4 = vpack.c.bf16 %v515_v1, %v513_v0 }
  0x5f   : > { %6281 = vmatpush1.bf16.msra.mxu0 %v6280_v3  ;;  %640 = vmatprep.mubr.f32.mxu0 %v349_v8  ;;  %v520_v3 = vld [vmem:[%s7394_s16 + $0x3b8] sm:$0xff]  ;;  %v522_v8 = vld [vmem:[%s7394_s16 + $0x3c8] sm:$0xff] }
  0x60   : > { %6283 = vmatprep.subr.bf16.mxu0 %v6282_v5  ;;  %v6322_v5 = vpack.c.bf16 %v520_v3, %v518_v2 }
  0x62   : > { %641 = vmatmul.mubr.f32.gmra.mrb[6].mxu0 %v348_v12  ;;  %v521_v12 = vld [vmem:[%s7394_s16 + $0x3c0] sm:$0xff] }
  0x63   : > { %6285 = vmatpush1.bf16.msra.mxu0 %v6284_v11  ;;  %711 = vmatprep.mubr.f32.mxu0 %v336_v16  ;;  %v6326_v11 = vpack.c.bf16 %v524_v9, %v522_v8 }
  0x64   : > { %6287 = vmatprep.subr.bf16.mxu0 %v6286_v13  ;;  %v523_v13 = vld [vmem:[%s7394_s16 + $0x3d0] sm:$0xff] }
  0x65   : > { %v6328_v16 = vpack.c.bf16 %v523_v13, %v521_v12 }
  0x67   : > { %6289 = vmatpush1.bf16.msra.mxu0 %v6288_v19  ;;  %v527_v19 = vld [vmem:[%s7394_s16 + $0x3f0] sm:$0xff] }
  0x68   : > { %6291 = vmatprep.subr.bf16.mxu0 %v6290_v20  ;;  %v530_v20 = vld [vmem:[%s7394_s16 + $0x408] sm:$0xff]  ;;  %v6332_v22 = vpack.c.bf16 %v527_v19, %v525_v18 }
  0x69   : > { %v6334_v23 = vpack.c.bf16 %v532_v21, %v530_v20 }
  0x6b   : > { %6293 = vmatpush1.bf16.msra.mxu0 %v6292_v25  ;;  %v531_v25 = vld [vmem:[%s7394_s16 + $0x410] sm:$0xff] }
  0x6c   : > { %6295 = vmatprep.subr.bf16.mxu0 %v6294_v26  ;;  %v534_v26 = vld [vmem:[%s7394_s16 + $0x428] sm:$0xff]  ;;  %v6336_v29 = vpack.c.bf16 %v531_v25, %v529_v24 }
  0x6f   : > { %6297 = vmatpush1.bf16.msra.mxu0 %v6296_v31  ;;  %v6338_v31 = vpack.c.bf16 %v536_v27, %v534_v26 }
  0x70   : > { %6299 = vmatprep.subr.bf16.mxu0 %v6298_v32  ;;  %v533_v32 = vld [vmem:[%s7394_s16 + $0x420] sm:$0xff] }
  0x73   : > { %6301 = vmatpush1.bf16.msra.mxu0 %v6300_v38  ;;  %v6340_v38 = vpack.c.bf16 %v535_v33, %v533_v32 }
  0x74   : > { %6303 = vmatprep.subr.bf16.mxu0 %v6302_v39  ;;  %v346_v39 = vld [vmem:[%s12443_s1 + $0x68] sm:$0xff] }
  0x77   : > { %6305 = vmatpush1.bf16.msra.mxu0 %v6304_v44  ;;  %v544_v44 = vld [vmem:[%s7394_s16 + $0x478] sm:$0xff] }
  0x78   : > { %6307 = vmatprep.subr.bf16.mxu0 %v6306_v45  ;;  %v345_v45 = vld [vmem:[%s12443_s1 + $0x60] sm:$0xff]  ;;  %v6346_v48 = vpack.c.bf16 %v544_v44, %v542_v43 }
  0x7b   : > { %6309 = vmatpush1.bf16.msra.mxu0 %v6308_v50  ;;  %v543_v50 = vld [vmem:[%s7394_s16 + $0x470] sm:$0xff] }
  0x7c   : > { %6311 = vmatprep.subr.bf16.mxu0 %v6310_v51  ;;  %v350_v51 = vld [vmem:[%s12443_s1 + $0x88] sm:$0xff]  ;;  %v6348_v52 = vpack.c.bf16 %v543_v50, %v541_v49 }
  0x7f   : > { %6313 = vmatpush1.bf16.msra.mxu0 %v6312_v56  ;;  %v352_v56 = vld [vmem:[%s12443_s1 + $0x98] sm:$0xff] }
  0x80   : > { %6315 = vmatprep.subr.bf16.mxu0 %v6314_v57 }
  0x83   : > { %6317 = vmatpush1.bf16.msra.mxu0 %v6316_v62 }
  0x84   : > { %6319 = vmatprep.subr.bf16.mxu0 %v6318_v63 }
  0x87   : > { %6321 = vmatpush1.bf16.msra.mxu0 %v6320_v4 }
  0x88   : > { %6323 = vmatprep.subr.bf16.mxu0 %v6322_v5 }
  0x8b   : > { %6325 = vmatpush1.bf16.msra.mxu0 %v6324_v10 }
  0x8c   : > { %6327 = vmatprep.subr.bf16.mxu0 %v6326_v11 }
  0x8f   : > { %6329 = vmatpush1.bf16.msra.mxu0 %v6328_v16 }
  0x90   : > { %6331 = vmatprep.subr.bf16.mxu0 %v6330_v17 }
  0x93   : > { %6333 = vmatpush1.bf16.msra.mxu0 %v6332_v22 }
  0x94   : > { %6335 = vmatprep.subr.bf16.mxu0 %v6334_v23 }
  0x96   : > { %712 = vmatmul.mubr.f32.vlgmr.msra.gmra.mrb[0].mxu0 %v335_v28 }
  0x97   : > { %6337 = vmatpush1.bf16.msra.mxu0 %v6336_v29  ;;  %717 = vmatprep.mubr.f32.mxu0 %v341_v30 }
  0x98   : > { %6339 = vmatprep.subr.bf16.mxu0 %v6338_v31 }
  0x9a   : > { %718 = vmatmul.mubr.f32.gmra.mrb[2].mxu0 %v340_v37 }
  0x9b   : > { %6341 = vmatpush1.bf16.msra.mxu0 %v6340_v38  ;;  %723 = vmatprep.mubr.f32.mxu0 %v346_v39 }
  0x9c   : > { %6343 = vmatprep.subr.bf16.mxu0 %v6342_v40 }
  0x9e   : > { %724 = vmatmul.mubr.f32.gmra.mrb[4].mxu0 %v345_v45 }
  0x9f   : > { %6345 = vmatpush1.bf16.msra.mxu0 %v6344_v46  ;;  %729 = vmatprep.mubr.f32.mxu0 %v351_v47 }
  0xa0   : > { %6347 = vmatprep.subr.bf16.mxu0 %v6346_v48 }
  0xa2   : > { %730 = vmatmul.mubr.f32.gmra.mrb[6].mxu0 %v350_v51 }
  0xa3   : > { %6349 = vmatpush1.bf16.msra.mxu0 %v6348_v52  ;;  %800 = vmatprep.mubr.f32.mxu0 %v12452_v36 }
  0xa6   : > { %6027 = vmatmul.mubr.msk.f32.vlgmr.msra.gmra.mrb[0].mxu0 %vm545_vm0, %v337_v53  ;;  %v856_v58 = vpop.permute.xlu1 %855 }
  0xa7   : > { %806 = vmatprep.mubr.f32.mxu0 %v12452_v36  ;;  %v828_v57 = vpop.permute.xlu0 %827 }
  0xaa   : > { %6028 = vmatmul.mubr.msk.f32.gmra.mrb[2].mxu0 %vm545_vm0, %v342_v54  ;;  %v861_v63 = vpop.permute.xlu1 %860 }
  0xab   : > { %812 = vmatprep.mubr.f32.mxu0 %v12452_v36  ;;  %v833_v59 = vpop.permute.xlu0 %832 }
  0xae   : > { %6029 = vmatmul.mubr.msk.f32.gmra.mrb[4].mxu0 %vm545_vm0, %v347_v55  ;;  %v843_v12 = vpop.permute.xlu1 %842 }
  0xaf   : > { %818 = vmatprep.mubr.f32.mxu0 %v12452_v36  ;;  %v838_v2 = vpop.permute.xlu0 %837 }
  0xb2   : > { %6030 = vmatmul.mubr.msk.f32.gmra.mrb[6].mxu0 %vm545_vm0, %v352_v56  ;;  %v871_v30 = vpop.permute.xlu1 %870 }
  0xb3   : > { %2055 = vmatprep.mubr.f32.mxu0 %v12452_v36  ;;  %v866_v19 = vpop.permute.xlu0 %865 }
 0x179   : > { %v802_v60 = vpop.f32.mrb[0].mxu0 }
 0x17a   : > { %v845_v61 = vmul.f32 %v828_v57, %v802_v60  ;;  %v804_v62 = vpop.f32.mrb[1].mxu0 }
 0x17b   : > { %v846_v0 = vmul.f32 %v828_v57, %v804_v62 }
 0x17c   : > { %v7627_v1 = vadd.f32 %v856_v58, %v845_v61 }
 0x17d   : > { %v7629_v3 = vadd.f32 %v856_v58, %v846_v0  ;;  %v808_v4 = vpop.f32.mrb[2].mxu0 }
 0x17e   : > { %v881_v5 = vsub.f32 0.0, %v7627_v1  ;;  %v847_v6 = vmul.f32 %v833_v59, %v808_v4  ;;  %v810_v7 = vpop.f32.mrb[3].mxu0 }
 0x17f   : > { %v882_v8 = vsub.f32 0.0, %v7629_v3  ;;  %v848_v9 = vmul.f32 %v833_v59, %v810_v7 }
 0x180   : > { %v889_v10 = vmul.f32 1.442695, %v881_v5  ;;  %v7633_v11 = vadd.f32 %v861_v63, %v847_v6 }
 0x181   : > { %v891_v13 = vmul.f32 1.442695, %v882_v8  ;;  %v7635_v14 = vadd.f32 %v861_v63, %v848_v9  ;;  %v814_v15 = vpop.f32.mrb[4].mxu0 }
 0x182   : > { %6693 = vpow2.f32 %v889_v10  ;;  %v883_v16 = vsub.f32 0.0, %v7633_v11  ;;  %v849_v17 = vmul.f32 %v838_v2, %v814_v15  ;;  %v816_v18 = vpop.f32.mrb[5].mxu0 }
 0x183   : > { %6695 = vpow2.f32 %v891_v13  ;;  %v884_v20 = vsub.f32 0.0, %v7635_v14  ;;  %v850_v21 = vmul.f32 %v838_v2, %v816_v18  ;;  %v365_v18 = vld [vmem:[%s12446_s4 + $0x20] sm:$0xff] }
 0x184   : > { %v893_v22 = vmul.f32 1.442695, %v883_v16  ;;  %v7639_v23 = vadd.f32 %v866_v19, %v849_v17  ;;  %v363_v16 = vld [vmem:[%s12446_s4 + $0x10] sm:$0xff]  ;;  %v364_v17 = vld [vmem:[%s12446_s4 + $0x18] sm:$0xff] }
 0x185   : > { %v895_v24 = vmul.f32 1.442695, %v884_v20  ;;  %v7641_v25 = vadd.f32 %v866_v19, %v850_v21  ;;  %v820_v26 = vpop.f32.mrb[6].mxu0  ;;  %v366_v19 = vld [vmem:[%s12446_s4 + $0x28] sm:$0xff]  ;;  %v367_v20 = vld [vmem:[%s12446_s4 + $0x30] sm:$0xff]  ;;  %v368_v21 = vld [vmem:[%s12446_s4 + $0x38] sm:$0xff] }
 0x186   : > { %6697 = vpow2.f32 %v893_v22  ;;  %v885_v27 = vsub.f32 0.0, %v7639_v23  ;;  %v851_v28 = vmul.f32 %v843_v12, %v820_v26  ;;  %v822_v29 = vpop.f32.mrb[7].mxu0  ;;  %v369_v22 = vld [vmem:[%s12446_s4 + $0x40] sm:$0xff] }
 0x187   : > { %6699 = vpow2.f32 %v895_v24  ;;  %v886_v31 = vsub.f32 0.0, %v7641_v25  ;;  %v852_v32 = vmul.f32 %v843_v12, %v822_v29  ;;  %v371_v24 = vld [vmem:[%s12446_s4 + $0x50] sm:$0xff] }
 0x188   : > { %v897_v33 = vmul.f32 1.442695, %v885_v27  ;;  %v879_v34 = vadd.f32 %v871_v30, %v851_v28 }
 0x189   : > { %v899_v35 = vmul.f32 1.442695, %v886_v31  ;;  %v880_v37 = vadd.f32 %v871_v30, %v852_v32 }
 0x18a   : > { %6701 = vpow2.f32 %v897_v33  ;;  %v887_v38 = vsub.f32 0.0, %v879_v34 }
 0x18b   : > { %6703 = vpow2.f32 %v899_v35  ;;  %v888_v39 = vsub.f32 0.0, %v880_v37  ;;  %v374_v35 = vld [vmem:[%s12447_s5 + $0x8] sm:$0xff] }
 0x18c   : > { %v6694_v40 = vpop.eup %6693  ;;  %v901_v41 = vmul.f32 1.442695, %v887_v38 }
 0x18d   : > { %v6696_v42 = vpop.eup %6695  ;;  %v905_v43 = vadd.f32 1.0, %v6694_v40  ;;  %v903_v44 = vmul.f32 1.442695, %v888_v39 }
 0x18e   : > { %v906_v45 = vadd.f32 1.0, %v6696_v42  ;;  %6705 = vpow2.f32 %v901_v41 }
 0x18f   : > { %6707 = vrcp.f32 %v905_v43 }
 0x190   : > { %v6698_v46 = vpop.eup %6697  ;;  %6709 = vpow2.f32 %v903_v44 }
 0x191   : > { %v6700_v47 = vpop.eup %6699  ;;  %v907_v48 = vadd.f32 1.0, %v6698_v46  ;;  %6711 = vrcp.f32 %v906_v45 }
 0x192   : > { %v908_v49 = vadd.f32 1.0, %v6700_v47 }
 0x193   : > { %6713 = vrcp.f32 %v907_v48 }
 0x194   : > { %v6702_v50 = vpop.eup %6701  ;;  %6715 = vrcp.f32 %v908_v49  ;;  %v375_v49 = vld [vmem:[%s12447_s5 + $0x10] sm:$0xff] }
 0x195   : > { %v6704_v51 = vpop.eup %6703  ;;  %v909_v52 = vadd.f32 1.0, %v6702_v50 }
 0x196   : > { %v910_v54 = vadd.f32 1.0, %v6704_v51  ;;  %v381_v51 = vld [vmem:[%s12448_s6] sm:$0xff] }
 0x197   : > { %6717 = vrcp.f32 %v909_v52  ;;  %v376_v52 = vld [vmem:[%s12447_s5 + $0x18] sm:$0xff] }
 0x198   : > { %v6706_v53 = vpop.eup %6705 }
 0x199   : > { %v911_v55 = vadd.f32 1.0, %v6706_v53  ;;  %v6708_v56 = vpop.eup %6707 }
 0x19a   : > { %v6710_v57 = vpop.eup %6709  ;;  %v921_v62 = vmul.f32 %v6708_v56, %v7627_v1 }
 0x19b   : > { %6719 = vrcp.f32 %v911_v55  ;;  %v6712_v58 = vpop.eup %6711  ;;  %v912_v59 = vadd.f32 1.0, %v6710_v57 }
 0x19c   : > { %6721 = vrcp.f32 %v910_v54  ;;  %v922_v0 = vmul.f32 %v6712_v58, %v7629_v3  ;;  %v361_v3 = vld [vmem:[%s12446_s4] sm:$0xff]  ;;  %v382_v54 = vld [vmem:[%s12448_s6 + $0x8] sm:$0xff] }
 0x19d   : > { %v6714_v60 = vpop.eup %6713  ;;  %6723 = vrcp.f32 %v912_v59 }
 0x19e   : > { %v6716_v61 = vpop.eup %6715  ;;  %v923_v63 = vmul.f32 %v6714_v60, %v7633_v11 }
 0x19f   : > { %v924_v2 = vmul.f32 %v6716_v61, %v7635_v14  ;;  %v362_v14 = vld [vmem:[%s12446_s4 + $0x8] sm:$0xff] }
 0x1a0   : > { %v6352_v4 = vpack.c.bf16 %v923_v63, %v921_v62 }
 0x1a1   : > { %v6350_v5 = vpack.c.bf16 %v924_v2, %v922_v0  ;;  %v6718_v6 = vpop.eup %6717  ;;  %v377_v0 = vld [vmem:[%s12447_s5 + $0x20] sm:$0xff] }
 0x1a2   : > { %v925_v9 = vmul.f32 %v6718_v6, %v7639_v23  ;;  %v370_v23 = vld [vmem:[%s12446_s4 + $0x48] sm:$0xff] }
 0x1a3   : > { %6351 = vmatprep.subr.bf16.mxu1 %v6350_v5 }
 0x1a4   : > { %6353 = vmatpush1.bf16.msra.mxu1 %v6352_v4  ;;  %v378_v4 = vld [vmem:[%s12447_s5 + $0x28] sm:$0xff] }
 0x1a5   : > { %v6720_v7 = vpop.eup %6719 }
 0x1a6   : > { %v6722_v8 = vpop.eup %6721  ;;  %v927_v10 = vmul.f32 %v6720_v7, %v879_v34  ;;  %v373_v34 = vld [vmem:[%s12447_s5] sm:$0xff] }
 0x1a7   : > { %v6724_v12 = vpop.eup %6723  ;;  %v926_v1 = vmul.f32 %v6722_v8, %v7641_v25  ;;  %v372_v25 = vld [vmem:[%s12446_s4 + $0x58] sm:$0xff] }
 0x1a8   : > { %v6356_v13 = vpack.c.bf16 %v927_v10, %v925_v9  ;;  %v928_v15 = vmul.f32 %v6724_v12, %v880_v37 }
 0x1aa   : > { %v6354_v11 = vpack.c.bf16 %v928_v15, %v926_v1 }
 0x1ac   : > { %6355 = vmatprep.subr.bf16.mxu1 %v6354_v11 }
 0x1ad   : > { %6357 = vmatpush1.bf16.msra.mxu1 %v6356_v13 }
 0x1b0   : > { %6031 = vmatmul.mubr.msk.f32.vlgmr.msra.gmra.mrb[0].mxu1 %vm929_vm1, %v361_v3 }
 0x1b1   : > { %1036 = vmatprep.mubr.f32.mxu1 %v12452_v36 }
 0x1b4   : > { %6032 = vmatmul.mubr.msk.f32.gmra.mrb[2].mxu1 %vm929_vm1, %v362_v14 }
 0x1b5   : > { %1042 = vmatprep.mubr.f32.mxu1 %v12452_v36 }
 0x1b8   : > { %6033 = vmatmul.mubr.msk.f32.gmra.mrb[4].mxu1 %vm929_vm1, %v363_v16 }
 0x1b9   : > { %1048 = vmatprep.mubr.f32.mxu1 %v12452_v36 }
 0x1bc   : > { %6034 = vmatmul.mubr.msk.f32.gmra.mrb[6].mxu1 %vm929_vm1, %v364_v17 }
 0x1bd   : > { %1054 = vmatprep.mubr.f32.mxu1 %v12452_v36 }
 0x1c0   : > { %6035 = vmatmul.mubr.msk.f32.gmra.mrb[8].mxu1 %vm929_vm1, %v365_v18 }
 0x1c1   : > { %1060 = vmatprep.mubr.f32.mxu1 %v12452_v36 }
 0x1c4   : > { %6036 = vmatmul.mubr.msk.f32.gmra.mrb[10].mxu1 %vm929_vm1, %v366_v19 }
 0x1c5   : > { %1066 = vmatprep.mubr.f32.mxu1 %v12452_v36 }
 0x1c8   : > { %6037 = vmatmul.mubr.msk.f32.gmra.mrb[12].mxu1 %vm929_vm1, %v367_v20 }
 0x1c9   : > { %1072 = vmatprep.mubr.f32.mxu1 %v12452_v36 }
 0x1cc   : > { %6038 = vmatmul.mubr.msk.f32.gmra.mrb[14].mxu1 %vm929_vm1, %v368_v21 }
 0x1cd   : > { %1078 = vmatprep.mubr.f32.mxu1 %v12452_v36 }
 0x1d0   : > { %6039 = vmatmul.mubr.msk.f32.gmra.mrb[16].mxu1 %vm929_vm1, %v369_v22 }
 0x1d1   : > { %1084 = vmatprep.mubr.f32.mxu1 %v12452_v36 }
 0x1d4   : > { %6040 = vmatmul.mubr.msk.f32.gmra.mrb[18].mxu1 %vm929_vm1, %v370_v23 }
 0x1d5   : > { %1090 = vmatprep.mubr.f32.mxu1 %v12452_v36 }
 0x1d8   : > { %6041 = vmatmul.mubr.msk.f32.gmra.mrb[20].mxu1 %vm929_vm1, %v371_v24 }
 0x1d9   : > { %1096 = vmatprep.mubr.f32.mxu1 %v12452_v36 }
 0x1dc   : > { %6042 = vmatmul.mubr.msk.f32.gmra.mrb[22].mxu1 %vm929_vm1, %v372_v25 }
 0x1dd   : > { %1336 = vmatprep.mubr.f32.mxu1 %v12452_v36 }
 0x283   : > { %v1032_v26 = vpop.f32.mrb[0].mxu1 }
 0x284   : > { %v1034_v27 = vpop.f32.mrb[1].mxu1 }
 0x285   : > { %1272 = vmatprep.subr.mxu1 %v1034_v27 }
 0x286   : > { %1273 = vmatpush1.msra.mxu1 %v1032_v26 }
 0x287   : > { %v7711_v28 = vpop.f32.mrb[2].mxu1 }
 0x288   : > { %12765 = vst [vmem:[#allocation3_spill] sm:$0xff] %v7711_v28  ;;  %v7713_v29 = vpop.f32.mrb[3].mxu1 }
 0x289   : > { %12766 = vst [vmem:[#allocation4_spill] sm:$0xff] %v7713_v29 }
 0x28b   : > { %v7715_v30 = vpop.f32.mrb[4].mxu1 }
 0x28c   : > { %12767 = vst [vmem:[#allocation5_spill] sm:$0xff] %v7715_v30  ;;  %v7717_v31 = vpop.f32.mrb[5].mxu1 }
 0x28d   : > { %12768 = vst [vmem:[#allocation6_spill] sm:$0xff] %v7717_v31 }
 0x28f   : > { %v7719_v32 = vpop.f32.mrb[6].mxu1 }
 0x290   : > { %12769 = vst [vmem:[#allocation7_spill] sm:$0xff] %v7719_v32  ;;  %v7721_v33 = vpop.f32.mrb[7].mxu1 }
 0x291   : > { %12770 = vst [vmem:[#allocation8_spill] sm:$0xff] %v7721_v33 }
 0x293   : > { %v1056_v37 = vpop.f32.mrb[8].mxu1 }
 0x294   : > { %v1103_v38 = vadd.f32 %v1056_v37, %v373_v34  ;;  %v1058_v39 = vpop.f32.mrb[9].mxu1 }
 0x295   : > { %v1104_v40 = vadd.f32 %v1058_v39, %v374_v35 }
 0x296   : > { %1111 = vxpose.xlu0.b32.start.end [1/1] (short) %v1103_v38, 128 }
 0x297   : > { %1143 = vxpose.xlu1.b32.start.end [1/1] (short) %v1104_v40, 128  ;;  %v1062_v41 = vpop.f32.mrb[10].mxu1 }
 0x298   : > { %v1064_v42 = vpop.f32.mrb[11].mxu1  ;;  %v1105_v50 = vadd.f32 %v1062_v41, %v375_v49 }
 0x299   : > { %v1106_v53 = vadd.f32 %v1064_v42, %v376_v52  ;;  %v379_v52 = vld [vmem:[%s12447_s5 + $0x30] sm:$0xff] }
 0x29b   : > { %v1068_v43 = vpop.f32.mrb[12].mxu1 }
 0x29c   : > { %v1070_v44 = vpop.f32.mrb[13].mxu1  ;;  %v1107_v5 = vadd.f32 %v1068_v43, %v377_v0 }
 0x29d   : > { %v1108_v7 = vadd.f32 %v1070_v44, %v378_v4 }
 0x29f   : > { %v7729_v45 = vpop.f32.mrb[14].mxu1 }
 0x2a0   : > { %v7731_v46 = vpop.f32.mrb[15].mxu1 }
 0x2a3   : > { %v1080_v47 = vpop.f32.mrb[16].mxu1 }
 0x2a4   : > { %v1082_v48 = vpop.f32.mrb[17].mxu1 }
 0x2a5   : > { %1991 = vmatprep.subr.mxu0 %v1082_v48 }
 0x2a6   : > { %1992 = vmatpush1.msra.mxu0 %v1080_v47 }
 0x2a7   : > { %2393 = vmatprep.subr.mxu0 %v7713_v29  ;;  %v7811_v25 = vpop.f32.mrb[18].mxu1 }
 0x2a8   : > { %12771 = vst [vmem:[#allocation9_spill] sm:$0xff] %v7811_v25  ;;  %v7814_v26 = vpop.f32.mrb[19].mxu1 }
 0x2a9   : > { %12772 = vst [vmem:[#allocation10_spill] sm:$0xff] %v7814_v26 }
 0x2ab   : > { %v7819_v35 = vpop.f32.mrb[20].mxu1 }
 0x2ac   : > { %12773 = vst [vmem:[#allocation11_spill] sm:$0xff] %v7819_v35  ;;  %v7822_v37 = vpop.f32.mrb[21].mxu1 }
 0x2ad   : > { %12774 = vst [vmem:[#allocation12_spill] sm:$0xff] %v7822_v37 }
 0x2af   : > { %v7827_v40 = vpop.f32.mrb[22].mxu1 }
 0x2b0   : > { %12775 = vst [vmem:[#allocation13_spill] sm:$0xff] %v7827_v40 }
 0x2d3   : > { %1935 = vxpose.xlu0.b32.start.end [1/1] (short) (narrow) %v381_v51, 64 }
 0x2d4   : > { %2233 = vxpose.xlu1.b32.start.end [1/1] (short) %v1105_v50, 128  ;;  %v7847_v50 = vpop.f32.mrb[23].mxu1 }
 0x2d5   : > { %12776 = vst [vmem:[#allocation14_spill] sm:$0xff] %v7847_v50 }
 0x2f0   : > { %2265 = vxpose.xlu0.b32.start.end [1/1] (short) %v1106_v53, 128  ;;  %v383_v53 = vld [vmem:[%s12448_s6 + $0x10] sm:$0xff] }
 0x311   : > { %3056 = vxpose.xlu1.b32.start.end [1/1] (short) (narrow) %v382_v54, 64 }
 0x316   : > { %v1127_v55 = vpop.trf.xlu0 }
 0x317   : > { %6043 = vmatmul.mubr.msk.f32.vlgmr.msra.gmra.mrb[24].mxu1 %vm1175_vm2, %v1127_v55  ;;  %v7747_v56 = vpop.trf.xlu1  ;;  %v1109_v55 = vadd.f32 %v7729_v45, %v379_v52  ;;  %v394_v52 = vld [vmem:[%s12450_s8 + $0x8] sm:$0xff] }
 0x318   : > { %1342 = vmatprep.mubr.f32.mxu1 %v12452_v36 }
 0x31a   : > { %v1128_v57 = vpop.trf.xlu0 }
 0x31b   : > { %6044 = vmatmul.mubr.msk.f32.gmra.mrb[26].mxu1 %vm1175_vm2, %v1128_v57  ;;  %v7751_v58 = vpop.trf.xlu1 }
 0x31c   : > { %1348 = vmatprep.mubr.f32.mxu1 %v12452_v36 }
 0x31e   : > { %v1129_v59 = vpop.trf.xlu0 }
 0x31f   : > { %6045 = vmatmul.mubr.msk.f32.gmra.mrb[28].mxu1 %vm1175_vm2, %v1129_v59  ;;  %v7755_v60 = vpop.trf.xlu1 }
 0x320   : > { %1354 = vmatprep.mubr.f32.mxu1 %v12452_v36 }
 0x322   : > { %v1130_v61 = vpop.trf.xlu0 }
 0x323   : > { %6046 = vmatmul.mubr.msk.f32.gmra.mrb[30].mxu1 %vm1175_vm2, %v1130_v61  ;;  %v7759_v62 = vpop.trf.xlu1 }
 0x324   : > { %1360 = vmatprep.mubr.f32.mxu1 %v12452_v36 }
 0x326   : > { %v1131_v63 = vpop.trf.xlu0 }
 0x327   : > { %6047 = vmatmul.mubr.msk.f32.gmra.mrb[32].mxu1 %vm1175_vm2, %v1131_v63  ;;  %v7766_v2 = vpop.trf.xlu1 }
 0x328   : > { %1366 = vmatprep.mubr.f32.mxu1 %v12452_v36 }
 0x32a   : > { %v1132_v6 = vpop.trf.xlu0 }
 0x32b   : > { %6048 = vmatmul.mubr.msk.f32.gmra.mrb[34].mxu1 %vm1175_vm2, %v1132_v6  ;;  %v7773_v8 = vpop.trf.xlu1 }
 0x32c   : > { %1372 = vmatprep.mubr.f32.mxu1 %v12452_v36 }
 0x32e   : > { %v1133_v9 = vpop.trf.xlu0  ;;  %3386 = vxpose.xlu0.b32.start.end [1/1] (short) %v1107_v5, 128 }
 0x32f   : > { %6049 = vmatmul.mubr.msk.f32.gmra.mrb[36].mxu1 %vm1175_vm2, %v1133_v9  ;;  %v7777_v10 = vpop.trf.xlu1  ;;  %3418 = vxpose.xlu1.b32.start.end [1/1] (short) %v1108_v7, 128 }
 0x330   : > { %1378 = vmatprep.mubr.f32.mxu1 %v12452_v36 }
 0x332   : > { %v1134_v12 = vpop.trf.xlu0 }
 0x333   : > { %6050 = vmatmul.mubr.msk.f32.gmra.mrb[38].mxu1 %vm1175_vm2, %v1134_v12  ;;  %v7781_v13 = vpop.trf.xlu1 }
 0x334   : > { %1384 = vmatprep.mubr.f32.mxu1 %v12452_v36 }
 0x336   : > { %v1135_v1 = vpop.trf.xlu0 }
 0x337   : > { %6051 = vmatmul.mubr.msk.f32.gmra.mrb[40].mxu1 %vm1175_vm2, %v1135_v1  ;;  %v7785_v15 = vpop.trf.xlu1 }
 0x338   : > { %1390 = vmatprep.mubr.f32.mxu1 %v12452_v36 }
 0x33a   : > { %v1136_v11 = vpop.trf.xlu0 }
 0x33b   : > { %6052 = vmatmul.mubr.msk.f32.gmra.mrb[42].mxu1 %vm1175_vm2, %v1136_v11  ;;  %v7789_v3 = vpop.trf.xlu1 }
 0x33c   : > { %1396 = vmatprep.mubr.f32.mxu1 %v12452_v36 }
 0x33e   : > { %v1137_v14 = vpop.trf.xlu0 }
 0x33f   : > { %6053 = vmatmul.mubr.msk.f32.gmra.mrb[44].mxu1 %vm1175_vm2, %v1137_v14  ;;  %v7793_v16 = vpop.trf.xlu1 }
 0x340   : > { %1402 = vmatprep.mubr.f32.mxu1 %v12452_v36 }
 0x342   : > { %v1138_v17 = vpop.trf.xlu0 }
 0x343   : > { %6054 = vmatmul.mubr.msk.f32.gmra.mrb[46].mxu1 %vm1175_vm2, %v1138_v17  ;;  %v7797_v18 = vpop.trf.xlu1 }
 0x344   : > { %1408 = vmatprep.mubr.f32.mxu1 %v12452_v36 }
 0x346   : > { %v1139_v19 = vpop.trf.xlu0 }
 0x347   : > { %6055 = vmatmul.mubr.msk.f32.gmra.mrb[48].mxu1 %vm1175_vm2, %v1139_v19  ;;  %v7801_v20 = vpop.trf.xlu1 }
 0x348   : > { %1414 = vmatprep.mubr.f32.mxu1 %v12452_v36 }
 0x34a   : > { %v1140_v21 = vpop.trf.xlu0 }
 0x34b   : > { %6056 = vmatmul.mubr.msk.f32.gmra.mrb[50].mxu1 %vm1175_vm2, %v1140_v21  ;;  %v7805_v22 = vpop.trf.xlu1 }
 0x34c   : > { %1420 = vmatprep.mubr.f32.mxu1 %v12452_v36 }
 0x34e   : > { %v1141_v23 = vpop.trf.xlu0 }
 0x34f   : > { %6057 = vmatmul.mubr.msk.f32.gmra.mrb[52].mxu1 %vm1175_vm2, %v1141_v23  ;;  %v7809_v24 = vpop.trf.xlu1 }
 0x350   : > { %1426 = vmatprep.mubr.f32.mxu1 %v12452_v36 }
 0x352   : > { %v1142_v27 = vpop.trf.xlu0 }
 0x353   : > { %6058 = vmatmul.mubr.msk.f32.gmra.mrb[54].mxu1 %vm1175_vm2, %v1142_v27  ;;  %v7817_v34 = vpop.trf.xlu1 }
 0x354   : > { %1432 = vmatprep.mubr.f32.mxu1 %v12452_v36 }
 0x356   : > { %v1951_v38 = vpop.trf.xlu0 }
 0x357   : > { %6059 = vmatmul.mubr.msk.f32.gmra.mrb[56].mxu1 %vm1175_vm2, %v7747_v56  ;;  %v2249_v39 = vpop.trf.xlu1  ;;  %6075 = vmatmul.mubr.msk.f32.vlgmr.msra.gmra.mrb[8].mxu0 %vm1175_vm2, %v1951_v38  ;;  %v390_v38 = vld [vmem:[%s12449_s7 + $0x28] sm:$0xff] }
 0x358   : > { %2394 = vmatpush1.msra.mxu0 %v7711_v28  ;;  %1438 = vmatprep.mubr.f32.mxu1 %v12452_v36 }
 0x359   : > { %2061 = vmatprep.mubr.f32.mxu0 %v12452_v36 }
 0x35a   : > { %v1952_v41 = vpop.trf.xlu0 }
 0x35b   : > { %6060 = vmatmul.mubr.msk.f32.gmra.mrb[58].mxu1 %vm1175_vm2, %v7751_v58  ;;  %v2250_v42 = vpop.trf.xlu1  ;;  %6076 = vmatmul.mubr.msk.f32.gmra.mrb[10].mxu0 %vm1175_vm2, %v1952_v41 }
 0x35c   : > { %1444 = vmatprep.mubr.f32.mxu1 %v12452_v36  ;;  %2067 = vmatprep.mubr.f32.mxu0 %v12452_v36 }
 0x35e   : > { %v1953_v43 = vpop.trf.xlu0 }
 0x35f   : > { %6061 = vmatmul.mubr.msk.f32.gmra.mrb[60].mxu1 %vm1175_vm2, %v7755_v60  ;;  %v2251_v44 = vpop.trf.xlu1  ;;  %6077 = vmatmul.mubr.msk.f32.gmra.mrb[12].mxu0 %vm1175_vm2, %v1953_v43  ;;  %v392_v43 = vld [vmem:[%s12449_s7 + $0x38] sm:$0xff] }
 0x360   : > { %1450 = vmatprep.mubr.f32.mxu1 %v12452_v36  ;;  %2073 = vmatprep.mubr.f32.mxu0 %v12452_v36 }
 0x362   : > { %v1954_v47 = vpop.trf.xlu0 }
 0x363   : > { %6062 = vmatmul.mubr.msk.f32.gmra.mrb[62].mxu1 %vm1175_vm2, %v7759_v62  ;;  %v2252_v48 = vpop.trf.xlu1  ;;  %6078 = vmatmul.mubr.msk.f32.gmra.mrb[14].mxu0 %vm1175_vm2, %v1954_v47  ;;  %v385_v47 = vld [vmem:[%s12449_s7] sm:$0xff] }
 0x364   : > { %1456 = vmatprep.mubr.f32.mxu1 %v12452_v36  ;;  %2079 = vmatprep.mubr.f32.mxu0 %v12452_v36 }
 0x366   : > { %v1955_v49 = vpop.trf.xlu0 }
 0x367   : > { %6063 = vmatmul.mubr.msk.f32.gmra.mrb[64].mxu1 %vm1175_vm2, %v7766_v2  ;;  %v2253_v51 = vpop.trf.xlu1  ;;  %6079 = vmatmul.mubr.msk.f32.gmra.mrb[16].mxu0 %vm1175_vm2, %v1955_v49  ;;  %v380_v2 = vld [vmem:[%s12447_s5 + $0x38] sm:$0xff] }
 0x368   : > { %1462 = vmatprep.mubr.f32.mxu1 %v12452_v36  ;;  %2085 = vmatprep.mubr.f32.mxu0 %v12452_v36  ;;  %v1110_v5 = vadd.f32 %v7731_v46, %v380_v2 }
 0x36a   : > { %v1956_v54 = vpop.trf.xlu0 }
 0x36b   : > { %6064 = vmatmul.mubr.msk.f32.gmra.mrb[66].mxu1 %vm1175_vm2, %v7773_v8  ;;  %v2254_v56 = vpop.trf.xlu1  ;;  %4209 = vxpose.xlu0.b32.start.end [1/1] (short) (narrow) %v383_v53, 64 }
 0x36c   : > { %1468 = vmatprep.mubr.f32.mxu1 %v12452_v36  ;;  %6080 = vmatmul.mubr.msk.f32.gmra.mrb[18].mxu0 %vm1175_vm2, %v1956_v54  ;;  %v387_v54 = vld [vmem:[%s12449_s7 + $0x10] sm:$0xff] }
 0x36d   : > { %2091 = vmatprep.mubr.f32.mxu0 %v12452_v36 }
 0x36e   : > { %v1957_v57 = vpop.trf.xlu0 }
 0x36f   : > { %6065 = vmatmul.mubr.msk.f32.gmra.mrb[68].mxu1 %vm1175_vm2, %v7777_v10  ;;  %v2255_v58 = vpop.trf.xlu1  ;;  %4539 = vxpose.xlu1.b32.start.end [1/1] (short) %v1109_v55, 128 }
 0x370   : > { %1474 = vmatprep.mubr.f32.mxu1 %v12452_v36  ;;  %6081 = vmatmul.mubr.msk.f32.gmra.mrb[20].mxu0 %vm1175_vm2, %v1957_v57 }
 0x371   : > { %2097 = vmatprep.mubr.f32.mxu0 %v12452_v36 }
 0x372   : > { %v1958_v45 = vpop.trf.xlu0 }
 0x373   : > { %6066 = vmatmul.mubr.msk.f32.gmra.mrb[70].mxu1 %vm1175_vm2, %v7781_v13  ;;  %v2256_v62 = vpop.trf.xlu1  ;;  %v384_v13 = vld [vmem:[%s12448_s6 + $0x18] sm:$0xff] }
 0x374   : > { %1480 = vmatprep.mubr.f32.mxu1 %v12452_v36  ;;  %6082 = vmatmul.mubr.msk.f32.gmra.mrb[22].mxu0 %vm1175_vm2, %v1958_v45  ;;  %v396_v45 = vld [vmem:[%s12450_s8 + $0x18] sm:$0xff] }
 0x375   : > { %2457 = vmatprep.mubr.f32.mxu0 %v12452_v36 }
 0x376   : > { %v7876_v59 = vpop.trf.xlu0 }
 0x377   : > { %6067 = vmatmul.mubr.msk.f32.gmra.mrb[72].mxu1 %vm1175_vm2, %v7785_v15  ;;  %v2257_v4 = vpop.trf.xlu1 }
 0x378   : > { %1486 = vmatprep.mubr.f32.mxu1 %v12452_v36  ;;  %6083 = vmatmul.mubr.msk.f32.vlgmr.msra.gmra.mrb[24].mxu0 %vm1175_vm2, %v2249_v39 }
 0x379   : > { %2463 = vmatprep.mubr.f32.mxu0 %v12452_v36 }
 0x37a   : > { %v7883_v60 = vpop.trf.xlu0 }
 0x37b   : > { %6068 = vmatmul.mubr.msk.f32.gmra.mrb[74].mxu1 %vm1175_vm2, %v7789_v3  ;;  %v2258_v7 = vpop.trf.xlu1 }
 0x37c   : > { %1492 = vmatprep.mubr.f32.mxu1 %v12452_v36  ;;  %6084 = vmatmul.mubr.msk.f32.gmra.mrb[26].mxu0 %vm1175_vm2, %v2250_v42 }
 0x37d   : > { %2469 = vmatprep.mubr.f32.mxu0 %v12452_v36 }
 0x37e   : > { %v2283_v61 = vpop.trf.xlu0 }
 0x37f   : > { %6069 = vmatmul.mubr.msk.f32.gmra.mrb[76].mxu1 %vm1175_vm2, %v7793_v16  ;;  %v2259_v46 = vpop.trf.xlu1 }
 0x380   : > { %1498 = vmatprep.mubr.f32.mxu1 %v12452_v36  ;;  %6085 = vmatmul.mubr.msk.f32.gmra.mrb[28].mxu0 %vm1175_vm2, %v2251_v44 }
 0x381   : > { %2475 = vmatprep.mubr.f32.mxu0 %v12452_v36 }
 0x382   : > { %v2284_v63 = vpop.trf.xlu0 }
 0x383   : > { %6070 = vmatmul.mubr.msk.f32.gmra.mrb[78].mxu1 %vm1175_vm2, %v7797_v18  ;;  %v2260_v9 = vpop.trf.xlu1 }
 0x384   : > { %1504 = vmatprep.mubr.f32.mxu1 %v12452_v36  ;;  %6086 = vmatmul.mubr.msk.f32.gmra.mrb[30].mxu0 %vm1175_vm2, %v2252_v48 }
 0x385   : > { %2481 = vmatprep.mubr.f32.mxu0 %v12452_v36 }
 0x386   : > { %v2285_v0 = vpop.trf.xlu0 }
 0x387   : > { %6071 = vmatmul.mubr.msk.f32.gmra.mrb[80].mxu1 %vm1175_vm2, %v7801_v20  ;;  %v2261_v10 = vpop.trf.xlu1  ;;  %v386_v20 = vld [vmem:[%s12449_s7 + $0x8] sm:$0xff] }
 0x388   : > { %1510 = vmatprep.mubr.f32.mxu1 %v12452_v36  ;;  %6087 = vmatmul.mubr.msk.f32.gmra.mrb[32].mxu0 %vm1175_vm2, %v2253_v51 }
 0x389   : > { %2487 = vmatprep.mubr.f32.mxu0 %v12452_v36 }
 0x38a   : > { %v2286_v6 = vpop.trf.xlu0 }
 0x38b   : > { %6072 = vmatmul.mubr.msk.f32.gmra.mrb[82].mxu1 %vm1175_vm2, %v7805_v22  ;;  %v2262_v12 = vpop.trf.xlu1  ;;  %v388_v22 = vld [vmem:[%s12449_s7 + $0x18] sm:$0xff] }
 0x38c   : > { %1516 = vmatprep.mubr.f32.mxu1 %v12452_v36  ;;  %6088 = vmatmul.mubr.msk.f32.gmra.mrb[34].mxu0 %vm1175_vm2, %v2254_v56 }
 0x38d   : > { %2493 = vmatprep.mubr.f32.mxu0 %v12452_v36 }
 0x38e   : > { %v2287_v8 = vpop.trf.xlu0  ;;  %4571 = vxpose.xlu0.b32.start.end [1/1] (short) %v1110_v5, 128  ;;  %v391_v5 = vld [vmem:[%s12449_s7 + $0x30] sm:$0xff] }
 0x38f   : > { %6073 = vmatmul.mubr.msk.f32.gmra.mrb[84].mxu1 %vm1175_vm2, %v7809_v24  ;;  %v2263_v1 = vpop.trf.xlu1 }
 0x390   : > { %1522 = vmatprep.mubr.f32.mxu1 %v12452_v36  ;;  %6089 = vmatmul.mubr.msk.f32.gmra.mrb[36].mxu0 %vm1175_vm2, %v2255_v58 }
 0x391   : > { %2499 = vmatprep.mubr.f32.mxu0 %v12452_v36 }
 0x392   : > { %v2288_v11 = vpop.trf.xlu0 }
 0x393   : > { %6074 = vmatmul.mubr.msk.f32.gmra.mrb[86].mxu1 %vm1175_vm2, %v7817_v34  ;;  %v2264_v15 = vpop.trf.xlu1 }
 0x394   : > { %6090 = vmatmul.mubr.msk.f32.gmra.mrb[38].mxu0 %vm1175_vm2, %v2256_v62 }
 0x395   : > { %2505 = vmatprep.mubr.f32.mxu0 %v12452_v36 }
 0x396   : > { %v2289_v3 = vpop.trf.xlu0 }
 0x397   : > { %v7964_v18 = vpop.trf.xlu1 }
 0x398   : > { %6091 = vmatmul.mubr.msk.f32.gmra.mrb[40].mxu0 %vm1175_vm2, %v2257_v4  ;;  %12777 = vst [vmem:[#allocation15_spill] sm:$0xff] %v7964_v18 }
 0x399   : > { %2511 = vmatprep.mubr.f32.mxu0 %v12452_v36 }
 0x39a   : > { %v2290_v14 = vpop.trf.xlu0 }
 0x39b   : > { %v7971_v21 = vpop.trf.xlu1 }
 0x39c   : > { %6092 = vmatmul.mubr.msk.f32.gmra.mrb[42].mxu0 %vm1175_vm2, %v2258_v7  ;;  %12778 = vst [vmem:[#allocation16_spill] sm:$0xff] %v7971_v21 }
 0x39d   : > { %2517 = vmatprep.mubr.f32.mxu0 %v12452_v36 }
 0x39e   : > { %v2291_v16 = vpop.trf.xlu0 }
 0x39f   : > { %v7980_v24 = vpop.trf.xlu1 }
 0x3a0   : > { %6093 = vmatmul.mubr.msk.f32.gmra.mrb[44].mxu0 %vm1175_vm2, %v2259_v46  ;;  %12779 = vst [vmem:[#allocation17_spill] sm:$0xff] %v7980_v24  ;;  %v400_v46 = vld [vmem:[%s12450_s8 + $0x38] sm:$0xff] }
 0x3a1   : > { %2523 = vmatprep.mubr.f32.mxu0 %v12452_v36 }
 0x3a2   : > { %v2292_v17 = vpop.trf.xlu0 }
 0x3a3   : > { %v7998_v44 = vpop.trf.xlu1 }
 0x3a4   : > { %6094 = vmatmul.mubr.msk.f32.gmra.mrb[46].mxu0 %vm1175_vm2, %v2260_v9  ;;  %12780 = vst [vmem:[#allocation18_spill] sm:$0xff] %v7998_v44 }
 0x3a5   : > { %2529 = vmatprep.mubr.f32.mxu0 %v12452_v36 }
 0x3a6   : > { %v2293_v19 = vpop.trf.xlu0 }
 0x3a7   : > { %v8018_v55 = vpop.trf.xlu1 }
 0x3a8   : > { %6095 = vmatmul.mubr.msk.f32.gmra.mrb[48].mxu0 %vm1175_vm2, %v2261_v10  ;;  %12781 = vst [vmem:[#allocation19_spill] sm:$0xff] %v8018_v55  ;;  %v393_v10 = vld [vmem:[%s12450_s8] sm:$0xff] }
 0x3a9   : > { %2535 = vmatprep.mubr.f32.mxu0 %v12452_v36 }
 0x3aa   : > { %v2294_v23 = vpop.trf.xlu0 }
 0x3ab   : > { %v8042_v2 = vpop.trf.xlu1 }
 0x3ac   : > { %5362 = vxpose.xlu1.b32.start.end [1/1] (short) (narrow) %v384_v13, 64  ;;  %6096 = vmatmul.mubr.msk.f32.gmra.mrb[50].mxu0 %vm1175_vm2, %v2262_v12  ;;  %12782 = vst [vmem:[#allocation20_spill] sm:$0xff] %v8042_v2 }
 0x3ad   : > { %2541 = vmatprep.mubr.f32.mxu0 %v12452_v36 }
 0x3ae   : > { %v2295_v41 = vpop.trf.xlu0 }
 0x3af   : > { %v8060_v12 = vpop.trf.xlu1 }
 0x3b0   : > { %6097 = vmatmul.mubr.msk.f32.gmra.mrb[52].mxu0 %vm1175_vm2, %v2263_v1  ;;  %12783 = vst [vmem:[#allocation21_spill] sm:$0xff] %v8060_v12 }
 0x3b1   : > { %2547 = vmatprep.mubr.f32.mxu0 %v12452_v36 }
 0x3b4   : > { %6098 = vmatmul.mubr.msk.f32.gmra.mrb[54].mxu0 %vm1175_vm2, %v2264_v15 }
 0x3b5   : > { %2553 = vmatprep.mubr.f32.mxu0 %v12452_v36 }
 0x3b8   : > { %6099 = vmatmul.mubr.msk.f32.gmra.mrb[56].mxu0 %vm1175_vm2, %v7876_v59 }
 0x3b9   : > { %2559 = vmatprep.mubr.f32.mxu0 %v12452_v36 }
 0x3bc   : > { %6100 = vmatmul.mubr.msk.f32.gmra.mrb[58].mxu0 %vm1175_vm2, %v7883_v60  ;;  %v389_v60 = vld [vmem:[%s12449_s7 + $0x20] sm:$0xff] }
 0x3bd   : > { %2565 = vmatprep.mubr.f32.mxu0 %v12452_v36 }
 0x3c0   : > { %6101 = vmatmul.mubr.msk.f32.gmra.mrb[60].mxu0 %vm1175_vm2, %v2283_v61 }
 0x3c1   : > { %2571 = vmatprep.mubr.f32.mxu0 %v12452_v36 }
 0x3c4   : > { %6102 = vmatmul.mubr.msk.f32.gmra.mrb[62].mxu0 %vm1175_vm2, %v2284_v63 }
 0x3c5   : > { %2577 = vmatprep.mubr.f32.mxu0 %v12452_v36 }
 0x3c8   : > { %6103 = vmatmul.mubr.msk.f32.gmra.mrb[64].mxu0 %vm1175_vm2, %v2285_v0  ;;  %v398_v0 = vld [vmem:[%s12450_s8 + $0x28] sm:$0xff] }
 0x3c9   : > { %2583 = vmatprep.mubr.f32.mxu0 %v12452_v36 }
 0x3cc   : > { %6104 = vmatmul.mubr.msk.f32.gmra.mrb[66].mxu0 %vm1175_vm2, %v2286_v6 }
 0x3cd   : > { %2589 = vmatprep.mubr.f32.mxu0 %v12452_v36 }
 0x3d0   : > { %6105 = vmatmul.mubr.msk.f32.gmra.mrb[68].mxu0 %vm1175_vm2, %v2287_v8 }
 0x3d1   : > { %2595 = vmatprep.mubr.f32.mxu0 %v12452_v36 }
 0x3d4   : > { %6106 = vmatmul.mubr.msk.f32.gmra.mrb[70].mxu0 %vm1175_vm2, %v2288_v11 }
 0x3d5   : > { %2601 = vmatprep.mubr.f32.mxu0 %v12452_v36 }
 0x3d8   : > { %6107 = vmatmul.mubr.msk.f32.gmra.mrb[72].mxu0 %vm1175_vm2, %v2289_v3  ;;  %v395_v3 = vld [vmem:[%s12450_s8 + $0x10] sm:$0xff] }
 0x3d9   : > { %2607 = vmatprep.mubr.f32.mxu0 %v12452_v36 }
 0x3dc   : > { %6108 = vmatmul.mubr.msk.f32.gmra.mrb[74].mxu0 %vm1175_vm2, %v2290_v14 }
 0x3dd   : > { %2613 = vmatprep.mubr.f32.mxu0 %v12452_v36 }
 0x3e0   : > { %6109 = vmatmul.mubr.msk.f32.gmra.mrb[76].mxu0 %vm1175_vm2, %v2291_v16 }
 0x3e1   : > { %2619 = vmatprep.mubr.f32.mxu0 %v12452_v36 }
 0x3e4   : > { %6110 = vmatmul.mubr.msk.f32.gmra.mrb[78].mxu0 %vm1175_vm2, %v2292_v17 }
 0x3e5   : > { %2625 = vmatprep.mubr.f32.mxu0 %v12452_v36 }
 0x3e6   : > { %5715 = vperm.xlu1 %6692, %v386_v20   ;;  %v397_v20 = vld [vmem:[%s12450_s8 + $0x20] sm:$0xff] }
 0x3e8   : > { %6111 = vmatmul.mubr.msk.f32.gmra.mrb[80].mxu0 %vm1175_vm2, %v2293_v19 }
 0x3e9   : > { %2631 = vmatprep.mubr.f32.mxu0 %v12452_v36 }
 0x3ea   : > { %5725 = vperm.xlu1 %6692, %v388_v22   ;;  %v7982_v27 = vpop.f32.mrb[24].mxu1 }
 0x3eb   : > { %v7984_v34 = vpop.f32.mrb[25].mxu1 }
 0x3ec   : > { %6112 = vmatmul.mubr.msk.f32.gmra.mrb[82].mxu0 %vm1175_vm2, %v2294_v23 }
 0x3ed   : > { %2637 = vmatprep.mubr.f32.mxu0 %v12452_v36 }
 0x3ee   : > { %5735 = vperm.xlu1 %6692, %v390_v38   ;;  %v7991_v39 = vpop.f32.mrb[26].mxu1 }
 0x3ef   : > { %v7993_v42 = vpop.f32.mrb[27].mxu1 }
 0x3f0   : > { %6113 = vmatmul.mubr.msk.f32.gmra.mrb[84].mxu0 %vm1175_vm2, %v2295_v41 }
 0x3f2   : > { %5745 = vperm.xlu1 %6692, %v392_v43   ;;  %v8004_v48 = vpop.f32.mrb[28].mxu1  ;;  %v399_v43 = vld [vmem:[%s12450_s8 + $0x30] sm:$0xff] }
 0x3f3   : > { %v1529_v49 = vmax.f32 %v7982_v27, %v8004_v48  ;;  %5710 = vperm.xlu0 %6691, %v385_v47   ;;  %v8008_v51 = vpop.f32.mrb[29].mxu1 }
 0x3f4   : > { %v1566_v53 = vmax.f32 %v7984_v34, %v8008_v51 }
 0x3f6   : > { %5771 = vperm.xlu1 %6692, %v394_v52   ;;  %v8020_v56 = vpop.f32.mrb[30].mxu1 }
 0x3f7   : > { %v1530_v57 = vmax.f32 %v7991_v39, %v8020_v56  ;;  %5720 = vperm.xlu0 %6691, %v387_v54   ;;  %v8024_v58 = vpop.f32.mrb[31].mxu1 }
 0x3f8   : > { %v1567_v59 = vmax.f32 %v7993_v42, %v8024_v58 }
 0x3fa   : > { %5781 = vperm.xlu1 %6692, %v396_v45   ;;  %v8034_v61 = vpop.f32.mrb[32].mxu1 }
 0x3fb   : > { %v1531_v62 = vmax.f32 %v1529_v49, %v8034_v61  ;;  %5730 = vperm.xlu0 %6691, %v389_v60   ;;  %v8037_v63 = vpop.f32.mrb[33].mxu1 }
 0x3fc   : > { %v1568_v4 = vmax.f32 %v1566_v53, %v8037_v63 }
 0x3fe   : > { %5791 = vperm.xlu1 %6692, %v398_v0   ;;  %v8048_v6 = vpop.f32.mrb[34].mxu1 }
 0x3ff   : > { %v1532_v7 = vmax.f32 %v1530_v57, %v8048_v6  ;;  %5740 = vperm.xlu0 %6691, %v391_v5   ;;  %v8051_v8 = vpop.f32.mrb[35].mxu1 }
 0x400   : > { %v1569_v9 = vmax.f32 %v1567_v59, %v8051_v8 }
 0x402   : > { %5801 = vperm.xlu1 %6692, %v400_v46   ;;  %v8062_v13 = vpop.f32.mrb[36].mxu1 }
 0x403   : > { %v1533_v1 = vmax.f32 %v1531_v62, %v8062_v13  ;;  %5766 = vperm.xlu0 %6691, %v393_v10   ;;  %v8065_v15 = vpop.f32.mrb[37].mxu1 }
 0x404   : > { %v1570_v11 = vmax.f32 %v1568_v4, %v8065_v15 }
 0x406   : > { %v8071_v14 = vpop.f32.mrb[38].mxu1 }
 0x407   : > { %v1534_v16 = vmax.f32 %v1532_v7, %v8071_v14  ;;  %5776 = vperm.xlu0 %6691, %v395_v3   ;;  %v8074_v17 = vpop.f32.mrb[39].mxu1 }
 0x408   : > { %v1571_v19 = vmax.f32 %v1569_v9, %v8074_v17 }
 0x40a   : > { %v8080_v22 = vpop.f32.mrb[40].mxu1 }
 0x40b   : > { %v1535_v23 = vmax.f32 %v1533_v1, %v8080_v22  ;;  %5786 = vperm.xlu0 %6691, %v397_v20   ;;  %v8083_v38 = vpop.f32.mrb[41].mxu1 }
 0x40c   : > { %v1572_v41 = vmax.f32 %v1570_v11, %v8083_v38 }
 0x40e   : > { %v8089_v47 = vpop.f32.mrb[42].mxu1 }
 0x40f   : > { %v1536_v49 = vmax.f32 %v1534_v16, %v8089_v47  ;;  %5796 = vperm.xlu0 %6691, %v399_v43   ;;  %v8092_v52 = vpop.f32.mrb[43].mxu1 }
 0x410   : > { %v1573_v53 = vmax.f32 %v1571_v19, %v8092_v52 }
 0x412   : > { %v8095_v54 = vpop.f32.mrb[44].mxu1 }
 0x413   : > { %v1537_v57 = vmax.f32 %v1535_v23, %v8095_v54  ;;  %v8098_v45 = vpop.f32.mrb[45].mxu1 }
 0x414   : > { %v1574_v59 = vmax.f32 %v1572_v41, %v8098_v45 }
 0x416   : > { %v8101_v60 = vpop.f32.mrb[46].mxu1 }
 0x417   : > { %v1538_v62 = vmax.f32 %v1536_v49, %v8101_v60  ;;  %v8104_v0 = vpop.f32.mrb[47].mxu1 }
 0x418   : > { %12784 = vst [vmem:[#allocation22_spill] sm:$0xff] %v8104_v0  ;;  %v1575_v4 = vmax.f32 %v1573_v53, %v8104_v0 }
 0x41a   : > { %v8107_v5 = vpop.f32.mrb[48].mxu1 }
 0x41b   : > { %v1539_v7 = vmax.f32 %v1537_v57, %v8107_v5  ;;  %v8110_v46 = vpop.f32.mrb[49].mxu1 }
 0x41c   : > { %12785 = vst [vmem:[#allocation23_spill] sm:$0xff] %v8110_v46  ;;  %v1576_v9 = vmax.f32 %v1574_v59, %v8110_v46 }
 0x41e   : > { %v8113_v10 = vpop.f32.mrb[50].mxu1 }
 0x41f   : > { %v1540_v1 = vmax.f32 %v1538_v62, %v8113_v10  ;;  %v8116_v11 = vpop.f32.mrb[51].mxu1 }
 0x420   : > { %12786 = vst [vmem:[#allocation24_spill] sm:$0xff] %v8116_v11  ;;  %v1577_v3 = vmax.f32 %v1575_v4, %v8116_v11 }
 0x422   : > { %v8119_v16 = vpop.f32.mrb[52].mxu1 }
 0x423   : > { %v1541_v19 = vmax.f32 %v1539_v7, %v8119_v16  ;;  %v8122_v20 = vpop.f32.mrb[53].mxu1 }
 0x424   : > { %12787 = vst [vmem:[#allocation25_spill] sm:$0xff] %v8122_v20  ;;  %v1578_v23 = vmax.f32 %v1576_v9, %v8122_v20 }
 0x426   : > { %v8125_v41 = vpop.f32.mrb[54].mxu1 }
 0x427   : > { %v1542_v43 = vmax.f32 %v1540_v1, %v8125_v41  ;;  %v8128_v49 = vpop.f32.mrb[55].mxu1 }
 0x428   : > { %12788 = vst [vmem:[#allocation26_spill] sm:$0xff] %v8128_v49  ;;  %v1579_v53 = vmax.f32 %v1577_v3, %v8128_v49 }
 0x42a   : > { %v8131_v57 = vpop.f32.mrb[56].mxu1 }
 0x42b   : > { %v1543_v59 = vmax.f32 %v1541_v19, %v8131_v57  ;;  %v8134_v62 = vpop.f32.mrb[57].mxu1 }
 0x42c   : > { %12789 = vst [vmem:[#allocation27_spill] sm:$0xff] %v8134_v62  ;;  %v1580_v4 = vmax.f32 %v1578_v23, %v8134_v62 }
 0x42e   : > { %v8137_v7 = vpop.f32.mrb[58].mxu1 }
 0x42f   : > { %v1544_v9 = vmax.f32 %v1542_v43, %v8137_v7  ;;  %v8140_v36 = vpop.f32.mrb[59].mxu1 }
 0x430   : > { %12790 = vst [vmem:[#allocation28_spill] sm:$0xff] %v8140_v36  ;;  %v1581_v1 = vmax.f32 %v1579_v53, %v8140_v36 }
 0x432   : > { %v8143_v40 = vpop.f32.mrb[60].mxu1 }
 0x433   : > { %v1545_v3 = vmax.f32 %v1543_v59, %v8143_v40  ;;  %v8146_v50 = vpop.f32.mrb[61].mxu1 }
 0x434   : > { %12791 = vst [vmem:[#allocation29_spill] sm:$0xff] %v8146_v50  ;;  %v1582_v19 = vmax.f32 %v1580_v4, %v8146_v50 }
 0x436   : > { %v8149_v32 = vpop.f32.mrb[62].mxu1 }
 0x437   : > { %v1546_v23 = vmax.f32 %v1544_v9, %v8149_v32  ;;  %v8152_v33 = vpop.f32.mrb[63].mxu1 }
 0x438   : > { %12792 = vst [vmem:[#allocation30_spill] sm:$0xff] %v8152_v33  ;;  %v1583_v43 = vmax.f32 %v1581_v1, %v8152_v33 }
 0x43a   : > { %v8155_v35 = vpop.f32.mrb[64].mxu1 }
 0x43b   : > { %v1547_v53 = vmax.f32 %v1545_v3, %v8155_v35  ;;  %v8158_v37 = vpop.f32.mrb[65].mxu1 }
 0x43c   : > { %12793 = vst [vmem:[#allocation31_spill] sm:$0xff] %v8158_v37  ;;  %v1584_v59 = vmax.f32 %v1582_v19, %v8158_v37 }
 0x43e   : > { %v8161_v12 = vpop.f32.mrb[66].mxu1 }
 0x43f   : > { %v1548_v4 = vmax.f32 %v1546_v23, %v8161_v12  ;;  %v8164_v2 = vpop.f32.mrb[67].mxu1 }
 0x440   : > { %12794 = vst [vmem:[#allocation32_spill] sm:$0xff] %v8164_v2  ;;  %v1585_v9 = vmax.f32 %v1583_v43, %v8164_v2 }
 0x442   : > { %v8167_v55 = vpop.f32.mrb[68].mxu1 }
 0x443   : > { %v1549_v1 = vmax.f32 %v1547_v53, %v8167_v55  ;;  %v8170_v44 = vpop.f32.mrb[69].mxu1 }
 0x444   : > { %12795 = vst [vmem:[#allocation33_spill] sm:$0xff] %v8170_v44  ;;  %v1586_v3 = vmax.f32 %v1584_v59, %v8170_v44 }
 0x446   : > { %v8173_v24 = vpop.f32.mrb[70].mxu1 }
 0x447   : > { %v1550_v19 = vmax.f32 %v1548_v4, %v8173_v24  ;;  %v8176_v21 = vpop.f32.mrb[71].mxu1 }
 0x448   : > { %12796 = vst [vmem:[#allocation34_spill] sm:$0xff] %v8176_v21  ;;  %v1587_v23 = vmax.f32 %v1585_v9, %v8176_v21 }
 0x44a   : > { %v8179_v30 = vpop.f32.mrb[72].mxu1 }
 0x44b   : > { %v1551_v43 = vmax.f32 %v1549_v1, %v8179_v30  ;;  %v8182_v18 = vpop.f32.mrb[73].mxu1 }
 0x44c   : > { %12797 = vst [vmem:[#allocation35_spill] sm:$0xff] %v8182_v18  ;;  %v1588_v53 = vmax.f32 %v1586_v3, %v8182_v18 }
 0x44e   : > { %v8185_v31 = vpop.f32.mrb[74].mxu1 }
 0x44f   : > { %v1552_v59 = vmax.f32 %v1550_v19, %v8185_v31  ;;  %v8188_v25 = vpop.f32.mrb[75].mxu1 }
 0x450   : > { %12798 = vst [vmem:[#allocation36_spill] sm:$0xff] %v8188_v25  ;;  %v1589_v4 = vmax.f32 %v1587_v23, %v8188_v25 }
 0x452   : > { %v8191_v26 = vpop.f32.mrb[76].mxu1 }
 0x453   : > { %v1553_v9 = vmax.f32 %v1551_v43, %v8191_v26  ;;  %v8194_v28 = vpop.f32.mrb[77].mxu1 }
 0x454   : > { %12799 = vst [vmem:[#allocation37_spill] sm:$0xff] %v8194_v28  ;;  %v1590_v1 = vmax.f32 %v1588_v53, %v8194_v28 }
 0x456   : > { %v8197_v29 = vpop.f32.mrb[78].mxu1 }
 0x457   : > { %v1554_v3 = vmax.f32 %v1552_v59, %v8197_v29  ;;  %v8200_v18 = vpop.f32.mrb[79].mxu1 }
 0x458   : > { %12800 = vst [vmem:[#allocation38_spill] sm:$0xff] %v8200_v18  ;;  %v1591_v19 = vmax.f32 %v1589_v4, %v8200_v18 }
 0x45a   : > { %v8203_v21 = vpop.f32.mrb[80].mxu1 }
 0x45b   : > { %v1555_v23 = vmax.f32 %v1553_v9, %v8203_v21  ;;  %v8206_v25 = vpop.f32.mrb[81].mxu1 }
 0x45c   : > { %12801 = vst [vmem:[#allocation39_spill] sm:$0xff] %v8206_v25  ;;  %v1592_v43 = vmax.f32 %v1590_v1, %v8206_v25 }
 0x45e   : > { %v8209_v44 = vpop.f32.mrb[82].mxu1 }
 0x45f   : > { %v1556_v53 = vmax.f32 %v1554_v3, %v8209_v44  ;;  %v8212_v28 = vpop.f32.mrb[83].mxu1 }
 0x460   : > { %12802 = vst [vmem:[#allocation40_spill] sm:$0xff] %v8212_v28  ;;  %v1593_v59 = vmax.f32 %v1591_v19, %v8212_v28 }
 0x462   : > { %v8215_v2 = vpop.f32.mrb[84].mxu1 }
 0x463   : > { %v1557_v4 = vmax.f32 %v1555_v23, %v8215_v2  ;;  %v8218_v18 = vpop.f32.mrb[85].mxu1 }
 0x464   : > { %12803 = vst [vmem:[#allocation41_spill] sm:$0xff] %v8218_v18  ;;  %v1594_v9 = vmax.f32 %v1592_v43, %v8218_v18 }
 0x466   : > { %v8221_v37 = vpop.f32.mrb[86].mxu1 }
 0x467   : > { %v1558_v1 = vmax.f32 %v1556_v53, %v8221_v37  ;;  %v8224_v25 = vpop.f32.mrb[87].mxu1 }
 0x468   : > { %12804 = vst [vmem:[#allocation42_spill] sm:$0xff] %v8224_v25  ;;  %v1595_v3 = vmax.f32 %v1593_v59, %v8224_v25 }
 0x469   : > { %v1559_v33 = vmax.f32 %v1557_v4, %v1558_v1 }
 0x46a   : > { %v1596_v50 = vmax.f32 %v1594_v9, %v1595_v3 }
 0x46b   : > { %v1560_v36 = vrot.slane %v1559_v33, 4 }
 0x46c   : > { %v1597_v19 = vrot.slane %v1596_v50, 4 }
 0x46d   : > { %v1561_v28 = vmax.f32 %v1559_v33, %v1560_v36 }
 0x46e   : > { %v1598_v62 = vmax.f32 %v1596_v50, %v1597_v19 }
 0x46f   : > { %v1562_v49 = vrot.slane %v1561_v28, 2 }
 0x470   : > { %v1599_v23 = vrot.slane %v1598_v62, 2 }
 0x471   : > { %v1563_v20 = vmax.f32 %v1561_v28, %v1562_v49 }
 0x472   : > { %v1600_v11 = vmax.f32 %v1598_v62, %v1599_v23 }
 0x473   : > { %v1564_v46 = vrot.slane %v1563_v20, 1 }
 0x474   : > { %v1601_v43 = vrot.slane %v1600_v11, 1 }
 0x475   : > { %v8227_v18 = vmax.f32 %v1563_v20, %v1564_v46 }
 0x476   : > { %v8229_v0 = vmax.f32 %v1600_v11, %v1601_v43 }
 0x477   : > { %v1603_v53 = vsub.f32 %v7982_v27, %v8227_v18  ;;  %v1605_v59 = vsub.f32 %v7991_v39, %v8227_v18  ;;  %v1607_v36 = vsub.f32 %v8004_v48, %v8227_v18  ;;  %v1609_v33 = vsub.f32 %v8020_v56, %v8227_v18 }
 0x478   : > { %v1611_v28 = vsub.f32 %v8034_v61, %v8227_v18  ;;  %v1613_v50 = vsub.f32 %v8048_v6, %v8227_v18  ;;  %v1615_v46 = vsub.f32 %v8062_v13, %v8227_v18  ;;  %v1617_v27 = vsub.f32 %v8071_v14, %v8227_v18  ;;  %v12827_v13 = vld [vmem:[#allocation38_spill] sm:$0xff] }
 0x479   : > { %v1619_v39 = vsub.f32 %v8080_v22, %v8227_v18  ;;  %v1621_v48 = vsub.f32 %v8089_v47, %v8227_v18  ;;  %v1623_v56 = vsub.f32 %v8095_v54, %v8227_v18  ;;  %v1625_v61 = vsub.f32 %v8101_v60, %v8227_v18  ;;  %v12820_v54 = vld [vmem:[#allocation33_spill] sm:$0xff]  ;;  %v12823_v22 = vld [vmem:[#allocation35_spill] sm:$0xff] }
 0x47a   : > { %v1667_v62 = vmul.f32 1.442695, %v1603_v53  ;;  %v1671_v3 = vmul.f32 1.442695, %v1605_v59  ;;  %v1675_v49 = vmul.f32 1.442695, %v1607_v36  ;;  %v12832_v60 = vsub.f32 %v8119_v16, %v8227_v18 }
 0x47b   : > { %v1679_v43 = vmul.f32 1.442695, %v1609_v33  ;;  %v1683_v4 = vmul.f32 1.442695, %v1611_v28  ;;  %v1687_v20 = vmul.f32 1.442695, %v1613_v50  ;;  %v12835_v16 = vsub.f32 %v8137_v7, %v8227_v18 }
 0x47c   : > { %6725 = vpow2.f32 %v1667_v62  ;;  %v1691_v9 = vmul.f32 1.442695, %v1615_v46  ;;  %v1695_v11 = vmul.f32 1.442695, %v1617_v27  ;;  %v1699_v28 = vmul.f32 1.442695, %v1619_v39 }
 0x47d   : > { %6727 = vpow2.f32 %v1671_v3  ;;  %v12807_v39 = vld [vmem:[#allocation22_spill] sm:$0xff]  ;;  %v12808_v46 = vld [vmem:[#allocation23_spill] sm:$0xff]  ;;  %v12809_v27 = vld [vmem:[#allocation24_spill] sm:$0xff]  ;;  %v1707_v53 = vmul.f32 1.442695, %v1623_v56 }
 0x47e   : > { %6729 = vpow2.f32 %v1675_v49  ;;  %v12811_v62 = vld [vmem:[#allocation25_spill] sm:$0xff]  ;;  %v12814_v50 = vld [vmem:[#allocation28_spill] sm:$0xff]  ;;  %v12818_v59 = vld [vmem:[#allocation31_spill] sm:$0xff]  ;;  %v1723_v36 = vmul.f32 1.442695, %v12832_v60 }
 0x47f   : > { %6731 = vpow2.f32 %v1679_v43  ;;  %v1703_v43 = vmul.f32 1.442695, %v1621_v48  ;;  %v12813_v48 = vld [vmem:[#allocation27_spill] sm:$0xff]  ;;  %v12815_v33 = vld [vmem:[#allocation29_spill] sm:$0xff]  ;;  %v12819_v3 = vld [vmem:[#allocation32_spill] sm:$0xff] }
 0x480   : > { %6733 = vpow2.f32 %v1683_v4  ;;  %v12812_v4 = vld [vmem:[#allocation26_spill] sm:$0xff]  ;;  %v12824_v56 = vld [vmem:[#allocation36_spill] sm:$0xff]  ;;  %v1735_v60 = vmul.f32 1.442695, %v12835_v16 }
 0x481   : > { %6735 = vpow2.f32 %v1687_v20 }
 0x482   : > { %6737 = vpow2.f32 %v1691_v9 }
 0x483   : > { %6739 = vpow2.f32 %v1695_v11  ;;  %v12817_v11 = vld [vmem:[#allocation30_spill] sm:$0xff] }
 0x484   : > { %6741 = vpow2.f32 %v1699_v28 }
 0x485   : > { %6743 = vpow2.f32 %v1703_v43  ;;  %v12828_v43 = vld [vmem:[#allocation39_spill] sm:$0xff] }
 0x486   : > { %v8307_v49 = vpop.eup %6725  ;;  %6745 = vpow2.f32 %v1707_v53 }
 0x487   : > { %12805 = vst [vmem:[#allocation43_spill] sm:$0xff] %v8307_v49  ;;  %v8315_v20 = vpop.eup %6727 }
 0x488   : > { %12806 = vst [vmem:[#allocation44_spill] sm:$0xff] %v8315_v20  ;;  %v1795_v1 = vadd.f32 %v8315_v20, %v8307_v49  ;;  %v8329_v9 = vpop.eup %6729  ;;  %v12831_v49 = vsub.f32 %v8113_v10, %v8227_v18  ;;  %v12834_v10 = vsub.f32 %v8131_v57, %v8227_v18  ;;  %v12837_v57 = vsub.f32 %v7993_v42, %v8229_v0 }
 0x489   : > { %12810 = vst [vmem:[#allocation22_spill] sm:$0xff] %v8329_v9  ;;  %v8342_v47 = vpop.eup %6731 }
 0x48a   : > { %v1796_v23 = vadd.f32 %v8329_v9, %v1795_v1  ;;  %12816 = vst [vmem:[#allocation23_spill] sm:$0xff] %v8342_v47  ;;  %v1711_v1 = vmul.f32 1.442695, %v1625_v61  ;;  %v8358_v6 = vpop.eup %6733  ;;  %v12829_v9 = vld [vmem:[#allocation40_spill] sm:$0xff]  ;;  %v12830_v61 = vld [vmem:[#allocation41_spill] sm:$0xff] }
 0x48b   : > { %12822 = vst [vmem:[#allocation24_spill] sm:$0xff] %v8358_v6  ;;  %v8374_v28 = vpop.eup %6735  ;;  %v1719_v20 = vmul.f32 1.442695, %v12831_v49  ;;  %v1731_v49 = vmul.f32 1.442695, %v12834_v10 }
 0x48c   : > { %v1797_v19 = vadd.f32 %v8342_v47, %v1796_v23  ;;  %v12826_v23 = vsub.f32 %v8107_v5, %v8227_v18  ;;  %6747 = vpow2.f32 %v1711_v1 }
 0x48e   : > { %v1715_v47 = vmul.f32 1.442695, %v12826_v23  ;;  %v1798_v14 = vadd.f32 %v8358_v6, %v1797_v19  ;;  %v8383_v23 = vpop.eup %6737 }
 0x48f   : > { %v8389_v6 = vpop.eup %6739 }
 0x490   : > { %v1799_v19 = vadd.f32 %v8374_v28, %v1798_v14  ;;  %6749 = vpow2.f32 %v1715_v47  ;;  %v8395_v25 = vpop.eup %6741  ;;  %v12833_v14 = vsub.f32 %v8125_v41, %v8227_v18 }
 0x491   : > { %6751 = vpow2.f32 %v1719_v20  ;;  %v8404_v47 = vpop.eup %6743  ;;  %v12836_v20 = vsub.f32 %v7984_v34, %v8229_v0  ;;  %v12840_v34 = vsub.f32 %v8008_v51, %v8229_v0 }
 0x492   : > { %v1800_v53 = vadd.f32 %v8383_v23, %v1799_v19  ;;  %v1727_v1 = vmul.f32 1.442695, %v12833_v14  ;;  %6753 = vpow2.f32 %v1723_v36  ;;  %v8413_v14 = vpop.eup %6745  ;;  %v12838_v36 = vsub.f32 %v8143_v40, %v8227_v18 }
 0x493   : > { %v1669_v41 = vmul.f32 1.442695, %v12836_v20  ;;  %v12843_v40 = vsub.f32 %v8024_v58, %v8229_v0 }
 0x494   : > { %v1801_v5 = vadd.f32 %v8389_v6, %v1800_v53  ;;  %6755 = vpow2.f32 %v1727_v1  ;;  %v1739_v10 = vmul.f32 1.442695, %v12838_v36  ;;  %v12841_v1 = vsub.f32 %v8149_v32, %v8227_v18 }
 0x495   : > { %6757 = vpow2.f32 %v1731_v49  ;;  %v12846_v32 = vsub.f32 %v8037_v63, %v8229_v0 }
 0x496   : > { %v1802_v19 = vadd.f32 %v8395_v25, %v1801_v5  ;;  %v1673_v5 = vmul.f32 1.442695, %v12837_v57  ;;  %v8422_v16 = vpop.eup %6747  ;;  %6759 = vpow2.f32 %v1735_v60  ;;  %v1743_v20 = vmul.f32 1.442695, %v12841_v1 }
 0x497   : > { %12839 = vst [vmem:[#allocation25_spill] sm:$0xff] %v8422_v16  ;;  %6761 = vpow2.f32 %v1669_v41  ;;  %v12844_v60 = vsub.f32 %v8155_v35, %v8227_v18  ;;  %v1685_v41 = vmul.f32 1.442695, %v12846_v32  ;;  %v12848_v35 = vsub.f32 %v8051_v8, %v8229_v0 }
 0x498   : > { %v1803_v53 = vadd.f32 %v8404_v47, %v1802_v19  ;;  %v1677_v19 = vmul.f32 1.442695, %v12840_v34  ;;  %6763 = vpow2.f32 %v1673_v5  ;;  %v12847_v5 = vsub.f32 %v8161_v12, %v8227_v18 }
 0x499   : > { %6765 = vpow2.f32 %v1739_v10  ;;  %v1747_v51 = vmul.f32 1.442695, %v12844_v60  ;;  %v1689_v34 = vmul.f32 1.442695, %v12848_v35  ;;  %v12850_v12 = vsub.f32 %v8065_v15, %v8229_v0 }
 0x49a   : > { %v1804_v7 = vadd.f32 %v8413_v14, %v1803_v53  ;;  %v8431_v49 = vpop.eup %6749  ;;  %v1681_v53 = vmul.f32 1.442695, %v12843_v40  ;;  %6767 = vpow2.f32 %v1677_v19  ;;  %v1751_v58 = vmul.f32 1.442695, %v12847_v5 }
 0x49b   : > { %12842 = vst [vmem:[#allocation26_spill] sm:$0xff] %v8431_v49  ;;  %v8440_v36 = vpop.eup %6751  ;;  %6769 = vpow2.f32 %v1743_v20  ;;  %v12849_v19 = vsub.f32 %v8167_v55, %v8227_v18  ;;  %v12851_v8 = vsub.f32 %v8173_v24, %v8227_v18  ;;  %v12853_v15 = vsub.f32 %v8179_v30, %v8227_v18 }
 0x49c   : > { %v1805_v42 = vadd.f32 %v8422_v16, %v1804_v7  ;;  %12845 = vst [vmem:[#allocation27_spill] sm:$0xff] %v8440_v36  ;;  %v8449_v7 = vpop.eup %6753  ;;  %6771 = vpow2.f32 %v1681_v53 }
 0x49d   : > { %6773 = vpow2.f32 %v1747_v51  ;;  %v1755_v63 = vmul.f32 1.442695, %v12849_v19  ;;  %v1759_v53 = vmul.f32 1.442695, %v12851_v8  ;;  %v12852_v51 = vsub.f32 %v8074_v17, %v8229_v0 }
 0x49e   : > { %v1806_v57 = vadd.f32 %v8431_v49, %v1805_v42  ;;  %v8458_v20 = vpop.eup %6755  ;;  %6775 = vpow2.f32 %v1685_v41  ;;  %v1693_v42 = vmul.f32 1.442695, %v12850_v12  ;;  %v1763_v41 = vmul.f32 1.442695, %v12853_v15 }
 0x49f   : > { %v8463_v40 = vpop.eup %6757  ;;  %6777 = vpow2.f32 %v1751_v58  ;;  %v12854_v58 = vsub.f32 %v8083_v38, %v8229_v0  ;;  %v12855_v17 = vsub.f32 %v8185_v31, %v8227_v18  ;;  %v12859_v15 = vsub.f32 %v8197_v29, %v8227_v18 }
 0x4a0   : > { %v1807_v10 = vadd.f32 %v8440_v36, %v1806_v57  ;;  %v8469_v55 = vpop.eup %6759  ;;  %6779 = vpow2.f32 %v1689_v34  ;;  %v1697_v57 = vmul.f32 1.442695, %v12852_v51  ;;  %v12858_v51 = vsub.f32 %v8098_v45, %v8229_v0 }
 0x4a1   : > { %v8474_v32 = vpop.eup %6761  ;;  %6781 = vpow2.f32 %v1755_v63  ;;  %v1767_v34 = vmul.f32 1.442695, %v12855_v17 }
 0x4a2   : > { %v1808_v1 = vadd.f32 %v8449_v7, %v1807_v10  ;;  %v8480_v24 = vpop.eup %6763  ;;  %6783 = vpow2.f32 %v1693_v42  ;;  %v1701_v10 = vmul.f32 1.442695, %v12854_v58  ;;  %v12857_v42 = vsub.f32 %v8191_v26, %v8227_v18 }
 0x4a3   : > { %v8485_v35 = vpop.eup %6765  ;;  %6785 = vpow2.f32 %v1759_v53  ;;  %v1832_v30 = vadd.f32 %v8480_v24, %v8474_v32 }
 0x4a4   : > { %v1809_v60 = vadd.f32 %v8458_v20, %v1808_v1  ;;  %v8493_v63 = vpop.eup %6767  ;;  %6787 = vpow2.f32 %v1697_v57  ;;  %v12856_v1 = vsub.f32 %v8092_v52, %v8229_v0  ;;  %v1771_v31 = vmul.f32 1.442695, %v12857_v42 }
 0x4a5   : > { %v8498_v12 = vpop.eup %6769  ;;  %6789 = vpow2.f32 %v1763_v41  ;;  %v1833_v53 = vadd.f32 %v8493_v63, %v1832_v30  ;;  %v1709_v57 = vmul.f32 1.442695, %v12858_v51  ;;  %v1775_v41 = vmul.f32 1.442695, %v12859_v15 }
 0x4a6   : > { %v1810_v5 = vadd.f32 %v8463_v40, %v1809_v60  ;;  %v1705_v38 = vmul.f32 1.442695, %v12856_v1  ;;  %v8505_v60 = vpop.eup %6771  ;;  %6791 = vpow2.f32 %v1701_v10  ;;  %v12860_v10 = vsub.f32 %v12807_v39, %v8229_v0 }
 0x4a7   : > { %v8510_v52 = vpop.eup %6773  ;;  %6793 = vpow2.f32 %v1767_v34  ;;  %v12861_v34 = vsub.f32 %v8203_v21, %v8227_v18 }
 0x4a8   : > { %v1811_v19 = vadd.f32 %v8469_v55, %v1810_v5  ;;  %v1834_v5 = vadd.f32 %v8505_v60, %v1833_v53  ;;  %v8517_v58 = vpop.eup %6775  ;;  %6795 = vpow2.f32 %v1705_v38  ;;  %v1713_v17 = vmul.f32 1.442695, %v12860_v10 }
 0x4a9   : > { %v8522_v45 = vpop.eup %6777  ;;  %6797 = vpow2.f32 %v1771_v31  ;;  %v12862_v38 = vsub.f32 %v12808_v46, %v8229_v0  ;;  %v12863_v31 = vsub.f32 %v8209_v44, %v8227_v18 }
 0x4aa   : > { %v1812_v8 = vadd.f32 %v8485_v35, %v1811_v19  ;;  %v1779_v19 = vmul.f32 1.442695, %v12861_v34  ;;  %v1835_v30 = vadd.f32 %v8517_v58, %v1834_v5  ;;  %v8529_v1 = vpop.eup %6779  ;;  %6799 = vpow2.f32 %v1709_v57 }
 0x4ab   : > { %v1717_v42 = vmul.f32 1.442695, %v12862_v38  ;;  %v8534_v39 = vpop.eup %6781  ;;  %6801 = vpow2.f32 %v1775_v41  ;;  %v12864_v57 = vsub.f32 %v12809_v27, %v8229_v0  ;;  %v12865_v41 = vsub.f32 %v8215_v2, %v8227_v18 }
 0x4ac   : > { %v1813_v26 = vadd.f32 %v8498_v12, %v1812_v8  ;;  %v1783_v8 = vmul.f32 1.442695, %v12863_v31  ;;  %v1836_v53 = vadd.f32 %v8529_v1, %v1835_v30  ;;  %v8541_v51 = vpop.eup %6783  ;;  %6803 = vpow2.f32 %v1713_v17 }
 0x4ad   : > { %v1721_v15 = vmul.f32 1.442695, %v12864_v57  ;;  %v8546_v46 = vpop.eup %6785  ;;  %6805 = vpow2.f32 %v1779_v19  ;;  %v12866_v17 = vsub.f32 %v12811_v62, %v8229_v0  ;;  %v12867_v19 = vsub.f32 %v8221_v37, %v8227_v18 }
 0x4ae   : > { %v1814_v29 = vadd.f32 %v8510_v52, %v1813_v26  ;;  %v1787_v26 = vmul.f32 1.442695, %v12865_v41  ;;  %v1837_v5 = vadd.f32 %v8541_v51, %v1836_v53  ;;  %v8553_v10 = vpop.eup %6787  ;;  %6807 = vpow2.f32 %v1717_v42 }
 0x4af   : > { %v1725_v34 = vmul.f32 1.442695, %v12866_v17  ;;  %v8558_v27 = vpop.eup %6789  ;;  %6809 = vpow2.f32 %v1783_v8  ;;  %v12868_v42 = vsub.f32 %v12812_v4, %v8229_v0  ;;  %v12869_v18 = vsub.f32 %v12813_v48, %v8229_v0 }
 0x4b0   : > { %v1815_v21 = vadd.f32 %v8522_v45, %v1814_v29  ;;  %v1791_v29 = vmul.f32 1.442695, %v12867_v19  ;;  %v1838_v30 = vadd.f32 %v8553_v10, %v1837_v5  ;;  %v8565_v38 = vpop.eup %6791  ;;  %6811 = vpow2.f32 %v1721_v15 }
 0x4b1   : > { %v1729_v31 = vmul.f32 1.442695, %v12868_v42  ;;  %v8570_v62 = vpop.eup %6793  ;;  %6813 = vpow2.f32 %v1787_v26  ;;  %v1733_v53 = vmul.f32 1.442695, %v12869_v18  ;;  %v12870_v26 = vsub.f32 %v12814_v50, %v8229_v0 }
 0x4b2   : > { %v1816_v44 = vadd.f32 %v8534_v39, %v1815_v21  ;;  %v1839_v21 = vadd.f32 %v8565_v38, %v1838_v30  ;;  %v8574_v37 = vpop.eup %6795  ;;  %6815 = vpow2.f32 %v1725_v34  ;;  %v12871_v19 = vsub.f32 %v12815_v33, %v8229_v0 }
 0x4b3   : > { %v8579_v57 = vpop.eup %6797  ;;  %6817 = vpow2.f32 %v1791_v29 }
 0x4b4   : > { %v1817_v2 = vadd.f32 %v8546_v46, %v1816_v44  ;;  %v1840_v15 = vadd.f32 %v8574_v37, %v1839_v21  ;;  %v8583_v41 = vpop.eup %6799  ;;  %6819 = vpow2.f32 %v1729_v31  ;;  %v1737_v44 = vmul.f32 1.442695, %v12870_v26 }
 0x4b5   : > { %v8588_v5 = vpop.eup %6801  ;;  %6821 = vpow2.f32 %v1733_v53  ;;  %v1741_v29 = vmul.f32 1.442695, %v12871_v19  ;;  %v12876_v26 = vsub.f32 %v12818_v59, %v8229_v0 }
 0x4b6   : > { %v1818_v8 = vadd.f32 %v8558_v27, %v1817_v2  ;;  %v1841_v48 = vadd.f32 %v8583_v41, %v1840_v15  ;;  %v8592_v34 = vpop.eup %6803  ;;  %v8597_v2 = vpop.f32.mrb[8].mxu0  ;;  %6823 = vpow2.f32 %v1737_v44 }
 0x4b7   : > { %12872 = vst [vmem:[#allocation28_spill] sm:$0xff] %v8597_v2  ;;  %v8599_v30 = vpop.eup %6805  ;;  %6825 = vpow2.f32 %v1741_v29  ;;  %v12881_v2 = vld [vmem:[#allocation34_spill] sm:$0xff] }
 0x4b8   : > { %v1819_v4 = vadd.f32 %v8570_v62, %v1818_v8  ;;  %v1842_v42 = vadd.f32 %v8592_v34, %v1841_v48  ;;  %v8603_v31 = vpop.eup %6807  ;;  %v12874_v8 = vsub.f32 %v12817_v11, %v8229_v0 }
 0x4b9   : > { %12873 = vst [vmem:[#allocation29_spill] sm:$0xff] %v8603_v31  ;;  %v8608_v18 = vpop.eup %6809 }
 0x4ba   : > { %v1820_v17 = vadd.f32 %v8579_v57, %v1819_v4  ;;  %v1745_v21 = vmul.f32 1.442695, %v12874_v8  ;;  %v1843_v53 = vadd.f32 %v8603_v31, %v1842_v42  ;;  %v2059_v4 = vpop.f32.mrb[9].mxu0  ;;  %v8612_v15 = vpop.eup %6811 }
 0x4bb   : > { %12875 = vst [vmem:[#allocation30_spill] sm:$0xff] %v8612_v15  ;;  %2168 = vmatprep.mubr.f32.mxu1 %v2059_v4  ;;  %v8617_v44 = vpop.eup %6813  ;;  %v8626_v8 = vpop.f32.mrb[10].mxu0 }
 0x4bc   : > { %v1821_v50 = vadd.f32 %v8588_v5, %v1820_v17  ;;  %v1749_v17 = vmul.f32 1.442695, %v12876_v26  ;;  %v1844_v48 = vadd.f32 %v8612_v15, %v1843_v53  ;;  %v8621_v19 = vpop.eup %6815  ;;  %6827 = vpow2.f32 %v1745_v21  ;;  %12878 = vst [vmem:[#allocation31_spill] sm:$0xff] %v8626_v8  ;;  %v8632_v26 = vpop.f32.mrb[11].mxu0 }
 0x4bd   : > { %v8628_v29 = vpop.eup %6817  ;;  %12879 = vst [vmem:[#allocation32_spill] sm:$0xff] %v8632_v26  ;;  %v12880_v21 = vsub.f32 %v12820_v54, %v8229_v0  ;;  %v8646_v36 = vpop.f32.mrb[12].mxu0 }
 0x4be   : > { %v1822_v33 = vadd.f32 %v8599_v30, %v1821_v50  ;;  %v12877_v50 = vsub.f32 %v12819_v3, %v8229_v0  ;;  %v1845_v4 = vadd.f32 %v8621_v19, %v1844_v48  ;;  %6829 = vpow2.f32 %v1749_v17  ;;  %12883 = vst [vmem:[#allocation33_spill] sm:$0xff] %v8646_v36  ;;  %v8649_v49 = vpop.f32.mrb[13].mxu0 }
 0x4bf   : > { %v1757_v53 = vmul.f32 1.442695, %v12880_v21  ;;  %12884 = vst [vmem:[#allocation35_spill] sm:$0xff] %v8649_v49 }
 0x4c0   : > { %v1823_v11 = vadd.f32 %v8608_v18, %v1822_v33  ;;  %v1753_v42 = vmul.f32 1.442695, %v12877_v50  ;;  %v8634_v33 = vpop.eup %6819 }
 0x4c1   : > { %v1846_v50 = vadd.f32 %v8634_v33, %v1845_v4  ;;  %v8641_v8 = vpop.eup %6821 }
 0x4c2   : > { %v1824_v59 = vadd.f32 %v8617_v44, %v1823_v11  ;;  %6831 = vpow2.f32 %v1753_v42  ;;  %v12882_v11 = vsub.f32 %v12881_v2, %v8229_v0  ;;  %v8651_v54 = vpop.eup %6823  ;;  %v12886_v2 = vsub.f32 %v12824_v56, %v8229_v0 }
 0x4c3   : > { %v1847_v17 = vadd.f32 %v8641_v8, %v1846_v50  ;;  %6833 = vpow2.f32 %v1757_v53  ;;  %v8657_v15 = vpop.eup %6825  ;;  %v8662_v50 = vpop.f32.mrb[14].mxu0  ;;  %v12891_v56 = vsub.f32 %v12827_v13, %v8229_v0 }
 0x4c4   : > { %v1825_v3 = vadd.f32 %v8628_v29, %v1824_v59  ;;  %v1761_v48 = vmul.f32 1.442695, %v12882_v11  ;;  %v12885_v59 = vsub.f32 %v12823_v22, %v8229_v0  ;;  %v1769_v11 = vmul.f32 1.442695, %v12886_v2  ;;  %12887 = vst [vmem:[#allocation36_spill] sm:$0xff] %v8662_v50  ;;  %v8665_v53 = vpop.f32.mrb[15].mxu0 }
 0x4c5   : > { %v1848_v42 = vadd.f32 %v8651_v54, %v1847_v17  ;;  %12888 = vst [vmem:[#allocation38_spill] sm:$0xff] %v8665_v53  ;;  %v12889_v22 = vld [vmem:[#allocation37_spill] sm:$0xff]  ;;  %v1777_v2 = vmul.f32 1.442695, %v12891_v56 }
 0x4c6   : > { %v1826_v26 = vrot.slane %v1825_v3, 4  ;;  %v1765_v4 = vmul.f32 1.442695, %v12885_v59  ;;  %6835 = vpow2.f32 %v1761_v48  ;;  %v8667_v31 = vpop.eup %6827 }
 0x4c7   : > { %v1849_v49 = vadd.f32 %v8657_v15, %v1848_v42  ;;  %v8678_v42 = vpop.f32.mrb[16].mxu0 }
 0x4c8   : > { %v1827_v21 = vadd.f32 %v1826_v26, %v1825_v3  ;;  %6837 = vpow2.f32 %v1765_v4  ;;  %v12890_v26 = vsub.f32 %v12889_v22, %v8229_v0  ;;  %v8673_v59 = vpop.eup %6829  ;;  %12892 = vst [vmem:[#allocation39_spill] sm:$0xff] %v8678_v42  ;;  %v8681_v4 = vpop.f32.mrb[17].mxu0 }
 0x4c9   : > { %v1850_v48 = vadd.f32 %v8667_v31, %v1849_v49  ;;  %6839 = vpow2.f32 %v1769_v11  ;;  %12893 = vst [vmem:[#allocation40_spill] sm:$0xff] %v8681_v4  ;;  %v12894_v49 = vsub.f32 %v12828_v43, %v8229_v0  ;;  %v12898_v43 = vsub.f32 %v12830_v61, %v8229_v0 }
 0x4ca   : > { %v1828_v36 = vrot.slane %v1827_v21, 2  ;;  %v1773_v3 = vmul.f32 1.442695, %v12890_v26 }
 0x4cb   : > { %v1851_v53 = vadd.f32 %v8673_v59, %v1850_v48  ;;  %v8694_v48 = vpop.f32.mrb[18].mxu0 }
 0x4cc   : > { %v1829_v17 = vadd.f32 %v1828_v36, %v1827_v21  ;;  %v8683_v16 = vpop.eup %6831  ;;  %6841 = vpow2.f32 %v1773_v3  ;;  %v1781_v36 = vmul.f32 1.442695, %v12894_v49  ;;  %v12895_v21 = vsub.f32 %v12829_v9, %v8229_v0  ;;  %12896 = vst [vmem:[#allocation41_spill] sm:$0xff] %v8694_v48  ;;  %v8697_v42 = vpop.f32.mrb[19].mxu0 }
 0x4cd   : > { %v1852_v13 = vadd.f32 %v8683_v16, %v1851_v53  ;;  %v8692_v22 = vpop.eup %6833  ;;  %6843 = vpow2.f32 %v1777_v2  ;;  %12897 = vst [vmem:[#allocation34_spill] sm:$0xff] %v8697_v42  ;;  %v1789_v9 = vmul.f32 1.442695, %v12898_v43 }
 0x4ce   : > { %v1830_v50 = vrot.slane %v1829_v17, 1  ;;  %v1785_v11 = vmul.f32 1.442695, %v12895_v21  ;;  %6845 = vpow2.f32 %v1781_v36  ;;  %v8710_v21 = vpop.f32.mrb[20].mxu0 }
 0x4cf   : > { %v1853_v56 = vadd.f32 %v8692_v22, %v1852_v13  ;;  %12901 = vst [vmem:[#allocation37_spill] sm:$0xff] %v8710_v21  ;;  %v8713_v48 = vpop.f32.mrb[21].mxu0 }
 0x4d0   : > { %v1831_v26 = vadd.f32 %v1830_v50, %v1829_v17  ;;  %v8699_v3 = vpop.eup %6835  ;;  %6847 = vpow2.f32 %v1785_v11  ;;  %v12899_v50 = vld [vmem:[#allocation42_spill] sm:$0xff] }
 0x4d1   : > { %v1854_v53 = vadd.f32 %v8699_v3, %v1853_v56  ;;  %v12900_v17 = vsub.f32 %v12899_v50, %v8229_v0  ;;  %12902 = vst [vmem:[#allocation42_spill] sm:$0xff] %v8713_v48  ;;  %v8720_v56 = vpop.f32.mrb[22].mxu0 }
 0x4d2   : > { %v8705_v49 = vpop.eup %6837  ;;  %6849 = vrcp.f32 %v1831_v26  ;;  %12903 = vst [vmem:[#allocation45_spill] sm:$0xff] %v8720_v56  ;;  %v8723_v0 = vpop.f32.mrb[23].mxu0 }
 0x4d3   : > { %v1793_v2 = vmul.f32 1.442695, %v12900_v17  ;;  %v1855_v13 = vadd.f32 %v8705_v49, %v1854_v53  ;;  %v8715_v36 = vpop.eup %6839  ;;  %6851 = vpow2.f32 %v1789_v9  ;;  %12904 = vst [vmem:[#allocation46_spill] sm:$0xff] %v8723_v0 }
 0x4d5   : > { %v1856_v61 = vadd.f32 %v8715_v36, %v1855_v13  ;;  %6853 = vpow2.f32 %v1793_v2 }
 0x4d6   : > { %v8718_v11 = vpop.eup %6841 }
 0x4d7   : > { %v1857_v26 = vadd.f32 %v8718_v11, %v1856_v61  ;;  %v8725_v43 = vpop.eup %6843 }
 0x4d8   : > { %v8728_v50 = vpop.eup %6845 }
 0x4d9   : > { %v1858_v53 = vadd.f32 %v8725_v43, %v1857_v26 }
 0x4da   : > { %v8730_v17 = vpop.eup %6847 }
 0x4db   : > { %v1859_v9 = vadd.f32 %v8728_v50, %v1858_v53 }
 0x4dc   : > { %v8733_v13 = vpop.eup %6849 }
 0x4dd   : > { %v1860_v2 = vadd.f32 %v8730_v17, %v1859_v9  ;;  %v8736_v21 = vpop.eup %6851  ;;  %v8741_v56 = vmul.f32 %v8733_v13, %v8449_v7  ;;  %v8745_v26 = vmul.f32 %v8733_v13, %v8458_v20  ;;  %v8751_v53 = vmul.f32 %v8733_v13, %v8463_v40 }
 0x4de   : > { %v8755_v9 = vmul.f32 %v8733_v13, %v8469_v55  ;;  %v8762_v48 = vmul.f32 %v8733_v13, %v8485_v35  ;;  %v8766_v20 = vmul.f32 %v8733_v13, %v8498_v12  ;;  %v8772_v55 = vmul.f32 %v8733_v13, %v8510_v52 }
 0x4df   : > { %v1861_v61 = vadd.f32 %v8736_v21, %v1860_v2  ;;  %v8747_v0 = vpop.eup %6853  ;;  %v8780_v7 = vmul.f32 %v8733_v13, %v8534_v39  ;;  %v8786_v42 = vmul.f32 %v8733_v13, %v8546_v46  ;;  %v8790_v52 = vmul.f32 %v8733_v13, %v8558_v27 }
 0x4e0   : > { %v8796_v40 = vmul.f32 %v8733_v13, %v8570_v62  ;;  %v8800_v39 = vmul.f32 %v8733_v13, %v8579_v57  ;;  %v8804_v12 = vmul.f32 %v8733_v13, %v8588_v5  ;;  %v8810_v4 = vmul.f32 %v8733_v13, %v8599_v30 }
 0x4e1   : > { %v1862_v2 = vadd.f32 %v8747_v0, %v1861_v61  ;;  %v8776_v61 = vmul.f32 %v8733_v13, %v8522_v45  ;;  %12905 = vst [vmem:[#allocation47_spill] sm:$0xff] %v8780_v7  ;;  %12906 = vst [vmem:[#allocation48_spill] sm:$0xff] %v8786_v42  ;;  %v8814_v62 = vmul.f32 %v8733_v13, %v8608_v18  ;;  %v12914_v42 = vld [vmem:[#allocation23_spill] sm:$0xff] }
 0x4e2   : > { %12907 = vst [vmem:[#allocation49_spill] sm:$0xff] %v8790_v52  ;;  %12908 = vst [vmem:[#allocation50_spill] sm:$0xff] %v8796_v40  ;;  %v8822_v5 = vmul.f32 %v8733_v13, %v8617_v44  ;;  %v12913_v40 = vld [vmem:[#allocation22_spill] sm:$0xff] }
 0x4e3   : > { %v1863_v35 = vrot.slane %v1862_v2, 4  ;;  %12909 = vst [vmem:[#allocation51_spill] sm:$0xff] %v8800_v39  ;;  %12910 = vst [vmem:[#allocation52_spill] sm:$0xff] %v8804_v12  ;;  %v12911_v39 = vld [vmem:[#allocation43_spill] sm:$0xff]  ;;  %v12912_v12 = vld [vmem:[#allocation44_spill] sm:$0xff]  ;;  %v1875_v7 = vmul.f32 %v8733_v13, %v12913_v40 }
 0x4e4   : > { %v1871_v44 = vmul.f32 %v8733_v13, %v12911_v39 }
 0x4e5   : > { %v1864_v46 = vadd.f32 %v1863_v35, %v1862_v2  ;;  %v8826_v2 = vmul.f32 %v8733_v13, %v8628_v29  ;;  %v1873_v29 = vmul.f32 %v8733_v13, %v12912_v12  ;;  %v1877_v35 = vmul.f32 %v8733_v13, %v12914_v42 }
 0x4e7   : > { %v1865_v30 = vrot.slane %v1864_v46, 2  ;;  %v6360_v42 = vpack.c.bf16 %v1873_v29, %v1871_v44 }
 0x4e9   : > { %v1866_v27 = vadd.f32 %v1865_v30, %v1864_v46  ;;  %v12915_v30 = vld [vmem:[#allocation24_spill] sm:$0xff] }
 0x4eb   : > { %v1867_v57 = vrot.slane %v1866_v27, 1 }
 0x4ed   : > { %v1868_v52 = vadd.f32 %v1867_v57, %v1866_v27 }
 0x4ef   : > { %6855 = vrcp.f32 %v1868_v52 }
 0x4f9   : > { %v8832_v45 = vpop.eup %6855 }
 0x4fa   : > { %v1872_v46 = vmul.f32 %v8832_v45, %v8474_v32  ;;  %v1874_v52 = vmul.f32 %v8832_v45, %v8480_v24  ;;  %v1876_v27 = vmul.f32 %v8832_v45, %v8493_v63  ;;  %v1878_v39 = vmul.f32 %v8832_v45, %v8505_v60 }
 0x4fb   : > { %v1880_v12 = vmul.f32 %v8832_v45, %v8517_v58  ;;  %v1882_v40 = vmul.f32 %v8832_v45, %v8529_v1  ;;  %v1879_v32 = vmul.f32 %v8733_v13, %v12915_v30  ;;  %v1881_v24 = vmul.f32 %v8733_v13, %v8374_v28 }
 0x4fc   : > { %v6358_v57 = vpack.c.bf16 %v1874_v52, %v1872_v46  ;;  %v1883_v63 = vmul.f32 %v8733_v13, %v8383_v23  ;;  %v6362_v18 = vpack.c.bf16 %v1878_v39, %v1876_v27  ;;  %v6364_v60 = vpack.c.bf16 %v1877_v35, %v1875_v7 }
 0x4fd   : > { %v1884_v46 = vmul.f32 %v8832_v45, %v8541_v51  ;;  %v8864_v58 = vmul.f32 %v8832_v45, %v8621_v19  ;;  %v1886_v1 = vmul.f32 %v8832_v45, %v8553_v10  ;;  %v1902_v28 = vmul.f32 %v8832_v45, %v8634_v33 }
 0x4fe   : > { %6359 = vmatprep.subr.bf16.mxu1 %v6358_v57  ;;  %v8872_v23 = vmul.f32 %v8832_v45, %v8641_v8  ;;  %v8876_v7 = vmul.f32 %v8832_v45, %v8651_v54  ;;  %v6366_v51 = vpack.c.bf16 %v1882_v40, %v1880_v12  ;;  %v8880_v19 = vmul.f32 %v8832_v45, %v8657_v15 }
 0x4ff   : > { %6361 = vmatpush1.bf16.msra.mxu1 %v6360_v42  ;;  %v8884_v10 = vmul.f32 %v8832_v45, %v8667_v31  ;;  %v8888_v33 = vmul.f32 %v8832_v45, %v8673_v59  ;;  %v6386_v8 = vpack.c.bf16 %v1902_v28, %v8864_v58  ;;  %v8895_v35 = vmul.f32 %v8832_v45, %v8683_v16  ;;  %v12918_v58 = vld [vmem:[#allocation30_spill] sm:$0xff] }
 0x500   : > { %6363 = vmatprep.subr.bf16.mxu1 %v6362_v18  ;;  %v6390_v54 = vpack.c.bf16 %v8876_v7, %v8872_v23  ;;  %v8899_v15 = vmul.f32 %v8832_v45, %v8692_v22  ;;  %v8905_v59 = vmul.f32 %v8832_v45, %v8699_v3  ;;  %v8909_v18 = vmul.f32 %v8832_v45, %v8705_v49  ;;  %v12920_v23 = vld [vmem:[#allocation27_spill] sm:$0xff] }
 0x501   : > { %v6394_v31 = vpack.c.bf16 %v8884_v10, %v8880_v19  ;;  %v8913_v44 = vmul.f32 %v8832_v45, %v8715_v36  ;;  %v6398_v16 = vpack.c.bf16 %v8895_v35, %v8888_v33  ;;  %v8919_v22 = vmul.f32 %v8832_v45, %v8718_v11  ;;  %v8977_v19 = vpop.f32.mrb[24].mxu0 }
 0x502   : > { %v8923_v3 = vmul.f32 %v8832_v45, %v8725_v43  ;;  %v8927_v49 = vmul.f32 %v8832_v45, %v8728_v50  ;;  %v6402_v36 = vpack.c.bf16 %v8905_v59, %v8899_v15  ;;  %v8935_v52 = vmul.f32 %v8832_v45, %v8730_v17  ;;  %v8982_v10 = vpop.f32.mrb[25].mxu0 }
 0x503   : > { %6365 = vmatpush1.bf16.msra.mxu1 %v6364_v60  ;;  %v6406_v29 = vpack.c.bf16 %v8913_v44, %v8909_v18  ;;  %v8939_v11 = vmul.f32 %v8832_v45, %v8736_v21  ;;  %v6368_v43 = vpack.c.bf16 %v1881_v24, %v1879_v32  ;;  %v1885_v50 = vmul.f32 %v8733_v13, %v8389_v6  ;;  %v8984_v33 = vpop.f32.mrb[26].mxu0 }
 0x504   : > { %6367 = vmatprep.subr.bf16.mxu1 %v6366_v51  ;;  %v6410_v27 = vpack.c.bf16 %v8923_v3, %v8919_v22  ;;  %v8947_v39 = vmul.f32 %v8832_v45, %v8747_v0  ;;  %v6370_v57 = vpack.c.bf16 %v1886_v1, %v1884_v46  ;;  %v1888_v17 = vmul.f32 %v8832_v45, %v8565_v38  ;;  %v12917_v46 = vld [vmem:[#allocation29_spill] sm:$0xff]  ;;  %v8986_v35 = vpop.f32.mrb[27].mxu0 }
 0x505   : > { %v1890_v12 = vmul.f32 %v8832_v45, %v8574_v37  ;;  %v6414_v21 = vpack.c.bf16 %v8935_v52, %v8927_v49  ;;  %v6372_v40 = vpack.c.bf16 %v1885_v50, %v1883_v63  ;;  %v1887_v0 = vmul.f32 %v8733_v13, %v8395_v25  ;;  %v12916_v63 = vld [vmem:[#allocation25_spill] sm:$0xff] }
 0x506   : > { %v6418_v6 = vpack.c.bf16 %v8947_v39, %v8939_v11  ;;  %v1889_v42 = vmul.f32 %v8733_v13, %v8404_v47  ;;  %v1892_v38 = vmul.f32 %v8832_v45, %v8583_v41  ;;  %v1894_v37 = vmul.f32 %v8832_v45, %v8592_v34  ;;  %v12919_v34 = vld [vmem:[#allocation26_spill] sm:$0xff]  ;;  %v12942_v39 = vld [vmem:[#allocation4_spill] sm:$0xff] }
 0x507   : > { %6369 = vmatpush1.bf16.msra.mxu1 %v6368_v43  ;;  %v6374_v30 = vpack.c.bf16 %v1890_v12, %v1888_v17  ;;  %v1891_v24 = vmul.f32 %v8733_v13, %v8413_v14  ;;  %v1893_v60 = vmul.f32 %v8733_v13, %v12916_v63  ;;  %v1896_v47 = vmul.f32 %v8832_v45, %v12917_v46  ;;  %v8991_v43 = vpop.f32.mrb[28].mxu0 }
 0x508   : > { %6371 = vmatprep.subr.bf16.mxu1 %v6370_v57  ;;  %v6376_v32 = vpack.c.bf16 %v1889_v42, %v1887_v0  ;;  %v6378_v25 = vpack.c.bf16 %v1894_v37, %v1892_v38  ;;  %v1898_v1 = vmul.f32 %v8832_v45, %v12918_v58  ;;  %v1895_v28 = vmul.f32 %v8733_v13, %v12919_v34  ;;  %v8995_v50 = vpop.f32.mrb[29].mxu0  ;;  %v12928_v34 = vld [vmem:[#allocation50_spill] sm:$0xff] }
 0x509   : > { %v6380_v41 = vpack.c.bf16 %v1893_v60, %v1891_v24  ;;  %v1897_v7 = vmul.f32 %v8733_v13, %v12920_v23  ;;  %v12921_v45 = vpack.c.bf16 %v8745_v26, %v8741_v56  ;;  %v12922_v13 = vpack.c.bf16 %v8755_v9, %v8751_v53  ;;  %v8999_v26 = vpop.f32.mrb[30].mxu0  ;;  %v12926_v60 = vld [vmem:[#allocation47_spill] sm:$0xff] }
 0x50a   : > { %v6382_v14 = vpack.c.bf16 %v1898_v1, %v1896_v47  ;;  %v2687_v56 = vmax.f32 %v8982_v10, %v8995_v50  ;;  %v9003_v57 = vpop.f32.mrb[31].mxu0  ;;  %v12923_v53 = vpack.c.bf16 %v8766_v20, %v8762_v48  ;;  %v12924_v48 = vpack.c.bf16 %v8776_v61, %v8772_v55  ;;  %v12925_v61 = vld [vmem:[#allocation48_spill] sm:$0xff] }
 0x50b   : > { %6373 = vmatpush1.bf16.msra.mxu1 %v6372_v40  ;;  %v6384_v51 = vpack.c.bf16 %v1897_v7, %v1895_v28  ;;  %v2688_v9 = vmax.f32 %v8986_v35, %v9003_v57  ;;  %v12929_v28 = vld [vmem:[#allocation49_spill] sm:$0xff] }
 0x50c   : > { %6375 = vmatprep.subr.bf16.mxu1 %v6374_v30  ;;  %v12930_v23 = vpack.c.bf16 %v12928_v34, %v12929_v28 }
 0x50f   : > { %6377 = vmatpush1.bf16.msra.mxu1 %v6376_v32 }
 0x510   : > { %6379 = vmatprep.subr.bf16.mxu1 %v6378_v25  ;;  %v12927_v25 = vpack.c.bf16 %v12925_v61, %v12926_v60 }
 0x513   : > { %6381 = vmatpush1.bf16.msra.mxu1 %v6380_v41 }
 0x514   : > { %6383 = vmatprep.subr.bf16.mxu1 %v6382_v14 }
 0x517   : > { %6385 = vmatpush1.bf16.msra.mxu1 %v6384_v51 }
 0x518   : > { %6387 = vmatprep.subr.bf16.mxu1 %v6386_v8  ;;  %v2650_v8 = vmax.f32 %v8977_v19, %v8991_v43 }
 0x51b   : > { %6389 = vmatpush1.bf16.msra.mxu1 %v12921_v45 }
 0x51c   : > { %6391 = vmatprep.subr.bf16.mxu1 %v6390_v54  ;;  %v2651_v54 = vmax.f32 %v8984_v33, %v8999_v26 }
 0x51f   : > { %6393 = vmatpush1.bf16.msra.mxu1 %v12922_v13 }
 0x520   : > { %6395 = vmatprep.subr.bf16.mxu1 %v6394_v31  ;;  %v9010_v31 = vpop.f32.mrb[32].mxu0 }
 0x521   : > { %v2652_v17 = vmax.f32 %v2650_v8, %v9010_v31  ;;  %v9013_v12 = vpop.f32.mrb[33].mxu0  ;;  %v12933_v8 = vld [vmem:[#allocation52_spill] sm:$0xff] }
 0x522   : > { %v2689_v40 = vmax.f32 %v2687_v56, %v9013_v12  ;;  %v9016_v0 = vpop.f32.mrb[34].mxu0  ;;  %v12934_v56 = vld [vmem:[#allocation51_spill] sm:$0xff] }
 0x523   : > { %6397 = vmatpush1.bf16.msra.mxu1 %v12923_v53  ;;  %v2653_v42 = vmax.f32 %v2651_v54, %v9016_v0  ;;  %v9019_v30 = vpop.f32.mrb[35].mxu0  ;;  %v12935_v54 = vpack.c.bf16 %v12933_v8, %v12934_v56  ;;  %v12950_v8 = vld [vmem:[#allocation31_spill] sm:$0xff] }
 0x524   : > { %6399 = vmatprep.subr.bf16.mxu1 %v6398_v16  ;;  %v2690_v20 = vmax.f32 %v2688_v9, %v9019_v30  ;;  %v9025_v38 = vpop.f32.mrb[36].mxu0 }
 0x525   : > { %v2654_v16 = vmax.f32 %v2652_v17, %v9025_v38  ;;  %v9031_v37 = vpop.f32.mrb[37].mxu0 }
 0x526   : > { %v2691_v32 = vmax.f32 %v2689_v40, %v9031_v37  ;;  %v9034_v24 = vpop.f32.mrb[38].mxu0 }
 0x527   : > { %6401 = vmatpush1.bf16.msra.mxu1 %v12924_v48  ;;  %v2655_v63 = vmax.f32 %v2653_v42, %v9034_v24  ;;  %v9037_v55 = vpop.f32.mrb[39].mxu0  ;;  %v12938_v48 = vpack.c.bf16 %v8814_v62, %v8810_v4  ;;  %v12941_v62 = vpack.c.bf16 %v8826_v2, %v8822_v5  ;;  %v12946_v2 = vld [vmem:[#allocation3_spill] sm:$0xff] }
 0x528   : > { %6403 = vmatprep.subr.bf16.mxu1 %v6402_v36  ;;  %v2692_v46 = vmax.f32 %v2690_v20, %v9037_v55  ;;  %v9043_v15 = vpop.f32.mrb[40].mxu0 }
 0x529   : > { %v2656_v59 = vmax.f32 %v2654_v16, %v9043_v15  ;;  %v9049_v36 = vpop.f32.mrb[41].mxu0 }
 0x52a   : > { %v2693_v47 = vmax.f32 %v2691_v32, %v9049_v36  ;;  %v9052_v58 = vpop.f32.mrb[42].mxu0 }
 0x52b   : > { %6405 = vmatpush1.bf16.msra.mxu1 %v12927_v25  ;;  %v2657_v1 = vmax.f32 %v2655_v63, %v9052_v58  ;;  %v9055_v41 = vpop.f32.mrb[43].mxu0 }
 0x52c   : > { %6407 = vmatprep.subr.bf16.mxu1 %v6406_v29  ;;  %v2694_v7 = vmax.f32 %v2692_v46, %v9055_v41  ;;  %v9061_v18 = vpop.f32.mrb[44].mxu0 }
 0x52d   : > { %v2658_v44 = vmax.f32 %v2656_v59, %v9061_v18  ;;  %v9067_v29 = vpop.f32.mrb[45].mxu0  ;;  %v12944_v59 = vld [vmem:[#allocation28_spill] sm:$0xff] }
 0x52e   : > { %12931 = vst [vmem:[#allocation43_spill] sm:$0xff] %v9067_v29  ;;  %v2695_v14 = vmax.f32 %v2693_v47, %v9067_v29  ;;  %v9070_v51 = vpop.f32.mrb[46].mxu0 }
 0x52f   : > { %6409 = vmatpush1.bf16.msra.mxu1 %v12930_v23  ;;  %v2659_v45 = vmax.f32 %v2657_v1, %v9070_v51  ;;  %v9073_v13 = vpop.f32.mrb[47].mxu0  ;;  %v12947_v1 = vld [vmem:[#allocation32_spill] sm:$0xff]  ;;  %v12948_v23 = vld [vmem:[#allocation10_spill] sm:$0xff] }
 0x530   : > { %6411 = vmatprep.subr.bf16.mxu1 %v6410_v27  ;;  %12932 = vst [vmem:[#allocation44_spill] sm:$0xff] %v9073_v13  ;;  %v2696_v53 = vmax.f32 %v2694_v7, %v9073_v13  ;;  %v9079_v22 = vpop.f32.mrb[48].mxu0 }
 0x531   : > { %v2660_v3 = vmax.f32 %v2658_v44, %v9079_v22  ;;  %v9085_v27 = vpop.f32.mrb[49].mxu0 }
 0x532   : > { %12936 = vst [vmem:[#allocation22_spill] sm:$0xff] %v9085_v27  ;;  %v2697_v9 = vmax.f32 %v2695_v14, %v9085_v27  ;;  %v9088_v17 = vpop.f32.mrb[50].mxu0 }
 0x533   : > { %6413 = vmatpush1.bf16.msra.mxu1 %v12935_v54  ;;  %v2661_v40 = vmax.f32 %v2659_v45, %v9088_v17  ;;  %v9091_v42 = vpop.f32.mrb[51].mxu0 }
 0x534   : > { %6415 = vmatprep.subr.bf16.mxu1 %v6414_v21  ;;  %12937 = vst [vmem:[#allocation23_spill] sm:$0xff] %v9091_v42  ;;  %v2698_v20 = vmax.f32 %v2696_v53, %v9091_v42  ;;  %v9097_v49 = vpop.f32.mrb[52].mxu0  ;;  %v12952_v53 = vld [vmem:[#allocation35_spill] sm:$0xff] }
 0x535   : > { %v2662_v52 = vmax.f32 %v2660_v3, %v9097_v49  ;;  %v9103_v21 = vpop.f32.mrb[53].mxu0 }
 0x536   : > { %12939 = vst [vmem:[#allocation24_spill] sm:$0xff] %v9103_v21  ;;  %v2699_v16 = vmax.f32 %v2697_v9, %v9103_v21  ;;  %v9106_v32 = vpop.f32.mrb[54].mxu0 }
 0x537   : > { %6417 = vmatpush1.bf16.msra.mxu1 %v12938_v48  ;;  %v2663_v63 = vmax.f32 %v2661_v40, %v9106_v32  ;;  %v9109_v4 = vpop.f32.mrb[55].mxu0 }
 0x538   : > { %6419 = vmatprep.subr.bf16.mxu1 %v6418_v6  ;;  %12940 = vst [vmem:[#allocation25_spill] sm:$0xff] %v9109_v4  ;;  %v2700_v61 = vmax.f32 %v2698_v20, %v9109_v4  ;;  %v9115_v11 = vpop.f32.mrb[56].mxu0 }
 0x539   : > { %v2664_v6 = vmax.f32 %v2662_v52, %v9115_v11  ;;  %v9119_v60 = vpop.f32.mrb[57].mxu0 }
 0x53a   : > { %12943 = vst [vmem:[#allocation29_spill] sm:$0xff] %v9119_v60  ;;  %v2701_v25 = vmax.f32 %v2699_v16, %v9119_v60  ;;  %v9122_v46 = vpop.f32.mrb[58].mxu0  ;;  %v12954_v16 = vld [vmem:[#allocation33_spill] sm:$0xff] }
 0x53b   : > { %6421 = vmatpush1.bf16.msra.mxu1 %v12941_v62  ;;  %v2665_v47 = vmax.f32 %v2663_v63, %v9122_v46  ;;  %v9126_v5 = vpop.f32.mrb[59].mxu0 }
 0x53c   : > { %6614 = vmatprep.subr.mxu1 %v12942_v39  ;;  %12945 = vst [vmem:[#allocation30_spill] sm:$0xff] %v9126_v5  ;;  %v2702_v34 = vmax.f32 %v2700_v61, %v9126_v5  ;;  %v9131_v28 = vpop.f32.mrb[60].mxu0  ;;  %v12956_v61 = vld [vmem:[#allocation38_spill] sm:$0xff] }
 0x53d   : > { %v2666_v7 = vmax.f32 %v2664_v6, %v9131_v28  ;;  %v9135_v44 = vpop.f32.mrb[61].mxu0 }
 0x53e   : > { %2169 = vmatmul.mubr.f32.vlgmr.msra.gmra.mrb[88].mxu1 %v12944_v59  ;;  %12949 = vst [vmem:[#allocation26_spill] sm:$0xff] %v9135_v44  ;;  %v2703_v14 = vmax.f32 %v2701_v25, %v9135_v44  ;;  %v9138_v45 = vpop.f32.mrb[62].mxu0 }
 0x53f   : > { %6615 = vmatpush1.msra.mxu1 %v12946_v2  ;;  %2174 = vmatprep.mubr.f32.mxu1 %v12947_v1  ;;  %v2667_v56 = vmax.f32 %v2665_v47, %v9138_v45  ;;  %v9142_v54 = vpop.f32.mrb[63].mxu0  ;;  %v12958_v1 = vld [vmem:[#allocation36_spill] sm:$0xff] }
 0x540   : > { %3112 = vmatprep.subr.mxu1 %v12948_v23  ;;  %12951 = vst [vmem:[#allocation27_spill] sm:$0xff] %v9142_v54  ;;  %v2704_v3 = vmax.f32 %v2702_v34, %v9142_v54  ;;  %v9146_v9 = vpop.f32.mrb[64].mxu0  ;;  %v12979_v54 = vld [vmem:[#allocation5_spill] sm:$0xff] }
 0x541   : > { %v2668_v40 = vmax.f32 %v2666_v7, %v9146_v9  ;;  %v9149_v48 = vpop.f32.mrb[65].mxu0  ;;  %v12960_v7 = vld [vmem:[#allocation40_spill] sm:$0xff] }
 0x542   : > { %2175 = vmatmul.mubr.f32.gmra.mrb[90].mxu1 %v12950_v8  ;;  %12953 = vst [vmem:[#allocation48_spill] sm:$0xff] %v9149_v48  ;;  %v2705_v20 = vmax.f32 %v2703_v14, %v9149_v48  ;;  %v9152_v52 = vpop.f32.mrb[66].mxu0  ;;  %v2296_v48 = vpop.trf.xlu0 }
 0x543   : > { %2180 = vmatprep.mubr.f32.mxu1 %v12952_v53  ;;  %v2669_v63 = vmax.f32 %v2667_v56, %v9152_v52  ;;  %v9156_v62 = vpop.f32.mrb[67].mxu0 }
 0x544   : > { %12955 = vst [vmem:[#allocation47_spill] sm:$0xff] %v9156_v62  ;;  %v2706_v39 = vmax.f32 %v2704_v3, %v9156_v62  ;;  %v9160_v6 = vpop.f32.mrb[68].mxu0  ;;  %v12974_v62 = vld [vmem:[#allocation45_spill] sm:$0xff] }
 0x545   : > { %v2670_v25 = vmax.f32 %v2668_v40, %v9160_v6  ;;  %v9163_v59 = vpop.f32.mrb[69].mxu0 }
 0x546   : > { %2181 = vmatmul.mubr.f32.gmra.mrb[92].mxu1 %v12954_v16  ;;  %12957 = vst [vmem:[#allocation50_spill] sm:$0xff] %v9163_v59  ;;  %v2707_v47 = vmax.f32 %v2705_v20, %v9163_v59  ;;  %v9166_v2 = vpop.f32.mrb[70].mxu0  ;;  %v12962_v20 = vld [vmem:[#allocation39_spill] sm:$0xff]  ;;  %v12968_v59 = vld [vmem:[#allocation42_spill] sm:$0xff] }
 0x547   : > { %2186 = vmatprep.mubr.f32.mxu1 %v12956_v61  ;;  %v2671_v34 = vmax.f32 %v2669_v63, %v9166_v2  ;;  %v9170_v23 = vpop.f32.mrb[71].mxu0  ;;  %v12964_v61 = vld [vmem:[#allocation34_spill] sm:$0xff] }
 0x548   : > { %12959 = vst [vmem:[#allocation49_spill] sm:$0xff] %v9170_v23  ;;  %v2708_v14 = vmax.f32 %v2706_v39, %v9170_v23  ;;  %v9174_v8 = vpop.f32.mrb[72].mxu0  ;;  %v12966_v23 = vld [vmem:[#allocation41_spill] sm:$0xff] }
 0x549   : > { %v2672_v56 = vmax.f32 %v2670_v25, %v9174_v8  ;;  %v9177_v53 = vpop.f32.mrb[73].mxu0 }
 0x54a   : > { %2187 = vmatmul.mubr.f32.gmra.mrb[94].mxu1 %v12958_v1  ;;  %12961 = vst [vmem:[#allocation52_spill] sm:$0xff] %v9177_v53  ;;  %v2709_v3 = vmax.f32 %v2707_v47, %v9177_v53  ;;  %v9180_v40 = vpop.f32.mrb[74].mxu0 }
 0x54b   : > { %2192 = vmatprep.mubr.f32.mxu1 %v12960_v7  ;;  %v2673_v16 = vmax.f32 %v2671_v34, %v9180_v40  ;;  %v9184_v63 = vpop.f32.mrb[75].mxu0 }
 0x54c   : > { %12963 = vst [vmem:[#allocation51_spill] sm:$0xff] %v9184_v63  ;;  %v2710_v39 = vmax.f32 %v2708_v14, %v9184_v63  ;;  %v9188_v1 = vpop.f32.mrb[76].mxu0 }
 0x54d   : > { %v2674_v25 = vmax.f32 %v2672_v56, %v9188_v1  ;;  %v9191_v7 = vpop.f32.mrb[77].mxu0 }
 0x54e   : > { %2193 = vmatmul.mubr.f32.gmra.mrb[96].mxu1 %v12962_v20  ;;  %12965 = vst [vmem:[#allocation4_spill] sm:$0xff] %v9191_v7  ;;  %v2711_v47 = vmax.f32 %v2709_v3, %v9191_v7  ;;  %v9194_v53 = vpop.f32.mrb[78].mxu0 }
 0x54f   : > { %2198 = vmatprep.mubr.f32.mxu1 %v12964_v61  ;;  %v2675_v34 = vmax.f32 %v2673_v16, %v9194_v53  ;;  %v9198_v20 = vpop.f32.mrb[79].mxu0 }
 0x550   : > { %12967 = vst [vmem:[#allocation28_spill] sm:$0xff] %v9198_v20  ;;  %v2712_v14 = vmax.f32 %v2710_v39, %v9198_v20  ;;  %v9202_v61 = vpop.f32.mrb[80].mxu0  ;;  %v12972_v39 = vld [vmem:[#allocation46_spill] sm:$0xff] }
 0x551   : > { %v9205_v56 = vmax.f32 %v2674_v25, %v9202_v61  ;;  %v9207_v63 = vpop.f32.mrb[81].mxu0 }
 0x552   : > { %2199 = vmatmul.mubr.f32.gmra.mrb[98].mxu1 %v12966_v23  ;;  %12969 = vst [vmem:[#allocation3_spill] sm:$0xff] %v9207_v63  ;;  %v9210_v3 = vmax.f32 %v2711_v47, %v9207_v63  ;;  %v9212_v7 = vpop.f32.mrb[82].mxu0  ;;  %v12970_v23 = vld [vmem:[#allocation37_spill] sm:$0xff]  ;;  %v3402_v47 = vpop.trf.xlu0 }
 0x553   : > { %2204 = vmatprep.mubr.f32.mxu1 %v12968_v59  ;;  %v9216_v16 = vmax.f32 %v2675_v34, %v9212_v7  ;;  %v9218_v59 = vpop.f32.mrb[83].mxu0  ;;  %v12975_v34 = vmov 0.0  }
 0x554   : > { %12971 = vst [vmem:[#allocation32_spill] sm:$0xff] %v9218_v59  ;;  %v9222_v20 = vmax.f32 %v2712_v14, %v9218_v59  ;;  %v9224_v25 = vpop.f32.mrb[84].mxu0  ;;  %v12977_v14 = vld [vmem:[#allocation6_spill] sm:$0xff]  ;;  %v12978_v59 = vld [vmem:[#allocation15_spill] sm:$0xff] }
 0x555   : > { %v9228_v63 = vpop.f32.mrb[85].mxu0 }
 0x556   : > { %2205 = vmatmul.mubr.f32.gmra.mrb[100].mxu1 %v12970_v23  ;;  %12973 = vst [vmem:[#allocation10_spill] sm:$0xff] %v9228_v63  ;;  %v12981_v23 = vld [vmem:[#allocation17_spill] sm:$0xff] }
 0x557   : > { %2210 = vmatprep.mubr.f32.mxu1 %v12972_v39  ;;  %v12976_v39 = vld [vmem:[#allocation9_spill] sm:$0xff] }
 0x55a   : > { %2211 = vmatmul.mubr.f32.gmra.mrb[102].mxu1 %v12974_v62  ;;  %v12980_v62 = vld [vmem:[#allocation16_spill] sm:$0xff] }
 0x55b   : > { %2643 = vmatprep.mubr.f32.mxu1 %v12975_v34 }
 0x55e   : > { %6114 = vmatmul.mubr.msk.f32.vlgmr.msra.gmra.mrb[104].mxu1 %vm1175_vm2, %v2296_v48  ;;  %v3403_v48 = vpop.trf.xlu0 }
 0x55f   : > { %3113 = vmatpush1.msra.mxu1 %v12976_v39  ;;  %3176 = vmatprep.mubr.f32.mxu1 %v12975_v34  ;;  %v12982_v39 = vld [vmem:[#allocation18_spill] sm:$0xff] }
 0x560   : > { %3546 = vmatprep.subr.mxu1 %v12977_v14 }
 0x562   : > { %6115 = vmatmul.mubr.msk.f32.vlgmr.msra.gmra.mrb[106].mxu1 %vm1175_vm2, %v12978_v59  ;;  %v3404_v59 = vpop.trf.xlu0 }
 0x563   : > { %3547 = vmatpush1.msra.mxu1 %v12979_v54  ;;  %3182 = vmatprep.mubr.f32.mxu1 %v12975_v34  ;;  %v12983_v54 = vld [vmem:[#allocation19_spill] sm:$0xff] }
 0x566   : > { %6116 = vmatmul.mubr.msk.f32.gmra.mrb[108].mxu1 %vm1175_vm2, %v12980_v62  ;;  %v3405_v14 = vpop.trf.xlu0  ;;  %v12984_v62 = vld [vmem:[#allocation20_spill] sm:$0xff] }
 0x567   : > { %3188 = vmatprep.mubr.f32.mxu1 %v12975_v34 }
 0x56a   : > { %6117 = vmatmul.mubr.msk.f32.gmra.mrb[110].mxu1 %vm1175_vm2, %v12981_v23  ;;  %v12985_v23 = vld [vmem:[#allocation21_spill] sm:$0xff]  ;;  %v3406_v44 = vpop.trf.xlu0 }
 0x56b   : > { %3194 = vmatprep.mubr.f32.mxu1 %v12975_v34 }
 0x56e   : > { %6118 = vmatmul.mubr.msk.f32.gmra.mrb[112].mxu1 %vm1175_vm2, %v12982_v39  ;;  %v3079_v39 = vpop.trf.xlu1 }
 0x56f   : > { %3200 = vmatprep.mubr.f32.mxu1 %v12975_v34 }
 0x572   : > { %6119 = vmatmul.mubr.msk.f32.gmra.mrb[114].mxu1 %vm1175_vm2, %v12983_v54  ;;  %v3407_v54 = vpop.trf.xlu0 }
 0x573   : > { %3206 = vmatprep.mubr.f32.mxu1 %v12975_v34 }
 0x576   : > { %6120 = vmatmul.mubr.msk.f32.gmra.mrb[116].mxu1 %vm1175_vm2, %v12984_v62  ;;  %v3408_v62 = vpop.trf.xlu0 }
 0x577   : > { %3212 = vmatprep.mubr.f32.mxu1 %v12975_v34 }
 0x57a   : > { %6121 = vmatmul.mubr.msk.f32.gmra.mrb[118].mxu1 %vm1175_vm2, %v12985_v23  ;;  %v3409_v23 = vpop.trf.xlu0 }
 0x57b   : > { %3218 = vmatprep.mubr.f32.mxu1 %v12975_v34 }
 0x57e   : > { %6122 = vmatmul.mubr.msk.f32.gmra.mrb[120].mxu1 %vm1175_vm2, %v3079_v39  ;;  %v3410_v39 = vpop.trf.xlu0 }
 0x57f   : > { %3610 = vmatprep.mubr.f32.mxu1 %v12975_v34 }
 0x582   : > { %6123 = vmatmul.mubr.msk.f32.vlgmr.msra.gmra.mrb[122].mxu1 %vm1175_vm2, %v3402_v47  ;;  %v3411_v47 = vpop.trf.xlu0 }
 0x583   : > { %3616 = vmatprep.mubr.f32.mxu1 %v12975_v34 }
 0x586   : > { %6124 = vmatmul.mubr.msk.f32.gmra.mrb[124].mxu1 %vm1175_vm2, %v3403_v48  ;;  %v3412_v48 = vpop.trf.xlu0 }
 0x587   : > { %3622 = vmatprep.mubr.f32.mxu1 %v12975_v34 }
 0x58a   : > { %6125 = vmatmul.mubr.msk.f32.gmra.mrb[126].mxu1 %vm1175_vm2, %v3404_v59  ;;  %v3413_v59 = vpop.trf.xlu0 }
 0x58b   : > { %3628 = vmatprep.mubr.f32.mxu1 %v12975_v34 }
 0x58e   : > { %6126 = vmatmul.mubr.msk.f32.gmra.mrb[128].mxu1 %vm1175_vm2, %v3405_v14 }
 0x58f   : > { %3634 = vmatprep.mubr.f32.mxu1 %v12975_v34 }
 0x592   : > { %6127 = vmatmul.mubr.msk.f32.gmra.mrb[130].mxu1 %vm1175_vm2, %v3406_v44  ;;  %v3434_v44 = vpop.trf.xlu1 }
 0x593   : > { %3640 = vmatprep.mubr.f32.mxu1 %v12975_v34 }
 0x596   : > { %6128 = vmatmul.mubr.msk.f32.gmra.mrb[132].mxu1 %vm1175_vm2, %v3407_v54  ;;  %v3435_v14 = vpop.trf.xlu1  ;;  %v3414_v54 = vpop.trf.xlu0 }
 0x597   : > { %3646 = vmatprep.mubr.f32.mxu1 %v12975_v34 }
 0x59a   : > { %6129 = vmatmul.mubr.msk.f32.gmra.mrb[134].mxu1 %vm1175_vm2, %v3408_v62  ;;  %v3436_v62 = vpop.trf.xlu1 }
 0x59b   : > { %3652 = vmatprep.mubr.f32.mxu1 %v12975_v34 }
 0x59e   : > { %6130 = vmatmul.mubr.msk.f32.gmra.mrb[136].mxu1 %vm1175_vm2, %v3409_v23  ;;  %v3415_v23 = vpop.trf.xlu0 }
 0x59f   : > { %3658 = vmatprep.mubr.f32.mxu1 %v12975_v34 }
 0x5a2   : > { %6131 = vmatmul.mubr.msk.f32.gmra.mrb[138].mxu1 %vm1175_vm2, %v3410_v39  ;;  %v3437_v39 = vpop.trf.xlu1 }
 0x5a3   : > { %3664 = vmatprep.mubr.f32.mxu1 %v12975_v34 }
 0x5a6   : > { %6132 = vmatmul.mubr.msk.f32.gmra.mrb[140].mxu1 %vm1175_vm2, %v3411_v47  ;;  %v3416_v47 = vpop.trf.xlu0 }
 0x5a7   : > { %3670 = vmatprep.mubr.f32.mxu1 %v12975_v34 }
 0x5aa   : > { %6133 = vmatmul.mubr.msk.f32.gmra.mrb[142].mxu1 %vm1175_vm2, %v3412_v48  ;;  %v3438_v48 = vpop.trf.xlu1 }
 0x5ab   : > { %3676 = vmatprep.mubr.f32.mxu1 %v12975_v34 }
 0x5ae   : > { %6134 = vmatmul.mubr.msk.f32.gmra.mrb[144].mxu1 %vm1175_vm2, %v3413_v59  ;;  %v3417_v59 = vpop.trf.xlu0  ;;  %v3439_v5 = vpop.trf.xlu1 }
 0x5af   : > { %3682 = vmatprep.mubr.f32.mxu1 %v12975_v34 }
 0x5b2   : > { %6135 = vmatmul.mubr.msk.f32.gmra.mrb[146].mxu1 %vm1175_vm2, %v3414_v54  ;;  %v3440_v54 = vpop.trf.xlu1 }
 0x5b3   : > { %3688 = vmatprep.mubr.f32.mxu1 %v12975_v34 }
 0x5b6   : > { %6136 = vmatmul.mubr.msk.f32.gmra.mrb[148].mxu1 %vm1175_vm2, %v3415_v23  ;;  %v3441_v23 = vpop.trf.xlu1 }
 0x5b7   : > { %3694 = vmatprep.mubr.f32.mxu1 %v12975_v34 }
 0x5ba   : > { %6137 = vmatmul.mubr.msk.f32.gmra.mrb[150].mxu1 %vm1175_vm2, %v3416_v47  ;;  %v3442_v47 = vpop.trf.xlu1 }
 0x5bb   : > { %3700 = vmatprep.mubr.f32.mxu1 %v12975_v34 }
 0x5be   : > { %6138 = vmatmul.mubr.msk.f32.gmra.mrb[152].mxu1 %vm1175_vm2, %v3417_v59 }
 0x5bf   : > { %3706 = vmatprep.mubr.f32.mxu1 %v12975_v34 }
 0x5c2   : > { %6139 = vmatmul.mubr.msk.f32.gmra.mrb[154].mxu1 %vm1175_vm2, %v3434_v44  ;;  %v3443_v44 = vpop.trf.xlu1 }
 0x5c3   : > { %3712 = vmatprep.mubr.f32.mxu1 %v12975_v34 }
 0x5c6   : > { %6140 = vmatmul.mubr.msk.f32.gmra.mrb[156].mxu1 %vm1175_vm2, %v3435_v14  ;;  %v3444_v14 = vpop.trf.xlu1 }
 0x5c7   : > { %3718 = vmatprep.mubr.f32.mxu1 %v12975_v34 }
 0x5ca   : > { %6141 = vmatmul.mubr.msk.f32.gmra.mrb[158].mxu1 %vm1175_vm2, %v3436_v62  ;;  %v3445_v62 = vpop.trf.xlu1 }
 0x5cb   : > { %3724 = vmatprep.mubr.f32.mxu1 %v12975_v34 }
 0x5ce   : > { %6142 = vmatmul.mubr.msk.f32.gmra.mrb[160].mxu1 %vm1175_vm2, %v3437_v39 }
 0x5cf   : > { %3730 = vmatprep.mubr.f32.mxu1 %v12975_v34 }
 0x5d2   : > { %6143 = vmatmul.mubr.msk.f32.gmra.mrb[162].mxu1 %vm1175_vm2, %v3438_v48 }
 0x5d3   : > { %3736 = vmatprep.mubr.f32.mxu1 %v12975_v34 }
 0x5d6   : > { %6144 = vmatmul.mubr.msk.f32.gmra.mrb[164].mxu1 %vm1175_vm2, %v3439_v5  ;;  %v3446_v5 = vpop.trf.xlu1 }
 0x5d7   : > { %3742 = vmatprep.mubr.f32.mxu1 %v12975_v34 }
 0x5da   : > { %6145 = vmatmul.mubr.msk.f32.gmra.mrb[166].mxu1 %vm1175_vm2, %v3440_v54  ;;  %v3447_v39 = vpop.trf.xlu1 }
 0x5db   : > { %3748 = vmatprep.mubr.f32.mxu1 %v12975_v34 }
 0x5de   : > { %6146 = vmatmul.mubr.msk.f32.gmra.mrb[168].mxu1 %vm1175_vm2, %v3441_v23  ;;  %v3448_v48 = vpop.trf.xlu1 }
 0x5df   : > { %3754 = vmatprep.mubr.f32.mxu1 %v12975_v34 }
 0x5e2   : > { %6147 = vmatmul.mubr.msk.f32.gmra.mrb[170].mxu1 %vm1175_vm2, %v3442_v47  ;;  %v3449_v59 = vpop.trf.xlu1 }
 0x5e3   : > { %3760 = vmatprep.mubr.f32.mxu1 %v12975_v34 }
 0x5e6   : > { %6148 = vmatmul.mubr.msk.f32.gmra.mrb[172].mxu1 %vm1175_vm2, %v3443_v44 }
 0x5e7   : > { %3766 = vmatprep.mubr.f32.mxu1 %v12975_v34 }
 0x5ea   : > { %6149 = vmatmul.mubr.msk.f32.gmra.mrb[174].mxu1 %vm1175_vm2, %v3444_v14 }
 0x5eb   : > { %3772 = vmatprep.mubr.f32.mxu1 %v12975_v34 }
 0x5ee   : > { %6150 = vmatmul.mubr.msk.f32.gmra.mrb[176].mxu1 %vm1175_vm2, %v3445_v62 }
 0x5ef   : > { %3778 = vmatprep.mubr.f32.mxu1 %v12975_v34 }
 0x5f2   : > { %6151 = vmatmul.mubr.msk.f32.gmra.mrb[178].mxu1 %vm1175_vm2, %v3446_v5 }
 0x5f3   : > { %3784 = vmatprep.mubr.f32.mxu1 %v12975_v34 }
 0x5f6   : > { %6152 = vmatmul.mubr.msk.f32.gmra.mrb[180].mxu1 %vm1175_vm2, %v3447_v39 }
 0x5f7   : > { %3790 = vmatprep.mubr.f32.mxu1 %v12975_v34 }
 0x5fa   : > { %6153 = vmatmul.mubr.msk.f32.gmra.mrb[182].mxu1 %vm1175_vm2, %v3448_v48 }
 0x5fb   : > { %3796 = vmatprep.mubr.f32.mxu1 %v12975_v34 }
 0x5fe   : > { %6154 = vmatmul.mubr.msk.f32.gmra.mrb[184].mxu1 %vm1175_vm2, %v3449_v59 }
 0x611   : > { %v9325_v54 = vpop.f32.mrb[88].mxu1 }
 0x612   : > { %12986 = vst [vmem:[#allocation31_spill] sm:$0xff] %v9325_v54  ;;  %v9327_v23 = vpop.f32.mrb[89].mxu1 }
 0x613   : > { %12987 = vst [vmem:[#allocation35_spill] sm:$0xff] %v9327_v23 }
 0x615   : > { %v9329_v47 = vpop.f32.mrb[90].mxu1 }
 0x616   : > { %12988 = vst [vmem:[#allocation33_spill] sm:$0xff] %v9329_v47  ;;  %v9331_v44 = vpop.f32.mrb[91].mxu1 }
 0x617   : > { %12989 = vst [vmem:[#allocation38_spill] sm:$0xff] %v9331_v44 }
 0x619   : > { %v9333_v14 = vpop.f32.mrb[92].mxu1 }
 0x61a   : > { %12990 = vst [vmem:[#allocation36_spill] sm:$0xff] %v9333_v14  ;;  %v9335_v62 = vpop.f32.mrb[93].mxu1 }
 0x61b   : > { %12991 = vst [vmem:[#allocation40_spill] sm:$0xff] %v9335_v62 }
 0x61d   : > { %v9337_v5 = vpop.f32.mrb[94].mxu1 }
 0x61e   : > { %12992 = vst [vmem:[#allocation39_spill] sm:$0xff] %v9337_v5  ;;  %v9339_v39 = vpop.f32.mrb[95].mxu1 }
 0x61f   : > { %12993 = vst [vmem:[#allocation34_spill] sm:$0xff] %v9339_v39 }
 0x621   : > { %v9341_v48 = vpop.f32.mrb[96].mxu1 }
 0x622   : > { %12994 = vst [vmem:[#allocation41_spill] sm:$0xff] %v9341_v48  ;;  %v9343_v34 = vpop.f32.mrb[97].mxu1 }
 0x623   : > { %12995 = vst [vmem:[#allocation42_spill] sm:$0xff] %v9343_v34 }
 0x625   : > { %v9345_v59 = vpop.f32.mrb[98].mxu1 }
 0x626   : > { %12996 = vst [vmem:[#allocation37_spill] sm:$0xff] %v9345_v59  ;;  %v9347_v54 = vpop.f32.mrb[99].mxu1 }
 0x627   : > { %12997 = vst [vmem:[#allocation46_spill] sm:$0xff] %v9347_v54  ;;  %v13003_v54 = vmax.f32 %v9205_v56, %v9224_v25 }
 0x629   : > { %v9349_v23 = vpop.f32.mrb[100].mxu1 }
 0x62a   : > { %12998 = vst [vmem:[#allocation45_spill] sm:$0xff] %v9349_v23  ;;  %v9351_v47 = vpop.f32.mrb[101].mxu1 }
 0x62b   : > { %12999 = vst [vmem:[#allocation9_spill] sm:$0xff] %v9351_v47  ;;  %v13004_v47 = vmax.f32 %v9210_v3, %v9228_v63 }
 0x62d   : > { %v9353_v44 = vpop.f32.mrb[102].mxu1 }
 0x62e   : > { %13000 = vst [vmem:[#allocation6_spill] sm:$0xff] %v9353_v44  ;;  %v9355_v14 = vpop.f32.mrb[103].mxu1 }
 0x62f   : > { %13001 = vst [vmem:[#allocation15_spill] sm:$0xff] %v9355_v14 }
 0x631   : > { %v9357_v62 = vpop.f32.mrb[104].mxu1 }
 0x632   : > { %v2679_v39 = vmax.f32 %v9216_v16, %v9357_v62  ;;  %v9361_v48 = vpop.f32.mrb[105].mxu1 }
 0x633   : > { %13002 = vst [vmem:[#allocation5_spill] sm:$0xff] %v9361_v48  ;;  %v2716_v59 = vmax.f32 %v9222_v20, %v9361_v48 }
 0x634   : > { %v2680_v23 = vmax.f32 %v13003_v54, %v2679_v39 }
 0x635   : > { %v2717_v44 = vmax.f32 %v13004_v47, %v2716_v59 }
 0x636   : > { %v2681_v34 = vrot.slane %v2680_v23, 4 }
 0x637   : > { %v2718_v14 = vrot.slane %v2717_v44, 4 }
 0x638   : > { %v2682_v5 = vmax.f32 %v2680_v23, %v2681_v34 }
 0x639   : > { %v2719_v60 = vmax.f32 %v2717_v44, %v2718_v14 }
 0x63a   : > { %v2683_v4 = vrot.slane %v2682_v5, 2 }
 0x63b   : > { %v2720_v21 = vrot.slane %v2719_v60, 2 }
 0x63c   : > { %v2684_v16 = vmax.f32 %v2682_v5, %v2683_v4  ;;  %v9383_v4 = vpop.f32.mrb[106].mxu1 }
 0x63d   : > { %v2721_v42 = vmax.f32 %v2719_v60, %v2720_v21  ;;  %13005 = vst [vmem:[#allocation16_spill] sm:$0xff] %v9383_v4  ;;  %v13047_v4 = vld [vmem:[#allocation28_spill] sm:$0xff] }
 0x63e   : > { %v2685_v27 = vrot.slane %v2684_v16, 1 }
 0x63f   : > { %v2722_v13 = vrot.slane %v2721_v42, 1 }
 0x640   : > { %v9371_v29 = vmax.f32 %v2684_v16, %v2685_v27 }
 0x641   : > { %v9373_v20 = vmax.f32 %v2721_v42, %v2722_v13  ;;  %v3180_v42 = vpop.f32.mrb[107].mxu1 }
 0x642   : > { %v2724_v56 = vsub.f32 %v8977_v19, %v9371_v29  ;;  %v2726_v3 = vsub.f32 %v8984_v33, %v9371_v29  ;;  %v2728_v34 = vsub.f32 %v8991_v43, %v9371_v29  ;;  %v2730_v54 = vsub.f32 %v8999_v26, %v9371_v29  ;;  %3289 = vmatprep.mubr.f32.mxu0 %v3180_v42 }
 0x643   : > { %v2732_v27 = vsub.f32 %v9010_v31, %v9371_v29  ;;  %v2734_v13 = vsub.f32 %v9016_v0, %v9371_v29  ;;  %v2736_v19 = vsub.f32 %v9025_v38, %v9371_v29  ;;  %v2738_v33 = vsub.f32 %v9034_v24, %v9371_v29  ;;  %v9401_v0 = vpop.f32.mrb[108].mxu1 }
 0x644   : > { %v2740_v43 = vsub.f32 %v9043_v15, %v9371_v29  ;;  %v2742_v26 = vsub.f32 %v9052_v58, %v9371_v29  ;;  %13006 = vst [vmem:[#allocation17_spill] sm:$0xff] %v9401_v0  ;;  %v9411_v23 = vpop.f32.mrb[109].mxu1  ;;  %v2788_v59 = vmul.f32 1.442695, %v2724_v56  ;;  %v2792_v24 = vmul.f32 1.442695, %v2726_v3 }
 0x645   : > { %13007 = vst [vmem:[#allocation18_spill] sm:$0xff] %v9411_v23  ;;  %v9421_v39 = vpop.f32.mrb[110].mxu1  ;;  %v2796_v38 = vmul.f32 1.442695, %v2728_v34  ;;  %v2800_v44 = vmul.f32 1.442695, %v2730_v54  ;;  %v13028_v56 = vsub.f32 %v9061_v18, %v9371_v29 }
 0x646   : > { %13008 = vst [vmem:[#allocation19_spill] sm:$0xff] %v9421_v39  ;;  %v9431_v47 = vpop.f32.mrb[111].mxu1  ;;  %6857 = vpow2.f32 %v2788_v59  ;;  %v2804_v31 = vmul.f32 1.442695, %v2732_v27  ;;  %v2808_v14 = vmul.f32 1.442695, %v2734_v13 }
 0x647   : > { %13009 = vst [vmem:[#allocation20_spill] sm:$0xff] %v9431_v47  ;;  %v9441_v60 = vpop.f32.mrb[112].mxu1  ;;  %6859 = vpow2.f32 %v2792_v24  ;;  %v2812_v5 = vmul.f32 1.442695, %v2736_v19  ;;  %v2816_v21 = vmul.f32 1.442695, %v2738_v33 }
 0x648   : > { %13010 = vst [vmem:[#allocation21_spill] sm:$0xff] %v9441_v60  ;;  %v9451_v15 = vpop.f32.mrb[113].mxu1  ;;  %6861 = vpow2.f32 %v2796_v38  ;;  %v2820_v19 = vmul.f32 1.442695, %v2740_v43  ;;  %v13017_v54 = vld [vmem:[#allocation43_spill] sm:$0xff]  ;;  %v13018_v24 = vld [vmem:[#allocation44_spill] sm:$0xff] }
 0x649   : > { %13011 = vst [vmem:[#allocation53_spill] sm:$0xff] %v9451_v15  ;;  %6863 = vpow2.f32 %v2800_v44  ;;  %v9459_v3 = vpop.f32.mrb[114].mxu1  ;;  %v2824_v38 = vmul.f32 1.442695, %v2742_v26  ;;  %v13021_v59 = vld [vmem:[#allocation23_spill] sm:$0xff]  ;;  %v13024_v33 = vld [vmem:[#allocation24_spill] sm:$0xff] }
 0x64a   : > { %6865 = vpow2.f32 %v2804_v31  ;;  %13012 = vst [vmem:[#allocation54_spill] sm:$0xff] %v9459_v3  ;;  %v9467_v27 = vpop.f32.mrb[115].mxu1  ;;  %v13025_v58 = vld [vmem:[#allocation25_spill] sm:$0xff]  ;;  %v2828_v42 = vmul.f32 1.442695, %v13028_v56  ;;  %v13029_v60 = vld [vmem:[#allocation30_spill] sm:$0xff] }
 0x64b   : > { %6867 = vpow2.f32 %v2808_v14  ;;  %13013 = vst [vmem:[#allocation55_spill] sm:$0xff] %v9467_v27  ;;  %v9477_v44 = vpop.f32.mrb[116].mxu1  ;;  %v13030_v15 = vld [vmem:[#allocation26_spill] sm:$0xff]  ;;  %v13033_v3 = vld [vmem:[#allocation27_spill] sm:$0xff]  ;;  %v13034_v47 = vld [vmem:[#allocation48_spill] sm:$0xff] }
 0x64c   : > { %13015 = vst [vmem:[#allocation57_spill] sm:$0xff] %v9477_v44  ;;  %6869 = vpow2.f32 %v2812_v5  ;;  %v9487_v34 = vpop.f32.mrb[117].mxu1  ;;  %v13020_v5 = vld [vmem:[#allocation22_spill] sm:$0xff]  ;;  %v13035_v56 = vld [vmem:[#allocation47_spill] sm:$0xff] }
 0x64d   : > { %13019 = vst [vmem:[#allocation43_spill] sm:$0xff] %v9487_v34  ;;  %v9498_v16 = vpop.f32.mrb[118].mxu1  ;;  %6871 = vpow2.f32 %v2816_v21  ;;  %v13026_v34 = vld [vmem:[#allocation29_spill] sm:$0xff]  ;;  %v13037_v21 = vsub.f32 %v9070_v51, %v9371_v29 }
 0x64e   : > { %13022 = vst [vmem:[#allocation44_spill] sm:$0xff] %v9498_v16  ;;  %v9508_v27 = vpop.f32.mrb[119].mxu1  ;;  %6873 = vpow2.f32 %v2820_v19  ;;  %v13046_v19 = vsub.f32 %v9079_v22, %v9371_v29 }
 0x64f   : > { %13027 = vst [vmem:[#allocation23_spill] sm:$0xff] %v9508_v27  ;;  %v2832_v44 = vmul.f32 1.442695, %v13037_v21  ;;  %6875 = vpow2.f32 %v2824_v38 }
 0x650   : > { %v9469_v13 = vpop.eup %6857  ;;  %v2836_v27 = vmul.f32 1.442695, %v13046_v19  ;;  %6877 = vpow2.f32 %v2828_v42  ;;  %v13055_v42 = vsub.f32 %v9088_v17, %v9371_v29  ;;  %v13060_v17 = vsub.f32 %v9106_v32, %v9371_v29 }
 0x651   : > { %13014 = vst [vmem:[#allocation56_spill] sm:$0xff] %v9469_v13  ;;  %v9479_v14 = vpop.eup %6859  ;;  %v9518_v39 = vpop.f32.mrb[120].mxu1  ;;  %6879 = vpow2.f32 %v2832_v44  ;;  %v13065_v32 = vsub.f32 %v8982_v10, %v9373_v20 }
 0x652   : > { %13016 = vst [vmem:[#allocation58_spill] sm:$0xff] %v9479_v14  ;;  %v2916_v31 = vadd.f32 %v9479_v14, %v9469_v13  ;;  %v9500_v43 = vpop.eup %6861  ;;  %13031 = vst [vmem:[#allocation24_spill] sm:$0xff] %v9518_v39  ;;  %v9528_v0 = vpop.f32.mrb[121].mxu1  ;;  %v13043_v14 = vld [vmem:[#allocation51_spill] sm:$0xff]  ;;  %v2840_v23 = vmul.f32 1.442695, %v13055_v42  ;;  %6881 = vpow2.f32 %v2836_v27  ;;  %v13061_v42 = vsub.f32 %v9115_v11, %v9371_v29 }
 0x653   : > { %13023 = vst [vmem:[#allocation22_spill] sm:$0xff] %v9500_v43  ;;  %v9520_v26 = vpop.eup %6863  ;;  %13036 = vst [vmem:[#allocation29_spill] sm:$0xff] %v9528_v0 }
 0x654   : > { %v2917_v16 = vadd.f32 %v9500_v43, %v2916_v31  ;;  %13032 = vst [vmem:[#allocation25_spill] sm:$0xff] %v9520_v26  ;;  %v9540_v18 = vpop.eup %6865  ;;  %6883 = vpow2.f32 %v2840_v23 }
 0x655   : > { %v9538_v43 = vpop.f32.mrb[122].mxu1  ;;  %13041 = vst [vmem:[#allocation26_spill] sm:$0xff] %v9540_v18  ;;  %v9560_v51 = vpop.eup %6867 }
 0x656   : > { %v2918_v39 = vadd.f32 %v9520_v26, %v2917_v16  ;;  %13040 = vst [vmem:[#allocation30_spill] sm:$0xff] %v9538_v43  ;;  %v9548_v26 = vpop.f32.mrb[123].mxu1  ;;  %13050 = vst [vmem:[#allocation47_spill] sm:$0xff] %v9560_v51  ;;  %v9573_v0 = vpop.eup %6869 }
 0x657   : > { %13045 = vst [vmem:[#allocation27_spill] sm:$0xff] %v9548_v26  ;;  %13054 = vst [vmem:[#allocation59_spill] sm:$0xff] %v9573_v0  ;;  %v9581_v22 = vpop.eup %6871 }
 0x658   : > { %v2919_v13 = vadd.f32 %v9540_v18, %v2918_v39  ;;  %13057 = vst [vmem:[#allocation61_spill] sm:$0xff] %v9581_v22  ;;  %v13058_v39 = vsub.f32 %v9097_v49, %v9371_v29  ;;  %v9589_v44 = vpop.eup %6873 }
 0x659   : > { %v9558_v31 = vpop.f32.mrb[124].mxu1  ;;  %v9600_v49 = vpop.eup %6875 }
 0x65a   : > { %13049 = vst [vmem:[#allocation48_spill] sm:$0xff] %v9558_v31  ;;  %v9568_v19 = vpop.f32.mrb[125].mxu1  ;;  %v2920_v38 = vadd.f32 %v9560_v51, %v2919_v13  ;;  %v2844_v13 = vmul.f32 1.442695, %v13058_v39  ;;  %13063 = vst [vmem:[#allocation64_spill] sm:$0xff] %v9600_v49  ;;  %v9611_v11 = vpop.eup %6877 }
 0x65b   : > { %13052 = vst [vmem:[#allocation51_spill] sm:$0xff] %v9568_v19  ;;  %13067 = vst [vmem:[#allocation66_spill] sm:$0xff] %v9611_v11  ;;  %v9622_v10 = vpop.eup %6879 }
 0x65c   : > { %v2921_v21 = vadd.f32 %v9573_v0, %v2920_v38  ;;  %v2848_v38 = vmul.f32 1.442695, %v13060_v17  ;;  %v2852_v0 = vmul.f32 1.442695, %v13061_v42  ;;  %6885 = vpow2.f32 %v2844_v13  ;;  %13071 = vst [vmem:[#allocation68_spill] sm:$0xff] %v9622_v10 }
 0x65d   : > { %v9571_v18 = vpop.f32.mrb[126].mxu1  ;;  %v2790_v17 = vmul.f32 1.442695, %v13065_v32  ;;  %v13072_v32 = vsub.f32 %v9138_v45, %v9371_v29 }
 0x65e   : > { %13053 = vst [vmem:[#allocation28_spill] sm:$0xff] %v9571_v18  ;;  %v9579_v16 = vpop.f32.mrb[127].mxu1  ;;  %v2922_v51 = vadd.f32 %v9581_v22, %v2921_v21  ;;  %v13064_v21 = vsub.f32 %v9122_v46, %v9371_v29  ;;  %6887 = vpow2.f32 %v2848_v38  ;;  %v13069_v46 = vsub.f32 %v9131_v28, %v9371_v29 }
 0x65f   : > { %13056 = vst [vmem:[#allocation60_spill] sm:$0xff] %v9579_v16  ;;  %6889 = vpow2.f32 %v2852_v0  ;;  %v2864_v38 = vmul.f32 1.442695, %v13072_v32  ;;  %v13074_v0 = vsub.f32 %v9146_v9, %v9371_v29  ;;  %v3840_v45 = vmax.f32 %v9548_v26, %v9579_v16 }
 0x660   : > { %v2923_v27 = vadd.f32 %v9589_v44, %v2922_v51  ;;  %v2856_v39 = vmul.f32 1.442695, %v13064_v21  ;;  %v13068_v51 = vsub.f32 %v8986_v35, %v9373_v20  ;;  %v2860_v13 = vmul.f32 1.442695, %v13069_v46 }
 0x661   : > { %v9587_v48 = vpop.f32.mrb[128].mxu1  ;;  %v13073_v35 = vsub.f32 %v8995_v50, %v9373_v20  ;;  %v2868_v28 = vmul.f32 1.442695, %v13074_v0  ;;  %v3803_v50 = vmax.f32 %v9538_v43, %v9571_v18 }
 0x662   : > { %13059 = vst [vmem:[#allocation62_spill] sm:$0xff] %v9587_v48  ;;  %v9598_v63 = vpop.f32.mrb[129].mxu1  ;;  %v2924_v23 = vadd.f32 %v9600_v49, %v2923_v27  ;;  %v2794_v42 = vmul.f32 1.442695, %v13068_v51  ;;  %6891 = vpow2.f32 %v2856_v39  ;;  %v9639_v49 = vpop.eup %6881  ;;  %v3804_v9 = vmax.f32 %v9558_v31, %v9587_v48 }
 0x663   : > { %13062 = vst [vmem:[#allocation63_spill] sm:$0xff] %v9598_v63  ;;  %v2798_v51 = vmul.f32 1.442695, %v13073_v35  ;;  %6893 = vpow2.f32 %v2790_v17  ;;  %13077 = vst [vmem:[#allocation70_spill] sm:$0xff] %v9639_v49  ;;  %v13079_v17 = vsub.f32 %v9013_v12, %v9373_v20  ;;  %v9657_v0 = vpop.eup %6883  ;;  %v13083_v12 = vsub.f32 %v9152_v52, %v9371_v29 }
 0x664   : > { %v2925_v27 = vadd.f32 %v9611_v11, %v2924_v23  ;;  %v13075_v23 = vsub.f32 %v9003_v57, %v9373_v20  ;;  %6895 = vpow2.f32 %v2794_v42  ;;  %v3841_v42 = vmax.f32 %v9568_v19, %v9598_v63  ;;  %13081 = vst [vmem:[#allocation73_spill] sm:$0xff] %v9657_v0 }
 0x665   : > { %v9609_v22 = vpop.f32.mrb[130].mxu1  ;;  %6897 = vpow2.f32 %v2860_v13  ;;  %v2806_v32 = vmul.f32 1.442695, %v13079_v17  ;;  %v13086_v52 = vsub.f32 %v9160_v6, %v9371_v29  ;;  %v13089_v6 = vsub.f32 %v9166_v2, %v9371_v29 }
 0x666   : > { %13066 = vst [vmem:[#allocation65_spill] sm:$0xff] %v9609_v22  ;;  %v9620_v21 = vpop.f32.mrb[131].mxu1  ;;  %v2926_v46 = vadd.f32 %v9622_v10, %v2925_v27  ;;  %v2802_v11 = vmul.f32 1.442695, %v13075_v23  ;;  %6899 = vpow2.f32 %v2798_v51  ;;  %v3805_v23 = vmax.f32 %v3803_v50, %v9609_v22  ;;  %v9669_v19 = vpop.eup %6885 }
 0x667   : > { %13070 = vst [vmem:[#allocation67_spill] sm:$0xff] %v9620_v21  ;;  %v3842_v16 = vmax.f32 %v3840_v45, %v9620_v21  ;;  %6901 = vpow2.f32 %v2864_v38  ;;  %v13084_v51 = vsub.f32 %v9019_v30, %v9373_v20  ;;  %v13088_v30 = vsub.f32 %v9031_v37, %v9373_v20 }
 0x668   : > { %v2927_v57 = vadd.f32 %v9639_v49, %v2926_v46  ;;  %v2872_v46 = vmul.f32 1.442695, %v13083_v12  ;;  %6903 = vpow2.f32 %v2802_v11 }
 0x669   : > { %v9637_v39 = vpop.f32.mrb[132].mxu1  ;;  %v2810_v50 = vmul.f32 1.442695, %v13084_v51  ;;  %6905 = vpow2.f32 %v2868_v28 }
 0x66a   : > { %13076 = vst [vmem:[#allocation69_spill] sm:$0xff] %v9637_v39  ;;  %v9647_v27 = vpop.f32.mrb[133].mxu1  ;;  %v3806_v13 = vmax.f32 %v3804_v9, %v9637_v39  ;;  %v2928_v17 = vadd.f32 %v9657_v0, %v2927_v57  ;;  %v2876_v57 = vmul.f32 1.442695, %v13086_v52  ;;  %6907 = vpow2.f32 %v2806_v32 }
 0x66b   : > { %13078 = vst [vmem:[#allocation71_spill] sm:$0xff] %v9647_v27  ;;  %v3843_v63 = vmax.f32 %v3841_v42, %v9647_v27  ;;  %v9685_v27 = vpop.eup %6887  ;;  %6909 = vpow2.f32 %v2872_v46  ;;  %v13090_v32 = vsub.f32 %v9037_v55, %v9373_v20  ;;  %v13094_v55 = vsub.f32 %v9049_v36, %v9373_v20 }
 0x66c   : > { %v2929_v42 = vadd.f32 %v9669_v19, %v2928_v17  ;;  %v9691_v28 = vpop.eup %6889  ;;  %v2880_v17 = vmul.f32 1.442695, %v13089_v6  ;;  %6911 = vpow2.f32 %v2810_v50  ;;  %v13096_v36 = vsub.f32 %v9188_v1, %v9371_v29 }
 0x66d   : > { %v9655_v35 = vpop.f32.mrb[134].mxu1  ;;  %v9697_v51 = vpop.eup %6891  ;;  %v2818_v52 = vmul.f32 1.442695, %v13090_v32  ;;  %6913 = vpow2.f32 %v2876_v57  ;;  %v2822_v32 = vmul.f32 1.442695, %v13094_v55 }
 0x66e   : > { %13080 = vst [vmem:[#allocation72_spill] sm:$0xff] %v9655_v35  ;;  %v9662_v26 = vpop.f32.mrb[135].mxu1  ;;  %v3807_v45 = vmax.f32 %v3805_v23, %v9655_v35  ;;  %v2892_v55 = vmul.f32 1.442695, %v13096_v36 }
 0x66f   : > { %13082 = vst [vmem:[#allocation74_spill] sm:$0xff] %v9662_v26  ;;  %v3844_v9 = vmax.f32 %v3842_v16, %v9662_v26  ;;  %v2814_v16 = vmul.f32 1.442695, %v13088_v30  ;;  %v9704_v30 = vpop.eup %6893 }
 0x670   : > { %v9715_v50 = vpop.eup %6895 }
 0x671   : > { %v9676_v38 = vpop.f32.mrb[136].mxu1  ;;  %6915 = vpow2.f32 %v2814_v16 }
 0x672   : > { %13085 = vst [vmem:[#allocation75_spill] sm:$0xff] %v9676_v38  ;;  %v3808_v12 = vmax.f32 %v3806_v13, %v9676_v38  ;;  %v9683_v11 = vpop.f32.mrb[137].mxu1  ;;  %v2930_v13 = vadd.f32 %v9685_v27, %v2929_v42  ;;  %6917 = vpow2.f32 %v2880_v17 }
 0x673   : > { %13087 = vst [vmem:[#allocation76_spill] sm:$0xff] %v9683_v11  ;;  %v3845_v23 = vmax.f32 %v3843_v63, %v9683_v11  ;;  %v13092_v63 = vsub.f32 %v9174_v8, %v9371_v29  ;;  %v9723_v11 = vpop.eup %6897  ;;  %v13095_v8 = vsub.f32 %v9180_v40, %v9371_v29  ;;  %6919 = vpow2.f32 %v2818_v52 }
 0x674   : > { %v2931_v2 = vadd.f32 %v9691_v28, %v2930_v13  ;;  %v9731_v16 = vpop.eup %6899 }
 0x675   : > { %v9702_v37 = vpop.f32.mrb[138].mxu1  ;;  %v2884_v46 = vmul.f32 1.442695, %v13092_v63  ;;  %v2953_v63 = vadd.f32 %v9715_v50, %v9704_v30  ;;  %v9741_v40 = vpop.eup %6901 }
 0x676   : > { %13091 = vst [vmem:[#allocation77_spill] sm:$0xff] %v9702_v37  ;;  %v9711_v42 = vmax.f32 %v3807_v45, %v9702_v37  ;;  %v9713_v6 = vpop.f32.mrb[139].mxu1  ;;  %v2888_v45 = vmul.f32 1.442695, %v13095_v8  ;;  %v2932_v13 = vadd.f32 %v9697_v51, %v2931_v2  ;;  %v9750_v1 = vpop.eup %6903 }
 0x677   : > { %13093 = vst [vmem:[#allocation78_spill] sm:$0xff] %v9713_v6  ;;  %v9721_v57 = vmax.f32 %v3844_v9, %v9713_v6  ;;  %v13097_v9 = vsub.f32 %v9055_v41, %v9373_v20  ;;  %6921 = vpow2.f32 %v2884_v46  ;;  %v2954_v8 = vadd.f32 %v9731_v16, %v2953_v63  ;;  %v9758_v46 = vpop.eup %6905 }
 0x678   : > { %v2933_v2 = vadd.f32 %v9723_v11, %v2932_v13  ;;  %6923 = vpow2.f32 %v2822_v32  ;;  %v13100_v41 = vsub.f32 %v13017_v54, %v9373_v20  ;;  %v13101_v13 = vsub.f32 %v9194_v53, %v9371_v29 }
 0x679   : > { %v2826_v17 = vmul.f32 1.442695, %v13097_v9  ;;  %v9739_v6 = vpop.f32.mrb[140].mxu1  ;;  %6925 = vpow2.f32 %v2888_v45  ;;  %v2955_v9 = vadd.f32 %v9750_v1, %v2954_v8  ;;  %v13102_v54 = vsub.f32 %v9202_v61, %v9371_v29 }
 0x67a   : > { %13098 = vst [vmem:[#allocation79_spill] sm:$0xff] %v9739_v6  ;;  %v9746_v26 = vmax.f32 %v3808_v12, %v9739_v6  ;;  %v9748_v21 = vpop.f32.mrb[141].mxu1  ;;  %v2830_v52 = vmul.f32 1.442695, %v13100_v41  ;;  %v2896_v12 = vmul.f32 1.442695, %v13101_v13  ;;  %v2934_v63 = vadd.f32 %v9741_v40, %v2933_v2  ;;  %v9765_v6 = vpop.eup %6907 }
 0x67b   : > { %13099 = vst [vmem:[#allocation80_spill] sm:$0xff] %v9748_v21  ;;  %v9756_v36 = vmax.f32 %v3845_v23, %v9748_v21  ;;  %v2900_v32 = vmul.f32 1.442695, %v13102_v54  ;;  %6927 = vpow2.f32 %v2826_v17  ;;  %v13103_v23 = vsub.f32 %v13018_v24, %v9373_v20  ;;  %v9775_v21 = vpop.eup %6909 }
 0x67c   : > { %6929 = vpow2.f32 %v2892_v55  ;;  %v2935_v53 = vadd.f32 %v9758_v46, %v2934_v63  ;;  %v2956_v2 = vadd.f32 %v9765_v6, %v2955_v9  ;;  %v9783_v61 = vpop.eup %6911  ;;  %v13106_v24 = vsub.f32 %v13020_v5, %v9373_v20 }
 0x67d   : > { %v2834_v41 = vmul.f32 1.442695, %v13103_v23  ;;  %v9773_v45 = vpop.f32.mrb[142].mxu1  ;;  %6931 = vpow2.f32 %v2830_v52  ;;  %v9790_v55 = vpop.eup %6913  ;;  %v13107_v63 = vsub.f32 %v9212_v7, %v9371_v29  ;;  %v13108_v5 = vsub.f32 %v9224_v25, %v9371_v29 }
 0x67e   : > { %13104 = vst [vmem:[#allocation81_spill] sm:$0xff] %v9773_v45  ;;  %v3811_v8 = vmax.f32 %v9711_v42, %v9773_v45  ;;  %v9781_v13 = vpop.f32.mrb[143].mxu1  ;;  %v2838_v17 = vmul.f32 1.442695, %v13106_v24  ;;  %6933 = vpow2.f32 %v2896_v12  ;;  %v2936_v42 = vadd.f32 %v9775_v21, %v2935_v53  ;;  %v9797_v45 = vpop.eup %6915 }
 0x67f   : > { %13105 = vst [vmem:[#allocation82_spill] sm:$0xff] %v9781_v13  ;;  %v3848_v54 = vmax.f32 %v9721_v57, %v9781_v13  ;;  %v2904_v9 = vmul.f32 1.442695, %v13107_v63  ;;  %v2957_v23 = vadd.f32 %v9783_v61, %v2956_v2  ;;  %v2908_v52 = vmul.f32 1.442695, %v13108_v5  ;;  %v9807_v13 = vpop.eup %6917 }
 0x680   : > { %6935 = vpow2.f32 %v2834_v41  ;;  %v13109_v57 = vsub.f32 %v13021_v59, %v9373_v20  ;;  %v2937_v7 = vadd.f32 %v9790_v55, %v2936_v42  ;;  %v9815_v25 = vpop.eup %6919  ;;  %v13112_v59 = vsub.f32 %v13024_v33, %v9373_v20 }
 0x681   : > { %v9805_v12 = vpop.f32.mrb[144].mxu1  ;;  %6937 = vpow2.f32 %v2900_v32  ;;  %v2958_v53 = vadd.f32 %v9797_v45, %v2957_v23  ;;  %v9822_v32 = vpop.eup %6921  ;;  %v13113_v42 = vsub.f32 %v9357_v62, %v9371_v29  ;;  %v13114_v33 = vsub.f32 %v13025_v58, %v9373_v20 }
 0x682   : > { %v2842_v24 = vmul.f32 1.442695, %v13109_v57  ;;  %13110 = vst [vmem:[#allocation83_spill] sm:$0xff] %v9805_v12  ;;  %v3812_v2 = vmax.f32 %v9746_v26, %v9805_v12  ;;  %v9813_v63 = vpop.f32.mrb[145].mxu1  ;;  %6939 = vpow2.f32 %v2838_v17  ;;  %v2846_v41 = vmul.f32 1.442695, %v13112_v59  ;;  %v9829_v12 = vpop.eup %6923 }
 0x683   : > { %13111 = vst [vmem:[#allocation84_spill] sm:$0xff] %v9813_v63  ;;  %v3849_v5 = vmax.f32 %v9756_v36, %v9813_v63  ;;  %6941 = vpow2.f32 %v2904_v9  ;;  %v2912_v23 = vmul.f32 1.442695, %v13113_v42  ;;  %v2938_v26 = vadd.f32 %v9807_v13, %v2937_v7  ;;  %v9836_v36 = vpop.eup %6925 }
 0x684   : > { %v2959_v57 = vadd.f32 %v9815_v25, %v2958_v53  ;;  %6943 = vpow2.f32 %v2842_v24  ;;  %v2850_v17 = vmul.f32 1.442695, %v13114_v33  ;;  %v13117_v58 = vsub.f32 %v13026_v34, %v9373_v20 }
 0x685   : > { %v9834_v59 = vpop.f32.mrb[146].mxu1  ;;  %6945 = vpow2.f32 %v2908_v52  ;;  %v2939_v9 = vadd.f32 %v9822_v32, %v2938_v26  ;;  %v9845_v53 = vpop.eup %6927 }
 0x686   : > { %13115 = vst [vmem:[#allocation85_spill] sm:$0xff] %v9834_v59  ;;  %v2960_v29 = vadd.f32 %v9829_v12, %v2959_v57  ;;  %v9841_v62 = vmax.f32 %v3811_v8, %v9834_v59  ;;  %v9843_v7 = vpop.f32.mrb[147].mxu1  ;;  %6947 = vpow2.f32 %v2846_v41  ;;  %v2854_v24 = vmul.f32 1.442695, %v13117_v58  ;;  %v9853_v52 = vpop.eup %6929 }
 0x687   : > { %13116 = vst [vmem:[#allocation86_spill] sm:$0xff] %v9843_v7  ;;  %v9851_v42 = vmax.f32 %v3848_v54, %v9843_v7  ;;  %6949 = vpow2.f32 %v2912_v23  ;;  %v2940_v26 = vadd.f32 %v9836_v36, %v2939_v9  ;;  %v9857_v57 = vpop.eup %6931  ;;  %v13118_v41 = vsub.f32 %v13029_v60, %v9373_v20 }
 0x688   : > { %v2961_v8 = vadd.f32 %v9845_v53, %v2960_v29  ;;  %6951 = vpow2.f32 %v2850_v17  ;;  %v9864_v34 = vpop.eup %6933  ;;  %v13122_v17 = vsub.f32 %v13030_v15, %v9373_v20 }
 0x689   : > { %v2858_v33 = vmul.f32 1.442695, %v13118_v41  ;;  %v9862_v63 = vpop.f32.mrb[148].mxu1  ;;  %v2941_v54 = vadd.f32 %v9853_v52, %v2940_v26  ;;  %6953 = vpow2.f32 %v2854_v24 }
 0x68a   : > { %13119 = vst [vmem:[#allocation87_spill] sm:$0xff] %v9862_v63  ;;  %v2962_v58 = vadd.f32 %v9857_v57, %v2961_v8  ;;  %v3814_v23 = vmax.f32 %v3812_v2, %v9862_v63  ;;  %v9869_v9 = vpop.f32.mrb[149].mxu1  ;;  %v9871_v29 = vpop.eup %6935  ;;  %v2862_v60 = vmul.f32 1.442695, %v13122_v17  ;;  %v13124_v2 = vsub.f32 %v13033_v3, %v9373_v20 }
 0x68b   : > { %13120 = vst [vmem:[#allocation88_spill] sm:$0xff] %v9869_v9  ;;  %13121 = vst [vmem:[#allocation89_spill] sm:$0xff] %v9871_v29  ;;  %v3851_v41 = vmax.f32 %v3849_v5, %v9869_v9  ;;  %v9877_v7 = vpop.eup %6937  ;;  %v2942_v59 = vadd.f32 %v9864_v34, %v2941_v54  ;;  %6955 = vpow2.f32 %v2858_v33  ;;  %v13128_v3 = vsub.f32 %v13034_v47, %v9373_v20 }
 0x68c   : > { %v2963_v26 = vadd.f32 %v9871_v29, %v2962_v58  ;;  %v9881_v8 = vpop.eup %6939  ;;  %v2866_v63 = vmul.f32 1.442695, %v13124_v2  ;;  %6957 = vpow2.f32 %v2862_v60 }
 0x68d   : > { %13123 = vst [vmem:[#allocation90_spill] sm:$0xff] %v9881_v8  ;;  %v9886_v24 = vpop.f32.mrb[150].mxu1  ;;  %v9888_v37 = vpop.eup %6941  ;;  %v2943_v15 = vadd.f32 %v9877_v7, %v2942_v59  ;;  %v2870_v33 = vmul.f32 1.442695, %v13128_v3 }
 0x68e   : > { %13125 = vst [vmem:[#allocation91_spill] sm:$0xff] %v9886_v24  ;;  %v2964_v5 = vadd.f32 %v9881_v8, %v2963_v26  ;;  %v3815_v54 = vmax.f32 %v9841_v62, %v9886_v24  ;;  %v9894_v17 = vpop.f32.mrb[151].mxu1  ;;  %v9896_v58 = vpop.eup %6943  ;;  %6959 = vpow2.f32 %v2866_v63  ;;  %v13129_v62 = vsub.f32 %v13035_v56, %v9373_v20  ;;  %v13132_v63 = vld [vmem:[#allocation50_spill] sm:$0xff] }
 0x68f   : > { %13126 = vst [vmem:[#allocation92_spill] sm:$0xff] %v9894_v17  ;;  %13127 = vst [vmem:[#allocation93_spill] sm:$0xff] %v9896_v58  ;;  %v3852_v2 = vmax.f32 %v9851_v42, %v9894_v17  ;;  %v9903_v9 = vpop.eup %6945  ;;  %v2944_v59 = vadd.f32 %v9888_v37, %v2943_v15  ;;  %6961 = vpow2.f32 %v2870_v33  ;;  %v13133_v35 = vsub.f32 %v13132_v63, %v9373_v20 }
 0x690   : > { %v2965_v26 = vadd.f32 %v9896_v58, %v2964_v5  ;;  %v9907_v38 = vpop.eup %6947  ;;  %v2874_v60 = vmul.f32 1.442695, %v13129_v62 }
 0x691   : > { %v9912_v24 = vpop.f32.mrb[152].mxu1  ;;  %v9914_v47 = vpop.eup %6949  ;;  %v2945_v3 = vadd.f32 %v9903_v9, %v2944_v59  ;;  %v2878_v56 = vmul.f32 1.442695, %v13133_v35 }
 0x692   : > { %13130 = vst [vmem:[#allocation94_spill] sm:$0xff] %v9912_v24  ;;  %v2966_v42 = vadd.f32 %v9907_v38, %v2965_v26  ;;  %v3816_v17 = vmax.f32 %v3814_v23, %v9912_v24  ;;  %v9919_v15 = vpop.f32.mrb[153].mxu1  ;;  %v9921_v5 = vpop.eup %6951  ;;  %6963 = vpow2.f32 %v2874_v60  ;;  %v13134_v26 = vld [vmem:[#allocation49_spill] sm:$0xff] }
 0x693   : > { %13131 = vst [vmem:[#allocation95_spill] sm:$0xff] %v9919_v15  ;;  %v3853_v62 = vmax.f32 %v3851_v41, %v9919_v15  ;;  %v2946_v39 = vadd.f32 %v9914_v47, %v2945_v3  ;;  %v9929_v59 = vpop.eup %6953  ;;  %v13135_v23 = vsub.f32 %v13134_v26, %v9373_v20  ;;  %6965 = vpow2.f32 %v2878_v56  ;;  %v13138_v3 = vld [vmem:[#allocation52_spill] sm:$0xff] }
 0x694   : > { %v2967_v22 = vadd.f32 %v9921_v5, %v2966_v42  ;;  %v13139_v42 = vsub.f32 %v13138_v3, %v9373_v20 }
 0x695   : > { %v2882_v24 = vmul.f32 1.442695, %v13135_v23  ;;  %v9934_v48 = vpop.f32.mrb[154].mxu1  ;;  %v2947_v33 = vrot.slane %v2946_v39, 4  ;;  %v9940_v41 = vpop.eup %6955 }
 0x696   : > { %13136 = vst [vmem:[#allocation50_spill] sm:$0xff] %v9934_v48  ;;  %v2968_v18 = vadd.f32 %v9929_v59, %v2967_v22  ;;  %v3817_v35 = vmax.f32 %v3815_v54, %v9934_v48  ;;  %v9938_v63 = vpop.f32.mrb[155].mxu1  ;;  %v2886_v60 = vmul.f32 1.442695, %v13139_v42  ;;  %v9947_v31 = vpop.eup %6957  ;;  %v13140_v22 = vsub.f32 %v13043_v14, %v9373_v20 }
 0x697   : > { %13137 = vst [vmem:[#allocation49_spill] sm:$0xff] %v9938_v63  ;;  %v3854_v15 = vmax.f32 %v3852_v2, %v9938_v63  ;;  %v2948_v26 = vadd.f32 %v2947_v33, %v2946_v39  ;;  %6967 = vpow2.f32 %v2882_v24 }
 0x698   : > { %v2969_v23 = vadd.f32 %v9940_v41, %v2968_v18  ;;  %v2890_v54 = vmul.f32 1.442695, %v13140_v22  ;;  %v9958_v2 = vpop.eup %6959  ;;  %6969 = vpow2.f32 %v2886_v60  ;;  %v13143_v18 = vld [vmem:[#allocation4_spill] sm:$0xff] }
 0x699   : > { %v9952_v48 = vpop.f32.mrb[156].mxu1  ;;  %v2949_v43 = vrot.slane %v2948_v26, 2  ;;  %v13144_v39 = vsub.f32 %v13143_v18, %v9373_v20  ;;  %v9965_v63 = vpop.eup %6961 }
 0x69a   : > { %13141 = vst [vmem:[#allocation52_spill] sm:$0xff] %v9952_v48  ;;  %v2970_v56 = vadd.f32 %v9947_v31, %v2969_v23  ;;  %v3818_v3 = vmax.f32 %v3816_v17, %v9952_v48  ;;  %v9956_v42 = vpop.f32.mrb[157].mxu1  ;;  %6971 = vpow2.f32 %v2890_v54  ;;  %v13145_v17 = vsub.f32 %v13047_v4, %v9373_v20 }
 0x69b   : > { %13142 = vst [vmem:[#allocation96_spill] sm:$0xff] %v9956_v42  ;;  %v2894_v24 = vmul.f32 1.442695, %v13144_v39  ;;  %v3855_v33 = vmax.f32 %v3853_v62, %v9956_v42  ;;  %v2950_v14 = vadd.f32 %v2949_v43, %v2948_v26  ;;  %v13148_v43 = vld [vmem:[#allocation3_spill] sm:$0xff]  ;;  %v13150_v42 = vld [vmem:[#allocation32_spill] sm:$0xff] }
 0x69c   : > { %v2971_v22 = vadd.f32 %v9958_v2, %v2970_v56  ;;  %v2898_v23 = vmul.f32 1.442695, %v13145_v17  ;;  %v9976_v62 = vpop.eup %6963  ;;  %v13149_v26 = vsub.f32 %v13148_v43, %v9373_v20 }
 0x69d   : > { %v9970_v48 = vpop.f32.mrb[158].mxu1  ;;  %v2951_v0 = vrot.slane %v2950_v14, 1  ;;  %6973 = vpow2.f32 %v2894_v24  ;;  %v9983_v17 = vpop.eup %6965 }
 0x69e   : > { %13146 = vst [vmem:[#allocation4_spill] sm:$0xff] %v9970_v48  ;;  %v2972_v60 = vadd.f32 %v9965_v63, %v2971_v22  ;;  %v3819_v18 = vmax.f32 %v3817_v35, %v9970_v48  ;;  %v9974_v39 = vpop.f32.mrb[159].mxu1  ;;  %v2902_v54 = vmul.f32 1.442695, %v13149_v26  ;;  %6975 = vpow2.f32 %v2898_v23 }
 0x69f   : > { %13147 = vst [vmem:[#allocation97_spill] sm:$0xff] %v9974_v39  ;;  %v3856_v56 = vmax.f32 %v3854_v15, %v9974_v39  ;;  %v13151_v22 = vsub.f32 %v13150_v42, %v9373_v20  ;;  %v2952_v49 = vadd.f32 %v2951_v0, %v2950_v14  ;;  %v13154_v15 = vld [vmem:[#allocation10_spill] sm:$0xff]  ;;  %v13156_v0 = vld [vmem:[#allocation5_spill] sm:$0xff] }
 0x6a0   : > { %v2973_v4 = vadd.f32 %v9976_v62, %v2972_v60  ;;  %6977 = vpow2.f32 %v2902_v54  ;;  %v13155_v60 = vsub.f32 %v13154_v15, %v9373_v20  ;;  %v13157_v14 = vsub.f32 %v13156_v0, %v9373_v20 }
 0x6a1   : > { %v2906_v35 = vmul.f32 1.442695, %v13151_v22  ;;  %v9988_v48 = vpop.f32.mrb[160].mxu1  ;;  %v9994_v26 = vpop.eup %6967 }
 0x6a2   : > { %13152 = vst [vmem:[#allocation3_spill] sm:$0xff] %v9988_v48  ;;  %v2974_v24 = vadd.f32 %v9983_v17, %v2973_v4  ;;  %v3820_v58 = vmax.f32 %v3818_v3, %v9988_v48  ;;  %v9992_v43 = vpop.f32.mrb[161].mxu1  ;;  %v2910_v23 = vmul.f32 1.442695, %v13155_v60  ;;  %v10001_v22 = vpop.eup %6969  ;;  %v2914_v3 = vmul.f32 1.442695, %v13157_v14 }
 0x6a3   : > { %13153 = vst [vmem:[#allocation32_spill] sm:$0xff] %v9992_v43  ;;  %v3857_v39 = vmax.f32 %v3855_v33, %v9992_v43  ;;  %6979 = vpow2.f32 %v2906_v35 }
 0x6a4   : > { %v2975_v42 = vadd.f32 %v9994_v26, %v2974_v24  ;;  %6981 = vrcp.f32 %v2952_v49  ;;  %v10012_v60 = vpop.eup %6971 }
 0x6a5   : > { %v10006_v4 = vpop.f32.mrb[162].mxu1  ;;  %6983 = vpow2.f32 %v2910_v23 }
 0x6a6   : > { %13158 = vst [vmem:[#allocation10_spill] sm:$0xff] %v10006_v4  ;;  %v2976_v54 = vadd.f32 %v10001_v22, %v2975_v42  ;;  %v3821_v48 = vmax.f32 %v3819_v18, %v10006_v4  ;;  %v10010_v15 = vpop.f32.mrb[163].mxu1  ;;  %6985 = vpow2.f32 %v2914_v3 }
 0x6a7   : > { %13159 = vst [vmem:[#allocation5_spill] sm:$0xff] %v10010_v15  ;;  %v3858_v33 = vmax.f32 %v3856_v56, %v10010_v15  ;;  %v10016_v24 = vpop.eup %6973 }
 0x6a8   : > { %v2977_v35 = vadd.f32 %v10012_v60, %v2976_v54  ;;  %v10024_v18 = vpop.eup %6975 }
 0x6a9   : > { %v10018_v20 = vpop.f32.mrb[164].mxu1 }
 0x6aa   : > { %13160 = vst [vmem:[#allocation98_spill] sm:$0xff] %v10018_v20  ;;  %v2978_v49 = vadd.f32 %v10016_v24, %v2977_v35  ;;  %v3822_v42 = vmax.f32 %v3820_v58, %v10018_v20  ;;  %v10022_v0 = vpop.f32.mrb[165].mxu1  ;;  %v10028_v56 = vpop.eup %6977 }
 0x6ab   : > { %13161 = vst [vmem:[#allocation99_spill] sm:$0xff] %v10022_v0  ;;  %v3859_v14 = vmax.f32 %v3857_v39, %v10022_v0 }
 0x6ac   : > { %v2979_v23 = vadd.f32 %v10024_v18, %v2978_v49 }
 0x6ad   : > { %v10030_v54 = vpop.f32.mrb[166].mxu1  ;;  %v10035_v43 = vpop.eup %6979 }
 0x6ae   : > { %v2980_v3 = vadd.f32 %v10028_v56, %v2979_v23  ;;  %v10033_v15 = vpop.f32.mrb[167].mxu1  ;;  %v10037_v35 = vpop.eup %6981  ;;  %v3823_v20 = vmax.f32 %v3821_v48, %v10030_v54 }
 0x6af   : > { %13162 = vst [vmem:[#allocation100_spill] sm:$0xff] %v10033_v15  ;;  %v10041_v4 = vpop.eup %6983  ;;  %v3860_v39 = vmax.f32 %v3858_v33, %v10033_v15  ;;  %v10060_v33 = vmul.f32 %v10037_v35, %v9685_v27  ;;  %v10082_v27 = vmul.f32 %v10037_v35, %v9758_v46  ;;  %v10096_v46 = vmul.f32 %v10037_v35, %v9775_v21 }
 0x6b0   : > { %v2981_v58 = vadd.f32 %v10035_v43, %v2980_v3  ;;  %v10050_v10 = vpop.eup %6985  ;;  %v10055_v3 = vmul.f32 %v10037_v35, %v9669_v19  ;;  %v10074_v19 = vmul.f32 %v10037_v35, %v9723_v11  ;;  %v10108_v11 = vmul.f32 %v10037_v35, %v9822_v32 }
 0x6b1   : > { %v10044_v49 = vpop.f32.mrb[168].mxu1  ;;  %13169 = vst [vmem:[#allocation107_spill] sm:$0xff] %v10082_v27  ;;  %13171 = vst [vmem:[#allocation109_spill] sm:$0xff] %v10096_v46  ;;  %v10128_v32 = vmul.f32 %v10037_v35, %v9877_v7  ;;  %v10142_v7 = vmul.f32 %v10037_v35, %v9888_v37  ;;  %v10150_v21 = vmul.f32 %v10037_v35, %v9914_v47 }
 0x6b2   : > { %13163 = vst [vmem:[#allocation101_spill] sm:$0xff] %v10044_v49  ;;  %v2982_v0 = vadd.f32 %v10041_v4, %v2981_v58  ;;  %v3824_v23 = vmax.f32 %v3822_v42, %v10044_v49  ;;  %v10048_v8 = vpop.f32.mrb[169].mxu1  ;;  %v10064_v58 = vmul.f32 %v10037_v35, %v9691_v28  ;;  %v10068_v42 = vmul.f32 %v10037_v35, %v9697_v51 }
 0x6b3   : > { %13164 = vst [vmem:[#allocation102_spill] sm:$0xff] %v10048_v8  ;;  %v3861_v29 = vmax.f32 %v3859_v14, %v10048_v8  ;;  %13167 = vst [vmem:[#allocation105_spill] sm:$0xff] %v10074_v19  ;;  %v10104_v51 = vmul.f32 %v10037_v35, %v9807_v13  ;;  %v10124_v13 = vmul.f32 %v10037_v35, %v9864_v34 }
 0x6b4   : > { %v2983_v48 = vadd.f32 %v10050_v10, %v2982_v0  ;;  %13165 = vst [vmem:[#allocation103_spill] sm:$0xff] %v10064_v58  ;;  %v10078_v0 = vmul.f32 %v10037_v35, %v9741_v40  ;;  %13174 = vst [vmem:[#allocation112_spill] sm:$0xff] %v10108_v11  ;;  %v13191_v11 = vld [vmem:[#allocation22_spill] sm:$0xff] }
 0x6b5   : > { %v10070_v15 = vpop.f32.mrb[170].mxu1  ;;  %13173 = vst [vmem:[#allocation111_spill] sm:$0xff] %v10104_v51  ;;  %13177 = vst [vmem:[#allocation115_spill] sm:$0xff] %v10124_v13  ;;  %v13196_v51 = vld [vmem:[#allocation59_spill] sm:$0xff] }
 0x6b6   : > { %13166 = vst [vmem:[#allocation104_spill] sm:$0xff] %v10070_v15  ;;  %13168 = vst [vmem:[#allocation106_spill] sm:$0xff] %v10078_v0  ;;  %v2984_v28 = vrot.slane %v2983_v48, 4  ;;  %v3825_v14 = vmax.f32 %v3823_v20, %v10070_v15  ;;  %v10085_v8 = vpop.f32.mrb[171].mxu1  ;;  %v10100_v20 = vmul.f32 %v10037_v35, %v9790_v55  ;;  %v10120_v55 = vmul.f32 %v10037_v35, %v9853_v52 }
 0x6b7   : > { %13170 = vst [vmem:[#allocation108_spill] sm:$0xff] %v10085_v8  ;;  %v3862_v49 = vmax.f32 %v3860_v39, %v10085_v8  ;;  %v10112_v39 = vmul.f32 %v10037_v35, %v9836_v36  ;;  %13178 = vst [vmem:[#allocation116_spill] sm:$0xff] %v10128_v32 }
 0x6b8   : > { %13172 = vst [vmem:[#allocation110_spill] sm:$0xff] %v10100_v20  ;;  %v2985_v15 = vadd.f32 %v2984_v28, %v2983_v48  ;;  %13176 = vst [vmem:[#allocation114_spill] sm:$0xff] %v10120_v55 }
 0x6b9   : > { %13175 = vst [vmem:[#allocation113_spill] sm:$0xff] %v10112_v39  ;;  %v10114_v40 = vpop.f32.mrb[172].mxu1  ;;  %13180 = vst [vmem:[#allocation118_spill] sm:$0xff] %v10142_v7  ;;  %v2996_v39 = vmul.f32 %v10037_v35, %v13191_v11 }
 0x6ba   : > { %v2986_v48 = vrot.slane %v2985_v15, 2  ;;  %v3826_v36 = vmax.f32 %v3824_v23, %v10114_v40  ;;  %v10131_v28 = vpop.f32.mrb[173].mxu1  ;;  %v10146_v23 = vmul.f32 %v10037_v35, %v9903_v9  ;;  %13182 = vst [vmem:[#allocation120_spill] sm:$0xff] %v10150_v21 }
 0x6bb   : > { %13179 = vst [vmem:[#allocation117_spill] sm:$0xff] %v10131_v28  ;;  %v3863_v8 = vmax.f32 %v3861_v29, %v10131_v28 }
 0x6bc   : > { %13181 = vst [vmem:[#allocation119_spill] sm:$0xff] %v10146_v23  ;;  %v2987_v27 = vadd.f32 %v2986_v48, %v2985_v15  ;;  %v13190_v23 = vld [vmem:[#allocation58_spill] sm:$0xff] }
 0x6bd   : > { %v10152_v20 = vpop.f32.mrb[174].mxu1 }
 0x6be   : > { %13183 = vst [vmem:[#allocation121_spill] sm:$0xff] %v10152_v20  ;;  %v2988_v52 = vrot.slane %v2987_v27, 1  ;;  %v3827_v34 = vmax.f32 %v3825_v14, %v10152_v20  ;;  %v10157_v55 = vpop.f32.mrb[175].mxu1  ;;  %v13271_v20 = vld [vmem:[#allocation5_spill] sm:$0xff] }
 0x6bf   : > { %13184 = vst [vmem:[#allocation122_spill] sm:$0xff] %v10157_v55  ;;  %v3864_v9 = vmax.f32 %v3862_v49, %v10157_v55  ;;  %v13194_v55 = vld [vmem:[#allocation47_spill] sm:$0xff] }
 0x6c0   : > { %v2989_v15 = vadd.f32 %v2988_v52, %v2987_v27  ;;  %v3002_v28 = vmul.f32 %v10037_v35, %v13194_v55 }
 0x6c1   : > { %v10162_v48 = vpop.f32.mrb[176].mxu1 }
 0x6c2   : > { %6987 = vrcp.f32 %v2989_v15  ;;  %v3828_v47 = vmax.f32 %v3826_v36, %v10162_v48  ;;  %v10165_v13 = vpop.f32.mrb[177].mxu1  ;;  %v13189_v36 = vld [vmem:[#allocation56_spill] sm:$0xff] }
 0x6c3   : > { %13185 = vst [vmem:[#allocation123_spill] sm:$0xff] %v10165_v13  ;;  %v3865_v29 = vmax.f32 %v3863_v8, %v10165_v13  ;;  %v2992_v15 = vmul.f32 %v10037_v35, %v13189_v36  ;;  %v2994_v8 = vmul.f32 %v10037_v35, %v13190_v23  ;;  %v13193_v13 = vld [vmem:[#allocation26_spill] sm:$0xff] }
 0x6c5   : > { %v10168_v32 = vpop.f32.mrb[178].mxu1  ;;  %v6424_v46 = vpack.c.bf16 %v2994_v8, %v2992_v15 }
 0x6c6   : > { %13186 = vst [vmem:[#allocation124_spill] sm:$0xff] %v10168_v32  ;;  %v10171_v14 = vmax.f32 %v3827_v34, %v10168_v32  ;;  %v10173_v7 = vpop.f32.mrb[179].mxu1  ;;  %v13233_v32 = vld [vmem:[#allocation51_spill] sm:$0xff] }
 0x6c7   : > { %13187 = vst [vmem:[#allocation125_spill] sm:$0xff] %v10173_v7  ;;  %v3866_v37 = vmax.f32 %v3864_v9, %v10173_v7  ;;  %v13192_v9 = vld [vmem:[#allocation25_spill] sm:$0xff] }
 0x6c8   : > { %v2998_v7 = vmul.f32 %v10037_v35, %v13192_v9 }
 0x6c9   : > { %v10176_v49 = vpop.f32.mrb[180].mxu1 }
 0x6ca   : > { %v3830_v27 = vmax.f32 %v3828_v47, %v10176_v49  ;;  %v10179_v52 = vpop.f32.mrb[181].mxu1  ;;  %v3000_v47 = vmul.f32 %v10037_v35, %v13193_v13  ;;  %v6428_v19 = vpack.c.bf16 %v2998_v7, %v2996_v39 }
 0x6cb   : > { %13188 = vst [vmem:[#allocation126_spill] sm:$0xff] %v10179_v52  ;;  %v3867_v21 = vmax.f32 %v3865_v29, %v10179_v52 }
 0x6cc   : > { %v10186_v34 = vpop.eup %6987  ;;  %v6432_v0 = vpack.c.bf16 %v3002_v28, %v3000_v47 }
 0x6cd   : > { %v2993_v36 = vmul.f32 %v10186_v34, %v9704_v30  ;;  %v2995_v23 = vmul.f32 %v10186_v34, %v9715_v50  ;;  %v2997_v29 = vmul.f32 %v10186_v34, %v9731_v16  ;;  %v2999_v11 = vmul.f32 %v10186_v34, %v9750_v1  ;;  %v10204_v52 = vpop.f32.mrb[182].mxu1 }
 0x6ce   : > { %v3001_v13 = vmul.f32 %v10186_v34, %v9765_v6  ;;  %v3003_v55 = vmul.f32 %v10186_v34, %v9783_v61  ;;  %v10210_v9 = vpop.f32.mrb[183].mxu1  ;;  %v3005_v50 = vmul.f32 %v10186_v34, %v9797_v45  ;;  %v3007_v16 = vmul.f32 %v10186_v34, %v9815_v25  ;;  %v13197_v6 = vld [vmem:[#allocation61_spill] sm:$0xff] }
 0x6cf   : > { %13195 = vst [vmem:[#allocation56_spill] sm:$0xff] %v10210_v9  ;;  %v6422_v30 = vpack.c.bf16 %v2995_v23, %v2993_v36  ;;  %v10218_v1 = vmul.f32 %v10037_v35, %v13196_v51  ;;  %v3006_v58 = vmul.f32 %v10037_v35, %v13197_v6  ;;  %v6426_v61 = vpack.c.bf16 %v2999_v11, %v2997_v29 }
 0x6d0   : > { %v3009_v36 = vmul.f32 %v10186_v34, %v9829_v12  ;;  %v3011_v45 = vmul.f32 %v10186_v34, %v9845_v53  ;;  %v10228_v25 = vmul.f32 %v10186_v34, %v9907_v38  ;;  %v6430_v39 = vpack.c.bf16 %v3003_v55, %v3001_v13 }
 0x6d1   : > { %6423 = vmatprep.subr.bf16.mxu0 %v6422_v30  ;;  %v10230_v51 = vpop.f32.mrb[184].mxu1  ;;  %v10234_v28 = vmul.f32 %v10186_v34, %v9921_v5  ;;  %v10238_v7 = vmul.f32 %v10186_v34, %v9929_v59  ;;  %v10242_v12 = vmul.f32 %v10186_v34, %v9940_v41  ;;  %v6434_v38 = vpack.c.bf16 %v3007_v16, %v3005_v50  ;;  %v13198_v16 = vld [vmem:[#allocation64_spill] sm:$0xff] }
 0x6d2   : > { %6425 = vmatpush1.bf16.msra.mxu0 %v6424_v46  ;;  %v10244_v53 = vpop.f32.mrb[185].mxu1  ;;  %v10248_v46 = vmul.f32 %v10186_v34, %v9947_v31  ;;  %v10252_v5 = vmul.f32 %v10186_v34, %v9958_v2  ;;  %v3831_v59 = vmax.f32 %v10171_v14, %v10204_v52  ;;  %v3868_v8 = vmax.f32 %v3866_v37, %v10210_v9  ;;  %v13231_v31 = vld [vmem:[#allocation27_spill] sm:$0xff] }
 0x6d3   : > { %6427 = vmatprep.subr.bf16.mxu0 %v6426_v61  ;;  %v10263_v47 = vmul.f32 %v10186_v34, %v9965_v63  ;;  %v10269_v2 = vmul.f32 %v10186_v34, %v9976_v62  ;;  %v3832_v14 = vmax.f32 %v3830_v27, %v10230_v51  ;;  %v3869_v23 = vmax.f32 %v3867_v21, %v10244_v53 }
 0x6d4   : > { %v10275_v29 = vmul.f32 %v10186_v34, %v9983_v17  ;;  %v10279_v63 = vmul.f32 %v10186_v34, %v9994_v26  ;;  %v10283_v37 = vmul.f32 %v10186_v34, %v10001_v22  ;;  %v10287_v62 = vmul.f32 %v10186_v34, %v10012_v60  ;;  %v13223_v22 = vld [vmem:[#allocation52_spill] sm:$0xff] }
 0x6d5   : > { %v3833_v21 = vmax.f32 %v3831_v59, %v3832_v14  ;;  %v3870_v27 = vmax.f32 %v3868_v8, %v3869_v23  ;;  %v10293_v17 = vmul.f32 %v10186_v34, %v10016_v24  ;;  %v10301_v60 = vmul.f32 %v10186_v34, %v10024_v18  ;;  %v13200_v23 = vld [vmem:[#allocation66_spill] sm:$0xff]  ;;  %v13228_v18 = vld [vmem:[#allocation101_spill] sm:$0xff] }
 0x6d6   : > { %6429 = vmatpush1.bf16.msra.mxu0 %v6428_v19  ;;  %v10305_v11 = vmul.f32 %v10186_v34, %v10028_v56  ;;  %v10309_v24 = vmul.f32 %v10186_v34, %v10035_v43  ;;  %v10313_v30 = vmul.f32 %v10186_v34, %v10041_v4  ;;  %v3008_v50 = vmul.f32 %v10037_v35, %v9589_v44 }
 0x6d7   : > { %6431 = vmatprep.subr.bf16.mxu0 %v6430_v39  ;;  %v3834_v13 = vrot.slane %v3833_v21, 4  ;;  %v3871_v55 = vrot.slane %v3870_v27, 4  ;;  %v10321_v56 = vmul.f32 %v10186_v34, %v10050_v10  ;;  %v3010_v43 = vmul.f32 %v10037_v35, %v13198_v16  ;;  %v13199_v10 = vld [vmem:[#allocation89_spill] sm:$0xff] }
 0x6d8   : > { %v3013_v44 = vmul.f32 %v10186_v34, %v9857_v57  ;;  %v6438_v59 = vpack.c.bf16 %v3011_v45, %v3009_v36  ;;  %v13203_v36 = vld [vmem:[#allocation93_spill] sm:$0xff]  ;;  %v13229_v26 = vpack.c.bf16 %v10234_v28, %v10228_v25  ;;  %v13232_v41 = vpack.c.bf16 %v10060_v33, %v10055_v3 }
 0x6d9   : > { %v3835_v6 = vmax.f32 %v3833_v21, %v3834_v13  ;;  %v3872_v61 = vmax.f32 %v3870_v27, %v3871_v55  ;;  %v3012_v21 = vmul.f32 %v10037_v35, %v13200_v23  ;;  %v6440_v27 = vpack.c.bf16 %v3010_v43, %v3008_v50  ;;  %v13201_v13 = vld [vmem:[#allocation68_spill] sm:$0xff]  ;;  %v13202_v55 = vld [vmem:[#allocation90_spill] sm:$0xff] }
 0x6da   : > { %6433 = vmatpush1.bf16.msra.mxu0 %v6432_v0  ;;  %v6436_v0 = vpack.c.bf16 %v3006_v58, %v10218_v1  ;;  %v3014_v58 = vmul.f32 %v10037_v35, %v13201_v13  ;;  %v3017_v16 = vmul.f32 %v10186_v34, %v13202_v55  ;;  %v3019_v45 = vmul.f32 %v10186_v34, %v13203_v36  ;;  %v13207_v55 = vld [vmem:[#allocation48_spill] sm:$0xff] }
 0x6db   : > { %6435 = vmatprep.subr.bf16.mxu0 %v6434_v38  ;;  %v3015_v38 = vmul.f32 %v10186_v34, %v13199_v10  ;;  %v3836_v8 = vrot.slane %v3835_v6, 2  ;;  %v3873_v14 = vrot.slane %v3872_v61, 2  ;;  %v13204_v10 = vld [vmem:[#allocation70_spill] sm:$0xff]  ;;  %v13234_v25 = vpack.c.bf16 %v10242_v12, %v10238_v7 }
 0x6dc   : > { %v3016_v39 = vmul.f32 %v10037_v35, %v13204_v10  ;;  %v13206_v34 = vld [vmem:[#allocation30_spill] sm:$0xff]  ;;  %v13214_v10 = vld [vmem:[#allocation77_spill] sm:$0xff]  ;;  %v13237_v3 = vpack.c.bf16 %v10252_v5, %v10248_v46  ;;  %v13243_v46 = vld [vmem:[#allocation63_spill] sm:$0xff]  ;;  %v13279_v15 = vpack.c.bf16 %v10287_v62, %v10283_v37 }
 0x6dd   : > { %v3837_v1 = vmax.f32 %v3835_v6, %v3836_v8  ;;  %v3874_v57 = vmax.f32 %v3872_v61, %v3873_v14  ;;  %v6442_v23 = vpack.c.bf16 %v3015_v38, %v3013_v44  ;;  %v6444_v6 = vpack.c.bf16 %v3014_v58, %v3012_v21  ;;  %v13209_v38 = vld [vmem:[#allocation62_spill] sm:$0xff]  ;;  %v13212_v58 = vld [vmem:[#allocation72_spill] sm:$0xff]  ;;  %v13285_v62 = vld [vmem:[#allocation125_spill] sm:$0xff] }
 0x6de   : > { %6437 = vmatpush1.bf16.msra.mxu0 %v6436_v0  ;;  %v13205_v0 = vld [vmem:[#allocation73_spill] sm:$0xff]  ;;  %v6446_v61 = vpack.c.bf16 %v3019_v45, %v3017_v16  ;;  %v13213_v16 = vld [vmem:[#allocation75_spill] sm:$0xff] }
 0x6df   : > { %6439 = vmatprep.subr.bf16.mxu0 %v6438_v59  ;;  %v3018_v4 = vmul.f32 %v10037_v35, %v13205_v0  ;;  %v3838_v59 = vrot.slane %v3837_v1, 1  ;;  %v3875_v50 = vrot.slane %v3874_v57, 1  ;;  %v13208_v35 = vld [vmem:[#allocation28_spill] sm:$0xff] }
 0x6e1   : > { %v10346_v43 = vmax.f32 %v3837_v1, %v3838_v59  ;;  %v6448_v8 = vpack.c.bf16 %v3018_v4, %v3016_v39  ;;  %v10348_v14 = vmax.f32 %v3874_v57, %v3875_v50  ;;  %v13210_v1 = vld [vmem:[#allocation65_spill] sm:$0xff] }
 0x6e2   : > { %6441 = vmatpush1.bf16.msra.mxu0 %v6440_v27  ;;  %v13211_v4 = vld [vmem:[#allocation69_spill] sm:$0xff] }
 0x6e3   : > { %6443 = vmatprep.subr.bf16.mxu0 %v6442_v23  ;;  %v3877_v13 = vsub.f32 %v13206_v34, %v10346_v43  ;;  %v3879_v36 = vsub.f32 %v13207_v55, %v10346_v43  ;;  %v3881_v44 = vsub.f32 %v13208_v35, %v10346_v43  ;;  %v3883_v27 = vsub.f32 %v13209_v38, %v10346_v43  ;;  %v13215_v23 = vld [vmem:[#allocation79_spill] sm:$0xff]  ;;  %v13216_v50 = vld [vmem:[#allocation81_spill] sm:$0xff]  ;;  %v13224_v55 = vld [vmem:[#allocation4_spill] sm:$0xff] }
 0x6e4   : > { %v3885_v21 = vsub.f32 %v13210_v1, %v10346_v43  ;;  %v3887_v39 = vsub.f32 %v13211_v4, %v10346_v43  ;;  %v3889_v57 = vsub.f32 %v13212_v58, %v10346_v43  ;;  %v3891_v45 = vsub.f32 %v13213_v16, %v10346_v43  ;;  %v13217_v34 = vld [vmem:[#allocation83_spill] sm:$0xff]  ;;  %v13218_v35 = vld [vmem:[#allocation85_spill] sm:$0xff]  ;;  %v13221_v16 = vld [vmem:[#allocation94_spill] sm:$0xff] }
 0x6e5   : > { %v3893_v0 = vsub.f32 %v13214_v10, %v10346_v43  ;;  %v3895_v59 = vsub.f32 %v13215_v23, %v10346_v43  ;;  %v13219_v1 = vld [vmem:[#allocation87_spill] sm:$0xff]  ;;  %v13222_v23 = vld [vmem:[#allocation50_spill] sm:$0xff]  ;;  %v3949_v19 = vmul.f32 1.442695, %v3881_v44  ;;  %v3953_v10 = vmul.f32 1.442695, %v3883_v27 }
 0x6e6   : > { %6445 = vmatpush1.bf16.msra.mxu0 %v6444_v6  ;;  %v13225_v38 = vld [vmem:[#allocation3_spill] sm:$0xff]  ;;  %v13226_v4 = vld [vmem:[#allocation10_spill] sm:$0xff]  ;;  %v13230_v6 = vld [vmem:[#allocation104_spill] sm:$0xff]  ;;  %v3961_v28 = vmul.f32 1.442695, %v3887_v39  ;;  %v13266_v5 = vsub.f32 %v13217_v34, %v10346_v43 }
 0x6e7   : > { %6447 = vmatprep.subr.bf16.mxu0 %v6446_v61  ;;  %v13220_v61 = vld [vmem:[#allocation91_spill] sm:$0xff]  ;;  %v13227_v58 = vld [vmem:[#allocation98_spill] sm:$0xff]  ;;  %v3965_v33 = vmul.f32 1.442695, %v3889_v57  ;;  %v13239_v27 = vld [vmem:[#allocation105_spill] sm:$0xff] }
 0x6e8   : > { %v3969_v12 = vmul.f32 1.442695, %v3891_v45  ;;  %v13244_v57 = vld [vmem:[#allocation67_spill] sm:$0xff]  ;;  %v3977_v45 = vmul.f32 1.442695, %v3895_v59  ;;  %v13253_v59 = vld [vmem:[#allocation84_spill] sm:$0xff] }
 0x6e9   : > { %v3985_v39 = vmul.f32 1.442695, %v13266_v5  ;;  %v13272_v34 = vld [vmem:[#allocation99_spill] sm:$0xff] }
 0x6ea   : > { %6449 = vmatpush1.bf16.msra.mxu0 %v6448_v8  ;;  %v3945_v8 = vmul.f32 1.442695, %v3879_v36  ;;  %v13235_v36 = vld [vmem:[#allocation103_spill] sm:$0xff] }
 0x6eb   : > { %6451 = vmatprep.subr.bf16.mxu0 %v13229_v26  ;;  %v3941_v26 = vmul.f32 1.442695, %v3877_v13  ;;  %v3957_v13 = vmul.f32 1.442695, %v3885_v21  ;;  %v13236_v44 = vpack.c.bf16 %v10068_v42, %v13235_v36  ;;  %v3973_v42 = vmul.f32 1.442695, %v3893_v0 }
 0x6ec   : > { %v13242_v21 = vld [vmem:[#allocation60_spill] sm:$0xff]  ;;  %v13258_v36 = vsub.f32 %v13216_v50, %v10346_v43 }
 0x6ed   : > { %6989 = vpow2.f32 %v3941_v26  ;;  %v13248_v0 = vld [vmem:[#allocation76_spill] sm:$0xff] }
 0x6ee   : > { %6453 = vmatpush1.bf16.msra.mxu0 %v13232_v41  ;;  %6991 = vpow2.f32 %v3945_v8  ;;  %v13238_v41 = vld [vmem:[#allocation106_spill] sm:$0xff]  ;;  %v13245_v8 = vld [vmem:[#allocation71_spill] sm:$0xff] }
 0x6ef   : > { %6455 = vmatprep.subr.bf16.mxu0 %v13234_v25  ;;  %6993 = vpow2.f32 %v3949_v19  ;;  %v13240_v7 = vpack.c.bf16 %v13238_v41, %v13239_v27  ;;  %v13241_v19 = vpack.c.bf16 %v10269_v2, %v10263_v47  ;;  %v13247_v47 = vld [vmem:[#allocation74_spill] sm:$0xff]  ;;  %v13255_v2 = vld [vmem:[#allocation107_spill] sm:$0xff]  ;;  %v13260_v27 = vld [vmem:[#allocation88_spill] sm:$0xff] }
 0x6f0   : > { %6995 = vpow2.f32 %v3953_v10  ;;  %v13252_v41 = vld [vmem:[#allocation82_spill] sm:$0xff]  ;;  %v3981_v10 = vmul.f32 1.442695, %v13258_v36  ;;  %v13273_v36 = vld [vmem:[#allocation111_spill] sm:$0xff] }
 0x6f1   : > { %6997 = vpow2.f32 %v3957_v13  ;;  %v13249_v13 = vld [vmem:[#allocation78_spill] sm:$0xff] }
 0x6f2   : > { %6457 = vmatpush1.bf16.msra.mxu0 %v13236_v44  ;;  %6999 = vpow2.f32 %v3961_v28 }
 0x6f3   : > { %6459 = vmatprep.subr.bf16.mxu0 %v13237_v3  ;;  %7001 = vpow2.f32 %v3965_v33  ;;  %v13251_v3 = vld [vmem:[#allocation80_spill] sm:$0xff]  ;;  %v13259_v33 = vld [vmem:[#allocation86_spill] sm:$0xff] }
 0x6f4   : > { %7003 = vpow2.f32 %v3969_v12 }
 0x6f5   : > { %7005 = vpow2.f32 %v3973_v42 }
 0x6f6   : > { %6461 = vmatpush1.bf16.msra.mxu0 %v13240_v7  ;;  %v13261_v7 = vpack.c.bf16 %v10279_v63, %v10275_v29  ;;  %7007 = vpow2.f32 %v3977_v45  ;;  %v13276_v63 = vsub.f32 %v13218_v35, %v10346_v43  ;;  %v13277_v45 = vld [vmem:[#allocation100_spill] sm:$0xff]  ;;  %v13281_v35 = vld [vmem:[#allocation117_spill] sm:$0xff]  ;;  %v13283_v29 = vsub.f32 %v13219_v1, %v10346_v43 }
 0x6f7   : > { %6463 = vmatprep.subr.bf16.mxu0 %v13241_v19  ;;  %v10447_v28 = vpop.eup %6989  ;;  %v13254_v19 = vld [vmem:[#allocation109_spill] sm:$0xff]  ;;  %7009 = vpow2.f32 %v3981_v10  ;;  %v13290_v10 = vpack.c.bf16 %v10301_v60, %v10293_v17  ;;  %v13296_v60 = vsub.f32 %v13222_v23, %v10346_v43 }
 0x6f8   : > { %13246 = vst [vmem:[#allocation58_spill] sm:$0xff] %v10447_v28  ;;  %v10455_v44 = vpop.eup %6991  ;;  %v13256_v25 = vpack.c.bf16 %v13254_v19, %v13255_v2  ;;  %v13263_v2 = vld [vmem:[#allocation92_spill] sm:$0xff]  ;;  %v3993_v19 = vmul.f32 1.442695, %v13283_v29  ;;  %7011 = vpow2.f32 %v3985_v39  ;;  %v13287_v29 = vld [vmem:[#allocation113_spill] sm:$0xff] }
 0x6f9   : > { %13250 = vst [vmem:[#allocation22_spill] sm:$0xff] %v10455_v44  ;;  %v10466_v26 = vpop.eup %6993  ;;  %v4069_v12 = vadd.f32 %v10455_v44, %v10447_v28 }
 0x6fa   : > { %6465 = vmatpush1.bf16.msra.mxu0 %v13256_v25  ;;  %13257 = vst [vmem:[#allocation25_spill] sm:$0xff] %v10466_v26  ;;  %v10480_v25 = vpop.eup %6995 }
 0x6fb   : > { %6467 = vmatprep.subr.bf16.mxu0 %v13261_v7  ;;  %13262 = vst [vmem:[#allocation26_spill] sm:$0xff] %v10480_v25  ;;  %v4070_v44 = vadd.f32 %v10466_v26, %v4069_v12  ;;  %v10496_v28 = vpop.eup %6997  ;;  %v13274_v12 = vld [vmem:[#allocation110_spill] sm:$0xff]  ;;  %v3989_v7 = vmul.f32 1.442695, %v13276_v63 }
 0x6fc   : > { %13269 = vst [vmem:[#allocation47_spill] sm:$0xff] %v10496_v28  ;;  %v13275_v26 = vpack.c.bf16 %v13273_v36, %v13274_v12  ;;  %v10518_v5 = vpop.eup %6999  ;;  %v13286_v63 = vld [vmem:[#allocation126_spill] sm:$0xff]  ;;  %v13291_v36 = vsub.f32 %v13220_v61, %v10346_v43 }
 0x6fd   : > { %v4071_v42 = vadd.f32 %v10480_v25, %v4070_v44  ;;  %v13282_v44 = vld [vmem:[#allocation122_spill] sm:$0xff]  ;;  %v10534_v50 = vpop.eup %7001  ;;  %7013 = vpow2.f32 %v3989_v7  ;;  %v4005_v7 = vmul.f32 1.442695, %v13296_v60  ;;  %v13307_v60 = vpack.c.bf16 %v10321_v56, %v10313_v30 }
 0x6fe   : > { %6469 = vmatpush1.bf16.msra.mxu0 %v13275_v26  ;;  %v13280_v26 = vld [vmem:[#allocation108_spill] sm:$0xff]  ;;  %v10549_v39 = vpop.eup %7003  ;;  %v3997_v12 = vmul.f32 1.442695, %v13291_v36  ;;  %7015 = vpow2.f32 %v3993_v19  ;;  %v13297_v36 = vpack.c.bf16 %v10309_v24, %v10305_v11  ;;  %v13303_v24 = vld [vmem:[#allocation118_spill] sm:$0xff]  ;;  %v13312_v30 = vsub.f32 %v13243_v46, %v10348_v14 }
 0x6ff   : > { %6471 = vmatprep.subr.bf16.mxu0 %v13279_v15  ;;  %v4072_v25 = vadd.f32 %v10496_v28, %v4071_v42  ;;  %v13284_v15 = vld [vmem:[#allocation123_spill] sm:$0xff]  ;;  %v13288_v42 = vld [vmem:[#allocation112_spill] sm:$0xff]  ;;  %v10555_v1 = vpop.eup %7005  ;;  %v13319_v46 = vsub.f32 %v13244_v57, %v10348_v14  ;;  %v13324_v57 = vld [vmem:[#allocation18_spill] sm:$0xff] }
 0x700   : > { %v13289_v28 = vpack.c.bf16 %v13287_v29, %v13288_v42  ;;  %v13293_v29 = vld [vmem:[#allocation115_spill] sm:$0xff]  ;;  %v13294_v42 = vld [vmem:[#allocation114_spill] sm:$0xff]  ;;  %7017 = vpow2.f32 %v3997_v12  ;;  %v3955_v56 = vmul.f32 1.442695, %v13312_v30 }
 0x701   : > { %v4073_v37 = vadd.f32 %v10518_v5, %v4072_v25  ;;  %v13295_v17 = vpack.c.bf16 %v13293_v29, %v13294_v42  ;;  %v13304_v42 = vld [vmem:[#allocation116_spill] sm:$0xff] }
 0x702   : > { %6473 = vmatpush1.bf16.msra.mxu0 %v13289_v28  ;;  %v13292_v28 = vsub.f32 %v13221_v16, %v10346_v43  ;;  %v13299_v16 = vsub.f32 %v13223_v22, %v10346_v43  ;;  %v13305_v12 = vpack.c.bf16 %v13303_v24, %v13304_v42  ;;  %v13320_v42 = vsub.f32 %v13227_v58, %v10346_v43 }
 0x703   : > { %6475 = vmatprep.subr.bf16.mxu0 %v13290_v10  ;;  %v4074_v9 = vadd.f32 %v10534_v50, %v4073_v37  ;;  %v10570_v37 = vpop.eup %7007  ;;  %v13300_v10 = vsub.f32 %v13224_v55, %v10346_v43  ;;  %v13306_v55 = vsub.f32 %v13231_v31, %v10348_v14  ;;  %v13325_v58 = vsub.f32 %v10030_v54, %v10346_v43 }
 0x704   : > { %v4001_v25 = vmul.f32 1.442695, %v13292_v28  ;;  %13298 = vst [vmem:[#allocation59_spill] sm:$0xff] %v10570_v37  ;;  %v4009_v19 = vmul.f32 1.442695, %v13299_v16  ;;  %v10579_v29 = vpop.eup %7009 }
 0x705   : > { %v4075_v61 = vadd.f32 %v10549_v39, %v4074_v9  ;;  %v4013_v28 = vmul.f32 1.442695, %v13300_v10  ;;  %13301 = vst [vmem:[#allocation61_spill] sm:$0xff] %v10579_v29  ;;  %v13302_v9 = vsub.f32 %v13225_v38, %v10346_v43  ;;  %v13309_v38 = vsub.f32 %v13233_v32, %v10348_v14  ;;  %v13313_v10 = vld [vmem:[#allocation120_spill] sm:$0xff] }
 0x706   : > { %6477 = vmatpush1.bf16.msra.mxu0 %v13295_v17  ;;  %7019 = vpow2.f32 %v4001_v25  ;;  %v3943_v17 = vmul.f32 1.442695, %v13306_v55  ;;  %v10594_v25 = vpop.eup %7011  ;;  %v13316_v32 = vsub.f32 %v13226_v4, %v10346_v43  ;;  %v13321_v4 = vld [vmem:[#allocation16_spill] sm:$0xff] }
 0x707   : > { %6479 = vmatprep.subr.bf16.mxu0 %v13297_v36  ;;  %v4076_v23 = vadd.f32 %v10555_v1, %v4075_v61  ;;  %v4017_v11 = vmul.f32 1.442695, %v13302_v9  ;;  %7021 = vpow2.f32 %v4005_v7  ;;  %13308 = vst [vmem:[#allocation64_spill] sm:$0xff] %v10594_v25  ;;  %v3947_v61 = vmul.f32 1.442695, %v13309_v38  ;;  %v10603_v31 = vpop.eup %7013  ;;  %v13323_v38 = vld [vmem:[#allocation11_spill] sm:$0xff] }
 0x708   : > { %7023 = vpow2.f32 %v4009_v19  ;;  %v13310_v36 = vsub.f32 %v13242_v21, %v10348_v14  ;;  %13311 = vst [vmem:[#allocation89_spill] sm:$0xff] %v10603_v31  ;;  %v13314_v19 = vld [vmem:[#allocation119_spill] sm:$0xff]  ;;  %v13317_v21 = vld [vmem:[#allocation12_spill] sm:$0xff]  ;;  %v10616_v24 = vpop.eup %7015 }
 0x709   : > { %v4077_v22 = vadd.f32 %v10570_v37, %v4076_v23  ;;  %7025 = vpow2.f32 %v4013_v28  ;;  %v13315_v23 = vpack.c.bf16 %v13313_v10, %v13314_v19  ;;  %v4021_v28 = vmul.f32 1.442695, %v13316_v32  ;;  %13318 = vst [vmem:[#allocation66_spill] sm:$0xff] %v10616_v24 }
 0x70a   : > { %6481 = vmatpush1.bf16.msra.mxu0 %v13305_v12  ;;  %v3951_v16 = vmul.f32 1.442695, %v13310_v36  ;;  %7027 = vpow2.f32 %v4017_v11  ;;  %v3959_v11 = vmul.f32 1.442695, %v13319_v46  ;;  %v4025_v12 = vmul.f32 1.442695, %v13320_v42  ;;  %v10626_v55 = vpop.eup %7017 }
 0x70b   : > { %6483 = vmatprep.subr.bf16.mxu0 %v13307_v60  ;;  %v4078_v7 = vadd.f32 %v10579_v29, %v4077_v22  ;;  %7029 = vpow2.f32 %v3943_v17  ;;  %v13322_v17 = vsub.f32 %v13245_v8, %v10348_v14  ;;  %v13326_v36 = vld [vmem:[#allocation8_spill] sm:$0xff]  ;;  %v13327_v8 = vsub.f32 %v13247_v47, %v10348_v14 }
 0x70c   : > { %7031 = vpow2.f32 %v3947_v61  ;;  %v4029_v61 = vmul.f32 1.442695, %v13325_v58  ;;  %v13328_v10 = vsub.f32 %v13228_v18, %v10346_v43  ;;  %v13331_v47 = vld [vmem:[#allocation20_spill] sm:$0xff]  ;;  %v13332_v18 = vsub.f32 %v13230_v6, %v10346_v43  ;;  %v13335_v6 = vld [vmem:[#allocation19_spill] sm:$0xff] }
 0x70d   : > { %v4079_v9 = vadd.f32 %v10594_v25, %v4078_v7  ;;  %7033 = vpow2.f32 %v3951_v16  ;;  %v3963_v60 = vmul.f32 1.442695, %v13322_v17  ;;  %v3967_v30 = vmul.f32 1.442695, %v13327_v8 }
 0x70e   : > { %6485 = vmatpush1.bf16.msra.mxu0 %v13315_v23  ;;  %7035 = vpow2.f32 %v3955_v56  ;;  %v4033_v19 = vmul.f32 1.442695, %v13328_v10  ;;  %v13329_v23 = vld [vmem:[#allocation17_spill] sm:$0xff]  ;;  %v4037_v46 = vmul.f32 1.442695, %v13332_v18 }
 0x70f   : > { %4265 = vmatprep.subr.mxu0 %v13317_v21  ;;  %v4080_v22 = vadd.f32 %v10603_v31, %v4079_v9  ;;  %7037 = vpow2.f32 %v4021_v28  ;;  %v13330_v28 = vsub.f32 %v13248_v0, %v10348_v14  ;;  %v13342_v18 = vld [vmem:[#allocation21_spill] sm:$0xff] }
 0x710   : > { %v10638_v16 = vpop.eup %7019  ;;  %7039 = vpow2.f32 %v3959_v11 }
 0x711   : > { %3290 = vmatmul.mubr.f32.vlgmr.msra.gmra.mrb[86].mxu0 %v13321_v4  ;;  %v4081_v7 = vadd.f32 %v10616_v24, %v4080_v22  ;;  %v10643_v56 = vpop.eup %7021  ;;  %7041 = vpow2.f32 %v4025_v12  ;;  %v3971_v9 = vmul.f32 1.442695, %v13330_v28  ;;  %v13333_v12 = vsub.f32 %v13249_v13, %v10348_v14  ;;  %v13337_v13 = vld [vmem:[#allocation53_spill] sm:$0xff] }
 0x712   : > { %4266 = vmatpush1.msra.mxu0 %v13323_v38  ;;  %3295 = vmatprep.mubr.f32.mxu0 %v13324_v57  ;;  %v10650_v32 = vpop.eup %7023  ;;  %7043 = vpow2.f32 %v3963_v60  ;;  %v13334_v4 = vsub.f32 %v10114_v40, %v10346_v43  ;;  %v13336_v57 = vsub.f32 %v13251_v3, %v10348_v14  ;;  %v13340_v3 = vsub.f32 %v13252_v41, %v10348_v14 }
 0x713   : > { %4699 = vmatprep.subr.mxu0 %v13326_v36  ;;  %v4082_v54 = vadd.f32 %v10626_v55, %v4081_v7  ;;  %v10656_v21 = vpop.eup %7025  ;;  %7045 = vpow2.f32 %v4029_v61  ;;  %v3975_v22 = vmul.f32 1.442695, %v13333_v12  ;;  %v13338_v7 = vld [vmem:[#allocation121_spill] sm:$0xff]  ;;  %v13343_v41 = vsub.f32 %v13253_v59, %v10348_v14  ;;  %v13344_v12 = vld [vmem:[#allocation55_spill] sm:$0xff] }
 0x714   : > { %v10662_v42 = vpop.eup %7027  ;;  %7047 = vpow2.f32 %v3967_v30  ;;  %v4041_v17 = vmul.f32 1.442695, %v13334_v4  ;;  %v3979_v58 = vmul.f32 1.442695, %v13336_v57  ;;  %v13339_v40 = vsub.f32 %v13338_v7, %v10346_v43 }
 0x715   : > { %3296 = vmatmul.mubr.f32.gmra.mrb[88].mxu0 %v13329_v23  ;;  %v4083_v11 = vadd.f32 %v10638_v16, %v4082_v54  ;;  %v10667_v0 = vpop.eup %7029  ;;  %7049 = vpow2.f32 %v4033_v19  ;;  %v3983_v19 = vmul.f32 1.442695, %v13340_v3  ;;  %v13341_v23 = vsub.f32 %v10162_v48, %v10346_v43  ;;  %v13345_v48 = vld [vmem:[#allocation124_spill] sm:$0xff] }
 0x716   : > { %3301 = vmatprep.mubr.f32.mxu0 %v13331_v47  ;;  %v10674_v38 = vpop.eup %7031  ;;  %7051 = vpow2.f32 %v3971_v9  ;;  %v4045_v36 = vmul.f32 1.442695, %v13339_v40  ;;  %v13346_v4 = vsub.f32 %v13345_v48, %v10346_v43  ;;  %v13347_v59 = vsub.f32 %v13259_v33, %v10348_v14 }
 0x717   : > { %v4084_v60 = vadd.f32 %v10643_v56, %v4083_v11  ;;  %v10680_v61 = vpop.eup %7033  ;;  %7053 = vpow2.f32 %v4037_v46  ;;  %v4106_v30 = vadd.f32 %v10674_v38, %v10667_v0  ;;  %v4049_v28 = vmul.f32 1.442695, %v13341_v23 }
 0x718   : > { %v10688_v10 = vpop.eup %7035  ;;  %7055 = vpow2.f32 %v3975_v22  ;;  %v3987_v11 = vmul.f32 1.442695, %v13343_v41  ;;  %v13348_v7 = vsub.f32 %v10176_v49, %v10346_v43  ;;  %v13350_v33 = vsub.f32 %v13260_v27, %v10348_v14 }
 0x719   : > { %3302 = vmatmul.mubr.f32.gmra.mrb[90].mxu0 %v13335_v6  ;;  %v4085_v8 = vadd.f32 %v10650_v32, %v4084_v60  ;;  %v10693_v54 = vpop.eup %7037  ;;  %7057 = vpow2.f32 %v4041_v17  ;;  %v4107_v47 = vadd.f32 %v10680_v61, %v4106_v30  ;;  %v4053_v17 = vmul.f32 1.442695, %v13346_v4  ;;  %v13349_v30 = vld [vmem:[#allocation54_spill] sm:$0xff] }
 0x71a   : > { %3307 = vmatprep.mubr.f32.mxu0 %v13337_v13  ;;  %v10701_v46 = vpop.eup %7039  ;;  %7059 = vpow2.f32 %v3979_v58  ;;  %v3991_v58 = vmul.f32 1.442695, %v13347_v59  ;;  %v4057_v40 = vmul.f32 1.442695, %v13348_v7  ;;  %v3995_v23 = vmul.f32 1.442695, %v13350_v33 }
 0x71b   : > { %v4086_v9 = vadd.f32 %v10656_v21, %v4085_v8  ;;  %v10707_v22 = vpop.eup %7041  ;;  %7061 = vpow2.f32 %v4045_v36  ;;  %v4108_v6 = vadd.f32 %v10688_v10, %v4107_v47  ;;  %v13352_v49 = vsub.f32 %v10204_v52, %v10346_v43  ;;  %v13359_v33 = vld [vmem:[#allocation49_spill] sm:$0xff] }
 0x71c   : > { %v10714_v57 = vpop.eup %7043  ;;  %7063 = vpow2.f32 %v3983_v19  ;;  %v10729_v19 = vpop.trf.xlu0  ;;  %v13353_v27 = vsub.f32 %v13263_v2, %v10348_v14  ;;  %v13354_v4 = vsub.f32 %v10230_v51, %v10346_v43 }
 0x71d   : > { %3308 = vmatmul.mubr.f32.gmra.mrb[92].mxu0 %v13342_v18  ;;  %v4087_v60 = vadd.f32 %v10662_v42, %v4086_v9  ;;  %v10719_v13 = vpop.eup %7045  ;;  %7065 = vpow2.f32 %v4049_v28  ;;  %v4109_v8 = vadd.f32 %v10701_v46, %v4108_v6  ;;  %v13351_v28 = vld [vmem:[#allocation43_spill] sm:$0xff]  ;;  %v4061_v47 = vmul.f32 1.442695, %v13352_v49  ;;  %v13355_v6 = vld [vmem:[#allocation57_spill] sm:$0xff] }
 0x71e   : > { %3313 = vmatprep.mubr.f32.mxu0 %v13344_v12  ;;  %v10727_v3 = vpop.eup %7047  ;;  %7067 = vpow2.f32 %v3987_v11  ;;  %v3999_v11 = vmul.f32 1.442695, %v13353_v27 }
 0x71f   : > { %v4088_v36 = vadd.f32 %v10693_v54, %v4087_v60  ;;  %v10735_v9 = vpop.eup %7049  ;;  %7069 = vpow2.f32 %v4053_v17  ;;  %v4110_v41 = vadd.f32 %v10714_v57, %v4109_v8  ;;  %v4065_v17 = vmul.f32 1.442695, %v13354_v4  ;;  %v13363_v4 = vld [vmem:[#allocation96_spill] sm:$0xff] }
 0x720   : > { %v10742_v12 = vpop.eup %7051  ;;  %7071 = vpow2.f32 %v3991_v58  ;;  %v13356_v58 = vld [vmem:[#allocation95_spill] sm:$0xff] }
 0x721   : > { %3314 = vmatmul.mubr.f32.gmra.mrb[94].mxu0 %v13349_v30  ;;  %v4089_v18 = vadd.f32 %v10707_v22, %v4088_v36  ;;  %v10747_v48 = vpop.eup %7053  ;;  %7073 = vpow2.f32 %v4057_v40  ;;  %v4111_v60 = vadd.f32 %v10727_v3, %v4110_v41  ;;  %v13357_v2 = vsub.f32 %v13356_v58, %v10348_v14  ;;  %v13358_v36 = vld [vmem:[#allocation23_spill] sm:$0xff]  ;;  %v4226_v30 = vpop.trf.xlu0 }
 0x722   : > { %3319 = vmatprep.mubr.f32.mxu0 %v13351_v28  ;;  %v10755_v59 = vpop.eup %7055  ;;  %7075 = vpow2.f32 %v3995_v23  ;;  %v13360_v23 = vsub.f32 %v13359_v33, %v10348_v14 }
 0x723   : > { %v4090_v52 = vadd.f32 %v10719_v13, %v4089_v18  ;;  %v4003_v7 = vmul.f32 1.442695, %v13357_v2  ;;  %v10761_v40 = vpop.eup %7057  ;;  %7077 = vpow2.f32 %v4061_v47  ;;  %v4112_v43 = vadd.f32 %v10742_v12, %v4111_v60  ;;  %v13361_v47 = vld [vmem:[#allocation44_spill] sm:$0xff]  ;;  %v13365_v60 = vld [vmem:[#allocation29_spill] sm:$0xff] }
 0x724   : > { %v10765_v8 = vpop.eup %7059  ;;  %7079 = vpow2.f32 %v3999_v11  ;;  %v4007_v28 = vmul.f32 1.442695, %v13360_v23 }
 0x725   : > { %3320 = vmatmul.mubr.f32.gmra.mrb[96].mxu0 %v13355_v6  ;;  %v4091_v51 = vadd.f32 %v10735_v9, %v4090_v52  ;;  %v10770_v49 = vpop.eup %7061  ;;  %7081 = vpow2.f32 %v4065_v17  ;;  %v4113_v41 = vadd.f32 %v10755_v59, %v4112_v43  ;;  %v13364_v52 = vsub.f32 %v13363_v4, %v10348_v14 }
 0x726   : > { %3325 = vmatprep.mubr.f32.mxu0 %v13358_v36  ;;  %v10775_v27 = vpop.eup %7063  ;;  %7083 = vpow2.f32 %v4003_v7  ;;  %v13367_v36 = vld [vmem:[#allocation97_spill] sm:$0xff] }
 0x727   : > { %v4092_v18 = vadd.f32 %v10747_v48, %v4091_v51  ;;  %13362 = vst [vmem:[#allocation68_spill] sm:$0xff] %v10775_v27  ;;  %v4011_v11 = vmul.f32 1.442695, %v13364_v52  ;;  %v10781_v6 = vpop.eup %7065  ;;  %v4114_v17 = vadd.f32 %v10765_v8, %v4113_v41  ;;  %7085 = vpow2.f32 %v4007_v28  ;;  %v13371_v41 = vld [vmem:[#allocation32_spill] sm:$0xff] }
 0x728   : > { %v10785_v2 = vpop.eup %7067  ;;  %v13368_v51 = vsub.f32 %v13367_v36, %v10348_v14  ;;  %v13372_v52 = vsub.f32 %v13371_v41, %v10348_v14 }
 0x729   : > { %3326 = vmatmul.mubr.f32.gmra.mrb[98].mxu0 %v13361_v47  ;;  %v4093_v58 = vadd.f32 %v10761_v40, %v4092_v18  ;;  %13366 = vst [vmem:[#allocation90_spill] sm:$0xff] %v10785_v2  ;;  %v10790_v7 = vpop.eup %7069  ;;  %v4115_v23 = vadd.f32 %v10775_v27, %v4114_v17  ;;  %v13369_v47 = vld [vmem:[#allocation24_spill] sm:$0xff]  ;;  %v4227_v18 = vpop.trf.xlu0  ;;  %7087 = vpow2.f32 %v4011_v11  ;;  %v13375_v17 = vsub.f32 %v13271_v20, %v10348_v14  ;;  %v13377_v20 = vld [vmem:[#allocation7_spill] sm:$0xff] }
 0x72a   : > { %3331 = vmatprep.mubr.f32.mxu0 %v13365_v60  ;;  %v4015_v43 = vmul.f32 1.442695, %v13368_v51  ;;  %v10795_v4 = vpop.eup %7071  ;;  %v4019_v28 = vmul.f32 1.442695, %v13372_v52  ;;  %v13373_v60 = vmov 0.0  }
 0x72b   : > { %v4094_v33 = vadd.f32 %v10770_v49, %v4093_v58  ;;  %13370 = vst [vmem:[#allocation93_spill] sm:$0xff] %v10795_v4  ;;  %v10801_v36 = vpop.eup %7073  ;;  %v4116_v58 = vadd.f32 %v10785_v2, %v4115_v23 }
 0x72c   : > { %v10805_v24 = vpop.eup %7075  ;;  %7089 = vpow2.f32 %v4015_v43  ;;  %v13376_v43 = vsub.f32 %v13272_v34, %v10348_v14 }
 0x72d   : > { %3332 = vmatmul.mubr.f32.gmra.mrb[100].mxu0 %v13369_v47  ;;  %v4095_v51 = vadd.f32 %v10781_v6, %v4094_v33  ;;  %13374 = vst [vmem:[#allocation70_spill] sm:$0xff] %v10805_v24  ;;  %v4023_v47 = vmul.f32 1.442695, %v13375_v17  ;;  %v10810_v11 = vpop.eup %7077  ;;  %v4117_v52 = vadd.f32 %v10795_v4, %v4116_v58  ;;  %v10818_v33 = vpop.trf.xlu1  ;;  %7091 = vpow2.f32 %v4019_v28 }
 0x72e   : > { %4329 = vmatprep.mubr.f32.mxu0 %v13373_v60  ;;  %v10816_v31 = vpop.eup %7079  ;;  %v4027_v23 = vmul.f32 1.442695, %v13376_v43  ;;  %v4228_v4 = vpop.trf.xlu0  ;;  %v13378_v28 = vsub.f32 %v13277_v45, %v10348_v14 }
 0x72f   : > { %v4096_v41 = vadd.f32 %v10790_v7, %v4095_v51  ;;  %v10825_v17 = vpop.eup %7081  ;;  %v4118_v58 = vadd.f32 %v10805_v24, %v4117_v52  ;;  %7093 = vpow2.f32 %v4023_v47 }
 0x730   : > { %v4031_v25 = vmul.f32 1.442695, %v13378_v28  ;;  %7095 = vpow2.f32 %v4027_v23 }
 0x731   : > { %6155 = vmatmul.mubr.msk.f32.vlgmr.msra.gmra.mrb[102].mxu0 %vm1175_vm2, %v10729_v19  ;;  %v4097_v51 = vadd.f32 %v10801_v36, %v4096_v41  ;;  %v10829_v19 = vpop.eup %7083  ;;  %v4119_v43 = vadd.f32 %v10816_v31, %v4118_v58  ;;  %v13379_v41 = vld [vmem:[#allocation102_spill] sm:$0xff] }
 0x732   : > { %4700 = vmatpush1.msra.mxu0 %v13377_v20  ;;  %4335 = vmatprep.mubr.f32.mxu0 %v13373_v60  ;;  %v10837_v20 = vpop.eup %7085  ;;  %v13380_v52 = vsub.f32 %v13379_v41, %v10348_v14  ;;  %7097 = vpow2.f32 %v4031_v25 }
 0x733   : > { %v4098_v34 = vadd.f32 %v10810_v11, %v4097_v51  ;;  %v4120_v45 = vadd.f32 %v10829_v19, %v4119_v43  ;;  %v10845_v28 = vpop.eup %7087  ;;  %v10847_v51 = vpop.trf.xlu1 }
 0x734   : > { %v4035_v24 = vmul.f32 1.442695, %v13380_v52  ;;  %v4229_v52 = vpop.trf.xlu0 }
 0x735   : > { %6156 = vmatmul.mubr.msk.f32.gmra.mrb[104].mxu0 %vm1175_vm2, %v4226_v30  ;;  %v4099_v47 = vadd.f32 %v10825_v17, %v4098_v34  ;;  %v13381_v30 = vsub.f32 %v13280_v26, %v10348_v14  ;;  %v4121_v29 = vadd.f32 %v10837_v20, %v4120_v45  ;;  %v13382_v34 = vsub.f32 %v13281_v35, %v10348_v14 }
 0x736   : > { %4341 = vmatprep.mubr.f32.mxu0 %v13373_v60  ;;  %v10854_v41 = vpop.eup %7089  ;;  %7099 = vpow2.f32 %v4035_v24  ;;  %v13383_v45 = vsub.f32 %v13282_v44, %v10348_v14 }
 0x737   : > { %v4039_v58 = vmul.f32 1.442695, %v13381_v30  ;;  %v4100_v23 = vrot.slane %v4099_v47, 4  ;;  %v4043_v43 = vmul.f32 1.442695, %v13382_v34  ;;  %v4122_v2 = vadd.f32 %v10845_v28, %v4121_v29  ;;  %v10861_v26 = vpop.eup %7091  ;;  %v10870_v35 = vpop.trf.xlu1 }
 0x738   : > { %v13384_v29 = vsub.f32 %v13284_v15, %v10348_v14  ;;  %v4230_v34 = vpop.trf.xlu0 }
 0x739   : > { %6157 = vmatmul.mubr.msk.f32.gmra.mrb[106].mxu0 %vm1175_vm2, %v4227_v18  ;;  %v4101_v25 = vadd.f32 %v4100_v23, %v4099_v47  ;;  %7101 = vpow2.f32 %v4039_v58  ;;  %v4047_v18 = vmul.f32 1.442695, %v13383_v45  ;;  %v4123_v27 = vadd.f32 %v10854_v41, %v4122_v2  ;;  %v10868_v24 = vpop.eup %7093 }
 0x73a   : > { %4347 = vmatprep.mubr.f32.mxu0 %v13373_v60  ;;  %7103 = vpow2.f32 %v4043_v43  ;;  %v4051_v47 = vmul.f32 1.442695, %v13384_v29  ;;  %v10877_v23 = vpop.eup %7095  ;;  %v13385_v2 = vsub.f32 %v13285_v62, %v10348_v14 }
 0x73b   : > { %v4102_v30 = vrot.slane %v4101_v25, 2  ;;  %v4124_v44 = vadd.f32 %v10861_v26, %v4123_v27  ;;  %7105 = vpow2.f32 %v4047_v18 }
 0x73c   : > { %v10884_v15 = vpop.eup %7097  ;;  %7107 = vpow2.f32 %v4051_v47 }
 0x73d   : > { %6158 = vmatmul.mubr.msk.f32.gmra.mrb[108].mxu0 %vm1175_vm2, %v4228_v4  ;;  %v4103_v58 = vadd.f32 %v4102_v30, %v4101_v25  ;;  %v4055_v4 = vmul.f32 1.442695, %v13385_v2  ;;  %v4125_v43 = vadd.f32 %v10868_v24, %v4124_v44  ;;  %v13386_v25 = vsub.f32 %v13286_v63, %v10348_v14  ;;  %v13387_v30 = vld [vmem:[#allocation56_spill] sm:$0xff]  ;;  %v10896_v44 = vpop.trf.xlu1 }
 0x73e   : > { %4353 = vmatprep.mubr.f32.mxu0 %v13373_v60  ;;  %v13388_v18 = vsub.f32 %v13387_v30, %v10348_v14  ;;  %v13389_v30 = vsub.f32 %v10244_v53, %v10348_v14 }
 0x73f   : > { %v4104_v45 = vrot.slane %v4103_v58, 1  ;;  %v4059_v27 = vmul.f32 1.442695, %v13386_v25  ;;  %v4126_v62 = vadd.f32 %v10877_v23, %v4125_v43  ;;  %7109 = vpow2.f32 %v4055_v4  ;;  %v4231_v25 = vpop.trf.xlu0 }
 0x740   : > { %v4063_v29 = vmul.f32 1.442695, %v13388_v18  ;;  %v10894_v2 = vpop.eup %7099  ;;  %v4067_v18 = vmul.f32 1.442695, %v13389_v30 }
 0x741   : > { %6159 = vmatmul.mubr.msk.f32.gmra.mrb[110].mxu0 %vm1175_vm2, %v4229_v52  ;;  %v4105_v52 = vadd.f32 %v4104_v45, %v4103_v58  ;;  %v4127_v47 = vadd.f32 %v10884_v15, %v4126_v62  ;;  %7111 = vpow2.f32 %v4059_v27  ;;  %v4559_v4 = vpop.trf.xlu1 }
 0x742   : > { %4359 = vmatprep.mubr.f32.mxu0 %v13373_v60  ;;  %7113 = vpow2.f32 %v4063_v29 }
 0x743   : > { %v10900_v63 = vpop.eup %7101  ;;  %v4128_v43 = vadd.f32 %v10894_v2, %v4127_v47  ;;  %7115 = vrcp.f32 %v4105_v52  ;;  %v4232_v45 = vpop.trf.xlu0 }
 0x744   : > { %v10907_v37 = vpop.eup %7103  ;;  %7117 = vpow2.f32 %v4067_v18 }
 0x745   : > { %6160 = vmatmul.mubr.msk.f32.gmra.mrb[112].mxu0 %vm1175_vm2, %v4230_v34  ;;  %v4129_v58 = vadd.f32 %v10900_v63, %v4128_v43  ;;  %v10911_v34 = vpop.eup %7105  ;;  %v4560_v47 = vpop.trf.xlu1 }
 0x746   : > { %4365 = vmatprep.mubr.f32.mxu0 %v13373_v60  ;;  %v10915_v14 = vpop.eup %7107 }
 0x747   : > { %v4130_v53 = vadd.f32 %v10907_v37, %v4129_v58 }
 0x749   : > { %6161 = vmatmul.mubr.msk.f32.gmra.mrb[114].mxu0 %vm1175_vm2, %v4231_v25  ;;  %v4131_v27 = vadd.f32 %v10911_v34, %v4130_v53  ;;  %v10919_v29 = vpop.eup %7109 }
 0x74a   : > { %4371 = vmatprep.mubr.f32.mxu0 %v13373_v60 }
 0x74b   : > { %v4132_v62 = vadd.f32 %v10915_v14, %v4131_v27  ;;  %v10923_v52 = vpop.eup %7111  ;;  %v4561_v27 = vpop.trf.xlu1 }
 0x74c   : > { %v10925_v25 = vpop.eup %7113 }
 0x74d   : > { %6162 = vmatmul.mubr.msk.f32.gmra.mrb[116].mxu0 %vm1175_vm2, %v4232_v45  ;;  %v4133_v30 = vadd.f32 %v10919_v29, %v4132_v62  ;;  %v10930_v18 = vpop.eup %7115 }
 0x74e   : > { %4763 = vmatprep.mubr.f32.mxu0 %v13373_v60  ;;  %v10934_v58 = vpop.eup %7117  ;;  %v10941_v45 = vmul.f32 %v10930_v18, %v10626_v55  ;;  %v10950_v62 = vmul.f32 %v10930_v18, %v10643_v56  ;;  %v10979_v55 = vmul.f32 %v10930_v18, %v10719_v13  ;;  %v10987_v56 = vmul.f32 %v10930_v18, %v10735_v9 }
 0x74f   : > { %v4134_v43 = vadd.f32 %v10923_v52, %v4133_v30  ;;  %v10954_v30 = vmul.f32 %v10930_v18, %v10650_v32  ;;  %v10971_v32 = vmul.f32 %v10930_v18, %v10693_v54  ;;  %v10991_v54 = vmul.f32 %v10930_v18, %v10747_v48 }
 0x750   : > { %v10998_v13 = vmul.f32 %v10930_v18, %v10761_v40  ;;  %v11006_v9 = vmul.f32 %v10930_v18, %v10781_v6  ;;  %v11016_v40 = vmul.f32 %v10930_v18, %v10801_v36  ;;  %v13397_v6 = vld [vmem:[#allocation22_spill] sm:$0xff] }
 0x751   : > { %6163 = vmatmul.mubr.msk.f32.vlgmr.msra.gmra.mrb[118].mxu0 %vm1175_vm2, %v10818_v33  ;;  %v4135_v53 = vadd.f32 %v10925_v25, %v4134_v43  ;;  %v10945_v33 = vmul.f32 %v10930_v18, %v10638_v16  ;;  %v10961_v16 = vmul.f32 %v10930_v18, %v10656_v21  ;;  %v10965_v43 = vmul.f32 %v10930_v18, %v10662_v42  ;;  %v13399_v36 = vld [vmem:[#allocation26_spill] sm:$0xff] }
 0x752   : > { %4769 = vmatprep.mubr.f32.mxu0 %v13373_v60  ;;  %13393 = vst [vmem:[#allocation28_spill] sm:$0xff] %v11016_v40 }
 0x753   : > { %13390 = vst [vmem:[#allocation73_spill] sm:$0xff] %v10961_v16  ;;  %v11012_v16 = vmul.f32 %v10930_v18, %v10790_v7 }
 0x755   : > { %6164 = vmatmul.mubr.msk.f32.gmra.mrb[120].mxu0 %vm1175_vm2, %v10847_v51  ;;  %v4136_v51 = vadd.f32 %v10934_v58, %v4135_v53  ;;  %v10975_v53 = vmul.f32 %v10930_v18, %v10707_v22  ;;  %13392 = vst [vmem:[#allocation48_spill] sm:$0xff] %v11012_v16  ;;  %v4562_v22 = vpop.trf.xlu1 }
 0x756   : > { %4775 = vmatprep.mubr.f32.mxu0 %v13373_v60 }
 0x757   : > { %v4137_v21 = vrot.slane %v4136_v51, 4 }
 0x759   : > { %6165 = vmatmul.mubr.msk.f32.gmra.mrb[122].mxu0 %vm1175_vm2, %v10870_v35  ;;  %v11002_v35 = vmul.f32 %v10930_v18, %v10770_v49  ;;  %v4138_v42 = vadd.f32 %v4137_v21, %v4136_v51  ;;  %v11024_v51 = vmul.f32 %v10930_v18, %v10810_v11  ;;  %v11028_v21 = vmul.f32 %v10930_v18, %v10825_v17  ;;  %v4563_v11 = vpop.trf.xlu1 }
 0x75a   : > { %4781 = vmatprep.mubr.f32.mxu0 %v13373_v60 }
 0x75b   : > { %13391 = vst [vmem:[#allocation30_spill] sm:$0xff] %v11002_v35  ;;  %13394 = vst [vmem:[#allocation62_spill] sm:$0xff] %v11024_v51  ;;  %v4139_v7 = vrot.slane %v4138_v42, 2  ;;  %v13400_v51 = vld [vmem:[#allocation47_spill] sm:$0xff] }
 0x75c   : > { %13395 = vst [vmem:[#allocation65_spill] sm:$0xff] %v11028_v21  ;;  %v4155_v21 = vmul.f32 %v10930_v18, %v10518_v5 }
 0x75d   : > { %6166 = vmatmul.mubr.msk.f32.gmra.mrb[124].mxu0 %vm1175_vm2, %v10896_v44  ;;  %v4140_v49 = vadd.f32 %v4139_v7, %v4138_v42  ;;  %v4564_v44 = vpop.trf.xlu1 }
 0x75e   : > { %4787 = vmatprep.mubr.f32.mxu0 %v13373_v60 }
 0x75f   : > { %v4141_v48 = vrot.slane %v4140_v49, 1 }
 0x761   : > { %6167 = vmatmul.mubr.msk.f32.gmra.mrb[126].mxu0 %vm1175_vm2, %v4559_v4  ;;  %v4142_v17 = vadd.f32 %v4141_v48, %v4140_v49  ;;  %v4565_v42 = vpop.trf.xlu1  ;;  %v13396_v4 = vld [vmem:[#allocation58_spill] sm:$0xff]  ;;  %v4147_v48 = vmul.f32 %v10930_v18, %v13397_v6 }
 0x762   : > { %4793 = vmatprep.mubr.f32.mxu0 %v13373_v60  ;;  %v4145_v7 = vmul.f32 %v10930_v18, %v13396_v4 }
 0x763   : > { %7119 = vrcp.f32 %v4142_v17 }
 0x765   : > { %6168 = vmatmul.mubr.msk.f32.gmra.mrb[128].mxu0 %vm1175_vm2, %v4560_v47  ;;  %v13398_v47 = vld [vmem:[#allocation25_spill] sm:$0xff]  ;;  %v4566_v35 = vpop.trf.xlu1 }
 0x766   : > { %4799 = vmatprep.mubr.f32.mxu0 %v13373_v60  ;;  %v4149_v17 = vmul.f32 %v10930_v18, %v13398_v47 }
 0x769   : > { %6169 = vmatmul.mubr.msk.f32.gmra.mrb[130].mxu0 %vm1175_vm2, %v4561_v27  ;;  %v4151_v27 = vmul.f32 %v10930_v18, %v13399_v36  ;;  %v11068_v36 = vpop.trf.xlu0 }
 0x76a   : > { %4805 = vmatprep.mubr.f32.mxu0 %v13373_v60 }
 0x76b   : > { %v6492_v40 = vpack.c.bf16 %v4151_v27, %v4149_v17 }
 0x76d   : > { %6170 = vmatmul.mubr.msk.f32.gmra.mrb[132].mxu0 %vm1175_vm2, %v4562_v22  ;;  %v11049_v49 = vpop.eup %7119  ;;  %v4153_v22 = vmul.f32 %v10930_v18, %v13400_v51 }
 0x76e   : > { %4811 = vmatprep.mubr.f32.mxu0 %v13373_v60  ;;  %v4146_v4 = vmul.f32 %v11049_v49, %v10667_v0  ;;  %v4148_v6 = vmul.f32 %v11049_v49, %v10674_v38  ;;  %v4150_v16 = vmul.f32 %v11049_v49, %v10680_v61  ;;  %v4152_v47 = vmul.f32 %v11049_v49, %v10688_v10 }
 0x76f   : > { %v4154_v5 = vmul.f32 %v11049_v49, %v10701_v46  ;;  %v4156_v0 = vmul.f32 %v11049_v49, %v10714_v57  ;;  %v11077_v38 = vmul.f32 %v10930_v18, %v10534_v50  ;;  %v6488_v61 = vpack.c.bf16 %v4147_v48, %v4145_v7  ;;  %v4567_v48 = vpop.trf.xlu1 }
 0x770   : > { %v6486_v51 = vpack.c.bf16 %v4148_v6, %v4146_v4  ;;  %v6496_v10 = vpack.c.bf16 %v4155_v21, %v4153_v22  ;;  %v6490_v4 = vpack.c.bf16 %v4152_v47, %v4150_v16  ;;  %v4158_v6 = vmul.f32 %v11049_v49, %v10727_v3 }
 0x771   : > { %6171 = vmatmul.mubr.msk.f32.gmra.mrb[134].mxu0 %vm1175_vm2, %v4563_v11  ;;  %v4159_v11 = vmul.f32 %v10930_v18, %v10549_v39  ;;  %v4160_v46 = vmul.f32 %v11049_v49, %v10742_v12  ;;  %v11087_v57 = vmul.f32 %v11049_v49, %v10816_v31  ;;  %v4162_v50 = vmul.f32 %v11049_v49, %v10755_v59 }
 0x772   : > { %4817 = vmatprep.mubr.f32.mxu0 %v13373_v60  ;;  %6487 = vmatprep.subr.bf16.mxu1 %v6486_v51  ;;  %v11094_v39 = vmul.f32 %v11049_v49, %v10829_v19  ;;  %v11098_v3 = vmul.f32 %v11049_v49, %v10837_v20  ;;  %v6494_v12 = vpack.c.bf16 %v4156_v0, %v4154_v5 }
 0x773   : > { %6489 = vmatpush1.bf16.msra.mxu1 %v6488_v61  ;;  %v11103_v31 = vmul.f32 %v11049_v49, %v10845_v28  ;;  %v11107_v16 = vmul.f32 %v11049_v49, %v10854_v41  ;;  %v11113_v19 = vmul.f32 %v11049_v49, %v10861_v26  ;;  %v11117_v20 = vmul.f32 %v11049_v49, %v10868_v24  ;;  %v11123_v28 = vpop.trf.xlu0  ;;  %v4568_v0 = vpop.trf.xlu1  ;;  %v13402_v61 = vld [vmem:[#allocation68_spill] sm:$0xff] }
 0x774   : > { %6491 = vmatprep.subr.bf16.mxu1 %v6490_v4  ;;  %v6514_v59 = vpack.c.bf16 %v11094_v39, %v11087_v57  ;;  %v11121_v21 = vmul.f32 %v11049_v49, %v10877_v23  ;;  %v11133_v26 = vmul.f32 %v11049_v49, %v10894_v2  ;;  %v11137_v24 = vmul.f32 %v11049_v49, %v10900_v63  ;;  %v13403_v4 = vld [vmem:[#allocation90_spill] sm:$0xff] }
 0x775   : > { %6172 = vmatmul.mubr.msk.f32.gmra.mrb[136].mxu0 %vm1175_vm2, %v4564_v44  ;;  %v6518_v41 = vpack.c.bf16 %v11103_v31, %v11098_v3  ;;  %v11129_v44 = vmul.f32 %v11049_v49, %v10884_v15  ;;  %v6522_v23 = vpack.c.bf16 %v11113_v19, %v11107_v16  ;;  %v11146_v15 = vmul.f32 %v11049_v49, %v10907_v37  ;;  %v13423_v16 = vld [vmem:[#allocation62_spill] sm:$0xff] }
 0x776   : > { %4823 = vmatprep.mubr.f32.mxu0 %v13373_v60  ;;  %v6526_v7 = vpack.c.bf16 %v11121_v21, %v11117_v20  ;;  %v11153_v63 = vmul.f32 %v11049_v49, %v10911_v34  ;;  %v11163_v37 = vmul.f32 %v11049_v49, %v10919_v29  ;;  %v11167_v17 = vmul.f32 %v11049_v49, %v10923_v52  ;;  %v13425_v19 = vld [vmem:[#allocation14_spill] sm:$0xff] }
 0x777   : > { %6493 = vmatpush1.bf16.msra.mxu1 %v6492_v40  ;;  %v6530_v2 = vpack.c.bf16 %v11133_v26, %v11129_v44  ;;  %v11157_v40 = vmul.f32 %v11049_v49, %v10915_v14  ;;  %v11171_v27 = vmul.f32 %v11049_v49, %v10925_v25  ;;  %v6498_v34 = vpack.c.bf16 %v4160_v46, %v4158_v6  ;;  %v4589_v52 = vpop.trf.xlu0  ;;  %v13405_v46 = vld [vmem:[#allocation64_spill] sm:$0xff] }
 0x778   : > { %6495 = vmatprep.subr.bf16.mxu1 %v6494_v12  ;;  %v4164_v14 = vmul.f32 %v11049_v49, %v10765_v8  ;;  %v11179_v47 = vmul.f32 %v11049_v49, %v10934_v58  ;;  %v6542_v29 = vpack.c.bf16 %v11167_v17, %v11163_v37  ;;  %v6500_v25 = vpack.c.bf16 %v4159_v11, %v11077_v38  ;;  %v13401_v58 = vld [vmem:[#allocation59_spill] sm:$0xff]  ;;  %v13404_v11 = vld [vmem:[#allocation61_spill] sm:$0xff]  ;;  %v13432_v17 = vld [vmem:[#allocation38_spill] sm:$0xff] }
 0x779   : > { %6173 = vmatmul.mubr.msk.f32.gmra.mrb[138].mxu0 %vm1175_vm2, %v4565_v42  ;;  %v6534_v42 = vpack.c.bf16 %v11146_v15, %v11137_v24  ;;  %v6538_v22 = vpack.c.bf16 %v11157_v40, %v11153_v63  ;;  %v4161_v51 = vmul.f32 %v10930_v18, %v10555_v1  ;;  %v4163_v5 = vmul.f32 %v10930_v18, %v13401_v58  ;;  %v13426_v24 = vld [vmem:[#allocation31_spill] sm:$0xff]  ;;  %v13430_v40 = vld [vmem:[#allocation33_spill] sm:$0xff] }
 0x77a   : > { %4829 = vmatprep.mubr.f32.mxu0 %v13373_v60  ;;  %v6546_v8 = vpack.c.bf16 %v11179_v47, %v11171_v27  ;;  %v4168_v6 = vmul.f32 %v11049_v49, %v13403_v4  ;;  %v4165_v1 = vmul.f32 %v10930_v18, %v13404_v11  ;;  %v4167_v12 = vmul.f32 %v10930_v18, %v13405_v46  ;;  %v13409_v4 = vld [vmem:[#allocation66_spill] sm:$0xff]  ;;  %v13428_v15 = vld [vmem:[#allocation35_spill] sm:$0xff]  ;;  %v13434_v47 = vld [vmem:[#allocation36_spill] sm:$0xff] }
 0x77b   : > { %6497 = vmatpush1.bf16.msra.mxu1 %v6496_v10  ;;  %v4166_v10 = vmul.f32 %v11049_v49, %v13402_v61  ;;  %v6504_v38 = vpack.c.bf16 %v4163_v5, %v4161_v51  ;;  %v13407_v61 = vld [vmem:[#allocation70_spill] sm:$0xff]  ;;  %v13408_v5 = vld [vmem:[#allocation89_spill] sm:$0xff]  ;;  %v13411_v57 = vpack.c.bf16 %v10954_v30, %v10950_v62  ;;  %v13414_v30 = vpack.c.bf16 %v10975_v53, %v10971_v32 }
 0x77c   : > { %6499 = vmatprep.subr.bf16.mxu1 %v6498_v34  ;;  %v6508_v51 = vpack.c.bf16 %v4167_v12, %v4165_v1  ;;  %v13416_v32 = vpack.c.bf16 %v10998_v13, %v10991_v54  ;;  %v13419_v54 = vld [vmem:[#allocation28_spill] sm:$0xff]  ;;  %v13438_v12 = vld [vmem:[#allocation39_spill] sm:$0xff] }
 0x77d   : > { %6174 = vmatmul.mubr.msk.f32.gmra.mrb[140].mxu0 %vm1175_vm2, %v4566_v35  ;;  %v6502_v35 = vpack.c.bf16 %v4164_v14, %v4162_v50  ;;  %v4590_v50 = vpop.trf.xlu0  ;;  %v6506_v34 = vpack.c.bf16 %v4168_v6, %v4166_v10  ;;  %v13406_v14 = vld [vmem:[#allocation93_spill] sm:$0xff]  ;;  %v4171_v10 = vmul.f32 %v10930_v18, %v13409_v4  ;;  %v13420_v13 = vld [vmem:[#allocation48_spill] sm:$0xff] }
 0x77e   : > { %4835 = vmatprep.mubr.f32.mxu0 %v13373_v60  ;;  %v4170_v58 = vmul.f32 %v11049_v49, %v13406_v14  ;;  %v13421_v3 = vpack.c.bf16 %v13419_v54, %v13420_v13  ;;  %v13440_v14 = vld [vmem:[#allocation34_spill] sm:$0xff]  ;;  %v13458_v54 = vld [vmem:[#allocation13_spill] sm:$0xff] }
 0x77f   : > { %6501 = vmatpush1.bf16.msra.mxu1 %v6500_v25  ;;  %v4172_v25 = vmul.f32 %v11049_v49, %v13407_v61 }
 0x780   : > { %6503 = vmatprep.subr.bf16.mxu1 %v6502_v35  ;;  %v4169_v35 = vmul.f32 %v10930_v18, %v13408_v5  ;;  %v13444_v5 = vld [vmem:[#allocation42_spill] sm:$0xff] }
 0x781   : > { %6175 = vmatmul.mubr.msk.f32.gmra.mrb[142].mxu0 %vm1175_vm2, %v4567_v48  ;;  %v4569_v48 = vpop.trf.xlu1  ;;  %v6510_v6 = vpack.c.bf16 %v4172_v25, %v4170_v58  ;;  %v4591_v11 = vpop.trf.xlu0  ;;  %v13442_v25 = vld [vmem:[#allocation41_spill] sm:$0xff] }
 0x782   : > { %4841 = vmatprep.mubr.f32.mxu0 %v13373_v60  ;;  %v6512_v49 = vpack.c.bf16 %v4171_v10, %v4169_v35  ;;  %v13446_v10 = vld [vmem:[#allocation37_spill] sm:$0xff] }
 0x783   : > { %6505 = vmatpush1.bf16.msra.mxu1 %v6504_v38  ;;  %v13410_v38 = vpack.c.bf16 %v10945_v33, %v10941_v45  ;;  %v13412_v45 = vld [vmem:[#allocation73_spill] sm:$0xff] }
 0x784   : > { %6507 = vmatprep.subr.bf16.mxu1 %v6506_v34  ;;  %v13413_v33 = vpack.c.bf16 %v10965_v43, %v13412_v45  ;;  %v13415_v43 = vpack.c.bf16 %v10987_v56, %v10979_v55  ;;  %v13417_v56 = vld [vmem:[#allocation30_spill] sm:$0xff]  ;;  %v13452_v45 = vld [vmem:[#allocation9_spill] sm:$0xff] }
 0x785   : > { %6176 = vmatmul.mubr.msk.f32.gmra.mrb[144].mxu0 %vm1175_vm2, %v4568_v0  ;;  %v4570_v0 = vpop.trf.xlu1  ;;  %v4592_v18 = vpop.trf.xlu0  ;;  %v13418_v53 = vpack.c.bf16 %v11006_v9, %v13417_v56  ;;  %v13422_v9 = vld [vmem:[#allocation65_spill] sm:$0xff] }
 0x786   : > { %4847 = vmatprep.mubr.f32.mxu0 %v13373_v60 }
 0x787   : > { %6509 = vmatpush1.bf16.msra.mxu1 %v6508_v51 }
 0x788   : > { %6511 = vmatprep.subr.bf16.mxu1 %v6510_v6 }
 0x789   : > { %6177 = vmatmul.mubr.msk.f32.gmra.mrb[146].mxu0 %vm1175_vm2, %v4569_v48  ;;  %v4593_v39 = vpop.trf.xlu0 }
 0x78a   : > { %4853 = vmatprep.mubr.f32.mxu0 %v13373_v60 }
 0x78b   : > { %6513 = vmatpush1.bf16.msra.mxu1 %v6512_v49  ;;  %v13448_v49 = vld [vmem:[#allocation46_spill] sm:$0xff] }
 0x78c   : > { %6515 = vmatprep.subr.bf16.mxu1 %v6514_v59  ;;  %v13424_v59 = vpack.c.bf16 %v13422_v9, %v13423_v16 }
 0x78d   : > { %6178 = vmatmul.mubr.msk.f32.gmra.mrb[148].mxu0 %vm1175_vm2, %v4570_v0  ;;  %v4594_v62 = vpop.trf.xlu0 }
 0x78e   : > { %4859 = vmatprep.mubr.f32.mxu0 %v13373_v60 }
 0x78f   : > { %6517 = vmatpush1.bf16.msra.mxu1 %v13410_v38  ;;  %v13450_v38 = vld [vmem:[#allocation45_spill] sm:$0xff] }
 0x790   : > { %6519 = vmatprep.subr.bf16.mxu1 %v6518_v41 }
 0x791   : > { %6179 = vmatmul.mubr.msk.f32.gmra.mrb[150].mxu0 %vm1175_vm2, %v11068_v36  ;;  %v4595_v36 = vpop.trf.xlu0 }
 0x792   : > { %4865 = vmatprep.mubr.f32.mxu0 %v13373_v60 }
 0x793   : > { %6521 = vmatpush1.bf16.msra.mxu1 %v13411_v57 }
 0x794   : > { %6523 = vmatprep.subr.bf16.mxu1 %v6522_v23 }
 0x795   : > { %6180 = vmatmul.mubr.msk.f32.gmra.mrb[152].mxu0 %vm1175_vm2, %v11123_v28  ;;  %v4596_v55 = vpop.trf.xlu0 }
 0x796   : > { %4871 = vmatprep.mubr.f32.mxu0 %v13373_v60 }
 0x797   : > { %6525 = vmatpush1.bf16.msra.mxu1 %v13413_v33 }
 0x798   : > { %6527 = vmatprep.subr.bf16.mxu1 %v6526_v7 }
 0x799   : > { %6181 = vmatmul.mubr.msk.f32.gmra.mrb[154].mxu0 %vm1175_vm2, %v4589_v52  ;;  %v4597_v31 = vpop.trf.xlu0 }
 0x79a   : > { %4877 = vmatprep.mubr.f32.mxu0 %v13373_v60 }
 0x79b   : > { %6529 = vmatpush1.bf16.msra.mxu1 %v13414_v30  ;;  %v13454_v30 = vld [vmem:[#allocation6_spill] sm:$0xff] }
 0x79c   : > { %6531 = vmatprep.subr.bf16.mxu1 %v6530_v2 }
 0x79d   : > { %6182 = vmatmul.mubr.msk.f32.gmra.mrb[156].mxu0 %vm1175_vm2, %v4590_v50  ;;  %v4598_v20 = vpop.trf.xlu0 }
 0x79e   : > { %4883 = vmatprep.mubr.f32.mxu0 %v13373_v60 }
 0x79f   : > { %6533 = vmatpush1.bf16.msra.mxu1 %v13415_v43 }
 0x7a0   : > { %6535 = vmatprep.subr.bf16.mxu1 %v6534_v42 }
 0x7a1   : > { %6183 = vmatmul.mubr.msk.f32.gmra.mrb[158].mxu0 %vm1175_vm2, %v4591_v11  ;;  %v4599_v21 = vpop.trf.xlu0 }
 0x7a2   : > { %4889 = vmatprep.mubr.f32.mxu0 %v13373_v60 }
 0x7a3   : > { %6537 = vmatpush1.bf16.msra.mxu1 %v13416_v32  ;;  %v13456_v32 = vld [vmem:[#allocation15_spill] sm:$0xff] }
 0x7a4   : > { %6539 = vmatprep.subr.bf16.mxu1 %v6538_v22 }
 0x7a5   : > { %6184 = vmatmul.mubr.msk.f32.gmra.mrb[160].mxu0 %vm1175_vm2, %v4592_v18  ;;  %v4600_v28 = vpop.trf.xlu0 }
 0x7a6   : > { %4895 = vmatprep.mubr.f32.mxu0 %v13373_v60 }
 0x7a7   : > { %6541 = vmatpush1.bf16.msra.mxu1 %v13418_v53 }
 0x7a8   : > { %6543 = vmatprep.subr.bf16.mxu1 %v6542_v29 }
 0x7a9   : > { %6185 = vmatmul.mubr.msk.f32.gmra.mrb[162].mxu0 %vm1175_vm2, %v4593_v39  ;;  %v4601_v41 = vpop.trf.xlu0 }
 0x7aa   : > { %4901 = vmatprep.mubr.f32.mxu0 %v13373_v60 }
 0x7ab   : > { %6545 = vmatpush1.bf16.msra.mxu1 %v13421_v3 }
 0x7ac   : > { %6547 = vmatprep.subr.bf16.mxu1 %v6546_v8  ;;  %v13436_v8 = vld [vmem:[#allocation40_spill] sm:$0xff] }
 0x7ad   : > { %6186 = vmatmul.mubr.msk.f32.gmra.mrb[164].mxu0 %vm1175_vm2, %v4594_v62  ;;  %v4602_v44 = vpop.trf.xlu0 }
 0x7ae   : > { %4907 = vmatprep.mubr.f32.mxu0 %v13373_v60 }
 0x7af   : > { %6549 = vmatpush1.bf16.msra.mxu1 %v13424_v59 }
 0x7b0   : > { %5418 = vmatprep.subr.mxu1 %v13425_v19 }
 0x7b1   : > { %6187 = vmatmul.mubr.msk.f32.gmra.mrb[166].mxu0 %vm1175_vm2, %v4595_v36 }
 0x7b2   : > { %4913 = vmatprep.mubr.f32.mxu0 %v13373_v60 }
 0x7b5   : > { %6188 = vmatmul.mubr.msk.f32.gmra.mrb[168].mxu0 %vm1175_vm2, %v4596_v55 }
 0x7b6   : > { %4919 = vmatprep.mubr.f32.mxu0 %v13373_v60 }
 0x7b9   : > { %6189 = vmatmul.mubr.msk.f32.gmra.mrb[170].mxu0 %vm1175_vm2, %v4597_v31 }
 0x7ba   : > { %4925 = vmatprep.mubr.f32.mxu0 %v13373_v60 }
 0x7bd   : > { %6190 = vmatmul.mubr.msk.f32.gmra.mrb[172].mxu0 %vm1175_vm2, %v4598_v20 }
 0x7be   : > { %4931 = vmatprep.mubr.f32.mxu0 %v13373_v60 }
 0x7c1   : > { %6191 = vmatmul.mubr.msk.f32.gmra.mrb[174].mxu0 %vm1175_vm2, %v4599_v21  ;;  %v5378_v21 = vpop.trf.xlu1 }
 0x7c2   : > { %4937 = vmatprep.mubr.f32.mxu0 %v13373_v60 }
 0x7c5   : > { %6192 = vmatmul.mubr.msk.f32.gmra.mrb[176].mxu0 %vm1175_vm2, %v4600_v28 }
 0x7c6   : > { %4943 = vmatprep.mubr.f32.mxu0 %v13373_v60 }
 0x7c9   : > { %6193 = vmatmul.mubr.msk.f32.gmra.mrb[178].mxu0 %vm1175_vm2, %v4601_v41 }
 0x7ca   : > { %4949 = vmatprep.mubr.f32.mxu0 %v13373_v60 }
 0x7cd   : > { %6194 = vmatmul.mubr.msk.f32.gmra.mrb[180].mxu0 %vm1175_vm2, %v4602_v44 }
 0x7e4   : > { %v3291_v26 = vpop.f32.mrb[86].mxu0 }
 0x7e5   : > { %v11305_v23 = vadd.f32 %v3291_v26, %v13426_v24  ;;  %v3293_v7 = vpop.f32.mrb[87].mxu0  ;;  %v5379_v24 = vpop.trf.xlu1 }
 0x7e6   : > { %v11308_v2 = vadd.f32 %v3293_v7, %v13428_v15 }
 0x7e7   : > { %13427 = vst [vmem:[#allocation69_spill] sm:$0xff] %v11305_v23 }
 0x7e8   : > { %13429 = vst [vmem:[#allocation72_spill] sm:$0xff] %v11308_v2  ;;  %v3297_v63 = vpop.f32.mrb[88].mxu0 }
 0x7e9   : > { %v11311_v42 = vadd.f32 %v3297_v63, %v13430_v40  ;;  %v3299_v37 = vpop.f32.mrb[89].mxu0  ;;  %v5380_v63 = vpop.trf.xlu1 }
 0x7ea   : > { %v11314_v27 = vadd.f32 %v3299_v37, %v13432_v17 }
 0x7eb   : > { %13431 = vst [vmem:[#allocation75_spill] sm:$0xff] %v11311_v42 }
 0x7ec   : > { %13433 = vst [vmem:[#allocation77_spill] sm:$0xff] %v11314_v27  ;;  %v3303_v22 = vpop.f32.mrb[90].mxu0 }
 0x7ed   : > { %v11317_v29 = vadd.f32 %v3303_v22, %v13434_v47  ;;  %v3305_v52 = vpop.f32.mrb[91].mxu0  ;;  %v5381_v47 = vpop.trf.xlu1 }
 0x7ee   : > { %v11320_v1 = vadd.f32 %v3305_v52, %v13436_v8 }
 0x7ef   : > { %13435 = vst [vmem:[#allocation79_spill] sm:$0xff] %v11317_v29 }
 0x7f0   : > { %13437 = vst [vmem:[#allocation81_spill] sm:$0xff] %v11320_v1  ;;  %v3309_v46 = vpop.f32.mrb[92].mxu0 }
 0x7f1   : > { %v11323_v50 = vadd.f32 %v3309_v46, %v13438_v12  ;;  %v3311_v34 = vpop.f32.mrb[93].mxu0 }
 0x7f2   : > { %v11326_v58 = vadd.f32 %v3311_v34, %v13440_v14  ;;  %v5382_v34 = vpop.trf.xlu1 }
 0x7f3   : > { %13439 = vst [vmem:[#allocation83_spill] sm:$0xff] %v11323_v50 }
 0x7f4   : > { %13441 = vst [vmem:[#allocation85_spill] sm:$0xff] %v11326_v58  ;;  %v3315_v61 = vpop.f32.mrb[94].mxu0 }
 0x7f5   : > { %v11329_v48 = vadd.f32 %v3315_v61, %v13442_v25  ;;  %v3317_v51 = vpop.f32.mrb[95].mxu0 }
 0x7f6   : > { %v11332_v35 = vadd.f32 %v3317_v51, %v13444_v5 }
 0x7f7   : > { %13443 = vst [vmem:[#allocation87_spill] sm:$0xff] %v11329_v48 }
 0x7f8   : > { %13445 = vst [vmem:[#allocation91_spill] sm:$0xff] %v11332_v35  ;;  %v3321_v4 = vpop.f32.mrb[96].mxu0 }
 0x7f9   : > { %v11335_v6 = vadd.f32 %v3321_v4, %v13446_v10  ;;  %v3323_v11 = vpop.f32.mrb[97].mxu0 }
 0x7fa   : > { %v11338_v0 = vadd.f32 %v3323_v11, %v13448_v49  ;;  %v5383_v11 = vpop.trf.xlu1 }
 0x7fb   : > { %13447 = vst [vmem:[#allocation94_spill] sm:$0xff] %v11335_v6 }
 0x7fc   : > { %13449 = vst [vmem:[#allocation50_spill] sm:$0xff] %v11338_v0  ;;  %v3327_v18 = vpop.f32.mrb[98].mxu0 }
 0x7fd   : > { %v11341_v57 = vadd.f32 %v3327_v18, %v13450_v38  ;;  %v3329_v39 = vpop.f32.mrb[99].mxu0 }
 0x7fe   : > { %v11344_v33 = vadd.f32 %v3329_v39, %v13452_v45 }
 0x7ff   : > { %13451 = vst [vmem:[#allocation52_spill] sm:$0xff] %v11341_v57 }
 0x800   : > { %13453 = vst [vmem:[#allocation4_spill] sm:$0xff] %v11344_v33  ;;  %v3333_v62 = vpop.f32.mrb[100].mxu0 }
 0x801   : > { %v11347_v43 = vadd.f32 %v3333_v62, %v13454_v30  ;;  %v3335_v36 = vpop.f32.mrb[101].mxu0  ;;  %v5384_v62 = vpop.trf.xlu1 }
 0x802   : > { %v11350_v55 = vadd.f32 %v3335_v36, %v13456_v32 }
 0x803   : > { %13455 = vst [vmem:[#allocation3_spill] sm:$0xff] %v11347_v43 }
 0x804   : > { %13457 = vst [vmem:[#allocation10_spill] sm:$0xff] %v11350_v55  ;;  %v4331_v56 = vpop.f32.mrb[102].mxu0 }
 0x805   : > { %v4333_v53 = vpop.f32.mrb[103].mxu0 }
 0x806   : > { %4442 = vmatprep.mubr.f32.mxu1 %v4333_v53 }
 0x807   : > { %4443 = vmatmul.mubr.f32.vlgmr.msra.gmra.mrb[186].mxu1 %v4331_v56 }
 0x808   : > { %5419 = vmatpush1.msra.mxu1 %v13458_v54  ;;  %v4337_v13 = vpop.f32.mrb[104].mxu0 }
 0x809   : > { %v4339_v3 = vpop.f32.mrb[105].mxu0 }
 0x80a   : > { %4448 = vmatprep.mubr.f32.mxu1 %v4339_v3  ;;  %v5385_v3 = vpop.trf.xlu1 }
 0x80b   : > { %4449 = vmatmul.mubr.f32.gmra.mrb[188].mxu1 %v4337_v13 }
 0x80c   : > { %v4343_v31 = vpop.f32.mrb[106].mxu0 }
 0x80d   : > { %v4345_v9 = vpop.f32.mrb[107].mxu0 }
 0x80e   : > { %4454 = vmatprep.mubr.f32.mxu1 %v4345_v9 }
 0x80f   : > { %4455 = vmatmul.mubr.f32.gmra.mrb[190].mxu1 %v4343_v31 }
 0x810   : > { %v4349_v16 = vpop.f32.mrb[108].mxu0 }
 0x811   : > { %v4351_v59 = vpop.f32.mrb[109].mxu0 }
 0x812   : > { %4460 = vmatprep.mubr.f32.mxu1 %v4351_v59 }
 0x813   : > { %4461 = vmatmul.mubr.f32.gmra.mrb[192].mxu1 %v4349_v16 }
 0x814   : > { %v4355_v19 = vpop.f32.mrb[110].mxu0 }
 0x815   : > { %v4357_v20 = vpop.f32.mrb[111].mxu0 }
 0x816   : > { %4466 = vmatprep.mubr.f32.mxu1 %v4357_v20 }
 0x817   : > { %4467 = vmatmul.mubr.f32.gmra.mrb[194].mxu1 %v4355_v19 }
 0x818   : > { %v4361_v28 = vpop.f32.mrb[112].mxu0 }
 0x819   : > { %v4363_v41 = vpop.f32.mrb[113].mxu0 }
 0x81a   : > { %4472 = vmatprep.mubr.f32.mxu1 %v4363_v41 }
 0x81b   : > { %4473 = vmatmul.mubr.f32.gmra.mrb[196].mxu1 %v4361_v28 }
 0x81c   : > { %v4367_v44 = vpop.f32.mrb[114].mxu0 }
 0x81d   : > { %v4369_v26 = vpop.f32.mrb[115].mxu0 }
 0x81e   : > { %4478 = vmatprep.mubr.f32.mxu1 %v4369_v26 }
 0x81f   : > { %4479 = vmatmul.mubr.f32.gmra.mrb[198].mxu1 %v4367_v44 }
 0x820   : > { %v4373_v7 = vpop.f32.mrb[116].mxu0 }
 0x821   : > { %v4375_v15 = vpop.f32.mrb[117].mxu0 }
 0x822   : > { %4484 = vmatprep.mubr.f32.mxu1 %v4375_v15 }
 0x823   : > { %4485 = vmatmul.mubr.f32.gmra.mrb[200].mxu1 %v4373_v7 }
 0x824   : > { %v11353_v40 = vpop.f32.mrb[118].mxu0  ;;  %5482 = vmatprep.mubr.f32.mxu1 %v13373_v60 }
 0x825   : > { %v11356_v37 = vpop.f32.mrb[119].mxu0 }
 0x827   : > { %6195 = vmatmul.mubr.msk.f32.vlgmr.msra.gmra.mrb[202].mxu1 %vm1175_vm2, %v5378_v21 }
 0x828   : > { %v11359_v17 = vpop.f32.mrb[120].mxu0  ;;  %5488 = vmatprep.mubr.f32.mxu1 %v13373_v60 }
 0x829   : > { %v11362_v22 = vpop.f32.mrb[121].mxu0 }
 0x82b   : > { %6196 = vmatmul.mubr.msk.f32.gmra.mrb[204].mxu1 %vm1175_vm2, %v5379_v24 }
 0x82c   : > { %v11365_v52 = vpop.f32.mrb[122].mxu0  ;;  %5494 = vmatprep.mubr.f32.mxu1 %v13373_v60 }
 0x82d   : > { %v4956_v8 = vmax.f32 %v11353_v40, %v11365_v52  ;;  %v11370_v46 = vpop.f32.mrb[123].mxu0 }
 0x82e   : > { %v4993_v12 = vmax.f32 %v11356_v37, %v11370_v46 }
 0x82f   : > { %6197 = vmatmul.mubr.msk.f32.gmra.mrb[206].mxu1 %vm1175_vm2, %v5380_v63 }
 0x830   : > { %v11375_v14 = vpop.f32.mrb[124].mxu0  ;;  %5500 = vmatprep.mubr.f32.mxu1 %v13373_v60 }
 0x831   : > { %v4957_v61 = vmax.f32 %v11359_v17, %v11375_v14  ;;  %v11380_v25 = vpop.f32.mrb[125].mxu0 }
 0x832   : > { %v4994_v51 = vmax.f32 %v11362_v22, %v11380_v25 }
 0x833   : > { %6198 = vmatmul.mubr.msk.f32.gmra.mrb[208].mxu1 %vm1175_vm2, %v5381_v47 }
 0x834   : > { %v11385_v5 = vpop.f32.mrb[126].mxu0  ;;  %5506 = vmatprep.mubr.f32.mxu1 %v13373_v60 }
 0x835   : > { %v4958_v4 = vmax.f32 %v4956_v8, %v11385_v5  ;;  %v11389_v10 = vpop.f32.mrb[127].mxu0 }
 0x836   : > { %v4995_v49 = vmax.f32 %v4993_v12, %v11389_v10 }
 0x837   : > { %6199 = vmatmul.mubr.msk.f32.gmra.mrb[210].mxu1 %vm1175_vm2, %v5382_v34 }
 0x838   : > { %v11393_v18 = vpop.f32.mrb[128].mxu0  ;;  %5512 = vmatprep.mubr.f32.mxu1 %v13373_v60 }
 0x839   : > { %v4959_v38 = vmax.f32 %v4957_v61, %v11393_v18  ;;  %v11397_v39 = vpop.f32.mrb[129].mxu0 }
 0x83a   : > { %v4996_v45 = vmax.f32 %v4994_v51, %v11397_v39 }
 0x83b   : > { %6200 = vmatmul.mubr.msk.f32.gmra.mrb[212].mxu1 %vm1175_vm2, %v5383_v11 }
 0x83c   : > { %v11401_v30 = vpop.f32.mrb[130].mxu0  ;;  %5518 = vmatprep.mubr.f32.mxu1 %v13373_v60 }
 0x83d   : > { %v4960_v36 = vmax.f32 %v4958_v4, %v11401_v30  ;;  %v11405_v32 = vpop.f32.mrb[131].mxu0 }
 0x83e   : > { %v4997_v56 = vmax.f32 %v4995_v49, %v11405_v32 }
 0x83f   : > { %6201 = vmatmul.mubr.msk.f32.gmra.mrb[214].mxu1 %vm1175_vm2, %v5384_v62 }
 0x840   : > { %v11409_v53 = vpop.f32.mrb[132].mxu0  ;;  %5524 = vmatprep.mubr.f32.mxu1 %v13373_v60 }
 0x841   : > { %v4961_v54 = vmax.f32 %v4959_v38, %v11409_v53  ;;  %v11413_v13 = vpop.f32.mrb[133].mxu0 }
 0x842   : > { %v4998_v31 = vmax.f32 %v4996_v45, %v11413_v13 }
 0x843   : > { %6202 = vmatmul.mubr.msk.f32.gmra.mrb[216].mxu1 %vm1175_vm2, %v5385_v3 }
 0x844   : > { %v11417_v9 = vpop.f32.mrb[134].mxu0 }
 0x845   : > { %v4962_v16 = vmax.f32 %v4960_v36, %v11417_v9  ;;  %v11420_v59 = vpop.f32.mrb[135].mxu0 }
 0x846   : > { %v4999_v19 = vmax.f32 %v4997_v56, %v11420_v59 }
 0x848   : > { %v11423_v20 = vpop.f32.mrb[136].mxu0 }
 0x849   : > { %v4963_v60 = vmax.f32 %v4961_v54, %v11423_v20  ;;  %v11426_v21 = vpop.f32.mrb[137].mxu0 }
 0x84a   : > { %v5000_v28 = vmax.f32 %v4998_v31, %v11426_v21 }
 0x84c   : > { %v11429_v41 = vpop.f32.mrb[138].mxu0 }
 0x84d   : > { %v4964_v44 = vmax.f32 %v4962_v16, %v11429_v41  ;;  %v11432_v26 = vpop.f32.mrb[139].mxu0 }
 0x84e   : > { %v5001_v24 = vmax.f32 %v4999_v19, %v11432_v26 }
 0x850   : > { %v11435_v7 = vpop.f32.mrb[140].mxu0 }
 0x851   : > { %v4965_v15 = vmax.f32 %v4963_v60, %v11435_v7  ;;  %v11438_v63 = vpop.f32.mrb[141].mxu0 }
 0x852   : > { %13459 = vst [vmem:[#allocation98_spill] sm:$0xff] %v11438_v63  ;;  %v5002_v47 = vmax.f32 %v5000_v28, %v11438_v63 }
 0x854   : > { %v11441_v8 = vpop.f32.mrb[142].mxu0 }
 0x855   : > { %v4966_v12 = vmax.f32 %v4964_v44, %v11441_v8  ;;  %v11444_v34 = vpop.f32.mrb[143].mxu0 }
 0x856   : > { %13460 = vst [vmem:[#allocation101_spill] sm:$0xff] %v11444_v34  ;;  %v5003_v61 = vmax.f32 %v5001_v24, %v11444_v34 }
 0x858   : > { %v11447_v51 = vpop.f32.mrb[144].mxu0 }
 0x859   : > { %v4967_v4 = vmax.f32 %v4965_v15, %v11447_v51  ;;  %v11450_v11 = vpop.f32.mrb[145].mxu0 }
 0x85a   : > { %13461 = vst [vmem:[#allocation104_spill] sm:$0xff] %v11450_v11  ;;  %v5004_v49 = vmax.f32 %v5002_v47, %v11450_v11 }
 0x85c   : > { %v11453_v38 = vpop.f32.mrb[146].mxu0 }
 0x85d   : > { %v4968_v45 = vmax.f32 %v4966_v12, %v11453_v38  ;;  %v11456_v62 = vpop.f32.mrb[147].mxu0 }
 0x85e   : > { %13462 = vst [vmem:[#allocation27_spill] sm:$0xff] %v11456_v62  ;;  %v5005_v36 = vmax.f32 %v5003_v61, %v11456_v62 }
 0x860   : > { %v11459_v56 = vpop.f32.mrb[148].mxu0 }
 0x861   : > { %v4969_v54 = vmax.f32 %v4967_v4, %v11459_v56  ;;  %v11462_v3 = vpop.f32.mrb[149].mxu0 }
 0x862   : > { %13463 = vst [vmem:[#allocation51_spill] sm:$0xff] %v11462_v3  ;;  %v5006_v31 = vmax.f32 %v5004_v49, %v11462_v3 }
 0x864   : > { %v11465_v16 = vpop.f32.mrb[150].mxu0 }
 0x865   : > { %v4970_v19 = vmax.f32 %v4968_v45, %v11465_v16  ;;  %v11468_v60 = vpop.f32.mrb[151].mxu0 }
 0x866   : > { %13464 = vst [vmem:[#allocation103_spill] sm:$0xff] %v11468_v60  ;;  %v5007_v28 = vmax.f32 %v5005_v36, %v11468_v60 }
 0x868   : > { %v11471_v44 = vpop.f32.mrb[152].mxu0 }
 0x869   : > { %v4971_v24 = vmax.f32 %v4969_v54, %v11471_v44  ;;  %v11474_v15 = vpop.f32.mrb[153].mxu0 }
 0x86a   : > { %13465 = vst [vmem:[#allocation106_spill] sm:$0xff] %v11474_v15  ;;  %v5008_v47 = vmax.f32 %v5006_v31, %v11474_v15 }
 0x86c   : > { %v11477_v12 = vpop.f32.mrb[154].mxu0 }
 0x86d   : > { %v4972_v61 = vmax.f32 %v4970_v19, %v11477_v12  ;;  %v11480_v4 = vpop.f32.mrb[155].mxu0 }
 0x86e   : > { %13466 = vst [vmem:[#allocation105_spill] sm:$0xff] %v11480_v4  ;;  %v5009_v49 = vmax.f32 %v5007_v28, %v11480_v4 }
 0x870   : > { %v11483_v45 = vpop.f32.mrb[156].mxu0 }
 0x871   : > { %v4973_v36 = vmax.f32 %v4971_v24, %v11483_v45  ;;  %v11486_v55 = vpop.f32.mrb[157].mxu0 }
 0x872   : > { %13467 = vst [vmem:[#allocation60_spill] sm:$0xff] %v11486_v55  ;;  %v5010_v54 = vmax.f32 %v5008_v47, %v11486_v55 }
 0x874   : > { %v11489_v43 = vpop.f32.mrb[158].mxu0 }
 0x875   : > { %v4974_v31 = vmax.f32 %v4972_v61, %v11489_v43  ;;  %v11492_v33 = vpop.f32.mrb[159].mxu0 }
 0x876   : > { %13468 = vst [vmem:[#allocation63_spill] sm:$0xff] %v11492_v33  ;;  %v5011_v19 = vmax.f32 %v5009_v49, %v11492_v33 }
 0x878   : > { %v11495_v57 = vpop.f32.mrb[160].mxu0 }
 0x879   : > { %v4975_v28 = vmax.f32 %v4973_v36, %v11495_v57  ;;  %v11498_v0 = vpop.f32.mrb[161].mxu0 }
 0x87a   : > { %13469 = vst [vmem:[#allocation67_spill] sm:$0xff] %v11498_v0  ;;  %v5012_v24 = vmax.f32 %v5010_v54, %v11498_v0 }
 0x87c   : > { %v11501_v6 = vpop.f32.mrb[162].mxu0 }
 0x87d   : > { %v4976_v47 = vmax.f32 %v4974_v31, %v11501_v6  ;;  %v11504_v35 = vpop.f32.mrb[163].mxu0 }
 0x87e   : > { %13470 = vst [vmem:[#allocation71_spill] sm:$0xff] %v11504_v35  ;;  %v5013_v61 = vmax.f32 %v5011_v19, %v11504_v35 }
 0x880   : > { %v11507_v48 = vpop.f32.mrb[164].mxu0 }
 0x881   : > { %v4977_v49 = vmax.f32 %v4975_v28, %v11507_v48  ;;  %v11510_v58 = vpop.f32.mrb[165].mxu0 }
 0x882   : > { %13471 = vst [vmem:[#allocation74_spill] sm:$0xff] %v11510_v58  ;;  %v5014_v36 = vmax.f32 %v5012_v24, %v11510_v58 }
 0x884   : > { %v11513_v50 = vpop.f32.mrb[166].mxu0 }
 0x885   : > { %v4978_v54 = vmax.f32 %v4976_v47, %v11513_v50  ;;  %v11516_v1 = vpop.f32.mrb[167].mxu0 }
 0x886   : > { %13472 = vst [vmem:[#allocation76_spill] sm:$0xff] %v11516_v1  ;;  %v5015_v31 = vmax.f32 %v5013_v61, %v11516_v1 }
 0x888   : > { %v11519_v29 = vpop.f32.mrb[168].mxu0 }
 0x889   : > { %v4979_v19 = vmax.f32 %v4977_v49, %v11519_v29  ;;  %v11522_v27 = vpop.f32.mrb[169].mxu0 }
 0x88a   : > { %13473 = vst [vmem:[#allocation78_spill] sm:$0xff] %v11522_v27  ;;  %v5016_v28 = vmax.f32 %v5014_v36, %v11522_v27 }
 0x88c   : > { %v11525_v42 = vpop.f32.mrb[170].mxu0 }
 0x88d   : > { %v4980_v24 = vmax.f32 %v4978_v54, %v11525_v42  ;;  %v11528_v2 = vpop.f32.mrb[171].mxu0 }
 0x88e   : > { %13474 = vst [vmem:[#allocation80_spill] sm:$0xff] %v11528_v2  ;;  %v5017_v47 = vmax.f32 %v5015_v31, %v11528_v2 }
 0x890   : > { %v11531_v23 = vpop.f32.mrb[172].mxu0 }
 0x891   : > { %v4981_v61 = vmax.f32 %v4979_v19, %v11531_v23  ;;  %v11534_v1 = vpop.f32.mrb[173].mxu0 }
 0x892   : > { %13475 = vst [vmem:[#allocation82_spill] sm:$0xff] %v11534_v1  ;;  %v5018_v49 = vmax.f32 %v5016_v28, %v11534_v1 }
 0x894   : > { %v11537_v58 = vpop.f32.mrb[174].mxu0 }
 0x895   : > { %v4982_v36 = vmax.f32 %v4980_v24, %v11537_v58  ;;  %v11540_v27 = vpop.f32.mrb[175].mxu0 }
 0x896   : > { %13476 = vst [vmem:[#allocation84_spill] sm:$0xff] %v11540_v27  ;;  %v5019_v54 = vmax.f32 %v5017_v47, %v11540_v27 }
 0x898   : > { %v11543_v35 = vpop.f32.mrb[176].mxu0 }
 0x899   : > { %v4983_v31 = vmax.f32 %v4981_v61, %v11543_v35  ;;  %v11546_v2 = vpop.f32.mrb[177].mxu0 }
 0x89a   : > { %13477 = vst [vmem:[#allocation109_spill] sm:$0xff] %v11546_v2  ;;  %v5020_v19 = vmax.f32 %v5018_v49, %v11546_v2 }
 0x89c   : > { %v11549_v0 = vpop.f32.mrb[178].mxu0 }
 0x89d   : > { %v4984_v28 = vmax.f32 %v4982_v36, %v11549_v0  ;;  %v11552_v1 = vpop.f32.mrb[179].mxu0 }
 0x89e   : > { %13478 = vst [vmem:[#allocation107_spill] sm:$0xff] %v11552_v1  ;;  %v5021_v24 = vmax.f32 %v5019_v54, %v11552_v1 }
 0x8a0   : > { %v11555_v33 = vpop.f32.mrb[180].mxu0 }
 0x8a1   : > { %v4985_v47 = vmax.f32 %v4983_v31, %v11555_v33  ;;  %v11558_v27 = vpop.f32.mrb[181].mxu0 }
 0x8a2   : > { %13479 = vst [vmem:[#allocation86_spill] sm:$0xff] %v11558_v27  ;;  %v5022_v61 = vmax.f32 %v5020_v19, %v11558_v27 }
 0x8a3   : > { %v4986_v55 = vmax.f32 %v4984_v28, %v4985_v47 }
 0x8a4   : > { %v5023_v4 = vmax.f32 %v5021_v24, %v5022_v61 }
 0x8a5   : > { %v4987_v15 = vrot.slane %v4986_v55, 4 }
 0x8a6   : > { %v5024_v49 = vrot.slane %v5023_v4, 4 }
 0x8a7   : > { %v4988_v2 = vmax.f32 %v4986_v55, %v4987_v15 }
 0x8a8   : > { %v5025_v60 = vmax.f32 %v5023_v4, %v5024_v49 }
 0x8a9   : > { %v4989_v3 = vrot.slane %v4988_v2, 2 }
 0x8aa   : > { %v5026_v36 = vrot.slane %v5025_v60, 2 }
 0x8ab   : > { %v4990_v62 = vmax.f32 %v4988_v2, %v4989_v3 }
 0x8ac   : > { %v5027_v11 = vmax.f32 %v5025_v60, %v5026_v36 }
 0x8ad   : > { %v4991_v34 = vrot.slane %v4990_v62, 1 }
 0x8ae   : > { %v5028_v54 = vrot.slane %v5027_v11, 1 }
 0x8af   : > { %v11561_v1 = vmax.f32 %v4990_v62, %v4991_v34 }
 0x8b0   : > { %v11563_v63 = vmax.f32 %v5027_v11, %v5028_v54 }
 0x8b1   : > { %v5030_v31 = vsub.f32 %v11353_v40, %v11561_v1  ;;  %v5032_v19 = vsub.f32 %v11359_v17, %v11561_v1  ;;  %v5034_v55 = vsub.f32 %v11365_v52, %v11561_v1  ;;  %v5036_v15 = vsub.f32 %v11375_v14, %v11561_v1 }
 0x8b2   : > { %v5038_v2 = vsub.f32 %v11385_v5, %v11561_v1  ;;  %v5040_v34 = vsub.f32 %v11393_v18, %v11561_v1  ;;  %v5042_v11 = vsub.f32 %v11401_v30, %v11561_v1  ;;  %v5044_v40 = vsub.f32 %v11409_v53, %v11561_v1  ;;  %v13502_v30 = vld [vmem:[#allocation82_spill] sm:$0xff] }
 0x8b3   : > { %v5046_v17 = vsub.f32 %v11417_v9, %v11561_v1  ;;  %v5048_v52 = vsub.f32 %v11423_v20, %v11561_v1  ;;  %v5050_v14 = vsub.f32 %v11429_v41, %v11561_v1  ;;  %v5052_v5 = vsub.f32 %v11435_v7, %v11561_v1  ;;  %v13495_v41 = vld [vmem:[#allocation71_spill] sm:$0xff]  ;;  %v13498_v9 = vld [vmem:[#allocation76_spill] sm:$0xff] }
 0x8b4   : > { %v5094_v4 = vmul.f32 1.442695, %v5030_v31  ;;  %v5098_v61 = vmul.f32 1.442695, %v5032_v19  ;;  %v5102_v60 = vmul.f32 1.442695, %v5034_v55  ;;  %v13507_v7 = vsub.f32 %v11453_v38, %v11561_v1 }
 0x8b5   : > { %v5106_v54 = vmul.f32 1.442695, %v5036_v15  ;;  %v5110_v28 = vmul.f32 1.442695, %v5038_v2  ;;  %v5114_v3 = vmul.f32 1.442695, %v5040_v34  ;;  %v13510_v38 = vsub.f32 %v11471_v44, %v11561_v1 }
 0x8b6   : > { %7121 = vpow2.f32 %v5094_v4  ;;  %v5118_v24 = vmul.f32 1.442695, %v5042_v11  ;;  %v5122_v62 = vmul.f32 1.442695, %v5044_v40  ;;  %v5126_v2 = vmul.f32 1.442695, %v5046_v17 }
 0x8b7   : > { %7123 = vpow2.f32 %v5098_v61  ;;  %v13482_v17 = vld [vmem:[#allocation98_spill] sm:$0xff]  ;;  %v13483_v11 = vld [vmem:[#allocation101_spill] sm:$0xff]  ;;  %v13484_v40 = vld [vmem:[#allocation104_spill] sm:$0xff]  ;;  %v5134_v31 = vmul.f32 1.442695, %v5050_v14 }
 0x8b8   : > { %7125 = vpow2.f32 %v5102_v60  ;;  %v13486_v4 = vld [vmem:[#allocation27_spill] sm:$0xff]  ;;  %v13489_v34 = vld [vmem:[#allocation106_spill] sm:$0xff]  ;;  %v13490_v15 = vld [vmem:[#allocation105_spill] sm:$0xff]  ;;  %v5150_v55 = vmul.f32 1.442695, %v13507_v7 }
 0x8b9   : > { %7127 = vpow2.f32 %v5106_v54  ;;  %v5130_v54 = vmul.f32 1.442695, %v5048_v52  ;;  %v13488_v52 = vld [vmem:[#allocation103_spill] sm:$0xff]  ;;  %v13499_v14 = vld [vmem:[#allocation78_spill] sm:$0xff]  ;;  %v5162_v7 = vmul.f32 1.442695, %v13510_v38 }
 0x8ba   : > { %7129 = vpow2.f32 %v5110_v28  ;;  %v13487_v28 = vld [vmem:[#allocation51_spill] sm:$0xff] }
 0x8bb   : > { %7131 = vpow2.f32 %v5114_v3  ;;  %v13493_v19 = vld [vmem:[#allocation63_spill] sm:$0xff] }
 0x8bc   : > { %7133 = vpow2.f32 %v5118_v24  ;;  %v13494_v61 = vld [vmem:[#allocation67_spill] sm:$0xff] }
 0x8bd   : > { %7135 = vpow2.f32 %v5122_v62  ;;  %v13492_v62 = vld [vmem:[#allocation60_spill] sm:$0xff] }
 0x8be   : > { %7137 = vpow2.f32 %v5126_v2 }
 0x8bf   : > { %7139 = vpow2.f32 %v5130_v54  ;;  %v13503_v54 = vld [vmem:[#allocation84_spill] sm:$0xff] }
 0x8c0   : > { %v11641_v60 = vpop.eup %7121  ;;  %7141 = vpow2.f32 %v5134_v31 }
 0x8c1   : > { %13480 = vst [vmem:[#allocation88_spill] sm:$0xff] %v11641_v60  ;;  %v11649_v3 = vpop.eup %7123 }
 0x8c2   : > { %13481 = vst [vmem:[#allocation92_spill] sm:$0xff] %v11649_v3  ;;  %v5222_v47 = vadd.f32 %v11649_v3, %v11641_v60  ;;  %v11663_v24 = vpop.eup %7125  ;;  %v13506_v60 = vsub.f32 %v11447_v51, %v11561_v1  ;;  %v13509_v51 = vsub.f32 %v11465_v16, %v11561_v1  ;;  %v13512_v16 = vsub.f32 %v11362_v22, %v11563_v63 }
 0x8c3   : > { %13485 = vst [vmem:[#allocation5_spill] sm:$0xff] %v11663_v24  ;;  %v11676_v20 = vpop.eup %7127 }
 0x8c4   : > { %v5223_v36 = vadd.f32 %v11663_v24, %v5222_v47  ;;  %13491 = vst [vmem:[#allocation99_spill] sm:$0xff] %v11676_v20  ;;  %v5138_v47 = vmul.f32 1.442695, %v5052_v5  ;;  %v11692_v18 = vpop.eup %7129  ;;  %v13504_v24 = vld [vmem:[#allocation109_spill] sm:$0xff]  ;;  %v13505_v5 = vld [vmem:[#allocation107_spill] sm:$0xff] }
 0x8c5   : > { %13497 = vst [vmem:[#allocation111_spill] sm:$0xff] %v11692_v18  ;;  %v11708_v2 = vpop.eup %7131  ;;  %v5146_v3 = vmul.f32 1.442695, %v13506_v60  ;;  %v5158_v60 = vmul.f32 1.442695, %v13509_v51 }
 0x8c6   : > { %v5224_v49 = vadd.f32 %v11676_v20, %v5223_v36  ;;  %v13501_v36 = vsub.f32 %v11441_v8, %v11561_v1  ;;  %7143 = vpow2.f32 %v5138_v47 }
 0x8c8   : > { %v5142_v20 = vmul.f32 1.442695, %v13501_v36  ;;  %v5225_v53 = vadd.f32 %v11692_v18, %v5224_v49  ;;  %v11717_v36 = vpop.eup %7133 }
 0x8c9   : > { %v11723_v18 = vpop.eup %7135 }
 0x8ca   : > { %v5226_v49 = vadd.f32 %v11708_v2, %v5225_v53  ;;  %7145 = vpow2.f32 %v5142_v20  ;;  %v11729_v27 = vpop.eup %7137  ;;  %v13508_v53 = vsub.f32 %v11459_v56, %v11561_v1 }
 0x8cb   : > { %7147 = vpow2.f32 %v5146_v3  ;;  %v11738_v20 = vpop.eup %7139  ;;  %v13511_v3 = vsub.f32 %v11356_v37, %v11563_v63  ;;  %v13515_v37 = vsub.f32 %v11370_v46, %v11563_v63 }
 0x8cc   : > { %v5227_v31 = vadd.f32 %v11717_v36, %v5226_v49  ;;  %v5154_v47 = vmul.f32 1.442695, %v13508_v53  ;;  %7149 = vpow2.f32 %v5150_v55  ;;  %v11747_v53 = vpop.eup %7141  ;;  %v13513_v55 = vsub.f32 %v11477_v12, %v11561_v1 }
 0x8cd   : > { %v5096_v56 = vmul.f32 1.442695, %v13511_v3  ;;  %v13518_v12 = vsub.f32 %v11380_v25, %v11563_v63 }
 0x8ce   : > { %v5228_v8 = vadd.f32 %v11723_v18, %v5227_v31  ;;  %7151 = vpow2.f32 %v5154_v47  ;;  %v5166_v51 = vmul.f32 1.442695, %v13513_v55  ;;  %v13516_v47 = vsub.f32 %v11483_v45, %v11561_v1 }
 0x8cf   : > { %7153 = vpow2.f32 %v5158_v60  ;;  %v13521_v45 = vsub.f32 %v11389_v10, %v11563_v63 }
 0x8d0   : > { %v5229_v49 = vadd.f32 %v11729_v27, %v5228_v8  ;;  %v5100_v8 = vmul.f32 1.442695, %v13512_v16  ;;  %v11756_v38 = vpop.eup %7143  ;;  %7155 = vpow2.f32 %v5162_v7  ;;  %v5170_v3 = vmul.f32 1.442695, %v13516_v47 }
 0x8d1   : > { %13514 = vst [vmem:[#allocation110_spill] sm:$0xff] %v11756_v38  ;;  %7157 = vpow2.f32 %v5096_v56  ;;  %v13519_v7 = vsub.f32 %v11489_v43, %v11561_v1  ;;  %v5112_v56 = vmul.f32 1.442695, %v13521_v45  ;;  %v13523_v43 = vsub.f32 %v11397_v39, %v11563_v63 }
 0x8d2   : > { %v5230_v31 = vadd.f32 %v11738_v20, %v5229_v49  ;;  %v5104_v49 = vmul.f32 1.442695, %v13515_v37  ;;  %7159 = vpow2.f32 %v5100_v8  ;;  %v13522_v8 = vsub.f32 %v11495_v57, %v11561_v1 }
 0x8d3   : > { %7161 = vpow2.f32 %v5166_v51  ;;  %v5174_v46 = vmul.f32 1.442695, %v13519_v7  ;;  %v5116_v37 = vmul.f32 1.442695, %v13523_v43  ;;  %v13525_v57 = vsub.f32 %v11405_v32, %v11563_v63 }
 0x8d4   : > { %v5231_v44 = vadd.f32 %v11747_v53, %v5230_v31  ;;  %v11765_v60 = vpop.eup %7145  ;;  %v5108_v31 = vmul.f32 1.442695, %v13518_v12  ;;  %7163 = vpow2.f32 %v5104_v49  ;;  %v5178_v25 = vmul.f32 1.442695, %v13522_v8 }
 0x8d5   : > { %13517 = vst [vmem:[#allocation100_spill] sm:$0xff] %v11765_v60  ;;  %v11774_v55 = vpop.eup %7147  ;;  %7165 = vpow2.f32 %v5170_v3  ;;  %v13524_v49 = vsub.f32 %v11501_v6, %v11561_v1  ;;  %v13526_v39 = vsub.f32 %v11507_v48, %v11561_v1  ;;  %v13528_v32 = vsub.f32 %v11513_v50, %v11561_v1 }
 0x8d6   : > { %v5232_v22 = vadd.f32 %v11756_v38, %v5231_v44  ;;  %13520 = vst [vmem:[#allocation108_spill] sm:$0xff] %v11774_v55  ;;  %v11783_v44 = vpop.eup %7149  ;;  %7167 = vpow2.f32 %v5108_v31 }
 0x8d7   : > { %7169 = vpow2.f32 %v5174_v46  ;;  %v5182_v10 = vmul.f32 1.442695, %v13524_v49  ;;  %v5186_v31 = vmul.f32 1.442695, %v13526_v39  ;;  %v13527_v46 = vsub.f32 %v11413_v13, %v11563_v63 }
 0x8d8   : > { %v5233_v16 = vadd.f32 %v11765_v60, %v5232_v22  ;;  %v11792_v3 = vpop.eup %7151  ;;  %7171 = vpow2.f32 %v5112_v56  ;;  %v5120_v22 = vmul.f32 1.442695, %v13525_v57  ;;  %v5190_v56 = vmul.f32 1.442695, %v13528_v32 }
 0x8d9   : > { %v11797_v12 = vpop.eup %7153  ;;  %7173 = vpow2.f32 %v5178_v25  ;;  %v13529_v25 = vsub.f32 %v11420_v59, %v11563_v63  ;;  %v13530_v13 = vsub.f32 %v11519_v29, %v11561_v1  ;;  %v13534_v32 = vsub.f32 %v11531_v23, %v11561_v1 }
 0x8da   : > { %v5234_v51 = vadd.f32 %v11774_v55, %v5233_v16  ;;  %v11803_v6 = vpop.eup %7155  ;;  %7175 = vpow2.f32 %v5116_v37  ;;  %v5124_v16 = vmul.f32 1.442695, %v13527_v46  ;;  %v13533_v46 = vsub.f32 %v11432_v26, %v11563_v63 }
 0x8db   : > { %v11808_v45 = vpop.eup %7157  ;;  %7177 = vpow2.f32 %v5182_v10  ;;  %v5194_v37 = vmul.f32 1.442695, %v13530_v13 }
 0x8dc   : > { %v5235_v47 = vadd.f32 %v11783_v44, %v5234_v51  ;;  %v11814_v48 = vpop.eup %7159  ;;  %7179 = vpow2.f32 %v5120_v22  ;;  %v5128_v51 = vmul.f32 1.442695, %v13529_v25  ;;  %v13532_v22 = vsub.f32 %v11525_v42, %v11561_v1 }
 0x8dd   : > { %v11819_v43 = vpop.eup %7161  ;;  %7181 = vpow2.f32 %v5186_v31  ;;  %v5259_v50 = vadd.f32 %v11814_v48, %v11808_v45 }
 0x8de   : > { %v5236_v7 = vadd.f32 %v11792_v3, %v5235_v47  ;;  %v11827_v10 = vpop.eup %7163  ;;  %7183 = vpow2.f32 %v5124_v16  ;;  %v13531_v47 = vsub.f32 %v11426_v21, %v11563_v63  ;;  %v5198_v29 = vmul.f32 1.442695, %v13532_v22 }
 0x8df   : > { %v11832_v57 = vpop.eup %7165  ;;  %7185 = vpow2.f32 %v5190_v56  ;;  %v5260_v31 = vadd.f32 %v11827_v10, %v5259_v50  ;;  %v5136_v16 = vmul.f32 1.442695, %v13533_v46  ;;  %v5202_v56 = vmul.f32 1.442695, %v13534_v32 }
 0x8e0   : > { %v5237_v8 = vadd.f32 %v11797_v12, %v5236_v7  ;;  %v5132_v59 = vmul.f32 1.442695, %v13531_v47  ;;  %v11839_v7 = vpop.eup %7167  ;;  %7187 = vpow2.f32 %v5128_v51  ;;  %v13535_v51 = vsub.f32 %v13482_v17, %v11563_v63 }
 0x8e1   : > { %v11844_v21 = vpop.eup %7169  ;;  %7189 = vpow2.f32 %v5194_v37  ;;  %v13536_v37 = vsub.f32 %v11537_v58, %v11561_v1 }
 0x8e2   : > { %v5238_v49 = vadd.f32 %v11803_v6, %v5237_v8  ;;  %v5261_v8 = vadd.f32 %v11839_v7, %v5260_v31  ;;  %v11851_v25 = vpop.eup %7171  ;;  %7191 = vpow2.f32 %v5132_v59  ;;  %v5140_v13 = vmul.f32 1.442695, %v13535_v51 }
 0x8e3   : > { %v11856_v26 = vpop.eup %7173  ;;  %7193 = vpow2.f32 %v5198_v29  ;;  %v13537_v59 = vsub.f32 %v13483_v11, %v11563_v63  ;;  %v13538_v29 = vsub.f32 %v11543_v35, %v11561_v1 }
 0x8e4   : > { %v5239_v39 = vadd.f32 %v11819_v43, %v5238_v49  ;;  %v5206_v49 = vmul.f32 1.442695, %v13536_v37  ;;  %v5262_v50 = vadd.f32 %v11851_v25, %v5261_v8  ;;  %v11863_v47 = vpop.eup %7175  ;;  %7195 = vpow2.f32 %v5136_v16 }
 0x8e5   : > { %v5144_v22 = vmul.f32 1.442695, %v13537_v59  ;;  %v11868_v17 = vpop.eup %7177  ;;  %7197 = vpow2.f32 %v5202_v56  ;;  %v13539_v16 = vsub.f32 %v13484_v40, %v11563_v63  ;;  %v13540_v56 = vsub.f32 %v11549_v0, %v11561_v1 }
 0x8e6   : > { %v5240_v42 = vadd.f32 %v11832_v57, %v5239_v39  ;;  %v5210_v39 = vmul.f32 1.442695, %v13538_v29  ;;  %v5263_v31 = vadd.f32 %v11863_v47, %v5262_v50  ;;  %v11875_v46 = vpop.eup %7179  ;;  %7199 = vpow2.f32 %v5140_v13 }
 0x8e7   : > { %v5148_v32 = vmul.f32 1.442695, %v13539_v16  ;;  %v11880_v11 = vpop.eup %7181  ;;  %7201 = vpow2.f32 %v5206_v49  ;;  %v13541_v13 = vsub.f32 %v13486_v4, %v11563_v63  ;;  %v13542_v49 = vsub.f32 %v11555_v33, %v11561_v1 }
 0x8e8   : > { %v5241_v23 = vadd.f32 %v11844_v21, %v5240_v42  ;;  %v5214_v42 = vmul.f32 1.442695, %v13540_v56  ;;  %v5264_v8 = vadd.f32 %v11875_v46, %v5263_v31  ;;  %v11887_v51 = vpop.eup %7183  ;;  %7203 = vpow2.f32 %v5144_v22 }
 0x8e9   : > { %v5152_v37 = vmul.f32 1.442695, %v13541_v13  ;;  %v11892_v40 = vpop.eup %7185  ;;  %7205 = vpow2.f32 %v5210_v39  ;;  %v13543_v22 = vsub.f32 %v13487_v28, %v11563_v63  ;;  %v13544_v33 = vsub.f32 %v13488_v52, %v11563_v63 }
 0x8ea   : > { %v5242_v58 = vadd.f32 %v11856_v26, %v5241_v23  ;;  %v5218_v23 = vmul.f32 1.442695, %v13542_v49  ;;  %v5265_v50 = vadd.f32 %v11887_v51, %v5264_v8  ;;  %v11899_v59 = vpop.eup %7187  ;;  %7207 = vpow2.f32 %v5148_v32 }
 0x8eb   : > { %v5156_v29 = vmul.f32 1.442695, %v13543_v22  ;;  %v11904_v4 = vpop.eup %7189  ;;  %7209 = vpow2.f32 %v5214_v42  ;;  %v5160_v31 = vmul.f32 1.442695, %v13544_v33  ;;  %v13545_v42 = vsub.f32 %v13489_v34, %v11563_v63 }
 0x8ec   : > { %v5243_v35 = vadd.f32 %v11868_v17, %v5242_v58  ;;  %v5266_v58 = vadd.f32 %v11899_v59, %v5265_v50  ;;  %v11908_v1 = vpop.eup %7191  ;;  %7211 = vpow2.f32 %v5152_v37  ;;  %v13546_v49 = vsub.f32 %v13490_v15, %v11563_v63 }
 0x8ed   : > { %v11913_v16 = vpop.eup %7193  ;;  %7213 = vpow2.f32 %v5218_v23 }
 0x8ee   : > { %v5244_v0 = vadd.f32 %v11880_v11, %v5243_v35  ;;  %v5267_v32 = vadd.f32 %v11908_v1, %v5266_v58  ;;  %v11917_v56 = vpop.eup %7195  ;;  %7215 = vpow2.f32 %v5156_v29  ;;  %v5164_v35 = vmul.f32 1.442695, %v13545_v42 }
 0x8ef   : > { %v11922_v8 = vpop.eup %7197  ;;  %7217 = vpow2.f32 %v5160_v31  ;;  %v5168_v23 = vmul.f32 1.442695, %v13546_v49  ;;  %v13551_v42 = vsub.f32 %v13493_v19, %v11563_v63 }
 0x8f0   : > { %v5245_v39 = vadd.f32 %v11892_v40, %v5244_v0  ;;  %v5268_v52 = vadd.f32 %v11917_v56, %v5267_v32  ;;  %v11926_v37 = vpop.eup %7199  ;;  %7219 = vpow2.f32 %v5164_v35 }
 0x8f1   : > { %v11933_v50 = vpop.eup %7201  ;;  %7221 = vpow2.f32 %v5168_v23 }
 0x8f2   : > { %v5246_v28 = vadd.f32 %v11904_v4, %v5245_v39  ;;  %v5269_v22 = vadd.f32 %v11926_v37, %v5268_v52  ;;  %v11937_v29 = vpop.eup %7203  ;;  %v13549_v39 = vsub.f32 %v13492_v62, %v11563_v63 }
 0x8f3   : > { %13548 = vst [vmem:[#allocation122_spill] sm:$0xff] %v11937_v29  ;;  %v11942_v33 = vpop.eup %7205 }
 0x8f4   : > { %v5247_v13 = vadd.f32 %v11913_v16, %v5246_v28  ;;  %v5172_v58 = vmul.f32 1.442695, %v13549_v39  ;;  %v5270_v31 = vadd.f32 %v11937_v29, %v5269_v22  ;;  %v11946_v32 = vpop.eup %7207 }
 0x8f5   : > { %13550 = vst [vmem:[#allocation123_spill] sm:$0xff] %v11946_v32  ;;  %v11951_v35 = vpop.eup %7209 }
 0x8f6   : > { %v5248_v34 = vadd.f32 %v11922_v8, %v5247_v13  ;;  %v5176_v13 = vmul.f32 1.442695, %v13551_v42  ;;  %v5271_v52 = vadd.f32 %v11946_v32, %v5270_v31  ;;  %v11955_v49 = vpop.eup %7211  ;;  %7223 = vpow2.f32 %v5172_v58 }
 0x8f7   : > { %v11962_v23 = vpop.eup %7213  ;;  %v13555_v58 = vsub.f32 %v13495_v41, %v11563_v63 }
 0x8f8   : > { %v5249_v15 = vadd.f32 %v11933_v50, %v5248_v34  ;;  %v13552_v34 = vsub.f32 %v13494_v61, %v11563_v63  ;;  %7225 = vpow2.f32 %v5176_v13 }
 0x8f9   : > { %v5184_v31 = vmul.f32 1.442695, %v13555_v58 }
 0x8fa   : > { %v11931_v0 = vpop.f32.mrb[202].mxu1  ;;  %v5250_v62 = vadd.f32 %v11942_v33, %v5249_v15  ;;  %v5180_v22 = vmul.f32 1.442695, %v13552_v34  ;;  %v11968_v15 = vpop.eup %7215 }
 0x8fb   : > { %13547 = vst [vmem:[#allocation117_spill] sm:$0xff] %v11931_v0  ;;  %v5486_v28 = vpop.f32.mrb[203].mxu1  ;;  %v13556_v0 = vld [vmem:[#allocation74_spill] sm:$0xff] }
 0x8fc   : > { %5595 = vmatprep.mubr.f32.mxu1 %v5486_v28  ;;  %v5251_v19 = vadd.f32 %v11951_v35, %v5250_v62  ;;  %v5272_v28 = vadd.f32 %v11955_v49, %v5271_v52  ;;  %7227 = vpow2.f32 %v5180_v22  ;;  %v13557_v62 = vsub.f32 %v13556_v0, %v11563_v63 }
 0x8fd   : > { %7229 = vpow2.f32 %v5184_v31  ;;  %v13561_v0 = vsub.f32 %v13499_v14, %v11563_v63  ;;  %v13566_v14 = vsub.f32 %v13502_v30, %v11563_v63 }
 0x8fe   : > { %v11960_v39 = vpop.f32.mrb[204].mxu1  ;;  %v5252_v61 = vadd.f32 %v11962_v23, %v5251_v19  ;;  %v5273_v34 = vadd.f32 %v11968_v15, %v5272_v28  ;;  %v5188_v52 = vmul.f32 1.442695, %v13557_v62  ;;  %v13560_v19 = vsub.f32 %v13498_v9, %v11563_v63  ;;  %v13564_v9 = vld [vmem:[#allocation80_spill] sm:$0xff] }
 0x8ff   : > { %13553 = vst [vmem:[#allocation125_spill] sm:$0xff] %v11960_v39  ;;  %v11966_v42 = vpop.f32.mrb[205].mxu1  ;;  %v11975_v39 = vpop.eup %7217  ;;  %v5196_v62 = vmul.f32 1.442695, %v13561_v0  ;;  %v5204_v0 = vmul.f32 1.442695, %v13566_v14 }
 0x900   : > { %13554 = vst [vmem:[#allocation126_spill] sm:$0xff] %v11966_v42  ;;  %v5253_v42 = vrot.slane %v5252_v61, 4  ;;  %v5274_v13 = vadd.f32 %v11975_v39, %v5273_v34  ;;  %v11985_v41 = vpop.eup %7219  ;;  %v5192_v28 = vmul.f32 1.442695, %v13560_v19  ;;  %7231 = vpow2.f32 %v5188_v52 }
 0x901   : > { %v11991_v32 = vpop.eup %7221 }
 0x902   : > { %v11980_v55 = vpop.f32.mrb[206].mxu1  ;;  %v5254_v58 = vadd.f32 %v5253_v42, %v5252_v61  ;;  %v5275_v22 = vadd.f32 %v11985_v41, %v5274_v13  ;;  %v12001_v29 = vpop.eup %7223  ;;  %7233 = vpow2.f32 %v5192_v28  ;;  %v13565_v42 = vsub.f32 %v13564_v9, %v11563_v63 }
 0x903   : > { %13558 = vst [vmem:[#allocation113_spill] sm:$0xff] %v11980_v55  ;;  %v11983_v60 = vpop.f32.mrb[207].mxu1  ;;  %v12007_v19 = vpop.eup %7225  ;;  %7235 = vpow2.f32 %v5196_v62 }
 0x904   : > { %13559 = vst [vmem:[#allocation112_spill] sm:$0xff] %v11983_v60  ;;  %v5255_v55 = vrot.slane %v5254_v58, 2  ;;  %v5276_v60 = vadd.f32 %v11991_v32, %v5275_v22  ;;  %v5200_v61 = vmul.f32 1.442695, %v13565_v42 }
 0x906   : > { %v11996_v34 = vpop.f32.mrb[208].mxu1  ;;  %v5256_v13 = vadd.f32 %v5255_v55, %v5254_v58  ;;  %v5277_v52 = vadd.f32 %v12001_v29, %v5276_v60  ;;  %v12017_v38 = vpop.eup %7227  ;;  %7237 = vpow2.f32 %v5200_v61  ;;  %v13569_v60 = vsub.f32 %v13503_v54, %v11563_v63 }
 0x907   : > { %13562 = vst [vmem:[#allocation115_spill] sm:$0xff] %v11996_v34  ;;  %v11999_v31 = vpop.f32.mrb[209].mxu1  ;;  %v13570_v58 = vsub.f32 %v13504_v24, %v11563_v63  ;;  %v12026_v9 = vpop.eup %7229  ;;  %7239 = vpow2.f32 %v5204_v0  ;;  %v13573_v54 = vsub.f32 %v13505_v5, %v11563_v63 }
 0x908   : > { %13563 = vst [vmem:[#allocation114_spill] sm:$0xff] %v11999_v31  ;;  %v5257_v34 = vrot.slane %v5256_v13, 1  ;;  %v5278_v31 = vadd.f32 %v12007_v19, %v5277_v52  ;;  %v5208_v55 = vmul.f32 1.442695, %v13569_v60 }
 0x909   : > { %v5212_v62 = vmul.f32 1.442695, %v13570_v58  ;;  %v5216_v24 = vmul.f32 1.442695, %v13573_v54 }
 0x90a   : > { %v12012_v22 = vpop.f32.mrb[210].mxu1  ;;  %v5279_v30 = vadd.f32 %v12017_v38, %v5278_v31  ;;  %v5258_v42 = vadd.f32 %v5257_v34, %v5256_v13  ;;  %v12033_v61 = vpop.eup %7231  ;;  %7241 = vpow2.f32 %v5208_v55  ;;  %v13574_v34 = vld [vmem:[#allocation86_spill] sm:$0xff] }
 0x90b   : > { %13567 = vst [vmem:[#allocation118_spill] sm:$0xff] %v12012_v22  ;;  %v12015_v28 = vpop.f32.mrb[211].mxu1  ;;  %7243 = vpow2.f32 %v5212_v62  ;;  %v13575_v13 = vsub.f32 %v13574_v34, %v11563_v63 }
 0x90c   : > { %13568 = vst [vmem:[#allocation116_spill] sm:$0xff] %v12015_v28  ;;  %v5280_v14 = vadd.f32 %v12026_v9, %v5279_v30  ;;  %v12039_v60 = vpop.eup %7233  ;;  %7245 = vrcp.f32 %v5258_v42 }
 0x90d   : > { %v5220_v0 = vmul.f32 1.442695, %v13575_v13  ;;  %v12049_v55 = vpop.eup %7235  ;;  %7247 = vpow2.f32 %v5216_v24 }
 0x90e   : > { %v12028_v52 = vpop.f32.mrb[212].mxu1  ;;  %v5281_v31 = vadd.f32 %v12033_v61, %v5280_v14 }
 0x90f   : > { %13571 = vst [vmem:[#allocation120_spill] sm:$0xff] %v12028_v52  ;;  %v12031_v22 = vpop.f32.mrb[213].mxu1  ;;  %7249 = vpow2.f32 %v5220_v0 }
 0x910   : > { %13572 = vst [vmem:[#allocation119_spill] sm:$0xff] %v12031_v22  ;;  %v5282_v30 = vadd.f32 %v12039_v60, %v5281_v31  ;;  %v12052_v62 = vpop.eup %7237 }
 0x911   : > { %v12059_v54 = vpop.eup %7239 }
 0x912   : > { %v12044_v58 = vpop.f32.mrb[214].mxu1  ;;  %v5283_v5 = vadd.f32 %v12049_v55, %v5282_v30 }
 0x913   : > { %13576 = vst [vmem:[#allocation12_spill] sm:$0xff] %v12044_v58  ;;  %v12047_v52 = vpop.f32.mrb[215].mxu1 }
 0x914   : > { %13577 = vst [vmem:[#allocation16_spill] sm:$0xff] %v12047_v52  ;;  %v5284_v42 = vadd.f32 %v12052_v62, %v5283_v5  ;;  %v12062_v34 = vpop.eup %7241 }
 0x915   : > { %v12064_v13 = vpop.eup %7243 }
 0x916   : > { %v12054_v14 = vpop.f32.mrb[216].mxu1  ;;  %v5285_v31 = vadd.f32 %v12059_v54, %v5284_v42  ;;  %v12067_v30 = vpop.eup %7245 }
 0x917   : > { %13578 = vst [vmem:[#allocation11_spill] sm:$0xff] %v12054_v14  ;;  %v12057_v63 = vpop.f32.mrb[217].mxu1  ;;  %v12070_v58 = vpop.eup %7247  ;;  %v12075_v14 = vmul.f32 %v12067_v30, %v11783_v44  ;;  %v12079_v42 = vmul.f32 %v12067_v30, %v11792_v3  ;;  %v12096_v52 = vmul.f32 %v12067_v30, %v11819_v43  ;;  %v12100_v3 = vmul.f32 %v12067_v30, %v11832_v57 }
 0x918   : > { %13579 = vst [vmem:[#allocation18_spill] sm:$0xff] %v12057_v63  ;;  %v5286_v24 = vadd.f32 %v12062_v34, %v5285_v31  ;;  %v12085_v31 = vmul.f32 %v12067_v30, %v11797_v12  ;;  %v12114_v44 = vmul.f32 %v12067_v30, %v11868_v17  ;;  %v12120_v22 = vmul.f32 %v12067_v30, %v11880_v11 }
 0x919   : > { %v12081_v63 = vpop.eup %7249  ;;  %v12130_v12 = vmul.f32 %v12067_v30, %v11904_v4  ;;  %v12134_v17 = vmul.f32 %v12067_v30, %v11913_v16  ;;  %v12138_v57 = vmul.f32 %v12067_v30, %v11922_v8  ;;  %v12144_v28 = vmul.f32 %v12067_v30, %v11933_v50 }
 0x91a   : > { %v5287_v0 = vadd.f32 %v12064_v13, %v5286_v24  ;;  %v12089_v24 = vmul.f32 %v12067_v30, %v11803_v6  ;;  %v12106_v6 = vmul.f32 %v12067_v30, %v11844_v21  ;;  %13580 = vst [vmem:[#allocation8_spill] sm:$0xff] %v12114_v44  ;;  %13581 = vst [vmem:[#allocation17_spill] sm:$0xff] %v12120_v22  ;;  %v13589_v22 = vld [vmem:[#allocation99_spill] sm:$0xff] }
 0x91b   : > { %v12124_v21 = vmul.f32 %v12067_v30, %v11892_v40  ;;  %13583 = vst [vmem:[#allocation19_spill] sm:$0xff] %v12130_v12  ;;  %13584 = vst [vmem:[#allocation53_spill] sm:$0xff] %v12134_v17  ;;  %v12148_v4 = vmul.f32 %v12067_v30, %v11942_v33  ;;  %v12156_v8 = vmul.f32 %v12067_v30, %v11951_v35  ;;  %v13586_v17 = vld [vmem:[#allocation88_spill] sm:$0xff]  ;;  %v13588_v12 = vld [vmem:[#allocation5_spill] sm:$0xff] }
 0x91c   : > { %v5288_v5 = vadd.f32 %v12070_v58, %v5287_v0  ;;  %13585 = vst [vmem:[#allocation121_spill] sm:$0xff] %v12138_v57  ;;  %v5298_v35 = vmul.f32 %v12067_v30, %v13586_v17  ;;  %v13587_v57 = vld [vmem:[#allocation92_spill] sm:$0xff]  ;;  %v5302_v44 = vmul.f32 %v12067_v30, %v13588_v12 }
 0x91d   : > { %13582 = vst [vmem:[#allocation20_spill] sm:$0xff] %v12124_v21 }
 0x91e   : > { %v5289_v0 = vadd.f32 %v12081_v63, %v5288_v5  ;;  %v12110_v5 = vmul.f32 %v12067_v30, %v11856_v26 }
 0x920   : > { %v5290_v43 = vrot.slane %v5289_v0, 4 }
 0x922   : > { %v5291_v11 = vadd.f32 %v5290_v43, %v5289_v0  ;;  %v12160_v0 = vmul.f32 %v12067_v30, %v11962_v23  ;;  %v5300_v23 = vmul.f32 %v12067_v30, %v13587_v57  ;;  %v5304_v43 = vmul.f32 %v12067_v30, %v13589_v22 }
 0x924   : > { %v5292_v50 = vrot.slane %v5291_v11, 2  ;;  %v6552_v22 = vpack.c.bf16 %v5300_v23, %v5298_v35 }
 0x926   : > { %v5293_v40 = vadd.f32 %v5292_v50, %v5291_v11  ;;  %v13590_v50 = vld [vmem:[#allocation111_spill] sm:$0xff] }
 0x928   : > { %v5294_v16 = vrot.slane %v5293_v40, 1 }
 0x92a   : > { %v5295_v21 = vadd.f32 %v5294_v16, %v5293_v40 }
 0x92c   : > { %7251 = vrcp.f32 %v5295_v21 }
 0x936   : > { %v12166_v26 = vpop.eup %7251 }
 0x937   : > { %v5299_v11 = vmul.f32 %v12166_v26, %v11808_v45  ;;  %v5301_v21 = vmul.f32 %v12166_v26, %v11814_v48  ;;  %v5303_v40 = vmul.f32 %v12166_v26, %v11827_v10  ;;  %v5305_v17 = vmul.f32 %v12166_v26, %v11839_v7 }
 0x938   : > { %v5307_v57 = vmul.f32 %v12166_v26, %v11851_v25  ;;  %v5309_v12 = vmul.f32 %v12166_v26, %v11863_v47  ;;  %v5306_v45 = vmul.f32 %v12067_v30, %v13590_v50  ;;  %v5308_v48 = vmul.f32 %v12067_v30, %v11708_v2 }
 0x939   : > { %v6550_v16 = vpack.c.bf16 %v5301_v21, %v5299_v11  ;;  %v5310_v10 = vmul.f32 %v12067_v30, %v11717_v36  ;;  %v6554_v33 = vpack.c.bf16 %v5305_v17, %v5303_v40  ;;  %v6556_v7 = vpack.c.bf16 %v5304_v43, %v5302_v44 }
 0x93a   : > { %v5311_v11 = vmul.f32 %v12166_v26, %v11875_v46  ;;  %v12198_v25 = vmul.f32 %v12166_v26, %v11955_v49  ;;  %v5313_v47 = vmul.f32 %v12166_v26, %v11887_v51  ;;  %v5329_v2 = vmul.f32 %v12166_v26, %v11968_v15 }
 0x93b   : > { %6551 = vmatprep.subr.bf16.mxu1 %v6550_v16  ;;  %v5331_v36 = vmul.f32 %v12166_v26, %v11975_v39  ;;  %v5333_v44 = vmul.f32 %v12166_v26, %v11985_v41  ;;  %v6558_v43 = vpack.c.bf16 %v5309_v12, %v5307_v57  ;;  %v5335_v46 = vmul.f32 %v12166_v26, %v11991_v32 }
 0x93c   : > { %6553 = vmatpush1.bf16.msra.mxu1 %v6552_v22  ;;  %v5337_v49 = vmul.f32 %v12166_v26, %v12001_v29  ;;  %v5339_v51 = vmul.f32 %v12166_v26, %v12007_v19  ;;  %v6578_v35 = vpack.c.bf16 %v5329_v2, %v12198_v25  ;;  %v5341_v39 = vmul.f32 %v12166_v26, %v12017_v38  ;;  %v13593_v25 = vld [vmem:[#allocation123_spill] sm:$0xff] }
 0x93d   : > { %6555 = vmatprep.subr.bf16.mxu1 %v6554_v33  ;;  %v6582_v15 = vpack.c.bf16 %v5333_v44, %v5331_v36  ;;  %v5343_v41 = vmul.f32 %v12166_v26, %v12026_v9  ;;  %v5345_v23 = vmul.f32 %v12166_v26, %v12033_v61  ;;  %v5347_v32 = vmul.f32 %v12166_v26, %v12039_v60  ;;  %v13595_v36 = vld [vmem:[#allocation108_spill] sm:$0xff] }
 0x93e   : > { %v6586_v33 = vpack.c.bf16 %v5337_v49, %v5335_v46  ;;  %v5349_v29 = vmul.f32 %v12166_v26, %v12049_v55  ;;  %v6590_v19 = vpack.c.bf16 %v5341_v39, %v5339_v51  ;;  %v5351_v21 = vmul.f32 %v12166_v26, %v12052_v62  ;;  %v13600_v51 = vld [vmem:[#allocation17_spill] sm:$0xff] }
 0x93f   : > { %v5353_v38 = vmul.f32 %v12166_v26, %v12059_v54  ;;  %v5355_v9 = vmul.f32 %v12166_v26, %v12062_v34  ;;  %v6594_v40 = vpack.c.bf16 %v5345_v23, %v5343_v41  ;;  %v5357_v60 = vmul.f32 %v12166_v26, %v12064_v13  ;;  %v13607_v39 = vld [vmem:[#allocation53_spill] sm:$0xff]  ;;  %v13612_v41 = vld [vmem:[#allocation126_spill] sm:$0xff]  ;;  %v13614_v23 = vld [vmem:[#allocation112_spill] sm:$0xff] }
 0x940   : > { %6557 = vmatpush1.bf16.msra.mxu1 %v6556_v7  ;;  %v6598_v61 = vpack.c.bf16 %v5349_v29, %v5347_v32  ;;  %v5359_v55 = vmul.f32 %v12166_v26, %v12070_v58  ;;  %v6560_v17 = vpack.c.bf16 %v5308_v48, %v5306_v45  ;;  %v5312_v16 = vmul.f32 %v12067_v30, %v11723_v18  ;;  %v13615_v32 = vld [vmem:[#allocation113_spill] sm:$0xff]  ;;  %v13616_v29 = vld [vmem:[#allocation114_spill] sm:$0xff] }
 0x941   : > { %6559 = vmatprep.subr.bf16.mxu1 %v6558_v43  ;;  %v6602_v62 = vpack.c.bf16 %v5353_v38, %v5351_v21  ;;  %v5361_v54 = vmul.f32 %v12166_v26, %v12081_v63  ;;  %v6562_v57 = vpack.c.bf16 %v5313_v47, %v5311_v11  ;;  %v5315_v34 = vmul.f32 %v12166_v26, %v11899_v59  ;;  %v13592_v11 = vld [vmem:[#allocation122_spill] sm:$0xff]  ;;  %v13622_v21 = vld [vmem:[#allocation16_spill] sm:$0xff] }
 0x942   : > { %v5317_v12 = vmul.f32 %v12166_v26, %v11908_v1  ;;  %v6606_v22 = vpack.c.bf16 %v5357_v60, %v5355_v9  ;;  %v6564_v58 = vpack.c.bf16 %v5312_v16, %v5310_v10  ;;  %v5314_v50 = vmul.f32 %v12067_v30, %v11729_v27  ;;  %v13591_v10 = vld [vmem:[#allocation110_spill] sm:$0xff]  ;;  %v13623_v38 = vld [vmem:[#allocation12_spill] sm:$0xff]  ;;  %v5716_v60 = vpop.permute.xlu1 %5715 }
 0x943   : > { %v6610_v13 = vpack.c.bf16 %v5361_v54, %v5359_v55  ;;  %v5316_v18 = vmul.f32 %v12067_v30, %v11738_v20  ;;  %v5319_v63 = vmul.f32 %v12166_v26, %v11917_v56  ;;  %v5321_v59 = vmul.f32 %v12166_v26, %v11926_v37  ;;  %v13594_v37 = vld [vmem:[#allocation100_spill] sm:$0xff]  ;;  %v13624_v9 = vld [vmem:[#allocation18_spill] sm:$0xff] }
 0x944   : > { %6561 = vmatpush1.bf16.msra.mxu1 %v6560_v17  ;;  %v6566_v45 = vpack.c.bf16 %v5317_v12, %v5315_v34  ;;  %v5318_v48 = vmul.f32 %v12067_v30, %v11747_v53  ;;  %v5320_v7 = vmul.f32 %v12067_v30, %v13591_v10  ;;  %v5323_v20 = vmul.f32 %v12166_v26, %v13592_v11  ;;  %v13626_v34 = vld [vmem:[#allocation69_spill] sm:$0xff] }
 0x945   : > { %6563 = vmatprep.subr.bf16.mxu1 %v6562_v57  ;;  %v6568_v1 = vpack.c.bf16 %v5316_v18, %v5314_v50  ;;  %v6570_v27 = vpack.c.bf16 %v5321_v59, %v5319_v63  ;;  %v5325_v47 = vmul.f32 %v12166_v26, %v13593_v25  ;;  %v5322_v2 = vmul.f32 %v12067_v30, %v13594_v37  ;;  %v13629_v11 = vld [vmem:[#allocation77_spill] sm:$0xff] }
 0x946   : > { %v6572_v56 = vpack.c.bf16 %v5320_v7, %v5318_v48  ;;  %v5324_v44 = vmul.f32 %v12067_v30, %v13595_v36  ;;  %v13596_v46 = vpack.c.bf16 %v12079_v42, %v12075_v14  ;;  %v13597_v26 = vpack.c.bf16 %v12089_v24, %v12085_v31  ;;  %v13603_v42 = vld [vmem:[#allocation19_spill] sm:$0xff]  ;;  %v13606_v24 = vld [vmem:[#allocation121_spill] sm:$0xff]  ;;  %v5726_v17 = vpop.permute.xlu1 %5725 }
 0x947   : > { %v6574_v53 = vpack.c.bf16 %v5325_v47, %v5323_v20  ;;  %v13598_v49 = vpack.c.bf16 %v12100_v3, %v12096_v52  ;;  %v13599_v30 = vpack.c.bf16 %v12110_v5, %v12106_v6  ;;  %v13608_v52 = vpack.c.bf16 %v13606_v24, %v13607_v39  ;;  %v13611_v5 = vld [vmem:[#allocation117_spill] sm:$0xff]  ;;  %v13628_v48 = vld [vmem:[#allocation75_spill] sm:$0xff] }
 0x948   : > { %6565 = vmatpush1.bf16.msra.mxu1 %v6564_v58  ;;  %v6576_v43 = vpack.c.bf16 %v5324_v44, %v5322_v2  ;;  %v13609_v3 = vpack.c.bf16 %v12148_v4, %v12144_v28  ;;  %v13610_v6 = vpack.c.bf16 %v12160_v0, %v12156_v8  ;;  %v13618_v28 = vld [vmem:[#allocation116_spill] sm:$0xff]  ;;  %v13619_v4 = vld [vmem:[#allocation118_spill] sm:$0xff]  ;;  %v13620_v8 = vld [vmem:[#allocation119_spill] sm:$0xff] }
 0x949   : > { %6567 = vmatprep.subr.bf16.mxu1 %v6566_v45  ;;  %v13621_v0 = vld [vmem:[#allocation120_spill] sm:$0xff] }
 0x94a   : > { %v13627_v58 = vld [vmem:[#allocation72_spill] sm:$0xff] }
 0x94c   : > { %6569 = vmatpush1.bf16.msra.mxu1 %v6568_v1 }
 0x94d   : > { %6571 = vmatprep.subr.bf16.mxu1 %v6570_v27 }
 0x950   : > { %6573 = vmatpush1.bf16.msra.mxu1 %v6572_v56 }
 0x951   : > { %6575 = vmatprep.subr.bf16.mxu1 %v6574_v53 }
 0x954   : > { %6577 = vmatpush1.bf16.msra.mxu1 %v6576_v43  ;;  %v13630_v43 = vld [vmem:[#allocation79_spill] sm:$0xff] }
 0x955   : > { %6579 = vmatprep.subr.bf16.mxu1 %v6578_v35  ;;  %v13601_v35 = vld [vmem:[#allocation8_spill] sm:$0xff] }
 0x956   : > { %v13602_v14 = vpack.c.bf16 %v13600_v51, %v13601_v35  ;;  %v13631_v51 = vld [vmem:[#allocation81_spill] sm:$0xff] }
 0x958   : > { %6581 = vmatpush1.bf16.msra.mxu1 %v13596_v46 }
 0x959   : > { %6583 = vmatprep.subr.bf16.mxu1 %v6582_v15  ;;  %v13604_v15 = vld [vmem:[#allocation20_spill] sm:$0xff] }
 0x95a   : > { %v13605_v31 = vpack.c.bf16 %v13603_v42, %v13604_v15 }
 0x95c   : > { %6585 = vmatpush1.bf16.msra.mxu1 %v13597_v26 }
 0x95d   : > { %6587 = vmatprep.subr.bf16.mxu1 %v6586_v33  ;;  %v13613_v33 = vld [vmem:[#allocation125_spill] sm:$0xff] }
 0x960   : > { %6589 = vmatpush1.bf16.msra.mxu1 %v13598_v49 }
 0x961   : > { %6591 = vmatprep.subr.bf16.mxu1 %v6590_v19  ;;  %v13617_v19 = vld [vmem:[#allocation115_spill] sm:$0xff] }
 0x964   : > { %6593 = vmatpush1.bf16.msra.mxu1 %v13599_v30 }
 0x965   : > { %6595 = vmatprep.subr.bf16.mxu1 %v6594_v40  ;;  %v13625_v40 = vld [vmem:[#allocation11_spill] sm:$0xff] }
 0x968   : > { %6597 = vmatpush1.bf16.msra.mxu1 %v13602_v14 }
 0x969   : > { %6599 = vmatprep.subr.bf16.mxu1 %v6598_v61  ;;  %v5711_v61 = vpop.permute.xlu0 %5710 }
 0x96c   : > { %6601 = vmatpush1.bf16.msra.mxu1 %v13605_v31 }
 0x96d   : > { %6603 = vmatprep.subr.bf16.mxu1 %v6602_v62  ;;  %v5721_v55 = vpop.permute.xlu0 %5720  ;;  %v12307_v62 = vpop.permute.xlu1 %5735 }
 0x970   : > { %6605 = vmatpush1.bf16.msra.mxu1 %v13608_v52 }
 0x971   : > { %6607 = vmatprep.subr.bf16.mxu1 %v6606_v22  ;;  %v12305_v16 = vpop.permute.xlu0 %5730 }
 0x974   : > { %6609 = vmatpush1.bf16.msra.mxu1 %v13609_v3 }
 0x975   : > { %6611 = vmatprep.subr.bf16.mxu1 %v6610_v13  ;;  %v12309_v54 = vpop.permute.xlu0 %5740  ;;  %v12312_v13 = vpop.permute.xlu1 %5745 }
 0x978   : > { %6613 = vmatpush1.bf16.msra.mxu1 %v13610_v6  ;;  %v13632_v6 = vld [vmem:[#allocation83_spill] sm:$0xff] }
 0x979   : > { %v5767_v45 = vpop.permute.xlu0 %5766  ;;  %v5772_v56 = vpop.permute.xlu1 %5771 }
 0x97b   : > { %5596 = vmatmul.mubr.f32.vlgmr.msra.gmra.mrb[186].mxu1 %v13611_v5 }
 0x97c   : > { %5601 = vmatprep.mubr.f32.mxu1 %v13612_v41 }
 0x97d   : > { %v5777_v15 = vpop.permute.xlu0 %5776 }
 0x97f   : > { %5602 = vmatmul.mubr.f32.gmra.mrb[188].mxu1 %v13613_v33 }
 0x980   : > { %5607 = vmatprep.mubr.f32.mxu1 %v13614_v23 }
 0x983   : > { %5608 = vmatmul.mubr.f32.gmra.mrb[190].mxu1 %v13615_v32  ;;  %v13633_v32 = vld [vmem:[#allocation85_spill] sm:$0xff] }
 0x984   : > { %5613 = vmatprep.mubr.f32.mxu1 %v13616_v29 }
 0x987   : > { %5614 = vmatmul.mubr.f32.gmra.mrb[192].mxu1 %v13617_v19 }
 0x988   : > { %5619 = vmatprep.mubr.f32.mxu1 %v13618_v28 }
 0x98b   : > { %5620 = vmatmul.mubr.f32.gmra.mrb[194].mxu1 %v13619_v4  ;;  %v5782_v4 = vpop.permute.xlu1 %5781 }
 0x98c   : > { %5625 = vmatprep.mubr.f32.mxu1 %v13620_v8 }
 0x98f   : > { %5626 = vmatmul.mubr.f32.gmra.mrb[196].mxu1 %v13621_v0 }
 0x990   : > { %5631 = vmatprep.mubr.f32.mxu1 %v13622_v21 }
 0x993   : > { %5632 = vmatmul.mubr.f32.gmra.mrb[198].mxu1 %v13623_v38 }
 0x994   : > { %5637 = vmatprep.mubr.f32.mxu1 %v13624_v9 }
 0x997   : > { %5638 = vmatmul.mubr.f32.gmra.mrb[200].mxu1 %v13625_v40  ;;  %v13634_v40 = vld [vmem:[#allocation87_spill] sm:$0xff] }
 0xa4e   : > { %v5597_v57 = vpop.f32.mrb[186].mxu1 }
 0xa4f   : > { %v6617_v12 = vadd.f32 %v5597_v57, %v13626_v34  ;;  %v5599_v22 = vpop.f32.mrb[187].mxu1  ;;  %v13635_v34 = vld [vmem:[#allocation91_spill] sm:$0xff] }
 0xa50   : > { %v6619_v50 = vadd.f32 %v5599_v22, %v13627_v58 }
 0xa51   : > { %v5748_v18 = vmul.f32 %v6617_v12, %v5711_v61 }
 0xa52   : > { %v5749_v63 = vmul.f32 %v6619_v50, %v5711_v61  ;;  %v5603_v59 = vpop.f32.mrb[188].mxu1  ;;  %v5787_v50 = vpop.permute.xlu0 %5786 }
 0xa53   : > { %v12315_v1 = vadd.f32 %v5767_v45, %v5748_v18  ;;  %v6621_v10 = vadd.f32 %v5603_v59, %v13628_v48  ;;  %v5605_v7 = vpop.f32.mrb[189].mxu1 }
 0xa54   : > { %v12318_v27 = vadd.f32 %v5767_v45, %v5749_v63  ;;  %v6623_v20 = vadd.f32 %v5605_v7, %v13629_v11 }
 0xa55   : > { %v5820_v25 = vsub.f32 0.0, %v12315_v1  ;;  %v5750_v47 = vmul.f32 %v6621_v10, %v5716_v60  ;;  %v13636_v10 = vld [vmem:[#allocation94_spill] sm:$0xff] }
 0xa56   : > { %v5821_v37 = vsub.f32 0.0, %v12318_v27  ;;  %v5751_v2 = vmul.f32 %v6623_v20, %v5716_v60  ;;  %v5609_v36 = vpop.f32.mrb[190].mxu1 }
 0xa57   : > { %v5836_v44 = vmul.f32 1.442695, %v5820_v25  ;;  %v12323_v53 = vadd.f32 %v5772_v56, %v5750_v47  ;;  %v6625_v46 = vadd.f32 %v5609_v36, %v13630_v43  ;;  %v5611_v26 = vpop.f32.mrb[191].mxu1  ;;  %v5792_v43 = vpop.permute.xlu1 %5791 }
 0xa58   : > { %v5838_v49 = vmul.f32 1.442695, %v5821_v37  ;;  %v12326_v30 = vadd.f32 %v5772_v56, %v5751_v2  ;;  %v6627_v35 = vadd.f32 %v5611_v26, %v13631_v51  ;;  %v13637_v37 = vld [vmem:[#allocation50_spill] sm:$0xff] }
 0xa59   : > { %7253 = vpow2.f32 %v5836_v44  ;;  %v5822_v14 = vsub.f32 0.0, %v12323_v53  ;;  %v5752_v42 = vmul.f32 %v6625_v46, %v5721_v55 }
 0xa5a   : > { %7255 = vpow2.f32 %v5838_v49  ;;  %v5823_v31 = vsub.f32 0.0, %v12326_v30  ;;  %v5753_v24 = vmul.f32 %v6627_v35, %v5721_v55  ;;  %v5615_v39 = vpop.f32.mrb[192].mxu1 }
 0xa5b   : > { %v5840_v52 = vmul.f32 1.442695, %v5822_v14  ;;  %v12331_v3 = vadd.f32 %v5777_v15, %v5752_v42  ;;  %v6629_v5 = vadd.f32 %v5615_v39, %v13632_v6  ;;  %v5617_v41 = vpop.f32.mrb[193].mxu1  ;;  %v13638_v42 = vld [vmem:[#allocation52_spill] sm:$0xff] }
 0xa5c   : > { %v5842_v33 = vmul.f32 1.442695, %v5823_v31  ;;  %v12334_v23 = vadd.f32 %v5777_v15, %v5753_v24  ;;  %v6631_v29 = vadd.f32 %v5617_v41, %v13633_v32 }
 0xa5d   : > { %7257 = vpow2.f32 %v5840_v52  ;;  %v5824_v19 = vsub.f32 0.0, %v12331_v3  ;;  %v5754_v28 = vmul.f32 %v6629_v5, %v5726_v17 }
 0xa5e   : > { %7259 = vpow2.f32 %v5842_v33  ;;  %v5825_v8 = vsub.f32 0.0, %v12334_v23  ;;  %v5755_v0 = vmul.f32 %v6631_v29, %v5726_v17  ;;  %v5621_v21 = vpop.f32.mrb[194].mxu1  ;;  %v5797_v33 = vpop.permute.xlu0 %5796  ;;  %v13639_v29 = vld [vmem:[#allocation4_spill] sm:$0xff] }
 0xa5f   : > { %v5844_v38 = vmul.f32 1.442695, %v5824_v19  ;;  %v12339_v9 = vadd.f32 %v5782_v4, %v5754_v28  ;;  %v6633_v61 = vadd.f32 %v5621_v21, %v13634_v40  ;;  %v5623_v60 = vpop.f32.mrb[195].mxu1  ;;  %v13640_v21 = vld [vmem:[#allocation3_spill] sm:$0xff] }
 0xa60   : > { %v5846_v55 = vmul.f32 1.442695, %v5825_v8  ;;  %v12342_v57 = vadd.f32 %v5782_v4, %v5755_v0  ;;  %v6635_v12 = vadd.f32 %v5623_v60, %v13635_v34 }
 0xa61   : > { %7261 = vpow2.f32 %v5844_v38  ;;  %v5826_v22 = vsub.f32 0.0, %v12339_v9  ;;  %v5756_v58 = vmul.f32 %v6633_v61, %v12305_v16 }
 0xa62   : > { %7263 = vpow2.f32 %v5846_v55  ;;  %v5827_v17 = vsub.f32 0.0, %v12342_v57  ;;  %v5757_v18 = vmul.f32 %v6635_v12, %v12305_v16  ;;  %v5627_v45 = vpop.f32.mrb[196].mxu1 }
 0xa63   : > { %v7254_v63 = vpop.eup %7253  ;;  %v5848_v59 = vmul.f32 1.442695, %v5826_v22  ;;  %v12349_v48 = vadd.f32 %v5787_v50, %v5756_v58  ;;  %v6637_v7 = vadd.f32 %v5627_v45, %v13636_v10  ;;  %v5629_v11 = vpop.f32.mrb[197].mxu1 }
 0xa64   : > { %v7256_v20 = vpop.eup %7255  ;;  %v5868_v25 = vadd.f32 1.0, %v7254_v63  ;;  %v5850_v47 = vmul.f32 1.442695, %v5827_v17  ;;  %v12352_v56 = vadd.f32 %v5787_v50, %v5757_v18  ;;  %v6639_v2 = vadd.f32 %v5629_v11, %v13637_v37  ;;  %v5802_v50 = vpop.permute.xlu1 %5801  ;;  %v13641_v18 = vld [vmem:[#allocation10_spill] sm:$0xff] }
 0xa65   : > { %v5869_v36 = vadd.f32 1.0, %v7256_v20  ;;  %7265 = vpow2.f32 %v5848_v59  ;;  %v5828_v44 = vsub.f32 0.0, %v12349_v48  ;;  %v5758_v16 = vmul.f32 %v6637_v7, %v12307_v62  ;;  %v5916_v7 = vld [vmem:[%s7394_s16 + $0x200] sm:$0xff] }
 0xa66   : > { %7267 = vrcp.f32 %v5868_v25  ;;  %v5829_v46 = vsub.f32 0.0, %v12352_v56  ;;  %v5759_v26 = vmul.f32 %v6639_v2, %v12307_v62  ;;  %v5633_v49 = vpop.f32.mrb[198].mxu1  ;;  %v5917_v2 = vld [vmem:[%s7394_s16 + $0x208] sm:$0xff] }
 0xa67   : > { %v7258_v51 = vpop.eup %7257  ;;  %7269 = vrcp.f32 %v5869_v36  ;;  %v5852_v35 = vmul.f32 1.442695, %v5828_v44  ;;  %v12359_v14 = vadd.f32 %v5792_v43, %v5758_v16  ;;  %v6641_v15 = vadd.f32 %v5633_v49, %v13638_v42  ;;  %v5635_v31 = vpop.f32.mrb[199].mxu1  ;;  %v5918_v42 = vld [vmem:[%s7394_s16 + $0x210] sm:$0xff] }
 0xa68   : > { %v7260_v24 = vpop.eup %7259  ;;  %v5870_v39 = vadd.f32 1.0, %v7258_v51  ;;  %7271 = vpow2.f32 %v5850_v47  ;;  %v5854_v52 = vmul.f32 1.442695, %v5829_v46  ;;  %v12362_v6 = vadd.f32 %v5792_v43, %v5759_v26 }
 0xa69   : > { %v5871_v5 = vadd.f32 1.0, %v7260_v24  ;;  %7273 = vpow2.f32 %v5852_v35  ;;  %v5830_v41 = vsub.f32 0.0, %v12359_v14  ;;  %v5760_v62 = vmul.f32 %v6641_v15, %v12309_v54 }
 0xa6a   : > { %7275 = vrcp.f32 %v5870_v39  ;;  %v5831_v32 = vsub.f32 0.0, %v12362_v6  ;;  %v6643_v19 = vadd.f32 %v5635_v31, %v13639_v29  ;;  %v5639_v28 = vpop.f32.mrb[200].mxu1  ;;  %v5919_v39 = vld [vmem:[%s7394_s16 + $0x218] sm:$0xff] }
 0xa6b   : > { %v7262_v4 = vpop.eup %7261  ;;  %7277 = vrcp.f32 %v5871_v5  ;;  %v5856_v8 = vmul.f32 1.442695, %v5830_v41  ;;  %v12368_v0 = vadd.f32 %v5797_v33, %v5760_v62  ;;  %v6645_v38 = vadd.f32 %v5639_v28, %v13640_v21  ;;  %v5641_v40 = vpop.f32.mrb[201].mxu1  ;;  %v5920_v28 = vld [vmem:[%s7394_s16 + $0x220] sm:$0xff]  ;;  %v5921_v21 = vld [vmem:[%s7394_s16 + $0x228] sm:$0xff] }
 0xa6c   : > { %v7264_v61 = vpop.eup %7263  ;;  %v5872_v60 = vadd.f32 1.0, %v7262_v4  ;;  %7279 = vpow2.f32 %v5854_v52  ;;  %v5858_v55 = vmul.f32 1.442695, %v5831_v32  ;;  %v5761_v34 = vmul.f32 %v6643_v19, %v12309_v54 }
 0xa6d   : > { %v5873_v12 = vadd.f32 1.0, %v7264_v61  ;;  %7281 = vpow2.f32 %v5856_v8  ;;  %v5832_v22 = vsub.f32 0.0, %v12368_v0  ;;  %v5762_v58 = vmul.f32 %v6645_v38, %v12312_v13 }
 0xa6e   : > { %7283 = vrcp.f32 %v5872_v60  ;;  %v12374_v17 = vadd.f32 %v5797_v33, %v5761_v34  ;;  %v6647_v45 = vadd.f32 %v5641_v40, %v13641_v18  ;;  %v5923_v18 = vld [vmem:[%s7394_s16 + $0x238] sm:$0xff] }
 0xa6f   : > { %v7266_v63 = vpop.eup %7265  ;;  %7285 = vrcp.f32 %v5873_v12  ;;  %v5860_v59 = vmul.f32 1.442695, %v5832_v22  ;;  %v12378_v10 = vadd.f32 %v5802_v50, %v5762_v58  ;;  %v5922_v12 = vld [vmem:[%s7394_s16 + $0x230] sm:$0xff] }
 0xa70   : > { %v7268_v54 = vpop.eup %7267  ;;  %v5874_v11 = vadd.f32 1.0, %v7266_v63  ;;  %7287 = vpow2.f32 %v5858_v55  ;;  %v5833_v20 = vsub.f32 0.0, %v12374_v17  ;;  %v5763_v25 = vmul.f32 %v6647_v45, %v12312_v13 }
 0xa71   : > { %v7270_v47 = vpop.eup %7269  ;;  %v5900_v37 = vmul.f32 %v7268_v54, %v12315_v1  ;;  %7289 = vpow2.f32 %v5860_v59  ;;  %v5834_v36 = vsub.f32 0.0, %v12378_v10  ;;  %v5924_v54 = vld [vmem:[%s7394_s16 + $0x240] sm:$0xff] }
 0xa72   : > { %v7272_v44 = vpop.eup %7271  ;;  %v5901_v16 = vmul.f32 %v7270_v47, %v12318_v27  ;;  %7291 = vrcp.f32 %v5874_v11  ;;  %v5862_v13 = vmul.f32 1.442695, %v5833_v20  ;;  %v12392_v43 = vadd.f32 %v5802_v50, %v5763_v25 }
 0xa73   : > { %v7274_v1 = vpop.eup %7273  ;;  %v5932_v46 = vadd.f32 %v5916_v7, %v5900_v37  ;;  %v5875_v26 = vadd.f32 1.0, %v7272_v44  ;;  %v5864_v49 = vmul.f32 1.442695, %v5834_v36 }
 0xa74   : > { %v7276_v51 = vpop.eup %7275  ;;  %v5933_v35 = vadd.f32 %v5917_v2, %v5901_v16  ;;  %v5876_v15 = vadd.f32 1.0, %v7274_v1  ;;  %7293 = vpow2.f32 %v5862_v13  ;;  %v5835_v31 = vsub.f32 0.0, %v12392_v43  ;;  %v5925_v2 = vld [vmem:[%s7394_s16 + $0x248] sm:$0xff]  ;;  %v5926_v16 = vld [vmem:[%s7394_s16 + $0x250] sm:$0xff] }
 0xa75   : > { %v7278_v24 = vpop.eup %7277  ;;  %5948 = vst [vmem:[%s12389_s27] sm:$0xff] %v5932_v46  ;;  %v5902_v27 = vmul.f32 %v7276_v51, %v12323_v53  ;;  %7295 = vrcp.f32 %v5875_v26  ;;  %v5927_v26 = vld [vmem:[%s7394_s16 + $0x258] sm:$0xff] }
 0xa76   : > { %v7280_v52 = vpop.eup %7279  ;;  %5949 = vst [vmem:[%s12389_s27 + $0x8] sm:$0xff] %v5933_v35  ;;  %v5903_v5 = vmul.f32 %v7278_v24, %v12326_v30  ;;  %7297 = vrcp.f32 %v5876_v15  ;;  %v5866_v41 = vmul.f32 1.442695, %v5835_v31  ;;  %v5929_v31 = vld [vmem:[%s7394_s16 + $0x268] sm:$0xff] }
 0xa77   : > { %v7282_v62 = vpop.eup %7281  ;;  %v5934_v33 = vadd.f32 %v5918_v42, %v5902_v27  ;;  %v5877_v32 = vadd.f32 1.0, %v7280_v52  ;;  %7299 = vpow2.f32 %v5864_v49  ;;  %v5930_v52 = vld [vmem:[%s7394_s16 + $0x270] sm:$0xff] }
 0xa78   : > { %v7284_v29 = vpop.eup %7283  ;;  %v5935_v19 = vadd.f32 %v5919_v39, %v5903_v5  ;;  %v5878_v4 = vadd.f32 1.0, %v7282_v62  ;;  %7301 = vpow2.f32 %v5866_v41  ;;  %v5931_v41 = vld [vmem:[%s7394_s16 + $0x278] sm:$0xff] }
 0xa79   : > { %v7286_v53 = vpop.eup %7285  ;;  %5950 = vst [vmem:[%s12389_s27 + $0x10] sm:$0xff] %v5934_v33  ;;  %v5904_v8 = vmul.f32 %v7284_v29, %v12331_v3  ;;  %7303 = vrcp.f32 %v5877_v32 }
 0xa7a   : > { %v7288_v30 = vpop.eup %7287  ;;  %5951 = vst [vmem:[%s12389_s27 + $0x18] sm:$0xff] %v5935_v19  ;;  %v5905_v38 = vmul.f32 %v7286_v53, %v12334_v23  ;;  %7305 = vrcp.f32 %v5878_v4 }
 0xa7b   : > { %v7290_v40 = vpop.eup %7289  ;;  %v5936_v61 = vadd.f32 %v5920_v28, %v5904_v8  ;;  %v5879_v60 = vadd.f32 1.0, %v7288_v30 }
 0xa7c   : > { %v7292_v55 = vpop.eup %7291  ;;  %v5937_v34 = vadd.f32 %v5921_v21, %v5905_v38  ;;  %v5880_v22 = vadd.f32 1.0, %v7290_v40 }
 0xa7d   : > { %5952 = vst [vmem:[%s12389_s27 + $0x20] sm:$0xff] %v5936_v61  ;;  %v5906_v3 = vmul.f32 %v7292_v55, %v12339_v9  ;;  %7307 = vrcp.f32 %v5879_v60 }
 0xa7e   : > { %v7294_v58 = vpop.eup %7293  ;;  %5953 = vst [vmem:[%s12389_s27 + $0x28] sm:$0xff] %v5937_v34  ;;  %7309 = vrcp.f32 %v5880_v22 }
 0xa7f   : > { %v7296_v50 = vpop.eup %7295  ;;  %v5938_v23 = vadd.f32 %v5922_v12, %v5906_v3  ;;  %v5881_v45 = vadd.f32 1.0, %v7294_v58 }
 0xa80   : > { %v7298_v63 = vpop.eup %7297  ;;  %v5907_v59 = vmul.f32 %v7296_v50, %v12342_v57 }
 0xa81   : > { %v7300_v7 = vpop.eup %7299  ;;  %5954 = vst [vmem:[%s12389_s27 + $0x30] sm:$0xff] %v5938_v23  ;;  %v5908_v9 = vmul.f32 %v7298_v63, %v12349_v48  ;;  %7311 = vrcp.f32 %v5881_v45 }
 0xa82   : > { %v7302_v11 = vpop.eup %7301  ;;  %v5939_v20 = vadd.f32 %v5923_v18, %v5907_v59  ;;  %v5882_v25 = vadd.f32 1.0, %v7300_v7 }
 0xa83   : > { %v7304_v47 = vpop.eup %7303  ;;  %v5940_v37 = vadd.f32 %v5924_v54, %v5908_v9  ;;  %v5883_v36 = vadd.f32 1.0, %v7302_v11 }
 0xa84   : > { %v7306_v44 = vpop.eup %7305  ;;  %5955 = vst [vmem:[%s12389_s27 + $0x38] sm:$0xff] %v5939_v20  ;;  %v5909_v57 = vmul.f32 %v7304_v47, %v12352_v56  ;;  %7313 = vrcp.f32 %v5882_v25  ;;  %v5928_v56 = vld [vmem:[%s7394_s16 + $0x260] sm:$0xff] }
 0xa85   : > { %5956 = vst [vmem:[%s12389_s27 + $0x40] sm:$0xff] %v5940_v37  ;;  %v5910_v48 = vmul.f32 %v7306_v44, %v12359_v14  ;;  %7315 = vrcp.f32 %v5883_v36 }
 0xa86   : > { %v5941_v13 = vadd.f32 %v5925_v2, %v5909_v57 }
 0xa87   : > { %v7308_v1 = vpop.eup %7307  ;;  %v5942_v46 = vadd.f32 %v5926_v16, %v5910_v48 }
 0xa88   : > { %v7310_v49 = vpop.eup %7309  ;;  %5957 = vst [vmem:[%s12389_s27 + $0x48] sm:$0xff] %v5941_v13  ;;  %v5911_v51 = vmul.f32 %v7308_v1, %v12362_v6 }
 0xa89   : > { %5958 = vst [vmem:[%s12389_s27 + $0x50] sm:$0xff] %v5942_v46  ;;  %v5912_v35 = vmul.f32 %v7310_v49, %v12368_v0 }
 0xa8a   : > { %v5943_v42 = vadd.f32 %v5927_v26, %v5911_v51 }
 0xa8b   : > { %v7312_v14 = vpop.eup %7311  ;;  %v5944_v15 = vadd.f32 %v5928_v56, %v5912_v35 }
 0xa8c   : > { %5959 = vst [vmem:[%s12389_s27 + $0x58] sm:$0xff] %v5943_v42  ;;  %v5913_v24 = vmul.f32 %v7312_v14, %v12374_v17 }
 0xa8d   : > { %5960 = vst [vmem:[%s12389_s27 + $0x60] sm:$0xff] %v5944_v15 }
 0xa8e   : > { %v7314_v27 = vpop.eup %7313  ;;  %v5945_v39 = vadd.f32 %v5929_v31, %v5913_v24 }
 0xa8f   : > { %v7316_v6 = vpop.eup %7315  ;;  %v5914_v5 = vmul.f32 %v7314_v27, %v12378_v10 }
 0xa90   : > { %5961 = vst [vmem:[%s12389_s27 + $0x68] sm:$0xff] %v5945_v39  ;;  %v5915_v0 = vmul.f32 %v7316_v6, %v12392_v43 }
 0xa91   : > { %v5946_v62 = vadd.f32 %v5930_v52, %v5914_v5 }
 0xa92   : > { %v5947_v33 = vadd.f32 %v5931_v41, %v5915_v0 }
 0xa93   : > { %5962 = vst [vmem:[%s12389_s27 + $0x70] sm:$0xff] %v5946_v62 }
 0xa94   : > { %5963 = vst [vmem:[%s12389_s27 + $0x78] sm:$0xff] %v5947_v33 }
 0xa95 PF: > { %s19_s30 = sadd.s32 1, %s7323_s30  }
 0xa96   : > { %p16_p4 = scmp.ge.s32.totalorder %s19_s30, 4  }
 0xa98   :  { %18 = sbr.rel (!%p16_p4) target bundleno = 1 (0x1), region = 86 }

</bundles_post_ra>
